<compile_context>
chip_gen: v7x
topology: tpu7x:2x2x1
jax: 0.10.0
libtpu: 0.0.40
codegen_flags: <defaults>
</compile_context>

<pallas_src>
import functools

import jax
import jax.numpy as jnp
from jax.experimental import pallas as pl
from jax.experimental.pallas import tpu as pltpu


# --------------------------- in-kernel helpers ----------------------------- #

def _layernorm(x, g, b, eps=1e-5):
    x = x.astype(jnp.float32)
    mu = jnp.mean(x, axis=-1, keepdims=True)
    d = x - mu
    var = jnp.mean(d * d, axis=-1, keepdims=True)
    return d * jax.lax.rsqrt(var + eps) * g + b


def _mha(q, k, v, wo, bo, mask_bias, H, dh):
    """Multi-head attention on VMEM values.

    q: (Lq, E) with scaling already folded into the projection; k, v: (Lk, E);
    wo: (E_in, E_out) out-projection (torch weight transposed); bo: (1, E_out);
    mask_bias: (1, Lk) additive bias or None.
    Returns (attn_out (Lq, E_out), [per-head probs (Lq, Lk)] * H).
    The out-projection is folded per head (sum_h (p_h @ v_h) @ wo_h), so no
    head-concatenation is needed.
    """
    Lq = q.shape[0]
    attn = jnp.zeros((Lq, wo.shape[1]), jnp.float32) + bo
    probs = []
    for h in range(H):
        sl = slice(h * dh, (h + 1) * dh)
        qh = q[:, sl]
        kh = k[:, sl]
        vh = v[:, sl]
        s = jax.lax.dot_general(qh, kh, (((1,), (1,)), ((), ())),
                                preferred_element_type=jnp.float32)   # (Lq, Lk)
        if mask_bias is not None:
            s = s + mask_bias
        s = s - jnp.max(s, axis=-1, keepdims=True)
        e = jnp.exp(s)
        p = e * pl.reciprocal(jnp.sum(e, axis=-1, keepdims=True), approx=True)
        probs.append(p)
        oh = jnp.dot(p, vh, preferred_element_type=jnp.float32)       # (Lq, dh)
        attn = attn + jnp.dot(oh, wo[sl, :], preferred_element_type=jnp.float32)
    return attn, probs


# ------------------------------ fused kernels ------------------------------ #

def _make_encoder_kernel(H, dh):
    def kernel(src_ref, pos_ref, maskb_ref,
               wqk, bqk, wv, bv, wo, bo,
               n1w, n1b, w1, b1, w2, b2, n2w, n2b,
               out_ref):
        src = src_ref[0].astype(jnp.float32)                          # (L, E)
        E = src.shape[1]
        x = src + pos_ref[0].astype(jnp.float32)                      # q = k source
        qk = jnp.dot(x, wqk[...], preferred_element_type=jnp.float32) + bqk[...]
        v = jnp.dot(src, wv[...], preferred_element_type=jnp.float32) + bv[...]
        o_attn, _ = _mha(qk[:, :E], qk[:, E:], v, wo[...], bo[...],
                         maskb_ref[0], H, dh)
        x1 = _layernorm(src + o_attn, n1w[...], n1b[...])
        h1 = jnp.maximum(
            jnp.dot(x1, w1[...], preferred_element_type=jnp.float32) + b1[...], 0.0)
        h2 = jnp.dot(h1, w2[...], preferred_element_type=jnp.float32) + b2[...]
        out_ref[0] = _layernorm(x1 + h2, n2w[...], n2b[...]).astype(out_ref.dtype)
    return kernel


def _make_decoder_kernel(H, dh, need_full):
    def kernel(tgt_ref, qpos_ref, mem_ref, mpos_ref, maskb_ref,
               wqk_s, bqk_s, wv_s, bv_s, wo_s, bo_s,
               n1w, n1b,
               wq_c, bq_c, wk_c, bk_c, wv_c, bv_c, wo_c, bo_c, wo_t_c,
               n2w, n2b,
               w1, b1, w2, b2,
               n3w, n3b,
               out_ref, *maybe_full):
        tgt = tgt_ref[0].astype(jnp.float32)                          # (Lq, E)
        qpos = qpos_ref[...].astype(jnp.float32)                      # (Lq, E)
        mem = mem_ref[0].astype(jnp.float32)                          # (Lk, E)
        mpos = mpos_ref[0].astype(jnp.float32)
        Lq, E = tgt.shape
        Lk = mem.shape[0]

        # ---- self attention (no key padding mask) ----
        x = tgt + qpos
        qk = jnp.dot(x, wqk_s[...], preferred_element_type=jnp.float32) + bqk_s[...]
        v_s = jnp.dot(tgt, wv_s[...], preferred_element_type=jnp.float32) + bv_s[...]
        o_s, _ = _mha(qk[:, :E], qk[:, E:], v_s, wo_s[...], bo_s[...], None, H, dh)
        t1 = _layernorm(tgt + o_s, n1w[...], n1b[...])

        # ---- cross attention (memory key padding mask) ----
        q_c = jnp.dot(t1 + qpos, wq_c[...], preferred_element_type=jnp.float32) + bq_c[...]
        k_c = jnp.dot(mem + mpos, wk_c[...], preferred_element_type=jnp.float32) + bk_c[...]
        v_c = jnp.dot(mem, wv_c[...], preferred_element_type=jnp.float32) + bv_c[...]
        o_c, probs_c = _mha(q_c, k_c, v_c, wo_c[...], bo_c[...], maskb_ref[0], H, dh)
        t2 = _layernorm(t1 + o_c, n2w[...], n2b[...])

        # ---- FFN ----
        h1 = jnp.maximum(
            jnp.dot(t2, w1[...], preferred_element_type=jnp.float32) + b1[...], 0.0)
        h2 = jnp.dot(h1, w2[...], preferred_element_type=jnp.float32) + b2[...]
        out_ref[0] = _layernorm(t2 + h2, n3w[...], n3b[...]).astype(out_ref.dtype)

        # ---- expanded per-key output (last decoder layer only) ----
        if need_full:
            full_ref = maybe_full[0]
            wo_t = wo_t_c[...]                                        # (E_out, E_in)
            acc = jnp.zeros((Lq, E, Lk), jnp.float32)
            for h in range(H):
                sl = slice(h * dh, (h + 1) * dh)
                # per-head V projected through W_out, already transposed: (E_out, Lk)
                vproj_t = jax.lax.dot_general(
                    wo_t[:, sl], v_c[:, sl], (((1,), (1,)), ((), ())),
                    preferred_element_type=jnp.float32)
                acc = acc + probs_c[h][:, None, :] * vproj_t[None, :, :]
            # TODO(synk): CustomMultiheadAttention source unavailable; the out_proj
            # bias is not distributed over key positions in the expanded output.
            full_ref[0] = acc.astype(full_ref.dtype)
    return kernel


# ------------------------------ pallas wrappers ----------------------------- #

def _full_spec(a):
    zeros = (0,) * a.ndim
    return pl.BlockSpec(a.shape, lambda i, _z=zeros: _z)


def encoder_layer(x, pos, mask_bias, p, nhead):
    N, L, E = x.shape
    a = p["attn"]
    weights = [a["wqk"], a["bqk"], a["wv"], a["bv"], a["wo"], a["bo"],
               p["norm1_w"], p["norm1_b"],
               p["lin1_w"], p["lin1_b"], p["lin2_w"], p["lin2_b"],
               p["norm2_w"], p["norm2_b"]]
    in_specs = [pl.BlockSpec((1, L, E), lambda i: (i, 0, 0)),
                pl.BlockSpec((1, L, E), lambda i: (i, 0, 0)),
                pl.BlockSpec((1, 1, L), lambda i: (i, 0, 0))] + \
               [_full_spec(w) for w in weights]
    return pl.pallas_call(
        _make_encoder_kernel(nhead, E // nhead),
        out_shape=jax.ShapeDtypeStruct((N, L, E), jnp.float32),
        grid=(N,),
        in_specs=in_specs,
        out_specs=pl.BlockSpec((1, L, E), lambda i: (i, 0, 0)),
        compiler_params=pltpu.CompilerParams(dimension_semantics=("parallel",)),
    )(x, pos, mask_bias, *weights)


def decoder_layer(tgt, query_pos, memory, mem_pos, mask_bias, p, nhead, need_full):
    N, Lq, E = tgt.shape
    Lk = memory.shape[1]
    sa, ca = p["self_attn"], p["cross_attn"]
    weights = [sa["wqk"], sa["bqk"], sa["wv"], sa["bv"], sa["wo"], sa["bo"],
               p["norm1_w"], p["norm1_b"],
               ca["wq"], ca["bq"], ca["wk"], ca["bk"], ca["wv"], ca["bv"],
               ca["wo"], ca["bo"], ca["wo_t"],
               p["norm2_w"], p["norm2_b"],
               p["lin1_w"], p["lin1_b"], p["lin2_w"], p["lin2_b"],
               p["norm3_w"], p["norm3_b"]]
    in_specs = [pl.BlockSpec((1, Lq, E), lambda i: (i, 0, 0)),
                _full_spec(query_pos),
                pl.BlockSpec((1, Lk, E), lambda i: (i, 0, 0)),
                pl.BlockSpec((1, Lk, E), lambda i: (i, 0, 0)),
                pl.BlockSpec((1, 1, Lk), lambda i: (i, 0, 0))] + \
               [_full_spec(w) for w in weights]
    if need_full:
        out_shape = (jax.ShapeDtypeStruct((N, Lq, E), jnp.float32),
                     jax.ShapeDtypeStruct((N, Lq, E, Lk), jnp.float32))
        out_specs = (pl.BlockSpec((1, Lq, E), lambda i: (i, 0, 0)),
                     pl.BlockSpec((1, Lq, E, Lk), lambda i: (i, 0, 0, 0)))
    else:
        out_shape = jax.ShapeDtypeStruct((N, Lq, E), jnp.float32)
        out_specs = pl.BlockSpec((1, Lq, E), lambda i: (i, 0, 0))
    res = pl.pallas_call(
        _make_decoder_kernel(nhead, E // nhead, need_full),
        out_shape=out_shape,
        grid=(N,),
        in_specs=in_specs,
        out_specs=out_specs,
        compiler_params=pltpu.CompilerParams(dimension_semantics=("parallel",)),
    )(tgt, query_pos, memory, mem_pos, mask_bias, *weights)
    if need_full:
        return res[0], res[1]
    return res, None


# ------------------------------ full forward ------------------------------- #

def transformer_forward(params, src, mask, query_embed, pos_embed, nhead):
    bs, c, hh, ww = src.shape
    hw = hh * ww
    src_b = src.reshape(bs, c, hw).transpose(0, 2, 1)         # (bs, HW, C)
    pos_b = pos_embed.reshape(bs, c, hw).transpose(0, 2, 1)   # (bs, HW, C)
    mask_bias = jnp.where(mask.reshape(bs, hw), -1e30, 0.0).astype(jnp.float32)
    mask_bias = mask_bias.reshape(bs, 1, hw)                  # tiny additive bias

    memory = src_b
    for lp in params["encoder_layers"]:
        memory = encoder_layer(memory, pos_b, mask_bias, lp, nhead)

    nq = query_embed.shape[0]
    out = jnp.zeros((bs, nq, c), jnp.float32)                 # tgt = zeros_like(query)
    n_dec = len(params["decoder_layers"])
    full = None
    for li, lp in enumerate(params["decoder_layers"]):
        need_full = li == n_dec - 1                           # only last layer's extras are used
        out, f = decoder_layer(out, query_embed, memory, pos_b, mask_bias, lp,
                               nhead, need_full)
        if need_full:
            full = f
    # NOTE: the final decoder LayerNorm ('hs') is not computed because its result is
    # not among the values returned for query_proc='expanded'.

    # _expanded_forward: full is (bs, nq, E, HW)
    hs_viz = jnp.mean(full, axis=2)                           # (bs, nq, HW)
    hs_full = full.reshape(bs * nq, c, hh, ww)                # (bs*nq, C, h, w)
    memory_out = memory.transpose(1, 0, 2)                    # (HW, bs, C) torch layout
    return hs_full, hs_viz, memory_out


# ------------------------ parameter init (torch layout) --------------------- #

def xavier(key, shape):
    fan_out, fan_in = shape[0], shape[1]
    limit = (6.0 / (fan_in + fan_out)) ** 0.5
    return jax.random.uniform(key, shape, jnp.float32, -limit, limit)


def init_attn(key, E):
    k1, k2 = jax.random.split(key)
    return {"in_w": xavier(k1, (3 * E, E)), "in_b": jnp.zeros((3 * E,), jnp.float32),
            "out_w": xavier(k2, (E, E)), "out_b": jnp.zeros((E,), jnp.float32)}


def init_enc_layer(key, E, F):
    ks = jax.random.split(key, 3)
    return {"self_attn": init_attn(ks[0], E),
            "lin1_w": xavier(ks[1], (F, E)), "lin1_b": jnp.zeros((F,), jnp.float32),
            "lin2_w": xavier(ks[2], (E, F)), "lin2_b": jnp.zeros((E,), jnp.float32),
            "norm1_w": jnp.ones((E,), jnp.float32), "norm1_b": jnp.zeros((E,), jnp.float32),
            "norm2_w": jnp.ones((E,), jnp.float32), "norm2_b": jnp.zeros((E,), jnp.float32)}


def init_dec_layer(key, E, F):
    ks = jax.random.split(key, 4)
    return {"self_attn": init_attn(ks[0], E),
            "cross_attn": init_attn(ks[1], E),
            "lin1_w": xavier(ks[2], (F, E)), "lin1_b": jnp.zeros((F,), jnp.float32),
            "lin2_w": xavier(ks[3], (E, F)), "lin2_b": jnp.zeros((E,), jnp.float32),
            "norm1_w": jnp.ones((E,), jnp.float32), "norm1_b": jnp.zeros((E,), jnp.float32),
            "norm2_w": jnp.ones((E,), jnp.float32), "norm2_b": jnp.zeros((E,), jnp.float32),
            "norm3_w": jnp.ones((E,), jnp.float32), "norm3_b": jnp.zeros((E,), jnp.float32)}


def init_transformer(key, E, F, n_enc, n_dec):
    keys = jax.random.split(key, n_enc + n_dec)
    return {"encoder_layers": [init_enc_layer(keys[i], E, F) for i in range(n_enc)],
            "decoder_layers": [init_dec_layer(keys[n_enc + i], E, F) for i in range(n_dec)],
            # decoder-final LayerNorm params (unused by the returned outputs)
            "dec_norm_w": jnp.ones((E,), jnp.float32),
            "dec_norm_b": jnp.zeros((E,), jnp.float32)}


# ---------------- parameter prep: torch layout -> kernel layout ------------- #

def _row(v):
    return v.reshape(1, -1)


def _prep_attn_fused_qk(p, E, H):
    """Self-attention: fold 1/sqrt(dh) into Wq/bq and fuse Q,K projections."""
    dh = E // H
    scale = float(dh) ** -0.5
    Wq, Wk, Wv = jnp.split(p["in_w"], 3, axis=0)
    bq, bk, bv = jnp.split(p["in_b"], 3)
    return {"wqk": jnp.concatenate([(Wq * scale).T, Wk.T], axis=1),   # (E, 2E)
            "bqk": jnp.concatenate([bq * scale, bk]).reshape(1, 2 * E),
            "wv": Wv.T, "bv": _row(bv),
            "wo": p["out_w"].T, "bo": _row(p["out_b"])}


def _prep_attn_split(p, E, H):
    """Cross-attention: q and k have different inputs; keep projections separate."""
    dh = E // H
    scale = float(dh) ** -0.5
    Wq, Wk, Wv = jnp.split(p["in_w"], 3, axis=0)
    bq, bk, bv = jnp.split(p["in_b"], 3)
    return {"wq": (Wq * scale).T, "bq": _row(bq * scale),
            "wk": Wk.T, "bk": _row(bk),
            "wv": Wv.T, "bv": _row(bv),
            "wo": p["out_w"].T, "bo": _row(p["out_b"]),
            "wo_t": p["out_w"]}   # untransposed copy for the expanded-output path


def prep_enc_layer(p, E, H):
    return {"attn": _prep_attn_fused_qk(p["self_attn"], E, H),
            "norm1_w": _row(p["norm1_w"]), "norm1_b": _row(p["norm1_b"]),
            "norm2_w": _row(p["norm2_w"]), "norm2_b": _row(p["norm2_b"]),
            "lin1_w": p["lin1_w"].T, "lin1_b": _row(p["lin1_b"]),
            "lin2_w": p["lin2_w"].T, "lin2_b": _row(p["lin2_b"])}


def prep_dec_layer(p, E, H):
    return {"self_attn": _prep_attn_fused_qk(p["self_attn"], E, H),
            "cross_attn": _prep_attn_split(p["cross_attn"], E, H),
            "norm1_w": _row(p["norm1_w"]), "norm1_b": _row(p["norm1_b"]),
            "norm2_w": _row(p["norm2_w"]), "norm2_b": _row(p["norm2_b"]),
            "norm3_w": _row(p["norm3_w"]), "norm3_b": _row(p["norm3_b"]),
            "lin1_w": p["lin1_w"].T, "lin1_b": _row(p["lin1_b"]),
            "lin2_w": p["lin2_w"].T, "lin2_b": _row(p["lin2_b"])}


def prep_transformer(params, E, H):
    return {"encoder_layers": [prep_enc_layer(p, E, H) for p in params["encoder_layers"]],
            "decoder_layers": [prep_dec_layer(p, E, H) for p in params["decoder_layers"]]}


# ----------------------------------- main ----------------------------------- #

if __name__ == "__main__":
    d_model, nhead = 32, 4
    num_enc, num_dec = 2, 2
    dim_ff = 64
    bs, h, w = 2, 4, 4
    num_queries = 8

    key = jax.random.PRNGKey(0)
    kp, ks, kq, kpos = jax.random.split(key, 4)

    params = init_transformer(kp, d_model, dim_ff, num_enc, num_dec)
    kparams = prep_transformer(params, d_model, nhead)

    src = jax.random.normal(ks, (bs, d_model, h, w), jnp.float32)       # NCHW
    pos_embed = jax.random.normal(kpos, (bs, d_model, h, w), jnp.float32)
    query_embed = jax.random.normal(kq, (num_queries, d_model), jnp.float32)
    mask = jnp.zeros((bs, h, w), jnp.bool_)                             # no padding

    fwd = jax.jit(functools.partial(transformer_forward, nhead=nhead))
    hs_full, hs_viz, memory = fwd(kparams, src, mask, query_embed, pos_embed)
    jax.block_until_ready((hs_full, hs_viz, memory))

    assert hs_full.shape == (bs * num_queries, d_model, h, w)
    assert hs_viz.shape == (bs, num_queries, h * w)
    assert memory.shape == (h * w, bs, d_model)
    assert bool(jnp.all(jnp.isfinite(hs_full)))
    print("KERNEL_OK")
</pallas_src>

<mosaic_0001>
module attributes {stable_mosaic.version = 11 : i64} {
  func.func @kernel(%arg0: i32, %arg1: memref<1x16x32xf32, #tpu.memory_space<vmem>>, %arg2: memref<1x16x32xf32, #tpu.memory_space<vmem>>, %arg3: memref<1x1x16xf32, #tpu.memory_space<vmem>>, %arg4: memref<32x64xf32, #tpu.memory_space<vmem>>, %arg5: memref<1x64xf32, #tpu.memory_space<vmem>>, %arg6: memref<32x32xf32, #tpu.memory_space<vmem>>, %arg7: memref<1x32xf32, #tpu.memory_space<vmem>>, %arg8: memref<32x32xf32, #tpu.memory_space<vmem>>, %arg9: memref<1x32xf32, #tpu.memory_space<vmem>>, %arg10: memref<1x32xf32, #tpu.memory_space<vmem>>, %arg11: memref<1x32xf32, #tpu.memory_space<vmem>>, %arg12: memref<32x64xf32, #tpu.memory_space<vmem>>, %arg13: memref<1x64xf32, #tpu.memory_space<vmem>>, %arg14: memref<64x32xf32, #tpu.memory_space<vmem>>, %arg15: memref<1x32xf32, #tpu.memory_space<vmem>>, %arg16: memref<1x32xf32, #tpu.memory_space<vmem>>, %arg17: memref<1x32xf32, #tpu.memory_space<vmem>>, %arg18: memref<1x16x32xf32, #tpu.memory_space<vmem>>) attributes {dimension_semantics = [#tpu.dimension_semantics<parallel>], iteration_bounds = array<i64: 2>, scalar_prefetch = 0 : i64, scratch_operands = 0 : i64, tpu.core_type = #tpu.core_type<tc>, window_params = [{transform_indices = @transform_0, window_bounds = array<i64: 1, 16, 32>}, {transform_indices = @transform_1, window_bounds = array<i64: 1, 16, 32>}, {transform_indices = @transform_2, window_bounds = array<i64: 1, 1, 16>}, {pipeline_mode = #tpu.pipeline_mode<synchronous>, transform_indices = @transform_3, window_bounds = array<i64: 32, 64>}, {pipeline_mode = #tpu.pipeline_mode<synchronous>, transform_indices = @transform_4, window_bounds = array<i64: 1, 64>}, {pipeline_mode = #tpu.pipeline_mode<synchronous>, transform_indices = @transform_5, window_bounds = array<i64: 32, 32>}, {pipeline_mode = #tpu.pipeline_mode<synchronous>, transform_indices = @transform_6, window_bounds = array<i64: 1, 32>}, {pipeline_mode = #tpu.pipeline_mode<synchronous>, transform_indices = @transform_7, window_bounds = array<i64: 32, 32>}, {pipeline_mode = #tpu.pipeline_mode<synchronous>, transform_indices = @transform_8, window_bounds = array<i64: 1, 32>}, {pipeline_mode = #tpu.pipeline_mode<synchronous>, transform_indices = @transform_9, window_bounds = array<i64: 1, 32>}, {pipeline_mode = #tpu.pipeline_mode<synchronous>, transform_indices = @transform_10, window_bounds = array<i64: 1, 32>}, {pipeline_mode = #tpu.pipeline_mode<synchronous>, transform_indices = @transform_11, window_bounds = array<i64: 32, 64>}, {pipeline_mode = #tpu.pipeline_mode<synchronous>, transform_indices = @transform_12, window_bounds = array<i64: 1, 64>}, {pipeline_mode = #tpu.pipeline_mode<synchronous>, transform_indices = @transform_13, window_bounds = array<i64: 64, 32>}, {pipeline_mode = #tpu.pipeline_mode<synchronous>, transform_indices = @transform_14, window_bounds = array<i64: 1, 32>}, {pipeline_mode = #tpu.pipeline_mode<synchronous>, transform_indices = @transform_15, window_bounds = array<i64: 1, 32>}, {pipeline_mode = #tpu.pipeline_mode<synchronous>, transform_indices = @transform_16, window_bounds = array<i64: 1, 32>}, {transform_indices = @transform_17, window_bounds = array<i64: 1, 16, 32>}]} {
    %c0 = arith.constant 0 : index
    %c0_0 = arith.constant 0 : index
    %c0_1 = arith.constant 0 : index
    %0 = vector.load %arg1[%c0, %c0_0, %c0_1] : memref<1x16x32xf32, #tpu.memory_space<vmem>>, vector<1x16x32xf32>
    %1 = vector.shape_cast %0 : vector<1x16x32xf32> to vector<16x32xf32>
    %c0_2 = arith.constant 0 : index
    %c0_3 = arith.constant 0 : index
    %c0_4 = arith.constant 0 : index
    %2 = vector.load %arg2[%c0_2, %c0_3, %c0_4] : memref<1x16x32xf32, #tpu.memory_space<vmem>>, vector<1x16x32xf32>
    %3 = vector.shape_cast %2 : vector<1x16x32xf32> to vector<16x32xf32>
    %4 = arith.addf %1, %3 : vector<16x32xf32>
    %c0_5 = arith.constant 0 : index
    %c0_6 = arith.constant 0 : index
    %5 = vector.load %arg4[%c0_5, %c0_6] : memref<32x64xf32, #tpu.memory_space<vmem>>, vector<32x64xf32>
    %cst = arith.constant dense<0.000000e+00> : vector<16x64xf32>
    %6 = tpu.matmul %4, %5, %cst {dimension_numbers = #tpu.dot_dimension_numbers<[1], [0], [0], [1], [0, 0, 1, 1], [], []>} : vector<16x32xf32>, vector<32x64xf32>, vector<16x64xf32> -> vector<16x64xf32>
    %c0_7 = arith.constant 0 : index
    %c0_8 = arith.constant 0 : index
    %7 = vector.load %arg5[%c0_7, %c0_8] : memref<1x64xf32, #tpu.memory_space<vmem>>, vector<1x64xf32>
    %8 = vector.broadcast %7 : vector<1x64xf32> to vector<16x64xf32>
    %9 = arith.addf %6, %8 : vector<16x64xf32>
    %c0_9 = arith.constant 0 : index
    %c0_10 = arith.constant 0 : index
    %10 = vector.load %arg6[%c0_9, %c0_10] : memref<32x32xf32, #tpu.memory_space<vmem>>, vector<32x32xf32>
    %cst_11 = arith.constant dense<0.000000e+00> : vector<16x32xf32>
    %11 = tpu.matmul %1, %10, %cst_11 {dimension_numbers = #tpu.dot_dimension_numbers<[1], [0], [0], [1], [0, 0, 1, 1], [], []>} : vector<16x32xf32>, vector<32x32xf32>, vector<16x32xf32> -> vector<16x32xf32>
    %c0_12 = arith.constant 0 : index
    %c0_13 = arith.constant 0 : index
    %12 = vector.load %arg7[%c0_12, %c0_13] : memref<1x32xf32, #tpu.memory_space<vmem>>, vector<1x32xf32>
    %13 = vector.broadcast %12 : vector<1x32xf32> to vector<16x32xf32>
    %14 = arith.addf %11, %13 : vector<16x32xf32>
    %15 = vector.extract_strided_slice %9 {offsets = [0, 0], sizes = [16, 32], strides = [1, 1]} : vector<16x64xf32> to vector<16x32xf32>
    %16 = vector.extract_strided_slice %9 {offsets = [0, 32], sizes = [16, 32], strides = [1, 1]} : vector<16x64xf32> to vector<16x32xf32>
    %c0_14 = arith.constant 0 : index
    %c0_15 = arith.constant 0 : index
    %17 = vector.load %arg8[%c0_14, %c0_15] : memref<32x32xf32, #tpu.memory_space<vmem>>, vector<32x32xf32>
    %c0_16 = arith.constant 0 : index
    %c0_17 = arith.constant 0 : index
    %18 = vector.load %arg9[%c0_16, %c0_17] : memref<1x32xf32, #tpu.memory_space<vmem>>, vector<1x32xf32>
    %c0_18 = arith.constant 0 : index
    %c0_19 = arith.constant 0 : index
    %c0_20 = arith.constant 0 : index
    %19 = vector.load %arg3[%c0_18, %c0_19, %c0_20] : memref<1x1x16xf32, #tpu.memory_space<vmem>>, vector<1x1x16xf32>
    %20 = vector.shape_cast %19 : vector<1x1x16xf32> to vector<1x16xf32>
    %cst_21 = arith.constant 0.000000e+00 : f32
    %21 = vector.broadcast %cst_21 : f32 to vector<16x32xf32>
    %22 = vector.broadcast %18 : vector<1x32xf32> to vector<16x32xf32>
    %23 = arith.addf %21, %22 : vector<16x32xf32>
    %24 = vector.extract_strided_slice %15 {offsets = [0, 0], sizes = [16, 8], strides = [1, 1]} : vector<16x32xf32> to vector<16x8xf32>
    %25 = vector.extract_strided_slice %16 {offsets = [0, 0], sizes = [16, 8], strides = [1, 1]} : vector<16x32xf32> to vector<16x8xf32>
    %26 = vector.extract_strided_slice %14 {offsets = [0, 0], sizes = [16, 8], strides = [1, 1]} : vector<16x32xf32> to vector<16x8xf32>
    %cst_22 = arith.constant dense<0.000000e+00> : vector<16x16xf32>
    %27 = tpu.matmul %24, %25, %cst_22 {dimension_numbers = #tpu.dot_dimension_numbers<[1], [1], [0], [0], [0, 0, 1, 0], [], []>} : vector<16x8xf32>, vector<16x8xf32>, vector<16x16xf32> -> vector<16x16xf32>
    %28 = vector.broadcast %20 : vector<1x16xf32> to vector<16x16xf32>
    %29 = arith.addf %27, %28 : vector<16x16xf32>
    %cst_23 = arith.constant dense<0xFF800000> : vector<16xf32>
    %30 = vector.multi_reduction <maximumf>, %29, %cst_23 [1] : vector<16x16xf32> to vector<16xf32>
    %31 = vector.shape_cast %30 : vector<16xf32> to vector<16x1xf32>
    %32 = vector.broadcast %31 : vector<16x1xf32> to vector<16x16xf32>
    %33 = arith.subf %29, %32 : vector<16x16xf32>
    %34 = math.exp %33 : vector<16x16xf32>
    %cst_24 = arith.constant dense<0.000000e+00> : vector<16xf32>
    %35 = vector.multi_reduction <add>, %34, %cst_24 [1] : vector<16x16xf32> to vector<16xf32>
    %36 = vector.shape_cast %35 : vector<16xf32> to vector<16x1xf32>
    %37 = tpu.reciprocal %36 {approx = true} : vector<16x1xf32> -> vector<16x1xf32>
    %38 = vector.broadcast %37 : vector<16x1xf32> to vector<16x16xf32>
    %39 = arith.mulf %34, %38 : vector<16x16xf32>
    %cst_25 = arith.constant dense<0.000000e+00> : vector<16x8xf32>
    %40 = tpu.matmul %39, %26, %cst_25 {dimension_numbers = #tpu.dot_dimension_numbers<[1], [0], [0], [1], [0, 0, 1, 1], [], []>} : vector<16x16xf32>, vector<16x8xf32>, vector<16x8xf32> -> vector<16x8xf32>
    %41 = vector.extract_strided_slice %17 {offsets = [0, 0], sizes = [8, 32], strides = [1, 1]} : vector<32x32xf32> to vector<8x32xf32>
    %cst_26 = arith.constant dense<0.000000e+00> : vector<16x32xf32>
    %42 = tpu.matmul %40, %41, %cst_26 {dimension_numbers = #tpu.dot_dimension_numbers<[1], [0], [0], [1], [0, 0, 1, 1], [], []>} : vector<16x8xf32>, vector<8x32xf32>, vector<16x32xf32> -> vector<16x32xf32>
    %43 = arith.addf %23, %42 : vector<16x32xf32>
    %44 = vector.extract_strided_slice %15 {offsets = [0, 8], sizes = [16, 8], strides = [1, 1]} : vector<16x32xf32> to vector<16x8xf32>
    %45 = vector.extract_strided_slice %16 {offsets = [0, 8], sizes = [16, 8], strides = [1, 1]} : vector<16x32xf32> to vector<16x8xf32>
    %46 = vector.extract_strided_slice %14 {offsets = [0, 8], sizes = [16, 8], strides = [1, 1]} : vector<16x32xf32> to vector<16x8xf32>
    %cst_27 = arith.constant dense<0.000000e+00> : vector<16x16xf32>
    %47 = tpu.matmul %44, %45, %cst_27 {dimension_numbers = #tpu.dot_dimension_numbers<[1], [1], [0], [0], [0, 0, 1, 0], [], []>} : vector<16x8xf32>, vector<16x8xf32>, vector<16x16xf32> -> vector<16x16xf32>
    %48 = vector.broadcast %20 : vector<1x16xf32> to vector<16x16xf32>
    %49 = arith.addf %47, %48 : vector<16x16xf32>
    %cst_28 = arith.constant dense<0xFF800000> : vector<16xf32>
    %50 = vector.multi_reduction <maximumf>, %49, %cst_28 [1] : vector<16x16xf32> to vector<16xf32>
    %51 = vector.shape_cast %50 : vector<16xf32> to vector<16x1xf32>
    %52 = vector.broadcast %51 : vector<16x1xf32> to vector<16x16xf32>
    %53 = arith.subf %49, %52 : vector<16x16xf32>
    %54 = math.exp %53 : vector<16x16xf32>
    %cst_29 = arith.constant dense<0.000000e+00> : vector<16xf32>
    %55 = vector.multi_reduction <add>, %54, %cst_29 [1] : vector<16x16xf32> to vector<16xf32>
    %56 = vector.shape_cast %55 : vector<16xf32> to vector<16x1xf32>
    %57 = tpu.reciprocal %56 {approx = true} : vector<16x1xf32> -> vector<16x1xf32>
    %58 = vector.broadcast %57 : vector<16x1xf32> to vector<16x16xf32>
    %59 = arith.mulf %54, %58 : vector<16x16xf32>
    %cst_30 = arith.constant dense<0.000000e+00> : vector<16x8xf32>
    %60 = tpu.matmul %59, %46, %cst_30 {dimension_numbers = #tpu.dot_dimension_numbers<[1], [0], [0], [1], [0, 0, 1, 1], [], []>} : vector<16x16xf32>, vector<16x8xf32>, vector<16x8xf32> -> vector<16x8xf32>
    %61 = vector.extract_strided_slice %17 {offsets = [8, 0], sizes = [8, 32], strides = [1, 1]} : vector<32x32xf32> to vector<8x32xf32>
    %cst_31 = arith.constant dense<0.000000e+00> : vector<16x32xf32>
    %62 = tpu.matmul %60, %61, %cst_31 {dimension_numbers = #tpu.dot_dimension_numbers<[1], [0], [0], [1], [0, 0, 1, 1], [], []>} : vector<16x8xf32>, vector<8x32xf32>, vector<16x32xf32> -> vector<16x32xf32>
    %63 = arith.addf %43, %62 : vector<16x32xf32>
    %64 = vector.extract_strided_slice %15 {offsets = [0, 16], sizes = [16, 8], strides = [1, 1]} : vector<16x32xf32> to vector<16x8xf32>
    %65 = vector.extract_strided_slice %16 {offsets = [0, 16], sizes = [16, 8], strides = [1, 1]} : vector<16x32xf32> to vector<16x8xf32>
    %66 = vector.extract_strided_slice %14 {offsets = [0, 16], sizes = [16, 8], strides = [1, 1]} : vector<16x32xf32> to vector<16x8xf32>
    %cst_32 = arith.constant dense<0.000000e+00> : vector<16x16xf32>
    %67 = tpu.matmul %64, %65, %cst_32 {dimension_numbers = #tpu.dot_dimension_numbers<[1], [1], [0], [0], [0, 0, 1, 0], [], []>} : vector<16x8xf32>, vector<16x8xf32>, vector<16x16xf32> -> vector<16x16xf32>
    %68 = vector.broadcast %20 : vector<1x16xf32> to vector<16x16xf32>
    %69 = arith.addf %67, %68 : vector<16x16xf32>
    %cst_33 = arith.constant dense<0xFF800000> : vector<16xf32>
    %70 = vector.multi_reduction <maximumf>, %69, %cst_33 [1] : vector<16x16xf32> to vector<16xf32>
    %71 = vector.shape_cast %70 : vector<16xf32> to vector<16x1xf32>
    %72 = vector.broadcast %71 : vector<16x1xf32> to vector<16x16xf32>
    %73 = arith.subf %69, %72 : vector<16x16xf32>
    %74 = math.exp %73 : vector<16x16xf32>
    %cst_34 = arith.constant dense<0.000000e+00> : vector<16xf32>
    %75 = vector.multi_reduction <add>, %74, %cst_34 [1] : vector<16x16xf32> to vector<16xf32>
    %76 = vector.shape_cast %75 : vector<16xf32> to vector<16x1xf32>
    %77 = tpu.reciprocal %76 {approx = true} : vector<16x1xf32> -> vector<16x1xf32>
    %78 = vector.broadcast %77 : vector<16x1xf32> to vector<16x16xf32>
    %79 = arith.mulf %74, %78 : vector<16x16xf32>
    %cst_35 = arith.constant dense<0.000000e+00> : vector<16x8xf32>
    %80 = tpu.matmul %79, %66, %cst_35 {dimension_numbers = #tpu.dot_dimension_numbers<[1], [0], [0], [1], [0, 0, 1, 1], [], []>} : vector<16x16xf32>, vector<16x8xf32>, vector<16x8xf32> -> vector<16x8xf32>
    %81 = vector.extract_strided_slice %17 {offsets = [16, 0], sizes = [8, 32], strides = [1, 1]} : vector<32x32xf32> to vector<8x32xf32>
    %cst_36 = arith.constant dense<0.000000e+00> : vector<16x32xf32>
    %82 = tpu.matmul %80, %81, %cst_36 {dimension_numbers = #tpu.dot_dimension_numbers<[1], [0], [0], [1], [0, 0, 1, 1], [], []>} : vector<16x8xf32>, vector<8x32xf32>, vector<16x32xf32> -> vector<16x32xf32>
    %83 = arith.addf %63, %82 : vector<16x32xf32>
    %84 = vector.extract_strided_slice %15 {offsets = [0, 24], sizes = [16, 8], strides = [1, 1]} : vector<16x32xf32> to vector<16x8xf32>
    %85 = vector.extract_strided_slice %16 {offsets = [0, 24], sizes = [16, 8], strides = [1, 1]} : vector<16x32xf32> to vector<16x8xf32>
    %86 = vector.extract_strided_slice %14 {offsets = [0, 24], sizes = [16, 8], strides = [1, 1]} : vector<16x32xf32> to vector<16x8xf32>
    %cst_37 = arith.constant dense<0.000000e+00> : vector<16x16xf32>
    %87 = tpu.matmul %84, %85, %cst_37 {dimension_numbers = #tpu.dot_dimension_numbers<[1], [1], [0], [0], [0, 0, 1, 0], [], []>} : vector<16x8xf32>, vector<16x8xf32>, vector<16x16xf32> -> vector<16x16xf32>
    %88 = vector.broadcast %20 : vector<1x16xf32> to vector<16x16xf32>
    %89 = arith.addf %87, %88 : vector<16x16xf32>
    %cst_38 = arith.constant dense<0xFF800000> : vector<16xf32>
    %90 = vector.multi_reduction <maximumf>, %89, %cst_38 [1] : vector<16x16xf32> to vector<16xf32>
    %91 = vector.shape_cast %90 : vector<16xf32> to vector<16x1xf32>
    %92 = vector.broadcast %91 : vector<16x1xf32> to vector<16x16xf32>
    %93 = arith.subf %89, %92 : vector<16x16xf32>
    %94 = math.exp %93 : vector<16x16xf32>
    %cst_39 = arith.constant dense<0.000000e+00> : vector<16xf32>
    %95 = vector.multi_reduction <add>, %94, %cst_39 [1] : vector<16x16xf32> to vector<16xf32>
    %96 = vector.shape_cast %95 : vector<16xf32> to vector<16x1xf32>
    %97 = tpu.reciprocal %96 {approx = true} : vector<16x1xf32> -> vector<16x1xf32>
    %98 = vector.broadcast %97 : vector<16x1xf32> to vector<16x16xf32>
    %99 = arith.mulf %94, %98 : vector<16x16xf32>
    %cst_40 = arith.constant dense<0.000000e+00> : vector<16x8xf32>
    %100 = tpu.matmul %99, %86, %cst_40 {dimension_numbers = #tpu.dot_dimension_numbers<[1], [0], [0], [1], [0, 0, 1, 1], [], []>} : vector<16x16xf32>, vector<16x8xf32>, vector<16x8xf32> -> vector<16x8xf32>
    %101 = vector.extract_strided_slice %17 {offsets = [24, 0], sizes = [8, 32], strides = [1, 1]} : vector<32x32xf32> to vector<8x32xf32>
    %cst_41 = arith.constant dense<0.000000e+00> : vector<16x32xf32>
    %102 = tpu.matmul %100, %101, %cst_41 {dimension_numbers = #tpu.dot_dimension_numbers<[1], [0], [0], [1], [0, 0, 1, 1], [], []>} : vector<16x8xf32>, vector<8x32xf32>, vector<16x32xf32> -> vector<16x32xf32>
    %103 = arith.addf %83, %102 : vector<16x32xf32>
    %104 = arith.addf %1, %103 : vector<16x32xf32>
    %c0_42 = arith.constant 0 : index
    %c0_43 = arith.constant 0 : index
    %105 = vector.load %arg10[%c0_42, %c0_43] : memref<1x32xf32, #tpu.memory_space<vmem>>, vector<1x32xf32>
    %c0_44 = arith.constant 0 : index
    %c0_45 = arith.constant 0 : index
    %106 = vector.load %arg11[%c0_44, %c0_45] : memref<1x32xf32, #tpu.memory_space<vmem>>, vector<1x32xf32>
    %cst_46 = arith.constant dense<0.000000e+00> : vector<16xf32>
    %107 = vector.multi_reduction <add>, %104, %cst_46 [1] : vector<16x32xf32> to vector<16xf32>
    %108 = vector.shape_cast %107 : vector<16xf32> to vector<16x1xf32>
    %cst_47 = arith.constant 3.200000e+01 : f32
    %109 = vector.broadcast %cst_47 : f32 to vector<16x1xf32>
    %110 = arith.divf %108, %109 : vector<16x1xf32>
    %111 = vector.broadcast %110 : vector<16x1xf32> to vector<16x32xf32>
    %112 = arith.subf %104, %111 : vector<16x32xf32>
    %113 = arith.mulf %112, %112 : vector<16x32xf32>
    %cst_48 = arith.constant dense<0.000000e+00> : vector<16xf32>
    %114 = vector.multi_reduction <add>, %113, %cst_48 [1] : vector<16x32xf32> to vector<16xf32>
    %115 = vector.shape_cast %114 : vector<16xf32> to vector<16x1xf32>
    %cst_49 = arith.constant 3.200000e+01 : f32
    %116 = vector.broadcast %cst_49 : f32 to vector<16x1xf32>
    %117 = arith.divf %115, %116 : vector<16x1xf32>
    %cst_50 = arith.constant 9.99999974E-6 : f32
    %118 = vector.broadcast %cst_50 : f32 to vector<16x1xf32>
    %119 = arith.addf %117, %118 : vector<16x1xf32>
    %120 = math.rsqrt %119 : vector<16x1xf32>
    %121 = vector.broadcast %120 : vector<16x1xf32> to vector<16x32xf32>
    %122 = arith.mulf %112, %121 : vector<16x32xf32>
    %123 = vector.broadcast %105 : vector<1x32xf32> to vector<16x32xf32>
    %124 = arith.mulf %122, %123 : vector<16x32xf32>
    %125 = vector.broadcast %106 : vector<1x32xf32> to vector<16x32xf32>
    %126 = arith.addf %124, %125 : vector<16x32xf32>
    %c0_51 = arith.constant 0 : index
    %c0_52 = arith.constant 0 : index
    %127 = vector.load %arg12[%c0_51, %c0_52] : memref<32x64xf32, #tpu.memory_space<vmem>>, vector<32x64xf32>
    %cst_53 = arith.constant dense<0.000000e+00> : vector<16x64xf32>
    %128 = tpu.matmul %126, %127, %cst_53 {dimension_numbers = #tpu.dot_dimension_numbers<[1], [0], [0], [1], [0, 0, 1, 1], [], []>} : vector<16x32xf32>, vector<32x64xf32>, vector<16x64xf32> -> vector<16x64xf32>
    %c0_54 = arith.constant 0 : index
    %c0_55 = arith.constant 0 : index
    %129 = vector.load %arg13[%c0_54, %c0_55] : memref<1x64xf32, #tpu.memory_space<vmem>>, vector<1x64xf32>
    %130 = vector.broadcast %129 : vector<1x64xf32> to vector<16x64xf32>
    %131 = arith.addf %128, %130 : vector<16x64xf32>
    %cst_56 = arith.constant 0.000000e+00 : f32
    %132 = vector.broadcast %cst_56 : f32 to vector<16x64xf32>
    %133 = arith.maximumf %131, %132 : vector<16x64xf32>
    %c0_57 = arith.constant 0 : index
    %c0_58 = arith.constant 0 : index
    %134 = vector.load %arg14[%c0_57, %c0_58] : memref<64x32xf32, #tpu.memory_space<vmem>>, vector<64x32xf32>
    %cst_59 = arith.constant dense<0.000000e+00> : vector<16x32xf32>
    %135 = tpu.matmul %133, %134, %cst_59 {dimension_numbers = #tpu.dot_dimension_numbers<[1], [0], [0], [1], [0, 0, 1, 1], [], []>} : vector<16x64xf32>, vector<64x32xf32>, vector<16x32xf32> -> vector<16x32xf32>
    %c0_60 = arith.constant 0 : index
    %c0_61 = arith.constant 0 : index
    %136 = vector.load %arg15[%c0_60, %c0_61] : memref<1x32xf32, #tpu.memory_space<vmem>>, vector<1x32xf32>
    %137 = vector.broadcast %136 : vector<1x32xf32> to vector<16x32xf32>
    %138 = arith.addf %135, %137 : vector<16x32xf32>
    %139 = arith.addf %126, %138 : vector<16x32xf32>
    %c0_62 = arith.constant 0 : index
    %c0_63 = arith.constant 0 : index
    %140 = vector.load %arg16[%c0_62, %c0_63] : memref<1x32xf32, #tpu.memory_space<vmem>>, vector<1x32xf32>
    %c0_64 = arith.constant 0 : index
    %c0_65 = arith.constant 0 : index
    %141 = vector.load %arg17[%c0_64, %c0_65] : memref<1x32xf32, #tpu.memory_space<vmem>>, vector<1x32xf32>
    %cst_66 = arith.constant dense<0.000000e+00> : vector<16xf32>
    %142 = vector.multi_reduction <add>, %139, %cst_66 [1] : vector<16x32xf32> to vector<16xf32>
    %143 = vector.shape_cast %142 : vector<16xf32> to vector<16x1xf32>
    %cst_67 = arith.constant 3.200000e+01 : f32
    %144 = vector.broadcast %cst_67 : f32 to vector<16x1xf32>
    %145 = arith.divf %143, %144 : vector<16x1xf32>
    %146 = vector.broadcast %145 : vector<16x1xf32> to vector<16x32xf32>
    %147 = arith.subf %139, %146 : vector<16x32xf32>
    %148 = arith.mulf %147, %147 : vector<16x32xf32>
    %cst_68 = arith.constant dense<0.000000e+00> : vector<16xf32>
    %149 = vector.multi_reduction <add>, %148, %cst_68 [1] : vector<16x32xf32> to vector<16xf32>
    %150 = vector.shape_cast %149 : vector<16xf32> to vector<16x1xf32>
    %cst_69 = arith.constant 3.200000e+01 : f32
    %151 = vector.broadcast %cst_69 : f32 to vector<16x1xf32>
    %152 = arith.divf %150, %151 : vector<16x1xf32>
    %cst_70 = arith.constant 9.99999974E-6 : f32
    %153 = vector.broadcast %cst_70 : f32 to vector<16x1xf32>
    %154 = arith.addf %152, %153 : vector<16x1xf32>
    %155 = math.rsqrt %154 : vector<16x1xf32>
    %156 = vector.broadcast %155 : vector<16x1xf32> to vector<16x32xf32>
    %157 = arith.mulf %147, %156 : vector<16x32xf32>
    %158 = vector.broadcast %140 : vector<1x32xf32> to vector<16x32xf32>
    %159 = arith.mulf %157, %158 : vector<16x32xf32>
    %160 = vector.broadcast %141 : vector<1x32xf32> to vector<16x32xf32>
    %161 = arith.addf %159, %160 : vector<16x32xf32>
    %c0_71 = arith.constant 0 : index
    %c0_72 = arith.constant 0 : index
    %c0_73 = arith.constant 0 : index
    %162 = vector.load %arg18[%c0_71, %c0_72, %c0_73] : memref<1x16x32xf32, #tpu.memory_space<vmem>>, vector<1x16x32xf32>
    %163 = vector.shape_cast %162 : vector<1x16x32xf32> to vector<16x32xf32>
    %164 = vector.shape_cast %161 : vector<16x32xf32> to vector<1x16x32xf32>
    tpu.vector_store %arg18[%c0_71, %c0_72, %c0_73], %164 {strides = array<i32>} : memref<1x16x32xf32, #tpu.memory_space<vmem>>, vector<1x16x32xf32>,
    return
  }
  func.func @transform_0(%arg0: i32) -> (i32, i32, i32) {
    %c0_i32 = arith.constant 0 : i32
    %c0_i32_0 = arith.constant 0 : i32
    %c0_i32_1 = arith.constant 0 : i32
    return %arg0, %c0_i32, %c0_i32_0 : i32, i32, i32
  }
  func.func @transform_1(%arg0: i32) -> (i32, i32, i32) {
    %c0_i32 = arith.constant 0 : i32
    %c0_i32_0 = arith.constant 0 : i32
    %c0_i32_1 = arith.constant 0 : i32
    return %arg0, %c0_i32, %c0_i32_0 : i32, i32, i32
  }
  func.func @transform_2(%arg0: i32) -> (i32, i32, i32) {
    %c0_i32 = arith.constant 0 : i32
    %c0_i32_0 = arith.constant 0 : i32
    %c0_i32_1 = arith.constant 0 : i32
    return %arg0, %c0_i32, %c0_i32_0 : i32, i32, i32
  }
  func.func @transform_3(%arg0: i32) -> (i32, i32) {
    %c0_i32 = arith.constant 0 : i32
    %c0_i32_0 = arith.constant 0 : i32
    %c0_i32_1 = arith.constant 0 : i32
    return %c0_i32, %c0_i32_0 : i32, i32
  }
  func.func @transform_4(%arg0: i32) -> (i32, i32) {
    %c0_i32 = arith.constant 0 : i32
    %c0_i32_0 = arith.constant 0 : i32
    %c0_i32_1 = arith.constant 0 : i32
    return %c0_i32, %c0_i32_0 : i32, i32
  }
  func.func @transform_5(%arg0: i32) -> (i32, i32) {
    %c0_i32 = arith.constant 0 : i32
    %c0_i32_0 = arith.constant 0 : i32
    %c0_i32_1 = arith.constant 0 : i32
    return %c0_i32, %c0_i32_0 : i32, i32
  }
  func.func @transform_6(%arg0: i32) -> (i32, i32) {
    %c0_i32 = arith.constant 0 : i32
    %c0_i32_0 = arith.constant 0 : i32
    %c0_i32_1 = arith.constant 0 : i32
    return %c0_i32, %c0_i32_0 : i32, i32
  }
  func.func @transform_7(%arg0: i32) -> (i32, i32) {
    %c0_i32 = arith.constant 0 : i32
    %c0_i32_0 = arith.constant 0 : i32
    %c0_i32_1 = arith.constant 0 : i32
    return %c0_i32, %c0_i32_0 : i32, i32
  }
  func.func @transform_8(%arg0: i32) -> (i32, i32) {
    %c0_i32 = arith.constant 0 : i32
    %c0_i32_0 = arith.constant 0 : i32
    %c0_i32_1 = arith.constant 0 : i32
    return %c0_i32, %c0_i32_0 : i32, i32
  }
  func.func @transform_9(%arg0: i32) -> (i32, i32) {
    %c0_i32 = arith.constant 0 : i32
    %c0_i32_0 = arith.constant 0 : i32
    %c0_i32_1 = arith.constant 0 : i32
    return %c0_i32, %c0_i32_0 : i32, i32
  }
  func.func @transform_10(%arg0: i32) -> (i32, i32) {
    %c0_i32 = arith.constant 0 : i32
    %c0_i32_0 = arith.constant 0 : i32
    %c0_i32_1 = arith.constant 0 : i32
    return %c0_i32, %c0_i32_0 : i32, i32
  }
  func.func @transform_11(%arg0: i32) -> (i32, i32) {
    %c0_i32 = arith.constant 0 : i32
    %c0_i32_0 = arith.constant 0 : i32
    %c0_i32_1 = arith.constant 0 : i32
    return %c0_i32, %c0_i32_0 : i32, i32
  }
  func.func @transform_12(%arg0: i32) -> (i32, i32) {
    %c0_i32 = arith.constant 0 : i32
    %c0_i32_0 = arith.constant 0 : i32
    %c0_i32_1 = arith.constant 0 : i32
    return %c0_i32, %c0_i32_0 : i32, i32
  }
  func.func @transform_13(%arg0: i32) -> (i32, i32) {
    %c0_i32 = arith.constant 0 : i32
    %c0_i32_0 = arith.constant 0 : i32
    %c0_i32_1 = arith.constant 0 : i32
    return %c0_i32, %c0_i32_0 : i32, i32
  }
  func.func @transform_14(%arg0: i32) -> (i32, i32) {
    %c0_i32 = arith.constant 0 : i32
    %c0_i32_0 = arith.constant 0 : i32
    %c0_i32_1 = arith.constant 0 : i32
    return %c0_i32, %c0_i32_0 : i32, i32
  }
  func.func @transform_15(%arg0: i32) -> (i32, i32) {
    %c0_i32 = arith.constant 0 : i32
    %c0_i32_0 = arith.constant 0 : i32
    %c0_i32_1 = arith.constant 0 : i32
    return %c0_i32, %c0_i32_0 : i32, i32
  }
  func.func @transform_16(%arg0: i32) -> (i32, i32) {
    %c0_i32 = arith.constant 0 : i32
    %c0_i32_0 = arith.constant 0 : i32
    %c0_i32_1 = arith.constant 0 : i32
    return %c0_i32, %c0_i32_0 : i32, i32
  }
  func.func @transform_17(%arg0: i32) -> (i32, i32, i32) {
    %c0_i32 = arith.constant 0 : i32
    %c0_i32_0 = arith.constant 0 : i32
    %c0_i32_1 = arith.constant 0 : i32
    return %arg0, %c0_i32, %c0_i32_0 : i32, i32, i32
  }
}

module attributes {stable_mosaic.version = 11 : i64} {
  func.func @kernel(%arg0: i32, %arg1: memref<1x8x32xf32, #tpu.memory_space<vmem>>, %arg2: memref<8x32xf32, #tpu.memory_space<vmem>>, %arg3: memref<1x16x32xf32, #tpu.memory_space<vmem>>, %arg4: memref<1x16x32xf32, #tpu.memory_space<vmem>>, %arg5: memref<1x1x16xf32, #tpu.memory_space<vmem>>, %arg6: memref<32x64xf32, #tpu.memory_space<vmem>>, %arg7: memref<1x64xf32, #tpu.memory_space<vmem>>, %arg8: memref<32x32xf32, #tpu.memory_space<vmem>>, %arg9: memref<1x32xf32, #tpu.memory_space<vmem>>, %arg10: memref<32x32xf32, #tpu.memory_space<vmem>>, %arg11: memref<1x32xf32, #tpu.memory_space<vmem>>, %arg12: memref<1x32xf32, #tpu.memory_space<vmem>>, %arg13: memref<1x32xf32, #tpu.memory_space<vmem>>, %arg14: memref<32x32xf32, #tpu.memory_space<vmem>>, %arg15: memref<1x32xf32, #tpu.memory_space<vmem>>, %arg16: memref<32x32xf32, #tpu.memory_space<vmem>>, %arg17: memref<1x32xf32, #tpu.memory_space<vmem>>, %arg18: memref<32x32xf32, #tpu.memory_space<vmem>>, %arg19: memref<1x32xf32, #tpu.memory_space<vmem>>, %arg20: memref<32x32xf32, #tpu.memory_space<vmem>>, %arg21: memref<1x32xf32, #tpu.memory_space<vmem>>, %arg22: memref<32x32xf32, #tpu.memory_space<vmem>>, %arg23: memref<1x32xf32, #tpu.memory_space<vmem>>, %arg24: memref<1x32xf32, #tpu.memory_space<vmem>>, %arg25: memref<32x64xf32, #tpu.memory_space<vmem>>, %arg26: memref<1x64xf32, #tpu.memory_space<vmem>>, %arg27: memref<64x32xf32, #tpu.memory_space<vmem>>, %arg28: memref<1x32xf32, #tpu.memory_space<vmem>>, %arg29: memref<1x32xf32, #tpu.memory_space<vmem>>, %arg30: memref<1x32xf32, #tpu.memory_space<vmem>>, %arg31: memref<1x8x32xf32, #tpu.memory_space<vmem>>) attributes {dimension_semantics = [#tpu.dimension_semantics<parallel>], iteration_bounds = array<i64: 2>, scalar_prefetch = 0 : i64, scratch_operands = 0 : i64, tpu.core_type = #tpu.core_type<tc>, window_params = [{transform_indices = @transform_0, window_bounds = array<i64: 1, 8, 32>}, {pipeline_mode = #tpu.pipeline_mode<synchronous>, transform_indices = @transform_1, window_bounds = array<i64: 8, 32>}, {transform_indices = @transform_2, window_bounds = array<i64: 1, 16, 32>}, {transform_indices = @transform_3, window_bounds = array<i64: 1, 16, 32>}, {transform_indices = @transform_4, window_bounds = array<i64: 1, 1, 16>}, {pipeline_mode = #tpu.pipeline_mode<synchronous>, transform_indices = @transform_5, window_bounds = array<i64: 32, 64>}, {pipeline_mode = #tpu.pipeline_mode<synchronous>, transform_indices = @transform_6, window_bounds = array<i64: 1, 64>}, {pipeline_mode = #tpu.pipeline_mode<synchronous>, transform_indices = @transform_7, window_bounds = array<i64: 32, 32>}, {pipeline_mode = #tpu.pipeline_mode<synchronous>, transform_indices = @transform_8, window_bounds = array<i64: 1, 32>}, {pipeline_mode = #tpu.pipeline_mode<synchronous>, transform_indices = @transform_9, window_bounds = array<i64: 32, 32>}, {pipeline_mode = #tpu.pipeline_mode<synchronous>, transform_indices = @transform_10, window_bounds = array<i64: 1, 32>}, {pipeline_mode = #tpu.pipeline_mode<synchronous>, transform_indices = @transform_11, window_bounds = array<i64: 1, 32>}, {pipeline_mode = #tpu.pipeline_mode<synchronous>, transform_indices = @transform_12, window_bounds = array<i64: 1, 32>}, {pipeline_mode = #tpu.pipeline_mode<synchronous>, transform_indices = @transform_13, window_bounds = array<i64: 32, 32>}, {pipeline_mode = #tpu.pipeline_mode<synchronous>, transform_indices = @transform_14, window_bounds = array<i64: 1, 32>}, {pipeline_mode = #tpu.pipeline_mode<synchronous>, transform_indices = @transform_15, window_bounds = array<i64: 32, 32>}, {pipeline_mode = #tpu.pipeline_mode<synchronous>, transform_indices = @transform_16, window_bounds = array<i64: 1, 32>}, {pipeline_mode = #tpu.pipeline_mode<synchronous>, transform_indices = @transform_17, window_bounds = array<i64: 32, 32>}, {pipeline_mode = #tpu.pipeline_mode<synchronous>, transform_indices = @transform_18, window_bounds = array<i64: 1, 32>}, {pipeline_mode = #tpu.pipeline_mode<synchronous>, transform_indices = @transform_19, window_bounds = array<i64: 32, 32>}, {pipeline_mode = #tpu.pipeline_mode<synchronous>, transform_indices = @transform_20, window_bounds = array<i64: 1, 32>}, {pipeline_mode = #tpu.pipeline_mode<synchronous>, transform_indices = @transform_21, window_bounds = array<i64: 32, 32>}, {pipeline_mode = #tpu.pipeline_mode<synchronous>, transform_indices = @transform_22, window_bounds = array<i64: 1, 32>}, {pipeline_mode = #tpu.pipeline_mode<synchronous>, transform_indices = @transform_23, window_bounds = array<i64: 1, 32>}, {pipeline_mode = #tpu.pipeline_mode<synchronous>, transform_indices = @transform_24, window_bounds = array<i64: 32, 64>}, {pipeline_mode = #tpu.pipeline_mode<synchronous>, transform_indices = @transform_25, window_bounds = array<i64: 1, 64>}, {pipeline_mode = #tpu.pipeline_mode<synchronous>, transform_indices = @transform_26, window_bounds = array<i64: 64, 32>}, {pipeline_mode = #tpu.pipeline_mode<synchronous>, transform_indices = @transform_27, window_bounds = array<i64: 1, 32>}, {pipeline_mode = #tpu.pipeline_mode<synchronous>, transform_indices = @transform_28, window_bounds = array<i64: 1, 32>}, {pipeline_mode = #tpu.pipeline_mode<synchronous>, transform_indices = @transform_29, window_bounds = array<i64: 1, 32>}, {transform_indices = @transform_30, window_bounds = array<i64: 1, 8, 32>}]} {
    %c0 = arith.constant 0 : index
    %c0_0 = arith.constant 0 : index
    %c0_1 = arith.constant 0 : index
    %0 = vector.load %arg1[%c0, %c0_0, %c0_1] : memref<1x8x32xf32, #tpu.memory_space<vmem>>, vector<1x8x32xf32>
    %1 = vector.shape_cast %0 : vector<1x8x32xf32> to vector<8x32xf32>
    %c0_2 = arith.constant 0 : index
    %c0_3 = arith.constant 0 : index
    %2 = vector.load %arg2[%c0_2, %c0_3] : memref<8x32xf32, #tpu.memory_space<vmem>>, vector<8x32xf32>
    %c0_4 = arith.constant 0 : index
    %c0_5 = arith.constant 0 : index
    %c0_6 = arith.constant 0 : index
    %3 = vector.load %arg3[%c0_4, %c0_5, %c0_6] : memref<1x16x32xf32, #tpu.memory_space<vmem>>, vector<1x16x32xf32>
    %4 = vector.shape_cast %3 : vector<1x16x32xf32> to vector<16x32xf32>
    %c0_7 = arith.constant 0 : index
    %c0_8 = arith.constant 0 : index
    %c0_9 = arith.constant 0 : index
    %5 = vector.load %arg4[%c0_7, %c0_8, %c0_9] : memref<1x16x32xf32, #tpu.memory_space<vmem>>, vector<1x16x32xf32>
    %6 = vector.shape_cast %5 : vector<1x16x32xf32> to vector<16x32xf32>
    %7 = arith.addf %1, %2 : vector<8x32xf32>
    %c0_10 = arith.constant 0 : index
    %c0_11 = arith.constant 0 : index
    %8 = vector.load %arg6[%c0_10, %c0_11] : memref<32x64xf32, #tpu.memory_space<vmem>>, vector<32x64xf32>
    %cst = arith.constant dense<0.000000e+00> : vector<8x64xf32>
    %9 = tpu.matmul %7, %8, %cst {dimension_numbers = #tpu.dot_dimension_numbers<[1], [0], [0], [1], [0, 0, 1, 1], [], []>} : vector<8x32xf32>, vector<32x64xf32>, vector<8x64xf32> -> vector<8x64xf32>
    %c0_12 = arith.constant 0 : index
    %c0_13 = arith.constant 0 : index
    %10 = vector.load %arg7[%c0_12, %c0_13] : memref<1x64xf32, #tpu.memory_space<vmem>>, vector<1x64xf32>
    %11 = vector.broadcast %10 : vector<1x64xf32> to vector<8x64xf32>
    %12 = arith.addf %9, %11 : vector<8x64xf32>
    %c0_14 = arith.constant 0 : index
    %c0_15 = arith.constant 0 : index
    %13 = vector.load %arg8[%c0_14, %c0_15] : memref<32x32xf32, #tpu.memory_space<vmem>>, vector<32x32xf32>
    %cst_16 = arith.constant dense<0.000000e+00> : vector<8x32xf32>
    %14 = tpu.matmul %1, %13, %cst_16 {dimension_numbers = #tpu.dot_dimension_numbers<[1], [0], [0], [1], [0, 0, 1, 1], [], []>} : vector<8x32xf32>, vector<32x32xf32>, vector<8x32xf32> -> vector<8x32xf32>
    %c0_17 = arith.constant 0 : index
    %c0_18 = arith.constant 0 : index
    %15 = vector.load %arg9[%c0_17, %c0_18] : memref<1x32xf32, #tpu.memory_space<vmem>>, vector<1x32xf32>
    %16 = vector.broadcast %15 : vector<1x32xf32> to vector<8x32xf32>
    %17 = arith.addf %14, %16 : vector<8x32xf32>
    %18 = vector.extract_strided_slice %12 {offsets = [0, 0], sizes = [8, 32], strides = [1, 1]} : vector<8x64xf32> to vector<8x32xf32>
    %19 = vector.extract_strided_slice %12 {offsets = [0, 32], sizes = [8, 32], strides = [1, 1]} : vector<8x64xf32> to vector<8x32xf32>
    %c0_19 = arith.constant 0 : index
    %c0_20 = arith.constant 0 : index
    %20 = vector.load %arg10[%c0_19, %c0_20] : memref<32x32xf32, #tpu.memory_space<vmem>>, vector<32x32xf32>
    %c0_21 = arith.constant 0 : index
    %c0_22 = arith.constant 0 : index
    %21 = vector.load %arg11[%c0_21, %c0_22] : memref<1x32xf32, #tpu.memory_space<vmem>>, vector<1x32xf32>
    %cst_23 = arith.constant 0.000000e+00 : f32
    %22 = vector.broadcast %cst_23 : f32 to vector<8x32xf32>
    %23 = vector.broadcast %21 : vector<1x32xf32> to vector<8x32xf32>
    %24 = arith.addf %22, %23 : vector<8x32xf32>
    %25 = vector.extract_strided_slice %18 {offsets = [0, 0], sizes = [8, 8], strides = [1, 1]} : vector<8x32xf32> to vector<8x8xf32>
    %26 = vector.extract_strided_slice %19 {offsets = [0, 0], sizes = [8, 8], strides = [1, 1]} : vector<8x32xf32> to vector<8x8xf32>
    %27 = vector.extract_strided_slice %17 {offsets = [0, 0], sizes = [8, 8], strides = [1, 1]} : vector<8x32xf32> to vector<8x8xf32>
    %cst_24 = arith.constant dense<0.000000e+00> : vector<8x8xf32>
    %28 = tpu.matmul %25, %26, %cst_24 {dimension_numbers = #tpu.dot_dimension_numbers<[1], [1], [0], [0], [0, 0, 1, 0], [], []>} : vector<8x8xf32>, vector<8x8xf32>, vector<8x8xf32> -> vector<8x8xf32>
    %cst_25 = arith.constant dense<0xFF800000> : vector<8xf32>
    %29 = vector.multi_reduction <maximumf>, %28, %cst_25 [1] : vector<8x8xf32> to vector<8xf32>
    %30 = vector.shape_cast %29 : vector<8xf32> to vector<8x1xf32>
    %31 = vector.broadcast %30 : vector<8x1xf32> to vector<8x8xf32>
    %32 = arith.subf %28, %31 : vector<8x8xf32>
    %33 = math.exp %32 : vector<8x8xf32>
    %cst_26 = arith.constant dense<0.000000e+00> : vector<8xf32>
    %34 = vector.multi_reduction <add>, %33, %cst_26 [1] : vector<8x8xf32> to vector<8xf32>
    %35 = vector.shape_cast %34 : vector<8xf32> to vector<8x1xf32>
    %36 = tpu.reciprocal %35 {approx = true} : vector<8x1xf32> -> vector<8x1xf32>
    %37 = vector.broadcast %36 : vector<8x1xf32> to vector<8x8xf32>
    %38 = arith.mulf %33, %37 : vector<8x8xf32>
    %cst_27 = arith.constant dense<0.000000e+00> : vector<8x8xf32>
    %39 = tpu.matmul %38, %27, %cst_27 {dimension_numbers = #tpu.dot_dimension_numbers<[1], [0], [0], [1], [0, 0, 1, 1], [], []>} : vector<8x8xf32>, vector<8x8xf32>, vector<8x8xf32> -> vector<8x8xf32>
    %40 = vector.extract_strided_slice %20 {offsets = [0, 0], sizes = [8, 32], strides = [1, 1]} : vector<32x32xf32> to vector<8x32xf32>
    %cst_28 = arith.constant dense<0.000000e+00> : vector<8x32xf32>
    %41 = tpu.matmul %39, %40, %cst_28 {dimension_numbers = #tpu.dot_dimension_numbers<[1], [0], [0], [1], [0, 0, 1, 1], [], []>} : vector<8x8xf32>, vector<8x32xf32>, vector<8x32xf32> -> vector<8x32xf32>
    %42 = arith.addf %24, %41 : vector<8x32xf32>
    %43 = vector.extract_strided_slice %18 {offsets = [0, 8], sizes = [8, 8], strides = [1, 1]} : vector<8x32xf32> to vector<8x8xf32>
    %44 = vector.extract_strided_slice %19 {offsets = [0, 8], sizes = [8, 8], strides = [1, 1]} : vector<8x32xf32> to vector<8x8xf32>
    %45 = vector.extract_strided_slice %17 {offsets = [0, 8], sizes = [8, 8], strides = [1, 1]} : vector<8x32xf32> to vector<8x8xf32>
    %cst_29 = arith.constant dense<0.000000e+00> : vector<8x8xf32>
    %46 = tpu.matmul %43, %44, %cst_29 {dimension_numbers = #tpu.dot_dimension_numbers<[1], [1], [0], [0], [0, 0, 1, 0], [], []>} : vector<8x8xf32>, vector<8x8xf32>, vector<8x8xf32> -> vector<8x8xf32>
    %cst_30 = arith.constant dense<0xFF800000> : vector<8xf32>
    %47 = vector.multi_reduction <maximumf>, %46, %cst_30 [1] : vector<8x8xf32> to vector<8xf32>
    %48 = vector.shape_cast %47 : vector<8xf32> to vector<8x1xf32>
    %49 = vector.broadcast %48 : vector<8x1xf32> to vector<8x8xf32>
    %50 = arith.subf %46, %49 : vector<8x8xf32>
    %51 = math.exp %50 : vector<8x8xf32>
    %cst_31 = arith.constant dense<0.000000e+00> : vector<8xf32>
    %52 = vector.multi_reduction <add>, %51, %cst_31 [1] : vector<8x8xf32> to vector<8xf32>
    %53 = vector.shape_cast %52 : vector<8xf32> to vector<8x1xf32>
    %54 = tpu.reciprocal %53 {approx = true} : vector<8x1xf32> -> vector<8x1xf32>
    %55 = vector.broadcast %54 : vector<8x1xf32> to vector<8x8xf32>
    %56 = arith.mulf %51, %55 : vector<8x8xf32>
    %cst_32 = arith.constant dense<0.000000e+00> : vector<8x8xf32>
    %57 = tpu.matmul %56, %45, %cst_32 {dimension_numbers = #tpu.dot_dimension_numbers<[1], [0], [0], [1], [0, 0, 1, 1], [], []>} : vector<8x8xf32>, vector<8x8xf32>, vector<8x8xf32> -> vector<8x8xf32>
    %58 = vector.extract_strided_slice %20 {offsets = [8, 0], sizes = [8, 32], strides = [1, 1]} : vector<32x32xf32> to vector<8x32xf32>
    %cst_33 = arith.constant dense<0.000000e+00> : vector<8x32xf32>
    %59 = tpu.matmul %57, %58, %cst_33 {dimension_numbers = #tpu.dot_dimension_numbers<[1], [0], [0], [1], [0, 0, 1, 1], [], []>} : vector<8x8xf32>, vector<8x32xf32>, vector<8x32xf32> -> vector<8x32xf32>
    %60 = arith.addf %42, %59 : vector<8x32xf32>
    %61 = vector.extract_strided_slice %18 {offsets = [0, 16], sizes = [8, 8], strides = [1, 1]} : vector<8x32xf32> to vector<8x8xf32>
    %62 = vector.extract_strided_slice %19 {offsets = [0, 16], sizes = [8, 8], strides = [1, 1]} : vector<8x32xf32> to vector<8x8xf32>
    %63 = vector.extract_strided_slice %17 {offsets = [0, 16], sizes = [8, 8], strides = [1, 1]} : vector<8x32xf32> to vector<8x8xf32>
    %cst_34 = arith.constant dense<0.000000e+00> : vector<8x8xf32>
    %64 = tpu.matmul %61, %62, %cst_34 {dimension_numbers = #tpu.dot_dimension_numbers<[1], [1], [0], [0], [0, 0, 1, 0], [], []>} : vector<8x8xf32>, vector<8x8xf32>, vector<8x8xf32> -> vector<8x8xf32>
    %cst_35 = arith.constant dense<0xFF800000> : vector<8xf32>
    %65 = vector.multi_reduction <maximumf>, %64, %cst_35 [1] : vector<8x8xf32> to vector<8xf32>
    %66 = vector.shape_cast %65 : vector<8xf32> to vector<8x1xf32>
    %67 = vector.broadcast %66 : vector<8x1xf32> to vector<8x8xf32>
    %68 = arith.subf %64, %67 : vector<8x8xf32>
    %69 = math.exp %68 : vector<8x8xf32>
    %cst_36 = arith.constant dense<0.000000e+00> : vector<8xf32>
    %70 = vector.multi_reduction <add>, %69, %cst_36 [1] : vector<8x8xf32> to vector<8xf32>
    %71 = vector.shape_cast %70 : vector<8xf32> to vector<8x1xf32>
    %72 = tpu.reciprocal %71 {approx = true} : vector<8x1xf32> -> vector<8x1xf32>
    %73 = vector.broadcast %72 : vector<8x1xf32> to vector<8x8xf32>
    %74 = arith.mulf %69, %73 : vector<8x8xf32>
    %cst_37 = arith.constant dense<0.000000e+00> : vector<8x8xf32>
    %75 = tpu.matmul %74, %63, %cst_37 {dimension_numbers = #tpu.dot_dimension_numbers<[1], [0], [0], [1], [0, 0, 1, 1], [], []>} : vector<8x8xf32>, vector<8x8xf32>, vector<8x8xf32> -> vector<8x8xf32>
    %76 = vector.extract_strided_slice %20 {offsets = [16, 0], sizes = [8, 32], strides = [1, 1]} : vector<32x32xf32> to vector<8x32xf32>
    %cst_38 = arith.constant dense<0.000000e+00> : vector<8x32xf32>
    %77 = tpu.matmul %75, %76, %cst_38 {dimension_numbers = #tpu.dot_dimension_numbers<[1], [0], [0], [1], [0, 0, 1, 1], [], []>} : vector<8x8xf32>, vector<8x32xf32>, vector<8x32xf32> -> vector<8x32xf32>
    %78 = arith.addf %60, %77 : vector<8x32xf32>
    %79 = vector.extract_strided_slice %18 {offsets = [0, 24], sizes = [8, 8], strides = [1, 1]} : vector<8x32xf32> to vector<8x8xf32>
    %80 = vector.extract_strided_slice %19 {offsets = [0, 24], sizes = [8, 8], strides = [1, 1]} : vector<8x32xf32> to vector<8x8xf32>
    %81 = vector.extract_strided_slice %17 {offsets = [0, 24], sizes = [8, 8], strides = [1, 1]} : vector<8x32xf32> to vector<8x8xf32>
    %cst_39 = arith.constant dense<0.000000e+00> : vector<8x8xf32>
    %82 = tpu.matmul %79, %80, %cst_39 {dimension_numbers = #tpu.dot_dimension_numbers<[1], [1], [0], [0], [0, 0, 1, 0], [], []>} : vector<8x8xf32>, vector<8x8xf32>, vector<8x8xf32> -> vector<8x8xf32>
    %cst_40 = arith.constant dense<0xFF800000> : vector<8xf32>
    %83 = vector.multi_reduction <maximumf>, %82, %cst_40 [1] : vector<8x8xf32> to vector<8xf32>
    %84 = vector.shape_cast %83 : vector<8xf32> to vector<8x1xf32>
    %85 = vector.broadcast %84 : vector<8x1xf32> to vector<8x8xf32>
    %86 = arith.subf %82, %85 : vector<8x8xf32>
    %87 = math.exp %86 : vector<8x8xf32>
    %cst_41 = arith.constant dense<0.000000e+00> : vector<8xf32>
    %88 = vector.multi_reduction <add>, %87, %cst_41 [1] : vector<8x8xf32> to vector<8xf32>
    %89 = vector.shape_cast %88 : vector<8xf32> to vector<8x1xf32>
    %90 = tpu.reciprocal %89 {approx = true} : vector<8x1xf32> -> vector<8x1xf32>
    %91 = vector.broadcast %90 : vector<8x1xf32> to vector<8x8xf32>
    %92 = arith.mulf %87, %91 : vector<8x8xf32>
    %cst_42 = arith.constant dense<0.000000e+00> : vector<8x8xf32>
    %93 = tpu.matmul %92, %81, %cst_42 {dimension_numbers = #tpu.dot_dimension_numbers<[1], [0], [0], [1], [0, 0, 1, 1], [], []>} : vector<8x8xf32>, vector<8x8xf32>, vector<8x8xf32> -> vector<8x8xf32>
    %94 = vector.extract_strided_slice %20 {offsets = [24, 0], sizes = [8, 32], strides = [1, 1]} : vector<32x32xf32> to vector<8x32xf32>
    %cst_43 = arith.constant dense<0.000000e+00> : vector<8x32xf32>
    %95 = tpu.matmul %93, %94, %cst_43 {dimension_numbers = #tpu.dot_dimension_numbers<[1], [0], [0], [1], [0, 0, 1, 1], [], []>} : vector<8x8xf32>, vector<8x32xf32>, vector<8x32xf32> -> vector<8x32xf32>
    %96 = arith.addf %78, %95 : vector<8x32xf32>
    %97 = arith.addf %1, %96 : vector<8x32xf32>
    %c0_44 = arith.constant 0 : index
    %c0_45 = arith.constant 0 : index
    %98 = vector.load %arg12[%c0_44, %c0_45] : memref<1x32xf32, #tpu.memory_space<vmem>>, vector<1x32xf32>
    %c0_46 = arith.constant 0 : index
    %c0_47 = arith.constant 0 : index
    %99 = vector.load %arg13[%c0_46, %c0_47] : memref<1x32xf32, #tpu.memory_space<vmem>>, vector<1x32xf32>
    %cst_48 = arith.constant dense<0.000000e+00> : vector<8xf32>
    %100 = vector.multi_reduction <add>, %97, %cst_48 [1] : vector<8x32xf32> to vector<8xf32>
    %101 = vector.shape_cast %100 : vector<8xf32> to vector<8x1xf32>
    %cst_49 = arith.constant 3.200000e+01 : f32
    %102 = vector.broadcast %cst_49 : f32 to vector<8x1xf32>
    %103 = arith.divf %101, %102 : vector<8x1xf32>
    %104 = vector.broadcast %103 : vector<8x1xf32> to vector<8x32xf32>
    %105 = arith.subf %97, %104 : vector<8x32xf32>
    %106 = arith.mulf %105, %105 : vector<8x32xf32>
    %cst_50 = arith.constant dense<0.000000e+00> : vector<8xf32>
    %107 = vector.multi_reduction <add>, %106, %cst_50 [1] : vector<8x32xf32> to vector<8xf32>
    %108 = vector.shape_cast %107 : vector<8xf32> to vector<8x1xf32>
    %cst_51 = arith.constant 3.200000e+01 : f32
    %109 = vector.broadcast %cst_51 : f32 to vector<8x1xf32>
    %110 = arith.divf %108, %109 : vector<8x1xf32>
    %cst_52 = arith.constant 9.99999974E-6 : f32
    %111 = vector.broadcast %cst_52 : f32 to vector<8x1xf32>
    %112 = arith.addf %110, %111 : vector<8x1xf32>
    %113 = math.rsqrt %112 : vector<8x1xf32>
    %114 = vector.broadcast %113 : vector<8x1xf32> to vector<8x32xf32>
    %115 = arith.mulf %105, %114 : vector<8x32xf32>
    %116 = vector.broadcast %98 : vector<1x32xf32> to vector<8x32xf32>
    %117 = arith.mulf %115, %116 : vector<8x32xf32>
    %118 = vector.broadcast %99 : vector<1x32xf32> to vector<8x32xf32>
    %119 = arith.addf %117, %118 : vector<8x32xf32>
    %120 = arith.addf %119, %2 : vector<8x32xf32>
    %c0_53 = arith.constant 0 : index
    %c0_54 = arith.constant 0 : index
    %121 = vector.load %arg14[%c0_53, %c0_54] : memref<32x32xf32, #tpu.memory_space<vmem>>, vector<32x32xf32>
    %cst_55 = arith.constant dense<0.000000e+00> : vector<8x32xf32>
    %122 = tpu.matmul %120, %121, %cst_55 {dimension_numbers = #tpu.dot_dimension_numbers<[1], [0], [0], [1], [0, 0, 1, 1], [], []>} : vector<8x32xf32>, vector<32x32xf32>, vector<8x32xf32> -> vector<8x32xf32>
    %c0_56 = arith.constant 0 : index
    %c0_57 = arith.constant 0 : index
    %123 = vector.load %arg15[%c0_56, %c0_57] : memref<1x32xf32, #tpu.memory_space<vmem>>, vector<1x32xf32>
    %124 = vector.broadcast %123 : vector<1x32xf32> to vector<8x32xf32>
    %125 = arith.addf %122, %124 : vector<8x32xf32>
    %126 = arith.addf %4, %6 : vector<16x32xf32>
    %c0_58 = arith.constant 0 : index
    %c0_59 = arith.constant 0 : index
    %127 = vector.load %arg16[%c0_58, %c0_59] : memref<32x32xf32, #tpu.memory_space<vmem>>, vector<32x32xf32>
    %cst_60 = arith.constant dense<0.000000e+00> : vector<16x32xf32>
    %128 = tpu.matmul %126, %127, %cst_60 {dimension_numbers = #tpu.dot_dimension_numbers<[1], [0], [0], [1], [0, 0, 1, 1], [], []>} : vector<16x32xf32>, vector<32x32xf32>, vector<16x32xf32> -> vector<16x32xf32>
    %c0_61 = arith.constant 0 : index
    %c0_62 = arith.constant 0 : index
    %129 = vector.load %arg17[%c0_61, %c0_62] : memref<1x32xf32, #tpu.memory_space<vmem>>, vector<1x32xf32>
    %130 = vector.broadcast %129 : vector<1x32xf32> to vector<16x32xf32>
    %131 = arith.addf %128, %130 : vector<16x32xf32>
    %c0_63 = arith.constant 0 : index
    %c0_64 = arith.constant 0 : index
    %132 = vector.load %arg18[%c0_63, %c0_64] : memref<32x32xf32, #tpu.memory_space<vmem>>, vector<32x32xf32>
    %cst_65 = arith.constant dense<0.000000e+00> : vector<16x32xf32>
    %133 = tpu.matmul %4, %132, %cst_65 {dimension_numbers = #tpu.dot_dimension_numbers<[1], [0], [0], [1], [0, 0, 1, 1], [], []>} : vector<16x32xf32>, vector<32x32xf32>, vector<16x32xf32> -> vector<16x32xf32>
    %c0_66 = arith.constant 0 : index
    %c0_67 = arith.constant 0 : index
    %134 = vector.load %arg19[%c0_66, %c0_67] : memref<1x32xf32, #tpu.memory_space<vmem>>, vector<1x32xf32>
    %135 = vector.broadcast %134 : vector<1x32xf32> to vector<16x32xf32>
    %136 = arith.addf %133, %135 : vector<16x32xf32>
    %c0_68 = arith.constant 0 : index
    %c0_69 = arith.constant 0 : index
    %137 = vector.load %arg20[%c0_68, %c0_69] : memref<32x32xf32, #tpu.memory_space<vmem>>, vector<32x32xf32>
    %c0_70 = arith.constant 0 : index
    %c0_71 = arith.constant 0 : index
    %138 = vector.load %arg21[%c0_70, %c0_71] : memref<1x32xf32, #tpu.memory_space<vmem>>, vector<1x32xf32>
    %c0_72 = arith.constant 0 : index
    %c0_73 = arith.constant 0 : index
    %c0_74 = arith.constant 0 : index
    %139 = vector.load %arg5[%c0_72, %c0_73, %c0_74] : memref<1x1x16xf32, #tpu.memory_space<vmem>>, vector<1x1x16xf32>
    %140 = vector.shape_cast %139 : vector<1x1x16xf32> to vector<1x16xf32>
    %cst_75 = arith.constant 0.000000e+00 : f32
    %141 = vector.broadcast %cst_75 : f32 to vector<8x32xf32>
    %142 = vector.broadcast %138 : vector<1x32xf32> to vector<8x32xf32>
    %143 = arith.addf %141, %142 : vector<8x32xf32>
    %144 = vector.extract_strided_slice %125 {offsets = [0, 0], sizes = [8, 8], strides = [1, 1]} : vector<8x32xf32> to vector<8x8xf32>
    %145 = vector.extract_strided_slice %131 {offsets = [0, 0], sizes = [16, 8], strides = [1, 1]} : vector<16x32xf32> to vector<16x8xf32>
    %146 = vector.extract_strided_slice %136 {offsets = [0, 0], sizes = [16, 8], strides = [1, 1]} : vector<16x32xf32> to vector<16x8xf32>
    %cst_76 = arith.constant dense<0.000000e+00> : vector<8x16xf32>
    %147 = tpu.matmul %144, %145, %cst_76 {dimension_numbers = #tpu.dot_dimension_numbers<[1], [1], [0], [0], [0, 0, 1, 0], [], []>} : vector<8x8xf32>, vector<16x8xf32>, vector<8x16xf32> -> vector<8x16xf32>
    %148 = vector.broadcast %140 : vector<1x16xf32> to vector<8x16xf32>
    %149 = arith.addf %147, %148 : vector<8x16xf32>
    %cst_77 = arith.constant dense<0xFF800000> : vector<8xf32>
    %150 = vector.multi_reduction <maximumf>, %149, %cst_77 [1] : vector<8x16xf32> to vector<8xf32>
    %151 = vector.shape_cast %150 : vector<8xf32> to vector<8x1xf32>
    %152 = vector.broadcast %151 : vector<8x1xf32> to vector<8x16xf32>
    %153 = arith.subf %149, %152 : vector<8x16xf32>
    %154 = math.exp %153 : vector<8x16xf32>
    %cst_78 = arith.constant dense<0.000000e+00> : vector<8xf32>
    %155 = vector.multi_reduction <add>, %154, %cst_78 [1] : vector<8x16xf32> to vector<8xf32>
    %156 = vector.shape_cast %155 : vector<8xf32> to vector<8x1xf32>
    %157 = tpu.reciprocal %156 {approx = true} : vector<8x1xf32> -> vector<8x1xf32>
    %158 = vector.broadcast %157 : vector<8x1xf32> to vector<8x16xf32>
    %159 = arith.mulf %154, %158 : vector<8x16xf32>
    %cst_79 = arith.constant dense<0.000000e+00> : vector<8x8xf32>
    %160 = tpu.matmul %159, %146, %cst_79 {dimension_numbers = #tpu.dot_dimension_numbers<[1], [0], [0], [1], [0, 0, 1, 1], [], []>} : vector<8x16xf32>, vector<16x8xf32>, vector<8x8xf32> -> vector<8x8xf32>
    %161 = vector.extract_strided_slice %137 {offsets = [0, 0], sizes = [8, 32], strides = [1, 1]} : vector<32x32xf32> to vector<8x32xf32>
    %cst_80 = arith.constant dense<0.000000e+00> : vector<8x32xf32>
    %162 = tpu.matmul %160, %161, %cst_80 {dimension_numbers = #tpu.dot_dimension_numbers<[1], [0], [0], [1], [0, 0, 1, 1], [], []>} : vector<8x8xf32>, vector<8x32xf32>, vector<8x32xf32> -> vector<8x32xf32>
    %163 = arith.addf %143, %162 : vector<8x32xf32>
    %164 = vector.extract_strided_slice %125 {offsets = [0, 8], sizes = [8, 8], strides = [1, 1]} : vector<8x32xf32> to vector<8x8xf32>
    %165 = vector.extract_strided_slice %131 {offsets = [0, 8], sizes = [16, 8], strides = [1, 1]} : vector<16x32xf32> to vector<16x8xf32>
    %166 = vector.extract_strided_slice %136 {offsets = [0, 8], sizes = [16, 8], strides = [1, 1]} : vector<16x32xf32> to vector<16x8xf32>
    %cst_81 = arith.constant dense<0.000000e+00> : vector<8x16xf32>
    %167 = tpu.matmul %164, %165, %cst_81 {dimension_numbers = #tpu.dot_dimension_numbers<[1], [1], [0], [0], [0, 0, 1, 0], [], []>} : vector<8x8xf32>, vector<16x8xf32>, vector<8x16xf32> -> vector<8x16xf32>
    %168 = vector.broadcast %140 : vector<1x16xf32> to vector<8x16xf32>
    %169 = arith.addf %167, %168 : vector<8x16xf32>
    %cst_82 = arith.constant dense<0xFF800000> : vector<8xf32>
    %170 = vector.multi_reduction <maximumf>, %169, %cst_82 [1] : vector<8x16xf32> to vector<8xf32>
    %171 = vector.shape_cast %170 : vector<8xf32> to vector<8x1xf32>
    %172 = vector.broadcast %171 : vector<8x1xf32> to vector<8x16xf32>
    %173 = arith.subf %169, %172 : vector<8x16xf32>
    %174 = math.exp %173 : vector<8x16xf32>
    %cst_83 = arith.constant dense<0.000000e+00> : vector<8xf32>
    %175 = vector.multi_reduction <add>, %174, %cst_83 [1] : vector<8x16xf32> to vector<8xf32>
    %176 = vector.shape_cast %175 : vector<8xf32> to vector<8x1xf32>
    %177 = tpu.reciprocal %176 {approx = true} : vector<8x1xf32> -> vector<8x1xf32>
    %178 = vector.broadcast %177 : vector<8x1xf32> to vector<8x16xf32>
    %179 = arith.mulf %174, %178 : vector<8x16xf32>
    %cst_84 = arith.constant dense<0.000000e+00> : vector<8x8xf32>
    %180 = tpu.matmul %179, %166, %cst_84 {dimension_numbers = #tpu.dot_dimension_numbers<[1], [0], [0], [1], [0, 0, 1, 1], [], []>} : vector<8x16xf32>, vector<16x8xf32>, vector<8x8xf32> -> vector<8x8xf32>
    %181 = vector.extract_strided_slice %137 {offsets = [8, 0], sizes = [8, 32], strides = [1, 1]} : vector<32x32xf32> to vector<8x32xf32>
    %cst_85 = arith.constant dense<0.000000e+00> : vector<8x32xf32>
    %182 = tpu.matmul %180, %181, %cst_85 {dimension_numbers = #tpu.dot_dimension_numbers<[1], [0], [0], [1], [0, 0, 1, 1], [], []>} : vector<8x8xf32>, vector<8x32xf32>, vector<8x32xf32> -> vector<8x32xf32>
    %183 = arith.addf %163, %182 : vector<8x32xf32>
    %184 = vector.extract_strided_slice %125 {offsets = [0, 16], sizes = [8, 8], strides = [1, 1]} : vector<8x32xf32> to vector<8x8xf32>
    %185 = vector.extract_strided_slice %131 {offsets = [0, 16], sizes = [16, 8], strides = [1, 1]} : vector<16x32xf32> to vector<16x8xf32>
    %186 = vector.extract_strided_slice %136 {offsets = [0, 16], sizes = [16, 8], strides = [1, 1]} : vector<16x32xf32> to vector<16x8xf32>
    %cst_86 = arith.constant dense<0.000000e+00> : vector<8x16xf32>
    %187 = tpu.matmul %184, %185, %cst_86 {dimension_numbers = #tpu.dot_dimension_numbers<[1], [1], [0], [0], [0, 0, 1, 0], [], []>} : vector<8x8xf32>, vector<16x8xf32>, vector<8x16xf32> -> vector<8x16xf32>
    %188 = vector.broadcast %140 : vector<1x16xf32> to vector<8x16xf32>
    %189 = arith.addf %187, %188 : vector<8x16xf32>
    %cst_87 = arith.constant dense<0xFF800000> : vector<8xf32>
    %190 = vector.multi_reduction <maximumf>, %189, %cst_87 [1] : vector<8x16xf32> to vector<8xf32>
    %191 = vector.shape_cast %190 : vector<8xf32> to vector<8x1xf32>
    %192 = vector.broadcast %191 : vector<8x1xf32> to vector<8x16xf32>
    %193 = arith.subf %189, %192 : vector<8x16xf32>
    %194 = math.exp %193 : vector<8x16xf32>
    %cst_88 = arith.constant dense<0.000000e+00> : vector<8xf32>
    %195 = vector.multi_reduction <add>, %194, %cst_88 [1] : vector<8x16xf32> to vector<8xf32>
    %196 = vector.shape_cast %195 : vector<8xf32> to vector<8x1xf32>
    %197 = tpu.reciprocal %196 {approx = true} : vector<8x1xf32> -> vector<8x1xf32>
    %198 = vector.broadcast %197 : vector<8x1xf32> to vector<8x16xf32>
    %199 = arith.mulf %194, %198 : vector<8x16xf32>
    %cst_89 = arith.constant dense<0.000000e+00> : vector<8x8xf32>
    %200 = tpu.matmul %199, %186, %cst_89 {dimension_numbers = #tpu.dot_dimension_numbers<[1], [0], [0], [1], [0, 0, 1, 1], [], []>} : vector<8x16xf32>, vector<16x8xf32>, vector<8x8xf32> -> vector<8x8xf32>
    %201 = vector.extract_strided_slice %137 {offsets = [16, 0], sizes = [8, 32], strides = [1, 1]} : vector<32x32xf32> to vector<8x32xf32>
    %cst_90 = arith.constant dense<0.000000e+00> : vector<8x32xf32>
    %202 = tpu.matmul %200, %201, %cst_90 {dimension_numbers = #tpu.dot_dimension_numbers<[1], [0], [0], [1], [0, 0, 1, 1], [], []>} : vector<8x8xf32>, vector<8x32xf32>, vector<8x32xf32> -> vector<8x32xf32>
    %203 = arith.addf %183, %202 : vector<8x32xf32>
    %204 = vector.extract_strided_slice %125 {offsets = [0, 24], sizes = [8, 8], strides = [1, 1]} : vector<8x32xf32> to vector<8x8xf32>
    %205 = vector.extract_strided_slice %131 {offsets = [0, 24], sizes = [16, 8], strides = [1, 1]} : vector<16x32xf32> to vector<16x8xf32>
    %206 = vector.extract_strided_slice %136 {offsets = [0, 24], sizes = [16, 8], strides = [1, 1]} : vector<16x32xf32> to vector<16x8xf32>
    %cst_91 = arith.constant dense<0.000000e+00> : vector<8x16xf32>
    %207 = tpu.matmul %204, %205, %cst_91 {dimension_numbers = #tpu.dot_dimension_numbers<[1], [1], [0], [0], [0, 0, 1, 0], [], []>} : vector<8x8xf32>, vector<16x8xf32>, vector<8x16xf32> -> vector<8x16xf32>
    %208 = vector.broadcast %140 : vector<1x16xf32> to vector<8x16xf32>
    %209 = arith.addf %207, %208 : vector<8x16xf32>
    %cst_92 = arith.constant dense<0xFF800000> : vector<8xf32>
    %210 = vector.multi_reduction <maximumf>, %209, %cst_92 [1] : vector<8x16xf32> to vector<8xf32>
    %211 = vector.shape_cast %210 : vector<8xf32> to vector<8x1xf32>
    %212 = vector.broadcast %211 : vector<8x1xf32> to vector<8x16xf32>
    %213 = arith.subf %209, %212 : vector<8x16xf32>
    %214 = math.exp %213 : vector<8x16xf32>
    %cst_93 = arith.constant dense<0.000000e+00> : vector<8xf32>
    %215 = vector.multi_reduction <add>, %214, %cst_93 [1] : vector<8x16xf32> to vector<8xf32>
    %216 = vector.shape_cast %215 : vector<8xf32> to vector<8x1xf32>
    %217 = tpu.reciprocal %216 {approx = true} : vector<8x1xf32> -> vector<8x1xf32>
    %218 = vector.broadcast %217 : vector<8x1xf32> to vector<8x16xf32>
    %219 = arith.mulf %214, %218 : vector<8x16xf32>
    %cst_94 = arith.constant dense<0.000000e+00> : vector<8x8xf32>
    %220 = tpu.matmul %219, %206, %cst_94 {dimension_numbers = #tpu.dot_dimension_numbers<[1], [0], [0], [1], [0, 0, 1, 1], [], []>} : vector<8x16xf32>, vector<16x8xf32>, vector<8x8xf32> -> vector<8x8xf32>
    %221 = vector.extract_strided_slice %137 {offsets = [24, 0], sizes = [8, 32], strides = [1, 1]} : vector<32x32xf32> to vector<8x32xf32>
    %cst_95 = arith.constant dense<0.000000e+00> : vector<8x32xf32>
    %222 = tpu.matmul %220, %221, %cst_95 {dimension_numbers = #tpu.dot_dimension_numbers<[1], [0], [0], [1], [0, 0, 1, 1], [], []>} : vector<8x8xf32>, vector<8x32xf32>, vector<8x32xf32> -> vector<8x32xf32>
    %223 = arith.addf %203, %222 : vector<8x32xf32>
    %224 = arith.addf %119, %223 : vector<8x32xf32>
    %c0_96 = arith.constant 0 : index
    %c0_97 = arith.constant 0 : index
    %225 = vector.load %arg23[%c0_96, %c0_97] : memref<1x32xf32, #tpu.memory_space<vmem>>, vector<1x32xf32>
    %c0_98 = arith.constant 0 : index
    %c0_99 = arith.constant 0 : index
    %226 = vector.load %arg24[%c0_98, %c0_99] : memref<1x32xf32, #tpu.memory_space<vmem>>, vector<1x32xf32>
    %cst_100 = arith.constant dense<0.000000e+00> : vector<8xf32>
    %227 = vector.multi_reduction <add>, %224, %cst_100 [1] : vector<8x32xf32> to vector<8xf32>
    %228 = vector.shape_cast %227 : vector<8xf32> to vector<8x1xf32>
    %cst_101 = arith.constant 3.200000e+01 : f32
    %229 = vector.broadcast %cst_101 : f32 to vector<8x1xf32>
    %230 = arith.divf %228, %229 : vector<8x1xf32>
    %231 = vector.broadcast %230 : vector<8x1xf32> to vector<8x32xf32>
    %232 = arith.subf %224, %231 : vector<8x32xf32>
    %233 = arith.mulf %232, %232 : vector<8x32xf32>
    %cst_102 = arith.constant dense<0.000000e+00> : vector<8xf32>
    %234 = vector.multi_reduction <add>, %233, %cst_102 [1] : vector<8x32xf32> to vector<8xf32>
    %235 = vector.shape_cast %234 : vector<8xf32> to vector<8x1xf32>
    %cst_103 = arith.constant 3.200000e+01 : f32
    %236 = vector.broadcast %cst_103 : f32 to vector<8x1xf32>
    %237 = arith.divf %235, %236 : vector<8x1xf32>
    %cst_104 = arith.constant 9.99999974E-6 : f32
    %238 = vector.broadcast %cst_104 : f32 to vector<8x1xf32>
    %239 = arith.addf %237, %238 : vector<8x1xf32>
    %240 = math.rsqrt %239 : vector<8x1xf32>
    %241 = vector.broadcast %240 : vector<8x1xf32> to vector<8x32xf32>
    %242 = arith.mulf %232, %241 : vector<8x32xf32>
    %243 = vector.broadcast %225 : vector<1x32xf32> to vector<8x32xf32>
    %244 = arith.mulf %242, %243 : vector<8x32xf32>
    %245 = vector.broadcast %226 : vector<1x32xf32> to vector<8x32xf32>
    %246 = arith.addf %244, %245 : vector<8x32xf32>
    %c0_105 = arith.constant 0 : index
    %c0_106 = arith.constant 0 : index
    %247 = vector.load %arg25[%c0_105, %c0_106] : memref<32x64xf32, #tpu.memory_space<vmem>>, vector<32x64xf32>
    %cst_107 = arith.constant dense<0.000000e+00> : vector<8x64xf32>
    %248 = tpu.matmul %246, %247, %cst_107 {dimension_numbers = #tpu.dot_dimension_numbers<[1], [0], [0], [1], [0, 0, 1, 1], [], []>} : vector<8x32xf32>, vector<32x64xf32>, vector<8x64xf32> -> vector<8x64xf32>
    %c0_108 = arith.constant 0 : index
    %c0_109 = arith.constant 0 : index
    %249 = vector.load %arg26[%c0_108, %c0_109] : memref<1x64xf32, #tpu.memory_space<vmem>>, vector<1x64xf32>
    %250 = vector.broadcast %249 : vector<1x64xf32> to vector<8x64xf32>
    %251 = arith.addf %248, %250 : vector<8x64xf32>
    %cst_110 = arith.constant 0.000000e+00 : f32
    %252 = vector.broadcast %cst_110 : f32 to vector<8x64xf32>
    %253 = arith.maximumf %251, %252 : vector<8x64xf32>
    %c0_111 = arith.constant 0 : index
    %c0_112 = arith.constant 0 : index
    %254 = vector.load %arg27[%c0_111, %c0_112] : memref<64x32xf32, #tpu.memory_space<vmem>>, vector<64x32xf32>
    %cst_113 = arith.constant dense<0.000000e+00> : vector<8x32xf32>
    %255 = tpu.matmul %253, %254, %cst_113 {dimension_numbers = #tpu.dot_dimension_numbers<[1], [0], [0], [1], [0, 0, 1, 1], [], []>} : vector<8x64xf32>, vector<64x32xf32>, vector<8x32xf32> -> vector<8x32xf32>
    %c0_114 = arith.constant 0 : index
    %c0_115 = arith.constant 0 : index
    %256 = vector.load %arg28[%c0_114, %c0_115] : memref<1x32xf32, #tpu.memory_space<vmem>>, vector<1x32xf32>
    %257 = vector.broadcast %256 : vector<1x32xf32> to vector<8x32xf32>
    %258 = arith.addf %255, %257 : vector<8x32xf32>
    %259 = arith.addf %246, %258 : vector<8x32xf32>
    %c0_116 = arith.constant 0 : index
    %c0_117 = arith.constant 0 : index
    %260 = vector.load %arg29[%c0_116, %c0_117] : memref<1x32xf32, #tpu.memory_space<vmem>>, vector<1x32xf32>
    %c0_118 = arith.constant 0 : index
    %c0_119 = arith.constant 0 : index
    %261 = vector.load %arg30[%c0_118, %c0_119] : memref<1x32xf32, #tpu.memory_space<vmem>>, vector<1x32xf32>
    %cst_120 = arith.constant dense<0.000000e+00> : vector<8xf32>
    %262 = vector.multi_reduction <add>, %259, %cst_120 [1] : vector<8x32xf32> to vector<8xf32>
    %263 = vector.shape_cast %262 : vector<8xf32> to vector<8x1xf32>
    %cst_121 = arith.constant 3.200000e+01 : f32
    %264 = vector.broadcast %cst_121 : f32 to vector<8x1xf32>
    %265 = arith.divf %263, %264 : vector<8x1xf32>
    %266 = vector.broadcast %265 : vector<8x1xf32> to vector<8x32xf32>
    %267 = arith.subf %259, %266 : vector<8x32xf32>
    %268 = arith.mulf %267, %267 : vector<8x32xf32>
    %cst_122 = arith.constant dense<0.000000e+00> : vector<8xf32>
    %269 = vector.multi_reduction <add>, %268, %cst_122 [1] : vector<8x32xf32> to vector<8xf32>
    %270 = vector.shape_cast %269 : vector<8xf32> to vector<8x1xf32>
    %cst_123 = arith.constant 3.200000e+01 : f32
    %271 = vector.broadcast %cst_123 : f32 to vector<8x1xf32>
    %272 = arith.divf %270, %271 : vector<8x1xf32>
    %cst_124 = arith.constant 9.99999974E-6 : f32
    %273 = vector.broadcast %cst_124 : f32 to vector<8x1xf32>
    %274 = arith.addf %272, %273 : vector<8x1xf32>
    %275 = math.rsqrt %274 : vector<8x1xf32>
    %276 = vector.broadcast %275 : vector<8x1xf32> to vector<8x32xf32>
    %277 = arith.mulf %267, %276 : vector<8x32xf32>
    %278 = vector.broadcast %260 : vector<1x32xf32> to vector<8x32xf32>
    %279 = arith.mulf %277, %278 : vector<8x32xf32>
    %280 = vector.broadcast %261 : vector<1x32xf32> to vector<8x32xf32>
    %281 = arith.addf %279, %280 : vector<8x32xf32>
    %c0_125 = arith.constant 0 : index
    %c0_126 = arith.constant 0 : index
    %c0_127 = arith.constant 0 : index
    %282 = vector.load %arg31[%c0_125, %c0_126, %c0_127] : memref<1x8x32xf32, #tpu.memory_space<vmem>>, vector<1x8x32xf32>
    %283 = vector.shape_cast %282 : vector<1x8x32xf32> to vector<8x32xf32>
    %284 = vector.shape_cast %281 : vector<8x32xf32> to vector<1x8x32xf32>
    tpu.vector_store %arg31[%c0_125, %c0_126, %c0_127], %284 {strides = array<i32>} : memref<1x8x32xf32, #tpu.memory_space<vmem>>, vector<1x8x32xf32>,
    return
  }
  func.func @transform_0(%arg0: i32) -> (i32, i32, i32) {
    %c0_i32 = arith.constant 0 : i32
    %c0_i32_0 = arith.constant 0 : i32
    %c0_i32_1 = arith.constant 0 : i32
    return %arg0, %c0_i32, %c0_i32_0 : i32, i32, i32
  }
  func.func @transform_1(%arg0: i32) -> (i32, i32) {
    %c0_i32 = arith.constant 0 : i32
    %c0_i32_0 = arith.constant 0 : i32
    %c0_i32_1 = arith.constant 0 : i32
    return %c0_i32, %c0_i32_0 : i32, i32
  }
  func.func @transform_2(%arg0: i32) -> (i32, i32, i32) {
    %c0_i32 = arith.constant 0 : i32
    %c0_i32_0 = arith.constant 0 : i32
    %c0_i32_1 = arith.constant 0 : i32
    return %arg0, %c0_i32, %c0_i32_0 : i32, i32, i32
  }
  func.func @transform_3(%arg0: i32) -> (i32, i32, i32) {
    %c0_i32 = arith.constant 0 : i32
    %c0_i32_0 = arith.constant 0 : i32
    %c0_i32_1 = arith.constant 0 : i32
    return %arg0, %c0_i32, %c0_i32_0 : i32, i32, i32
  }
  func.func @transform_4(%arg0: i32) -> (i32, i32, i32) {
    %c0_i32 = arith.constant 0 : i32
    %c0_i32_0 = arith.constant 0 : i32
    %c0_i32_1 = arith.constant 0 : i32
    return %arg0, %c0_i32, %c0_i32_0 : i32, i32, i32
  }
  func.func @transform_5(%arg0: i32) -> (i32, i32) {
    %c0_i32 = arith.constant 0 : i32
    %c0_i32_0 = arith.constant 0 : i32
    %c0_i32_1 = arith.constant 0 : i32
    return %c0_i32, %c0_i32_0 : i32, i32
  }
  func.func @transform_6(%arg0: i32) -> (i32, i32) {
    %c0_i32 = arith.constant 0 : i32
    %c0_i32_0 = arith.constant 0 : i32
    %c0_i32_1 = arith.constant 0 : i32
    return %c0_i32, %c0_i32_0 : i32, i32
  }
  func.func @transform_7(%arg0: i32) -> (i32, i32) {
    %c0_i32 = arith.constant 0 : i32
    %c0_i32_0 = arith.constant 0 : i32
    %c0_i32_1 = arith.constant 0 : i32
    return %c0_i32, %c0_i32_0 : i32, i32
  }
  func.func @transform_8(%arg0: i32) -> (i32, i32) {
    %c0_i32 = arith.constant 0 : i32
    %c0_i32_0 = arith.constant 0 : i32
    %c0_i32_1 = arith.constant 0 : i32
    return %c0_i32, %c0_i32_0 : i32, i32
  }
  func.func @transform_9(%arg0: i32) -> (i32, i32) {
    %c0_i32 = arith.constant 0 : i32
    %c0_i32_0 = arith.constant 0 : i32
    %c0_i32_1 = arith.constant 0 : i32
    return %c0_i32, %c0_i32_0 : i32, i32
  }
  func.func @transform_10(%arg0: i32) -> (i32, i32) {
    %c0_i32 = arith.constant 0 : i32
    %c0_i32_0 = arith.constant 0 : i32
    %c0_i32_1 = arith.constant 0 : i32
    return %c0_i32, %c0_i32_0 : i32, i32
  }
  func.func @transform_11(%arg0: i32) -> (i32, i32) {
    %c0_i32 = arith.constant 0 : i32
    %c0_i32_0 = arith.constant 0 : i32
    %c0_i32_1 = arith.constant 0 : i32
    return %c0_i32, %c0_i32_0 : i32, i32
  }
  func.func @transform_12(%arg0: i32) -> (i32, i32) {
    %c0_i32 = arith.constant 0 : i32
    %c0_i32_0 = arith.constant 0 : i32
    %c0_i32_1 = arith.constant 0 : i32
    return %c0_i32, %c0_i32_0 : i32, i32
  }
  func.func @transform_13(%arg0: i32) -> (i32, i32) {
    %c0_i32 = arith.constant 0 : i32
    %c0_i32_0 = arith.constant 0 : i32
    %c0_i32_1 = arith.constant 0 : i32
    return %c0_i32, %c0_i32_0 : i32, i32
  }
  func.func @transform_14(%arg0: i32) -> (i32, i32) {
    %c0_i32 = arith.constant 0 : i32
    %c0_i32_0 = arith.constant 0 : i32
    %c0_i32_1 = arith.constant 0 : i32
    return %c0_i32, %c0_i32_0 : i32, i32
  }
  func.func @transform_15(%arg0: i32) -> (i32, i32) {
    %c0_i32 = arith.constant 0 : i32
    %c0_i32_0 = arith.constant 0 : i32
    %c0_i32_1 = arith.constant 0 : i32
    return %c0_i32, %c0_i32_0 : i32, i32
  }
  func.func @transform_16(%arg0: i32) -> (i32, i32) {
    %c0_i32 = arith.constant 0 : i32
    %c0_i32_0 = arith.constant 0 : i32
    %c0_i32_1 = arith.constant 0 : i32
    return %c0_i32, %c0_i32_0 : i32, i32
  }
  func.func @transform_17(%arg0: i32) -> (i32, i32) {
    %c0_i32 = arith.constant 0 : i32
    %c0_i32_0 = arith.constant 0 : i32
    %c0_i32_1 = arith.constant 0 : i32
    return %c0_i32, %c0_i32_0 : i32, i32
  }
  func.func @transform_18(%arg0: i32) -> (i32, i32) {
    %c0_i32 = arith.constant 0 : i32
    %c0_i32_0 = arith.constant 0 : i32
    %c0_i32_1 = arith.constant 0 : i32
    return %c0_i32, %c0_i32_0 : i32, i32
  }
  func.func @transform_19(%arg0: i32) -> (i32, i32) {
    %c0_i32 = arith.constant 0 : i32
    %c0_i32_0 = arith.constant 0 : i32
    %c0_i32_1 = arith.constant 0 : i32
    return %c0_i32, %c0_i32_0 : i32, i32
  }
  func.func @transform_20(%arg0: i32) -> (i32, i32) {
    %c0_i32 = arith.constant 0 : i32
    %c0_i32_0 = arith.constant 0 : i32
    %c0_i32_1 = arith.constant 0 : i32
    return %c0_i32, %c0_i32_0 : i32, i32
  }
  func.func @transform_21(%arg0: i32) -> (i32, i32) {
    %c0_i32 = arith.constant 0 : i32
    %c0_i32_0 = arith.constant 0 : i32
    %c0_i32_1 = arith.constant 0 : i32
    return %c0_i32, %c0_i32_0 : i32, i32
  }
  func.func @transform_22(%arg0: i32) -> (i32, i32) {
    %c0_i32 = arith.constant 0 : i32
    %c0_i32_0 = arith.constant 0 : i32
    %c0_i32_1 = arith.constant 0 : i32
    return %c0_i32, %c0_i32_0 : i32, i32
  }
  func.func @transform_23(%arg0: i32) -> (i32, i32) {
    %c0_i32 = arith.constant 0 : i32
    %c0_i32_0 = arith.constant 0 : i32
    %c0_i32_1 = arith.constant 0 : i32
    return %c0_i32, %c0_i32_0 : i32, i32
  }
  func.func @transform_24(%arg0: i32) -> (i32, i32) {
    %c0_i32 = arith.constant 0 : i32
    %c0_i32_0 = arith.constant 0 : i32
    %c0_i32_1 = arith.constant 0 : i32
    return %c0_i32, %c0_i32_0 : i32, i32
  }
  func.func @transform_25(%arg0: i32) -> (i32, i32) {
    %c0_i32 = arith.constant 0 : i32
    %c0_i32_0 = arith.constant 0 : i32
    %c0_i32_1 = arith.constant 0 : i32
    return %c0_i32, %c0_i32_0 : i32, i32
  }
  func.func @transform_26(%arg0: i32) -> (i32, i32) {
    %c0_i32 = arith.constant 0 : i32
    %c0_i32_0 = arith.constant 0 : i32
    %c0_i32_1 = arith.constant 0 : i32
    return %c0_i32, %c0_i32_0 : i32, i32
  }
  func.func @transform_27(%arg0: i32) -> (i32, i32) {
    %c0_i32 = arith.constant 0 : i32
    %c0_i32_0 = arith.constant 0 : i32
    %c0_i32_1 = arith.constant 0 : i32
    return %c0_i32, %c0_i32_0 : i32, i32
  }
  func.func @transform_28(%arg0: i32) -> (i32, i32) {
    %c0_i32 = arith.constant 0 : i32
    %c0_i32_0 = arith.constant 0 : i32
    %c0_i32_1 = arith.constant 0 : i32
    return %c0_i32, %c0_i32_0 : i32, i32
  }
  func.func @transform_29(%arg0: i32) -> (i32, i32) {
    %c0_i32 = arith.constant 0 : i32
    %c0_i32_0 = arith.constant 0 : i32
    %c0_i32_1 = arith.constant 0 : i32
    return %c0_i32, %c0_i32_0 : i32, i32
  }
  func.func @transform_30(%arg0: i32) -> (i32, i32, i32) {
    %c0_i32 = arith.constant 0 : i32
    %c0_i32_0 = arith.constant 0 : i32
    %c0_i32_1 = arith.constant 0 : i32
    return %arg0, %c0_i32, %c0_i32_0 : i32, i32, i32
  }
}

module attributes {stable_mosaic.version = 11 : i64} {
  func.func @kernel(%arg0: i32, %arg1: memref<1x8x32xf32, #tpu.memory_space<vmem>>, %arg2: memref<8x32xf32, #tpu.memory_space<vmem>>, %arg3: memref<1x16x32xf32, #tpu.memory_space<vmem>>, %arg4: memref<1x16x32xf32, #tpu.memory_space<vmem>>, %arg5: memref<1x1x16xf32, #tpu.memory_space<vmem>>, %arg6: memref<32x64xf32, #tpu.memory_space<vmem>>, %arg7: memref<1x64xf32, #tpu.memory_space<vmem>>, %arg8: memref<32x32xf32, #tpu.memory_space<vmem>>, %arg9: memref<1x32xf32, #tpu.memory_space<vmem>>, %arg10: memref<32x32xf32, #tpu.memory_space<vmem>>, %arg11: memref<1x32xf32, #tpu.memory_space<vmem>>, %arg12: memref<1x32xf32, #tpu.memory_space<vmem>>, %arg13: memref<1x32xf32, #tpu.memory_space<vmem>>, %arg14: memref<32x32xf32, #tpu.memory_space<vmem>>, %arg15: memref<1x32xf32, #tpu.memory_space<vmem>>, %arg16: memref<32x32xf32, #tpu.memory_space<vmem>>, %arg17: memref<1x32xf32, #tpu.memory_space<vmem>>, %arg18: memref<32x32xf32, #tpu.memory_space<vmem>>, %arg19: memref<1x32xf32, #tpu.memory_space<vmem>>, %arg20: memref<32x32xf32, #tpu.memory_space<vmem>>, %arg21: memref<1x32xf32, #tpu.memory_space<vmem>>, %arg22: memref<32x32xf32, #tpu.memory_space<vmem>>, %arg23: memref<1x32xf32, #tpu.memory_space<vmem>>, %arg24: memref<1x32xf32, #tpu.memory_space<vmem>>, %arg25: memref<32x64xf32, #tpu.memory_space<vmem>>, %arg26: memref<1x64xf32, #tpu.memory_space<vmem>>, %arg27: memref<64x32xf32, #tpu.memory_space<vmem>>, %arg28: memref<1x32xf32, #tpu.memory_space<vmem>>, %arg29: memref<1x32xf32, #tpu.memory_space<vmem>>, %arg30: memref<1x32xf32, #tpu.memory_space<vmem>>, %arg31: memref<1x8x32xf32, #tpu.memory_space<vmem>>, %arg32: memref<1x8x32x16xf32, #tpu.memory_space<vmem>>) attributes {dimension_semantics = [#tpu.dimension_semantics<parallel>], iteration_bounds = array<i64: 2>, scalar_prefetch = 0 : i64, scratch_operands = 0 : i64, tpu.core_type = #tpu.core_type<tc>, window_params = [{transform_indices = @transform_0, window_bounds = array<i64: 1, 8, 32>}, {pipeline_mode = #tpu.pipeline_mode<synchronous>, transform_indices = @transform_1, window_bounds = array<i64: 8, 32>}, {transform_indices = @transform_2, window_bounds = array<i64: 1, 16, 32>}, {transform_indices = @transform_3, window_bounds = array<i64: 1, 16, 32>}, {transform_indices = @transform_4, window_bounds = array<i64: 1, 1, 16>}, {pipeline_mode = #tpu.pipeline_mode<synchronous>, transform_indices = @transform_5, window_bounds = array<i64: 32, 64>}, {pipeline_mode = #tpu.pipeline_mode<synchronous>, transform_indices = @transform_6, window_bounds = array<i64: 1, 64>}, {pipeline_mode = #tpu.pipeline_mode<synchronous>, transform_indices = @transform_7, window_bounds = array<i64: 32, 32>}, {pipeline_mode = #tpu.pipeline_mode<synchronous>, transform_indices = @transform_8, window_bounds = array<i64: 1, 32>}, {pipeline_mode = #tpu.pipeline_mode<synchronous>, transform_indices = @transform_9, window_bounds = array<i64: 32, 32>}, {pipeline_mode = #tpu.pipeline_mode<synchronous>, transform_indices = @transform_10, window_bounds = array<i64: 1, 32>}, {pipeline_mode = #tpu.pipeline_mode<synchronous>, transform_indices = @transform_11, window_bounds = array<i64: 1, 32>}, {pipeline_mode = #tpu.pipeline_mode<synchronous>, transform_indices = @transform_12, window_bounds = array<i64: 1, 32>}, {pipeline_mode = #tpu.pipeline_mode<synchronous>, transform_indices = @transform_13, window_bounds = array<i64: 32, 32>}, {pipeline_mode = #tpu.pipeline_mode<synchronous>, transform_indices = @transform_14, window_bounds = array<i64: 1, 32>}, {pipeline_mode = #tpu.pipeline_mode<synchronous>, transform_indices = @transform_15, window_bounds = array<i64: 32, 32>}, {pipeline_mode = #tpu.pipeline_mode<synchronous>, transform_indices = @transform_16, window_bounds = array<i64: 1, 32>}, {pipeline_mode = #tpu.pipeline_mode<synchronous>, transform_indices = @transform_17, window_bounds = array<i64: 32, 32>}, {pipeline_mode = #tpu.pipeline_mode<synchronous>, transform_indices = @transform_18, window_bounds = array<i64: 1, 32>}, {pipeline_mode = #tpu.pipeline_mode<synchronous>, transform_indices = @transform_19, window_bounds = array<i64: 32, 32>}, {pipeline_mode = #tpu.pipeline_mode<synchronous>, transform_indices = @transform_20, window_bounds = array<i64: 1, 32>}, {pipeline_mode = #tpu.pipeline_mode<synchronous>, transform_indices = @transform_21, window_bounds = array<i64: 32, 32>}, {pipeline_mode = #tpu.pipeline_mode<synchronous>, transform_indices = @transform_22, window_bounds = array<i64: 1, 32>}, {pipeline_mode = #tpu.pipeline_mode<synchronous>, transform_indices = @transform_23, window_bounds = array<i64: 1, 32>}, {pipeline_mode = #tpu.pipeline_mode<synchronous>, transform_indices = @transform_24, window_bounds = array<i64: 32, 64>}, {pipeline_mode = #tpu.pipeline_mode<synchronous>, transform_indices = @transform_25, window_bounds = array<i64: 1, 64>}, {pipeline_mode = #tpu.pipeline_mode<synchronous>, transform_indices = @transform_26, window_bounds = array<i64: 64, 32>}, {pipeline_mode = #tpu.pipeline_mode<synchronous>, transform_indices = @transform_27, window_bounds = array<i64: 1, 32>}, {pipeline_mode = #tpu.pipeline_mode<synchronous>, transform_indices = @transform_28, window_bounds = array<i64: 1, 32>}, {pipeline_mode = #tpu.pipeline_mode<synchronous>, transform_indices = @transform_29, window_bounds = array<i64: 1, 32>}, {transform_indices = @transform_30, window_bounds = array<i64: 1, 8, 32>}, {transform_indices = @transform_31, window_bounds = array<i64: 1, 8, 32, 16>}]} {
    %c0 = arith.constant 0 : index
    %c0_0 = arith.constant 0 : index
    %c0_1 = arith.constant 0 : index
    %0 = vector.load %arg1[%c0, %c0_0, %c0_1] : memref<1x8x32xf32, #tpu.memory_space<vmem>>, vector<1x8x32xf32>
    %1 = vector.shape_cast %0 : vector<1x8x32xf32> to vector<8x32xf32>
    %c0_2 = arith.constant 0 : index
    %c0_3 = arith.constant 0 : index
    %2 = vector.load %arg2[%c0_2, %c0_3] : memref<8x32xf32, #tpu.memory_space<vmem>>, vector<8x32xf32>
    %c0_4 = arith.constant 0 : index
    %c0_5 = arith.constant 0 : index
    %c0_6 = arith.constant 0 : index
    %3 = vector.load %arg3[%c0_4, %c0_5, %c0_6] : memref<1x16x32xf32, #tpu.memory_space<vmem>>, vector<1x16x32xf32>
    %4 = vector.shape_cast %3 : vector<1x16x32xf32> to vector<16x32xf32>
    %c0_7 = arith.constant 0 : index
    %c0_8 = arith.constant 0 : index
    %c0_9 = arith.constant 0 : index
    %5 = vector.load %arg4[%c0_7, %c0_8, %c0_9] : memref<1x16x32xf32, #tpu.memory_space<vmem>>, vector<1x16x32xf32>
    %6 = vector.shape_cast %5 : vector<1x16x32xf32> to vector<16x32xf32>
    %7 = arith.addf %1, %2 : vector<8x32xf32>
    %c0_10 = arith.constant 0 : index
    %c0_11 = arith.constant 0 : index
    %8 = vector.load %arg6[%c0_10, %c0_11] : memref<32x64xf32, #tpu.memory_space<vmem>>, vector<32x64xf32>
    %cst = arith.constant dense<0.000000e+00> : vector<8x64xf32>
    %9 = tpu.matmul %7, %8, %cst {dimension_numbers = #tpu.dot_dimension_numbers<[1], [0], [0], [1], [0, 0, 1, 1], [], []>} : vector<8x32xf32>, vector<32x64xf32>, vector<8x64xf32> -> vector<8x64xf32>
    %c0_12 = arith.constant 0 : index
    %c0_13 = arith.constant 0 : index
    %10 = vector.load %arg7[%c0_12, %c0_13] : memref<1x64xf32, #tpu.memory_space<vmem>>, vector<1x64xf32>
    %11 = vector.broadcast %10 : vector<1x64xf32> to vector<8x64xf32>
    %12 = arith.addf %9, %11 : vector<8x64xf32>
    %c0_14 = arith.constant 0 : index
    %c0_15 = arith.constant 0 : index
    %13 = vector.load %arg8[%c0_14, %c0_15] : memref<32x32xf32, #tpu.memory_space<vmem>>, vector<32x32xf32>
    %cst_16 = arith.constant dense<0.000000e+00> : vector<8x32xf32>
    %14 = tpu.matmul %1, %13, %cst_16 {dimension_numbers = #tpu.dot_dimension_numbers<[1], [0], [0], [1], [0, 0, 1, 1], [], []>} : vector<8x32xf32>, vector<32x32xf32>, vector<8x32xf32> -> vector<8x32xf32>
    %c0_17 = arith.constant 0 : index
    %c0_18 = arith.constant 0 : index
    %15 = vector.load %arg9[%c0_17, %c0_18] : memref<1x32xf32, #tpu.memory_space<vmem>>, vector<1x32xf32>
    %16 = vector.broadcast %15 : vector<1x32xf32> to vector<8x32xf32>
    %17 = arith.addf %14, %16 : vector<8x32xf32>
    %18 = vector.extract_strided_slice %12 {offsets = [0, 0], sizes = [8, 32], strides = [1, 1]} : vector<8x64xf32> to vector<8x32xf32>
    %19 = vector.extract_strided_slice %12 {offsets = [0, 32], sizes = [8, 32], strides = [1, 1]} : vector<8x64xf32> to vector<8x32xf32>
    %c0_19 = arith.constant 0 : index
    %c0_20 = arith.constant 0 : index
    %20 = vector.load %arg10[%c0_19, %c0_20] : memref<32x32xf32, #tpu.memory_space<vmem>>, vector<32x32xf32>
    %c0_21 = arith.constant 0 : index
    %c0_22 = arith.constant 0 : index
    %21 = vector.load %arg11[%c0_21, %c0_22] : memref<1x32xf32, #tpu.memory_space<vmem>>, vector<1x32xf32>
    %cst_23 = arith.constant 0.000000e+00 : f32
    %22 = vector.broadcast %cst_23 : f32 to vector<8x32xf32>
    %23 = vector.broadcast %21 : vector<1x32xf32> to vector<8x32xf32>
    %24 = arith.addf %22, %23 : vector<8x32xf32>
    %25 = vector.extract_strided_slice %18 {offsets = [0, 0], sizes = [8, 8], strides = [1, 1]} : vector<8x32xf32> to vector<8x8xf32>
    %26 = vector.extract_strided_slice %19 {offsets = [0, 0], sizes = [8, 8], strides = [1, 1]} : vector<8x32xf32> to vector<8x8xf32>
    %27 = vector.extract_strided_slice %17 {offsets = [0, 0], sizes = [8, 8], strides = [1, 1]} : vector<8x32xf32> to vector<8x8xf32>
    %cst_24 = arith.constant dense<0.000000e+00> : vector<8x8xf32>
    %28 = tpu.matmul %25, %26, %cst_24 {dimension_numbers = #tpu.dot_dimension_numbers<[1], [1], [0], [0], [0, 0, 1, 0], [], []>} : vector<8x8xf32>, vector<8x8xf32>, vector<8x8xf32> -> vector<8x8xf32>
    %cst_25 = arith.constant dense<0xFF800000> : vector<8xf32>
    %29 = vector.multi_reduction <maximumf>, %28, %cst_25 [1] : vector<8x8xf32> to vector<8xf32>
    %30 = vector.shape_cast %29 : vector<8xf32> to vector<8x1xf32>
    %31 = vector.broadcast %30 : vector<8x1xf32> to vector<8x8xf32>
    %32 = arith.subf %28, %31 : vector<8x8xf32>
    %33 = math.exp %32 : vector<8x8xf32>
    %cst_26 = arith.constant dense<0.000000e+00> : vector<8xf32>
    %34 = vector.multi_reduction <add>, %33, %cst_26 [1] : vector<8x8xf32> to vector<8xf32>
    %35 = vector.shape_cast %34 : vector<8xf32> to vector<8x1xf32>
    %36 = tpu.reciprocal %35 {approx = true} : vector<8x1xf32> -> vector<8x1xf32>
    %37 = vector.broadcast %36 : vector<8x1xf32> to vector<8x8xf32>
    %38 = arith.mulf %33, %37 : vector<8x8xf32>
    %cst_27 = arith.constant dense<0.000000e+00> : vector<8x8xf32>
    %39 = tpu.matmul %38, %27, %cst_27 {dimension_numbers = #tpu.dot_dimension_numbers<[1], [0], [0], [1], [0, 0, 1, 1], [], []>} : vector<8x8xf32>, vector<8x8xf32>, vector<8x8xf32> -> vector<8x8xf32>
    %40 = vector.extract_strided_slice %20 {offsets = [0, 0], sizes = [8, 32], strides = [1, 1]} : vector<32x32xf32> to vector<8x32xf32>
    %cst_28 = arith.constant dense<0.000000e+00> : vector<8x32xf32>
    %41 = tpu.matmul %39, %40, %cst_28 {dimension_numbers = #tpu.dot_dimension_numbers<[1], [0], [0], [1], [0, 0, 1, 1], [], []>} : vector<8x8xf32>, vector<8x32xf32>, vector<8x32xf32> -> vector<8x32xf32>
    %42 = arith.addf %24, %41 : vector<8x32xf32>
    %43 = vector.extract_strided_slice %18 {offsets = [0, 8], sizes = [8, 8], strides = [1, 1]} : vector<8x32xf32> to vector<8x8xf32>
    %44 = vector.extract_strided_slice %19 {offsets = [0, 8], sizes = [8, 8], strides = [1, 1]} : vector<8x32xf32> to vector<8x8xf32>
    %45 = vector.extract_strided_slice %17 {offsets = [0, 8], sizes = [8, 8], strides = [1, 1]} : vector<8x32xf32> to vector<8x8xf32>
    %cst_29 = arith.constant dense<0.000000e+00> : vector<8x8xf32>
    %46 = tpu.matmul %43, %44, %cst_29 {dimension_numbers = #tpu.dot_dimension_numbers<[1], [1], [0], [0], [0, 0, 1, 0], [], []>} : vector<8x8xf32>, vector<8x8xf32>, vector<8x8xf32> -> vector<8x8xf32>
    %cst_30 = arith.constant dense<0xFF800000> : vector<8xf32>
    %47 = vector.multi_reduction <maximumf>, %46, %cst_30 [1] : vector<8x8xf32> to vector<8xf32>
    %48 = vector.shape_cast %47 : vector<8xf32> to vector<8x1xf32>
    %49 = vector.broadcast %48 : vector<8x1xf32> to vector<8x8xf32>
    %50 = arith.subf %46, %49 : vector<8x8xf32>
    %51 = math.exp %50 : vector<8x8xf32>
    %cst_31 = arith.constant dense<0.000000e+00> : vector<8xf32>
    %52 = vector.multi_reduction <add>, %51, %cst_31 [1] : vector<8x8xf32> to vector<8xf32>
    %53 = vector.shape_cast %52 : vector<8xf32> to vector<8x1xf32>
    %54 = tpu.reciprocal %53 {approx = true} : vector<8x1xf32> -> vector<8x1xf32>
    %55 = vector.broadcast %54 : vector<8x1xf32> to vector<8x8xf32>
    %56 = arith.mulf %51, %55 : vector<8x8xf32>
    %cst_32 = arith.constant dense<0.000000e+00> : vector<8x8xf32>
    %57 = tpu.matmul %56, %45, %cst_32 {dimension_numbers = #tpu.dot_dimension_numbers<[1], [0], [0], [1], [0, 0, 1, 1], [], []>} : vector<8x8xf32>, vector<8x8xf32>, vector<8x8xf32> -> vector<8x8xf32>
    %58 = vector.extract_strided_slice %20 {offsets = [8, 0], sizes = [8, 32], strides = [1, 1]} : vector<32x32xf32> to vector<8x32xf32>
    %cst_33 = arith.constant dense<0.000000e+00> : vector<8x32xf32>
    %59 = tpu.matmul %57, %58, %cst_33 {dimension_numbers = #tpu.dot_dimension_numbers<[1], [0], [0], [1], [0, 0, 1, 1], [], []>} : vector<8x8xf32>, vector<8x32xf32>, vector<8x32xf32> -> vector<8x32xf32>
    %60 = arith.addf %42, %59 : vector<8x32xf32>
    %61 = vector.extract_strided_slice %18 {offsets = [0, 16], sizes = [8, 8], strides = [1, 1]} : vector<8x32xf32> to vector<8x8xf32>
    %62 = vector.extract_strided_slice %19 {offsets = [0, 16], sizes = [8, 8], strides = [1, 1]} : vector<8x32xf32> to vector<8x8xf32>
    %63 = vector.extract_strided_slice %17 {offsets = [0, 16], sizes = [8, 8], strides = [1, 1]} : vector<8x32xf32> to vector<8x8xf32>
    %cst_34 = arith.constant dense<0.000000e+00> : vector<8x8xf32>
    %64 = tpu.matmul %61, %62, %cst_34 {dimension_numbers = #tpu.dot_dimension_numbers<[1], [1], [0], [0], [0, 0, 1, 0], [], []>} : vector<8x8xf32>, vector<8x8xf32>, vector<8x8xf32> -> vector<8x8xf32>
    %cst_35 = arith.constant dense<0xFF800000> : vector<8xf32>
    %65 = vector.multi_reduction <maximumf>, %64, %cst_35 [1] : vector<8x8xf32> to vector<8xf32>
    %66 = vector.shape_cast %65 : vector<8xf32> to vector<8x1xf32>
    %67 = vector.broadcast %66 : vector<8x1xf32> to vector<8x8xf32>
    %68 = arith.subf %64, %67 : vector<8x8xf32>
    %69 = math.exp %68 : vector<8x8xf32>
    %cst_36 = arith.constant dense<0.000000e+00> : vector<8xf32>
    %70 = vector.multi_reduction <add>, %69, %cst_36 [1] : vector<8x8xf32> to vector<8xf32>
    %71 = vector.shape_cast %70 : vector<8xf32> to vector<8x1xf32>
    %72 = tpu.reciprocal %71 {approx = true} : vector<8x1xf32> -> vector<8x1xf32>
    %73 = vector.broadcast %72 : vector<8x1xf32> to vector<8x8xf32>
    %74 = arith.mulf %69, %73 : vector<8x8xf32>
    %cst_37 = arith.constant dense<0.000000e+00> : vector<8x8xf32>
    %75 = tpu.matmul %74, %63, %cst_37 {dimension_numbers = #tpu.dot_dimension_numbers<[1], [0], [0], [1], [0, 0, 1, 1], [], []>} : vector<8x8xf32>, vector<8x8xf32>, vector<8x8xf32> -> vector<8x8xf32>
    %76 = vector.extract_strided_slice %20 {offsets = [16, 0], sizes = [8, 32], strides = [1, 1]} : vector<32x32xf32> to vector<8x32xf32>
    %cst_38 = arith.constant dense<0.000000e+00> : vector<8x32xf32>
    %77 = tpu.matmul %75, %76, %cst_38 {dimension_numbers = #tpu.dot_dimension_numbers<[1], [0], [0], [1], [0, 0, 1, 1], [], []>} : vector<8x8xf32>, vector<8x32xf32>, vector<8x32xf32> -> vector<8x32xf32>
    %78 = arith.addf %60, %77 : vector<8x32xf32>
    %79 = vector.extract_strided_slice %18 {offsets = [0, 24], sizes = [8, 8], strides = [1, 1]} : vector<8x32xf32> to vector<8x8xf32>
    %80 = vector.extract_strided_slice %19 {offsets = [0, 24], sizes = [8, 8], strides = [1, 1]} : vector<8x32xf32> to vector<8x8xf32>
    %81 = vector.extract_strided_slice %17 {offsets = [0, 24], sizes = [8, 8], strides = [1, 1]} : vector<8x32xf32> to vector<8x8xf32>
    %cst_39 = arith.constant dense<0.000000e+00> : vector<8x8xf32>
    %82 = tpu.matmul %79, %80, %cst_39 {dimension_numbers = #tpu.dot_dimension_numbers<[1], [1], [0], [0], [0, 0, 1, 0], [], []>} : vector<8x8xf32>, vector<8x8xf32>, vector<8x8xf32> -> vector<8x8xf32>
    %cst_40 = arith.constant dense<0xFF800000> : vector<8xf32>
    %83 = vector.multi_reduction <maximumf>, %82, %cst_40 [1] : vector<8x8xf32> to vector<8xf32>
    %84 = vector.shape_cast %83 : vector<8xf32> to vector<8x1xf32>
    %85 = vector.broadcast %84 : vector<8x1xf32> to vector<8x8xf32>
    %86 = arith.subf %82, %85 : vector<8x8xf32>
    %87 = math.exp %86 : vector<8x8xf32>
    %cst_41 = arith.constant dense<0.000000e+00> : vector<8xf32>
    %88 = vector.multi_reduction <add>, %87, %cst_41 [1] : vector<8x8xf32> to vector<8xf32>
    %89 = vector.shape_cast %88 : vector<8xf32> to vector<8x1xf32>
    %90 = tpu.reciprocal %89 {approx = true} : vector<8x1xf32> -> vector<8x1xf32>
    %91 = vector.broadcast %90 : vector<8x1xf32> to vector<8x8xf32>
    %92 = arith.mulf %87, %91 : vector<8x8xf32>
    %cst_42 = arith.constant dense<0.000000e+00> : vector<8x8xf32>
    %93 = tpu.matmul %92, %81, %cst_42 {dimension_numbers = #tpu.dot_dimension_numbers<[1], [0], [0], [1], [0, 0, 1, 1], [], []>} : vector<8x8xf32>, vector<8x8xf32>, vector<8x8xf32> -> vector<8x8xf32>
    %94 = vector.extract_strided_slice %20 {offsets = [24, 0], sizes = [8, 32], strides = [1, 1]} : vector<32x32xf32> to vector<8x32xf32>
    %cst_43 = arith.constant dense<0.000000e+00> : vector<8x32xf32>
    %95 = tpu.matmul %93, %94, %cst_43 {dimension_numbers = #tpu.dot_dimension_numbers<[1], [0], [0], [1], [0, 0, 1, 1], [], []>} : vector<8x8xf32>, vector<8x32xf32>, vector<8x32xf32> -> vector<8x32xf32>
    %96 = arith.addf %78, %95 : vector<8x32xf32>
    %97 = arith.addf %1, %96 : vector<8x32xf32>
    %c0_44 = arith.constant 0 : index
    %c0_45 = arith.constant 0 : index
    %98 = vector.load %arg12[%c0_44, %c0_45] : memref<1x32xf32, #tpu.memory_space<vmem>>, vector<1x32xf32>
    %c0_46 = arith.constant 0 : index
    %c0_47 = arith.constant 0 : index
    %99 = vector.load %arg13[%c0_46, %c0_47] : memref<1x32xf32, #tpu.memory_space<vmem>>, vector<1x32xf32>
    %cst_48 = arith.constant dense<0.000000e+00> : vector<8xf32>
    %100 = vector.multi_reduction <add>, %97, %cst_48 [1] : vector<8x32xf32> to vector<8xf32>
    %101 = vector.shape_cast %100 : vector<8xf32> to vector<8x1xf32>
    %cst_49 = arith.constant 3.200000e+01 : f32
    %102 = vector.broadcast %cst_49 : f32 to vector<8x1xf32>
    %103 = arith.divf %101, %102 : vector<8x1xf32>
    %104 = vector.broadcast %103 : vector<8x1xf32> to vector<8x32xf32>
    %105 = arith.subf %97, %104 : vector<8x32xf32>
    %106 = arith.mulf %105, %105 : vector<8x32xf32>
    %cst_50 = arith.constant dense<0.000000e+00> : vector<8xf32>
    %107 = vector.multi_reduction <add>, %106, %cst_50 [1] : vector<8x32xf32> to vector<8xf32>
    %108 = vector.shape_cast %107 : vector<8xf32> to vector<8x1xf32>
    %cst_51 = arith.constant 3.200000e+01 : f32
    %109 = vector.broadcast %cst_51 : f32 to vector<8x1xf32>
    %110 = arith.divf %108, %109 : vector<8x1xf32>
    %cst_52 = arith.constant 9.99999974E-6 : f32
    %111 = vector.broadcast %cst_52 : f32 to vector<8x1xf32>
    %112 = arith.addf %110, %111 : vector<8x1xf32>
    %113 = math.rsqrt %112 : vector<8x1xf32>
    %114 = vector.broadcast %113 : vector<8x1xf32> to vector<8x32xf32>
    %115 = arith.mulf %105, %114 : vector<8x32xf32>
    %116 = vector.broadcast %98 : vector<1x32xf32> to vector<8x32xf32>
    %117 = arith.mulf %115, %116 : vector<8x32xf32>
    %118 = vector.broadcast %99 : vector<1x32xf32> to vector<8x32xf32>
    %119 = arith.addf %117, %118 : vector<8x32xf32>
    %120 = arith.addf %119, %2 : vector<8x32xf32>
    %c0_53 = arith.constant 0 : index
    %c0_54 = arith.constant 0 : index
    %121 = vector.load %arg14[%c0_53, %c0_54] : memref<32x32xf32, #tpu.memory_space<vmem>>, vector<32x32xf32>
    %cst_55 = arith.constant dense<0.000000e+00> : vector<8x32xf32>
    %122 = tpu.matmul %120, %121, %cst_55 {dimension_numbers = #tpu.dot_dimension_numbers<[1], [0], [0], [1], [0, 0, 1, 1], [], []>} : vector<8x32xf32>, vector<32x32xf32>, vector<8x32xf32> -> vector<8x32xf32>
    %c0_56 = arith.constant 0 : index
    %c0_57 = arith.constant 0 : index
    %123 = vector.load %arg15[%c0_56, %c0_57] : memref<1x32xf32, #tpu.memory_space<vmem>>, vector<1x32xf32>
    %124 = vector.broadcast %123 : vector<1x32xf32> to vector<8x32xf32>
    %125 = arith.addf %122, %124 : vector<8x32xf32>
    %126 = arith.addf %4, %6 : vector<16x32xf32>
    %c0_58 = arith.constant 0 : index
    %c0_59 = arith.constant 0 : index
    %127 = vector.load %arg16[%c0_58, %c0_59] : memref<32x32xf32, #tpu.memory_space<vmem>>, vector<32x32xf32>
    %cst_60 = arith.constant dense<0.000000e+00> : vector<16x32xf32>
    %128 = tpu.matmul %126, %127, %cst_60 {dimension_numbers = #tpu.dot_dimension_numbers<[1], [0], [0], [1], [0, 0, 1, 1], [], []>} : vector<16x32xf32>, vector<32x32xf32>, vector<16x32xf32> -> vector<16x32xf32>
    %c0_61 = arith.constant 0 : index
    %c0_62 = arith.constant 0 : index
    %129 = vector.load %arg17[%c0_61, %c0_62] : memref<1x32xf32, #tpu.memory_space<vmem>>, vector<1x32xf32>
    %130 = vector.broadcast %129 : vector<1x32xf32> to vector<16x32xf32>
    %131 = arith.addf %128, %130 : vector<16x32xf32>
    %c0_63 = arith.constant 0 : index
    %c0_64 = arith.constant 0 : index
    %132 = vector.load %arg18[%c0_63, %c0_64] : memref<32x32xf32, #tpu.memory_space<vmem>>, vector<32x32xf32>
    %cst_65 = arith.constant dense<0.000000e+00> : vector<16x32xf32>
    %133 = tpu.matmul %4, %132, %cst_65 {dimension_numbers = #tpu.dot_dimension_numbers<[1], [0], [0], [1], [0, 0, 1, 1], [], []>} : vector<16x32xf32>, vector<32x32xf32>, vector<16x32xf32> -> vector<16x32xf32>
    %c0_66 = arith.constant 0 : index
    %c0_67 = arith.constant 0 : index
    %134 = vector.load %arg19[%c0_66, %c0_67] : memref<1x32xf32, #tpu.memory_space<vmem>>, vector<1x32xf32>
    %135 = vector.broadcast %134 : vector<1x32xf32> to vector<16x32xf32>
    %136 = arith.addf %133, %135 : vector<16x32xf32>
    %c0_68 = arith.constant 0 : index
    %c0_69 = arith.constant 0 : index
    %137 = vector.load %arg20[%c0_68, %c0_69] : memref<32x32xf32, #tpu.memory_space<vmem>>, vector<32x32xf32>
    %c0_70 = arith.constant 0 : index
    %c0_71 = arith.constant 0 : index
    %138 = vector.load %arg21[%c0_70, %c0_71] : memref<1x32xf32, #tpu.memory_space<vmem>>, vector<1x32xf32>
    %c0_72 = arith.constant 0 : index
    %c0_73 = arith.constant 0 : index
    %c0_74 = arith.constant 0 : index
    %139 = vector.load %arg5[%c0_72, %c0_73, %c0_74] : memref<1x1x16xf32, #tpu.memory_space<vmem>>, vector<1x1x16xf32>
    %140 = vector.shape_cast %139 : vector<1x1x16xf32> to vector<1x16xf32>
    %cst_75 = arith.constant 0.000000e+00 : f32
    %141 = vector.broadcast %cst_75 : f32 to vector<8x32xf32>
    %142 = vector.broadcast %138 : vector<1x32xf32> to vector<8x32xf32>
    %143 = arith.addf %141, %142 : vector<8x32xf32>
    %144 = vector.extract_strided_slice %125 {offsets = [0, 0], sizes = [8, 8], strides = [1, 1]} : vector<8x32xf32> to vector<8x8xf32>
    %145 = vector.extract_strided_slice %131 {offsets = [0, 0], sizes = [16, 8], strides = [1, 1]} : vector<16x32xf32> to vector<16x8xf32>
    %146 = vector.extract_strided_slice %136 {offsets = [0, 0], sizes = [16, 8], strides = [1, 1]} : vector<16x32xf32> to vector<16x8xf32>
    %cst_76 = arith.constant dense<0.000000e+00> : vector<8x16xf32>
    %147 = tpu.matmul %144, %145, %cst_76 {dimension_numbers = #tpu.dot_dimension_numbers<[1], [1], [0], [0], [0, 0, 1, 0], [], []>} : vector<8x8xf32>, vector<16x8xf32>, vector<8x16xf32> -> vector<8x16xf32>
    %148 = vector.broadcast %140 : vector<1x16xf32> to vector<8x16xf32>
    %149 = arith.addf %147, %148 : vector<8x16xf32>
    %cst_77 = arith.constant dense<0xFF800000> : vector<8xf32>
    %150 = vector.multi_reduction <maximumf>, %149, %cst_77 [1] : vector<8x16xf32> to vector<8xf32>
    %151 = vector.shape_cast %150 : vector<8xf32> to vector<8x1xf32>
    %152 = vector.broadcast %151 : vector<8x1xf32> to vector<8x16xf32>
    %153 = arith.subf %149, %152 : vector<8x16xf32>
    %154 = math.exp %153 : vector<8x16xf32>
    %cst_78 = arith.constant dense<0.000000e+00> : vector<8xf32>
    %155 = vector.multi_reduction <add>, %154, %cst_78 [1] : vector<8x16xf32> to vector<8xf32>
    %156 = vector.shape_cast %155 : vector<8xf32> to vector<8x1xf32>
    %157 = tpu.reciprocal %156 {approx = true} : vector<8x1xf32> -> vector<8x1xf32>
    %158 = vector.broadcast %157 : vector<8x1xf32> to vector<8x16xf32>
    %159 = arith.mulf %154, %158 : vector<8x16xf32>
    %cst_79 = arith.constant dense<0.000000e+00> : vector<8x8xf32>
    %160 = tpu.matmul %159, %146, %cst_79 {dimension_numbers = #tpu.dot_dimension_numbers<[1], [0], [0], [1], [0, 0, 1, 1], [], []>} : vector<8x16xf32>, vector<16x8xf32>, vector<8x8xf32> -> vector<8x8xf32>
    %161 = vector.extract_strided_slice %137 {offsets = [0, 0], sizes = [8, 32], strides = [1, 1]} : vector<32x32xf32> to vector<8x32xf32>
    %cst_80 = arith.constant dense<0.000000e+00> : vector<8x32xf32>
    %162 = tpu.matmul %160, %161, %cst_80 {dimension_numbers = #tpu.dot_dimension_numbers<[1], [0], [0], [1], [0, 0, 1, 1], [], []>} : vector<8x8xf32>, vector<8x32xf32>, vector<8x32xf32> -> vector<8x32xf32>
    %163 = arith.addf %143, %162 : vector<8x32xf32>
    %164 = vector.extract_strided_slice %125 {offsets = [0, 8], sizes = [8, 8], strides = [1, 1]} : vector<8x32xf32> to vector<8x8xf32>
    %165 = vector.extract_strided_slice %131 {offsets = [0, 8], sizes = [16, 8], strides = [1, 1]} : vector<16x32xf32> to vector<16x8xf32>
    %166 = vector.extract_strided_slice %136 {offsets = [0, 8], sizes = [16, 8], strides = [1, 1]} : vector<16x32xf32> to vector<16x8xf32>
    %cst_81 = arith.constant dense<0.000000e+00> : vector<8x16xf32>
    %167 = tpu.matmul %164, %165, %cst_81 {dimension_numbers = #tpu.dot_dimension_numbers<[1], [1], [0], [0], [0, 0, 1, 0], [], []>} : vector<8x8xf32>, vector<16x8xf32>, vector<8x16xf32> -> vector<8x16xf32>
    %168 = vector.broadcast %140 : vector<1x16xf32> to vector<8x16xf32>
    %169 = arith.addf %167, %168 : vector<8x16xf32>
    %cst_82 = arith.constant dense<0xFF800000> : vector<8xf32>
    %170 = vector.multi_reduction <maximumf>, %169, %cst_82 [1] : vector<8x16xf32> to vector<8xf32>
    %171 = vector.shape_cast %170 : vector<8xf32> to vector<8x1xf32>
    %172 = vector.broadcast %171 : vector<8x1xf32> to vector<8x16xf32>
    %173 = arith.subf %169, %172 : vector<8x16xf32>
    %174 = math.exp %173 : vector<8x16xf32>
    %cst_83 = arith.constant dense<0.000000e+00> : vector<8xf32>
    %175 = vector.multi_reduction <add>, %174, %cst_83 [1] : vector<8x16xf32> to vector<8xf32>
    %176 = vector.shape_cast %175 : vector<8xf32> to vector<8x1xf32>
    %177 = tpu.reciprocal %176 {approx = true} : vector<8x1xf32> -> vector<8x1xf32>
    %178 = vector.broadcast %177 : vector<8x1xf32> to vector<8x16xf32>
    %179 = arith.mulf %174, %178 : vector<8x16xf32>
    %cst_84 = arith.constant dense<0.000000e+00> : vector<8x8xf32>
    %180 = tpu.matmul %179, %166, %cst_84 {dimension_numbers = #tpu.dot_dimension_numbers<[1], [0], [0], [1], [0, 0, 1, 1], [], []>} : vector<8x16xf32>, vector<16x8xf32>, vector<8x8xf32> -> vector<8x8xf32>
    %181 = vector.extract_strided_slice %137 {offsets = [8, 0], sizes = [8, 32], strides = [1, 1]} : vector<32x32xf32> to vector<8x32xf32>
    %cst_85 = arith.constant dense<0.000000e+00> : vector<8x32xf32>
    %182 = tpu.matmul %180, %181, %cst_85 {dimension_numbers = #tpu.dot_dimension_numbers<[1], [0], [0], [1], [0, 0, 1, 1], [], []>} : vector<8x8xf32>, vector<8x32xf32>, vector<8x32xf32> -> vector<8x32xf32>
    %183 = arith.addf %163, %182 : vector<8x32xf32>
    %184 = vector.extract_strided_slice %125 {offsets = [0, 16], sizes = [8, 8], strides = [1, 1]} : vector<8x32xf32> to vector<8x8xf32>
    %185 = vector.extract_strided_slice %131 {offsets = [0, 16], sizes = [16, 8], strides = [1, 1]} : vector<16x32xf32> to vector<16x8xf32>
    %186 = vector.extract_strided_slice %136 {offsets = [0, 16], sizes = [16, 8], strides = [1, 1]} : vector<16x32xf32> to vector<16x8xf32>
    %cst_86 = arith.constant dense<0.000000e+00> : vector<8x16xf32>
    %187 = tpu.matmul %184, %185, %cst_86 {dimension_numbers = #tpu.dot_dimension_numbers<[1], [1], [0], [0], [0, 0, 1, 0], [], []>} : vector<8x8xf32>, vector<16x8xf32>, vector<8x16xf32> -> vector<8x16xf32>
    %188 = vector.broadcast %140 : vector<1x16xf32> to vector<8x16xf32>
    %189 = arith.addf %187, %188 : vector<8x16xf32>
    %cst_87 = arith.constant dense<0xFF800000> : vector<8xf32>
    %190 = vector.multi_reduction <maximumf>, %189, %cst_87 [1] : vector<8x16xf32> to vector<8xf32>
    %191 = vector.shape_cast %190 : vector<8xf32> to vector<8x1xf32>
    %192 = vector.broadcast %191 : vector<8x1xf32> to vector<8x16xf32>
    %193 = arith.subf %189, %192 : vector<8x16xf32>
    %194 = math.exp %193 : vector<8x16xf32>
    %cst_88 = arith.constant dense<0.000000e+00> : vector<8xf32>
    %195 = vector.multi_reduction <add>, %194, %cst_88 [1] : vector<8x16xf32> to vector<8xf32>
    %196 = vector.shape_cast %195 : vector<8xf32> to vector<8x1xf32>
    %197 = tpu.reciprocal %196 {approx = true} : vector<8x1xf32> -> vector<8x1xf32>
    %198 = vector.broadcast %197 : vector<8x1xf32> to vector<8x16xf32>
    %199 = arith.mulf %194, %198 : vector<8x16xf32>
    %cst_89 = arith.constant dense<0.000000e+00> : vector<8x8xf32>
    %200 = tpu.matmul %199, %186, %cst_89 {dimension_numbers = #tpu.dot_dimension_numbers<[1], [0], [0], [1], [0, 0, 1, 1], [], []>} : vector<8x16xf32>, vector<16x8xf32>, vector<8x8xf32> -> vector<8x8xf32>
    %201 = vector.extract_strided_slice %137 {offsets = [16, 0], sizes = [8, 32], strides = [1, 1]} : vector<32x32xf32> to vector<8x32xf32>
    %cst_90 = arith.constant dense<0.000000e+00> : vector<8x32xf32>
    %202 = tpu.matmul %200, %201, %cst_90 {dimension_numbers = #tpu.dot_dimension_numbers<[1], [0], [0], [1], [0, 0, 1, 1], [], []>} : vector<8x8xf32>, vector<8x32xf32>, vector<8x32xf32> -> vector<8x32xf32>
    %203 = arith.addf %183, %202 : vector<8x32xf32>
    %204 = vector.extract_strided_slice %125 {offsets = [0, 24], sizes = [8, 8], strides = [1, 1]} : vector<8x32xf32> to vector<8x8xf32>
    %205 = vector.extract_strided_slice %131 {offsets = [0, 24], sizes = [16, 8], strides = [1, 1]} : vector<16x32xf32> to vector<16x8xf32>
    %206 = vector.extract_strided_slice %136 {offsets = [0, 24], sizes = [16, 8], strides = [1, 1]} : vector<16x32xf32> to vector<16x8xf32>
    %cst_91 = arith.constant dense<0.000000e+00> : vector<8x16xf32>
    %207 = tpu.matmul %204, %205, %cst_91 {dimension_numbers = #tpu.dot_dimension_numbers<[1], [1], [0], [0], [0, 0, 1, 0], [], []>} : vector<8x8xf32>, vector<16x8xf32>, vector<8x16xf32> -> vector<8x16xf32>
    %208 = vector.broadcast %140 : vector<1x16xf32> to vector<8x16xf32>
    %209 = arith.addf %207, %208 : vector<8x16xf32>
    %cst_92 = arith.constant dense<0xFF800000> : vector<8xf32>
    %210 = vector.multi_reduction <maximumf>, %209, %cst_92 [1] : vector<8x16xf32> to vector<8xf32>
    %211 = vector.shape_cast %210 : vector<8xf32> to vector<8x1xf32>
    %212 = vector.broadcast %211 : vector<8x1xf32> to vector<8x16xf32>
    %213 = arith.subf %209, %212 : vector<8x16xf32>
    %214 = math.exp %213 : vector<8x16xf32>
    %cst_93 = arith.constant dense<0.000000e+00> : vector<8xf32>
    %215 = vector.multi_reduction <add>, %214, %cst_93 [1] : vector<8x16xf32> to vector<8xf32>
    %216 = vector.shape_cast %215 : vector<8xf32> to vector<8x1xf32>
    %217 = tpu.reciprocal %216 {approx = true} : vector<8x1xf32> -> vector<8x1xf32>
    %218 = vector.broadcast %217 : vector<8x1xf32> to vector<8x16xf32>
    %219 = arith.mulf %214, %218 : vector<8x16xf32>
    %cst_94 = arith.constant dense<0.000000e+00> : vector<8x8xf32>
    %220 = tpu.matmul %219, %206, %cst_94 {dimension_numbers = #tpu.dot_dimension_numbers<[1], [0], [0], [1], [0, 0, 1, 1], [], []>} : vector<8x16xf32>, vector<16x8xf32>, vector<8x8xf32> -> vector<8x8xf32>
    %221 = vector.extract_strided_slice %137 {offsets = [24, 0], sizes = [8, 32], strides = [1, 1]} : vector<32x32xf32> to vector<8x32xf32>
    %cst_95 = arith.constant dense<0.000000e+00> : vector<8x32xf32>
    %222 = tpu.matmul %220, %221, %cst_95 {dimension_numbers = #tpu.dot_dimension_numbers<[1], [0], [0], [1], [0, 0, 1, 1], [], []>} : vector<8x8xf32>, vector<8x32xf32>, vector<8x32xf32> -> vector<8x32xf32>
    %223 = arith.addf %203, %222 : vector<8x32xf32>
    %224 = arith.addf %119, %223 : vector<8x32xf32>
    %c0_96 = arith.constant 0 : index
    %c0_97 = arith.constant 0 : index
    %225 = vector.load %arg23[%c0_96, %c0_97] : memref<1x32xf32, #tpu.memory_space<vmem>>, vector<1x32xf32>
    %c0_98 = arith.constant 0 : index
    %c0_99 = arith.constant 0 : index
    %226 = vector.load %arg24[%c0_98, %c0_99] : memref<1x32xf32, #tpu.memory_space<vmem>>, vector<1x32xf32>
    %cst_100 = arith.constant dense<0.000000e+00> : vector<8xf32>
    %227 = vector.multi_reduction <add>, %224, %cst_100 [1] : vector<8x32xf32> to vector<8xf32>
    %228 = vector.shape_cast %227 : vector<8xf32> to vector<8x1xf32>
    %cst_101 = arith.constant 3.200000e+01 : f32
    %229 = vector.broadcast %cst_101 : f32 to vector<8x1xf32>
    %230 = arith.divf %228, %229 : vector<8x1xf32>
    %231 = vector.broadcast %230 : vector<8x1xf32> to vector<8x32xf32>
    %232 = arith.subf %224, %231 : vector<8x32xf32>
    %233 = arith.mulf %232, %232 : vector<8x32xf32>
    %cst_102 = arith.constant dense<0.000000e+00> : vector<8xf32>
    %234 = vector.multi_reduction <add>, %233, %cst_102 [1] : vector<8x32xf32> to vector<8xf32>
    %235 = vector.shape_cast %234 : vector<8xf32> to vector<8x1xf32>
    %cst_103 = arith.constant 3.200000e+01 : f32
    %236 = vector.broadcast %cst_103 : f32 to vector<8x1xf32>
    %237 = arith.divf %235, %236 : vector<8x1xf32>
    %cst_104 = arith.constant 9.99999974E-6 : f32
    %238 = vector.broadcast %cst_104 : f32 to vector<8x1xf32>
    %239 = arith.addf %237, %238 : vector<8x1xf32>
    %240 = math.rsqrt %239 : vector<8x1xf32>
    %241 = vector.broadcast %240 : vector<8x1xf32> to vector<8x32xf32>
    %242 = arith.mulf %232, %241 : vector<8x32xf32>
    %243 = vector.broadcast %225 : vector<1x32xf32> to vector<8x32xf32>
    %244 = arith.mulf %242, %243 : vector<8x32xf32>
    %245 = vector.broadcast %226 : vector<1x32xf32> to vector<8x32xf32>
    %246 = arith.addf %244, %245 : vector<8x32xf32>
    %c0_105 = arith.constant 0 : index
    %c0_106 = arith.constant 0 : index
    %247 = vector.load %arg25[%c0_105, %c0_106] : memref<32x64xf32, #tpu.memory_space<vmem>>, vector<32x64xf32>
    %cst_107 = arith.constant dense<0.000000e+00> : vector<8x64xf32>
    %248 = tpu.matmul %246, %247, %cst_107 {dimension_numbers = #tpu.dot_dimension_numbers<[1], [0], [0], [1], [0, 0, 1, 1], [], []>} : vector<8x32xf32>, vector<32x64xf32>, vector<8x64xf32> -> vector<8x64xf32>
    %c0_108 = arith.constant 0 : index
    %c0_109 = arith.constant 0 : index
    %249 = vector.load %arg26[%c0_108, %c0_109] : memref<1x64xf32, #tpu.memory_space<vmem>>, vector<1x64xf32>
    %250 = vector.broadcast %249 : vector<1x64xf32> to vector<8x64xf32>
    %251 = arith.addf %248, %250 : vector<8x64xf32>
    %cst_110 = arith.constant 0.000000e+00 : f32
    %252 = vector.broadcast %cst_110 : f32 to vector<8x64xf32>
    %253 = arith.maximumf %251, %252 : vector<8x64xf32>
    %c0_111 = arith.constant 0 : index
    %c0_112 = arith.constant 0 : index
    %254 = vector.load %arg27[%c0_111, %c0_112] : memref<64x32xf32, #tpu.memory_space<vmem>>, vector<64x32xf32>
    %cst_113 = arith.constant dense<0.000000e+00> : vector<8x32xf32>
    %255 = tpu.matmul %253, %254, %cst_113 {dimension_numbers = #tpu.dot_dimension_numbers<[1], [0], [0], [1], [0, 0, 1, 1], [], []>} : vector<8x64xf32>, vector<64x32xf32>, vector<8x32xf32> -> vector<8x32xf32>
    %c0_114 = arith.constant 0 : index
    %c0_115 = arith.constant 0 : index
    %256 = vector.load %arg28[%c0_114, %c0_115] : memref<1x32xf32, #tpu.memory_space<vmem>>, vector<1x32xf32>
    %257 = vector.broadcast %256 : vector<1x32xf32> to vector<8x32xf32>
    %258 = arith.addf %255, %257 : vector<8x32xf32>
    %259 = arith.addf %246, %258 : vector<8x32xf32>
    %c0_116 = arith.constant 0 : index
    %c0_117 = arith.constant 0 : index
    %260 = vector.load %arg29[%c0_116, %c0_117] : memref<1x32xf32, #tpu.memory_space<vmem>>, vector<1x32xf32>
    %c0_118 = arith.constant 0 : index
    %c0_119 = arith.constant 0 : index
    %261 = vector.load %arg30[%c0_118, %c0_119] : memref<1x32xf32, #tpu.memory_space<vmem>>, vector<1x32xf32>
    %cst_120 = arith.constant dense<0.000000e+00> : vector<8xf32>
    %262 = vector.multi_reduction <add>, %259, %cst_120 [1] : vector<8x32xf32> to vector<8xf32>
    %263 = vector.shape_cast %262 : vector<8xf32> to vector<8x1xf32>
    %cst_121 = arith.constant 3.200000e+01 : f32
    %264 = vector.broadcast %cst_121 : f32 to vector<8x1xf32>
    %265 = arith.divf %263, %264 : vector<8x1xf32>
    %266 = vector.broadcast %265 : vector<8x1xf32> to vector<8x32xf32>
    %267 = arith.subf %259, %266 : vector<8x32xf32>
    %268 = arith.mulf %267, %267 : vector<8x32xf32>
    %cst_122 = arith.constant dense<0.000000e+00> : vector<8xf32>
    %269 = vector.multi_reduction <add>, %268, %cst_122 [1] : vector<8x32xf32> to vector<8xf32>
    %270 = vector.shape_cast %269 : vector<8xf32> to vector<8x1xf32>
    %cst_123 = arith.constant 3.200000e+01 : f32
    %271 = vector.broadcast %cst_123 : f32 to vector<8x1xf32>
    %272 = arith.divf %270, %271 : vector<8x1xf32>
    %cst_124 = arith.constant 9.99999974E-6 : f32
    %273 = vector.broadcast %cst_124 : f32 to vector<8x1xf32>
    %274 = arith.addf %272, %273 : vector<8x1xf32>
    %275 = math.rsqrt %274 : vector<8x1xf32>
    %276 = vector.broadcast %275 : vector<8x1xf32> to vector<8x32xf32>
    %277 = arith.mulf %267, %276 : vector<8x32xf32>
    %278 = vector.broadcast %260 : vector<1x32xf32> to vector<8x32xf32>
    %279 = arith.mulf %277, %278 : vector<8x32xf32>
    %280 = vector.broadcast %261 : vector<1x32xf32> to vector<8x32xf32>
    %281 = arith.addf %279, %280 : vector<8x32xf32>
    %c0_125 = arith.constant 0 : index
    %c0_126 = arith.constant 0 : index
    %c0_127 = arith.constant 0 : index
    %282 = vector.load %arg31[%c0_125, %c0_126, %c0_127] : memref<1x8x32xf32, #tpu.memory_space<vmem>>, vector<1x8x32xf32>
    %283 = vector.shape_cast %282 : vector<1x8x32xf32> to vector<8x32xf32>
    %284 = vector.shape_cast %281 : vector<8x32xf32> to vector<1x8x32xf32>
    tpu.vector_store %arg31[%c0_125, %c0_126, %c0_127], %284 {strides = array<i32>} : memref<1x8x32xf32, #tpu.memory_space<vmem>>, vector<1x8x32xf32>,
    %c0_128 = arith.constant 0 : index
    %c0_129 = arith.constant 0 : index
    %285 = vector.load %arg22[%c0_128, %c0_129] : memref<32x32xf32, #tpu.memory_space<vmem>>, vector<32x32xf32>
    %cst_130 = arith.constant 0.000000e+00 : f32
    %286 = vector.broadcast %cst_130 : f32 to vector<8x32x16xf32>
    %287 = vector.extract_strided_slice %285 {offsets = [0, 0], sizes = [32, 8], strides = [1, 1]} : vector<32x32xf32> to vector<32x8xf32>
    %288 = vector.extract_strided_slice %136 {offsets = [0, 0], sizes = [16, 8], strides = [1, 1]} : vector<16x32xf32> to vector<16x8xf32>
    %cst_131 = arith.constant dense<0.000000e+00> : vector<32x16xf32>
    %289 = tpu.matmul %287, %288, %cst_131 {dimension_numbers = #tpu.dot_dimension_numbers<[1], [1], [0], [0], [0, 0, 1, 0], [], []>} : vector<32x8xf32>, vector<16x8xf32>, vector<32x16xf32> -> vector<32x16xf32>
    %290 = vector.shape_cast %159 : vector<8x16xf32> to vector<8x1x16xf32>
    %291 = vector.shape_cast %289 : vector<32x16xf32> to vector<1x32x16xf32>
    %292 = vector.broadcast %290 : vector<8x1x16xf32> to vector<8x32x16xf32>
    %293 = vector.broadcast %291 : vector<1x32x16xf32> to vector<8x32x16xf32>
    %294 = arith.mulf %292, %293 : vector<8x32x16xf32>
    %295 = arith.addf %286, %294 : vector<8x32x16xf32>
    %296 = vector.extract_strided_slice %285 {offsets = [0, 8], sizes = [32, 8], strides = [1, 1]} : vector<32x32xf32> to vector<32x8xf32>
    %297 = vector.extract_strided_slice %136 {offsets = [0, 8], sizes = [16, 8], strides = [1, 1]} : vector<16x32xf32> to vector<16x8xf32>
    %cst_132 = arith.constant dense<0.000000e+00> : vector<32x16xf32>
    %298 = tpu.matmul %296, %297, %cst_132 {dimension_numbers = #tpu.dot_dimension_numbers<[1], [1], [0], [0], [0, 0, 1, 0], [], []>} : vector<32x8xf32>, vector<16x8xf32>, vector<32x16xf32> -> vector<32x16xf32>
    %299 = vector.shape_cast %179 : vector<8x16xf32> to vector<8x1x16xf32>
    %300 = vector.shape_cast %298 : vector<32x16xf32> to vector<1x32x16xf32>
    %301 = vector.broadcast %299 : vector<8x1x16xf32> to vector<8x32x16xf32>
    %302 = vector.broadcast %300 : vector<1x32x16xf32> to vector<8x32x16xf32>
    %303 = arith.mulf %301, %302 : vector<8x32x16xf32>
    %304 = arith.addf %295, %303 : vector<8x32x16xf32>
    %305 = vector.extract_strided_slice %285 {offsets = [0, 16], sizes = [32, 8], strides = [1, 1]} : vector<32x32xf32> to vector<32x8xf32>
    %306 = vector.extract_strided_slice %136 {offsets = [0, 16], sizes = [16, 8], strides = [1, 1]} : vector<16x32xf32> to vector<16x8xf32>
    %cst_133 = arith.constant dense<0.000000e+00> : vector<32x16xf32>
    %307 = tpu.matmul %305, %306, %cst_133 {dimension_numbers = #tpu.dot_dimension_numbers<[1], [1], [0], [0], [0, 0, 1, 0], [], []>} : vector<32x8xf32>, vector<16x8xf32>, vector<32x16xf32> -> vector<32x16xf32>
    %308 = vector.shape_cast %199 : vector<8x16xf32> to vector<8x1x16xf32>
    %309 = vector.shape_cast %307 : vector<32x16xf32> to vector<1x32x16xf32>
    %310 = vector.broadcast %308 : vector<8x1x16xf32> to vector<8x32x16xf32>
    %311 = vector.broadcast %309 : vector<1x32x16xf32> to vector<8x32x16xf32>
    %312 = arith.mulf %310, %311 : vector<8x32x16xf32>
    %313 = arith.addf %304, %312 : vector<8x32x16xf32>
    %314 = vector.extract_strided_slice %285 {offsets = [0, 24], sizes = [32, 8], strides = [1, 1]} : vector<32x32xf32> to vector<32x8xf32>
    %315 = vector.extract_strided_slice %136 {offsets = [0, 24], sizes = [16, 8], strides = [1, 1]} : vector<16x32xf32> to vector<16x8xf32>
    %cst_134 = arith.constant dense<0.000000e+00> : vector<32x16xf32>
    %316 = tpu.matmul %314, %315, %cst_134 {dimension_numbers = #tpu.dot_dimension_numbers<[1], [1], [0], [0], [0, 0, 1, 0], [], []>} : vector<32x8xf32>, vector<16x8xf32>, vector<32x16xf32> -> vector<32x16xf32>
    %317 = vector.shape_cast %219 : vector<8x16xf32> to vector<8x1x16xf32>
    %318 = vector.shape_cast %316 : vector<32x16xf32> to vector<1x32x16xf32>
    %319 = vector.broadcast %317 : vector<8x1x16xf32> to vector<8x32x16xf32>
    %320 = vector.broadcast %318 : vector<1x32x16xf32> to vector<8x32x16xf32>
    %321 = arith.mulf %319, %320 : vector<8x32x16xf32>
    %322 = arith.addf %313, %321 : vector<8x32x16xf32>
    %c0_135 = arith.constant 0 : index
    %c0_136 = arith.constant 0 : index
    %c0_137 = arith.constant 0 : index
    %c0_138 = arith.constant 0 : index
    %323 = vector.load %arg32[%c0_135, %c0_136, %c0_137, %c0_138] : memref<1x8x32x16xf32, #tpu.memory_space<vmem>>, vector<1x8x32x16xf32>
    %324 = vector.shape_cast %323 : vector<1x8x32x16xf32> to vector<8x32x16xf32>
    %325 = vector.shape_cast %322 : vector<8x32x16xf32> to vector<1x8x32x16xf32>
    tpu.vector_store %arg32[%c0_135, %c0_136, %c0_137, %c0_138], %325 {strides = array<i32>} : memref<1x8x32x16xf32, #tpu.memory_space<vmem>>, vector<1x8x32x16xf32>,
    return
  }
  func.func @transform_0(%arg0: i32) -> (i32, i32, i32) {
    %c0_i32 = arith.constant 0 : i32
    %c0_i32_0 = arith.constant 0 : i32
    %c0_i32_1 = arith.constant 0 : i32
    return %arg0, %c0_i32, %c0_i32_0 : i32, i32, i32
  }
  func.func @transform_1(%arg0: i32) -> (i32, i32) {
    %c0_i32 = arith.constant 0 : i32
    %c0_i32_0 = arith.constant 0 : i32
    %c0_i32_1 = arith.constant 0 : i32
    return %c0_i32, %c0_i32_0 : i32, i32
  }
  func.func @transform_2(%arg0: i32) -> (i32, i32, i32) {
    %c0_i32 = arith.constant 0 : i32
    %c0_i32_0 = arith.constant 0 : i32
    %c0_i32_1 = arith.constant 0 : i32
    return %arg0, %c0_i32, %c0_i32_0 : i32, i32, i32
  }
  func.func @transform_3(%arg0: i32) -> (i32, i32, i32) {
    %c0_i32 = arith.constant 0 : i32
    %c0_i32_0 = arith.constant 0 : i32
    %c0_i32_1 = arith.constant 0 : i32
    return %arg0, %c0_i32, %c0_i32_0 : i32, i32, i32
  }
  func.func @transform_4(%arg0: i32) -> (i32, i32, i32) {
    %c0_i32 = arith.constant 0 : i32
    %c0_i32_0 = arith.constant 0 : i32
    %c0_i32_1 = arith.constant 0 : i32
    return %arg0, %c0_i32, %c0_i32_0 : i32, i32, i32
  }
  func.func @transform_5(%arg0: i32) -> (i32, i32) {
    %c0_i32 = arith.constant 0 : i32
    %c0_i32_0 = arith.constant 0 : i32
    %c0_i32_1 = arith.constant 0 : i32
    return %c0_i32, %c0_i32_0 : i32, i32
  }
  func.func @transform_6(%arg0: i32) -> (i32, i32) {
    %c0_i32 = arith.constant 0 : i32
    %c0_i32_0 = arith.constant 0 : i32
    %c0_i32_1 = arith.constant 0 : i32
    return %c0_i32, %c0_i32_0 : i32, i32
  }
  func.func @transform_7(%arg0: i32) -> (i32, i32) {
    %c0_i32 = arith.constant 0 : i32
    %c0_i32_0 = arith.constant 0 : i32
    %c0_i32_1 = arith.constant 0 : i32
    return %c0_i32, %c0_i32_0 : i32, i32
  }
  func.func @transform_8(%arg0: i32) -> (i32, i32) {
    %c0_i32 = arith.constant 0 : i32
    %c0_i32_0 = arith.constant 0 : i32
    %c0_i32_1 = arith.constant 0 : i32
    return %c0_i32, %c0_i32_0 : i32, i32
  }
  func.func @transform_9(%arg0: i32) -> (i32, i32) {
    %c0_i32 = arith.constant 0 : i32
    %c0_i32_0 = arith.constant 0 : i32
    %c0_i32_1 = arith.constant 0 : i32
    return %c0_i32, %c0_i32_0 : i32, i32
  }
  func.func @transform_10(%arg0: i32) -> (i32, i32) {
    %c0_i32 = arith.constant 0 : i32
    %c0_i32_0 = arith.constant 0 : i32
    %c0_i32_1 = arith.constant 0 : i32
    return %c0_i32, %c0_i32_0 : i32, i32
  }
  func.func @transform_11(%arg0: i32) -> (i32, i32) {
    %c0_i32 = arith.constant 0 : i32
    %c0_i32_0 = arith.constant 0 : i32
    %c0_i32_1 = arith.constant 0 : i32
    return %c0_i32, %c0_i32_0 : i32, i32
  }
  func.func @transform_12(%arg0: i32) -> (i32, i32) {
    %c0_i32 = arith.constant 0 : i32
    %c0_i32_0 = arith.constant 0 : i32
    %c0_i32_1 = arith.constant 0 : i32
    return %c0_i32, %c0_i32_0 : i32, i32
  }
  func.func @transform_13(%arg0: i32) -> (i32, i32) {
    %c0_i32 = arith.constant 0 : i32
    %c0_i32_0 = arith.constant 0 : i32
    %c0_i32_1 = arith.constant 0 : i32
    return %c0_i32, %c0_i32_0 : i32, i32
  }
  func.func @transform_14(%arg0: i32) -> (i32, i32) {
    %c0_i32 = arith.constant 0 : i32
    %c0_i32_0 = arith.constant 0 : i32
    %c0_i32_1 = arith.constant 0 : i32
    return %c0_i32, %c0_i32_0 : i32, i32
  }
  func.func @transform_15(%arg0: i32) -> (i32, i32) {
    %c0_i32 = arith.constant 0 : i32
    %c0_i32_0 = arith.constant 0 : i32
    %c0_i32_1 = arith.constant 0 : i32
    return %c0_i32, %c0_i32_0 : i32, i32
  }
  func.func @transform_16(%arg0: i32) -> (i32, i32) {
    %c0_i32 = arith.constant 0 : i32
    %c0_i32_0 = arith.constant 0 : i32
    %c0_i32_1 = arith.constant 0 : i32
    return %c0_i32, %c0_i32_0 : i32, i32
  }
  func.func @transform_17(%arg0: i32) -> (i32, i32) {
    %c0_i32 = arith.constant 0 : i32
    %c0_i32_0 = arith.constant 0 : i32
    %c0_i32_1 = arith.constant 0 : i32
    return %c0_i32, %c0_i32_0 : i32, i32
  }
  func.func @transform_18(%arg0: i32) -> (i32, i32) {
    %c0_i32 = arith.constant 0 : i32
    %c0_i32_0 = arith.constant 0 : i32
    %c0_i32_1 = arith.constant 0 : i32
    return %c0_i32, %c0_i32_0 : i32, i32
  }
  func.func @transform_19(%arg0: i32) -> (i32, i32) {
    %c0_i32 = arith.constant 0 : i32
    %c0_i32_0 = arith.constant 0 : i32
    %c0_i32_1 = arith.constant 0 : i32
    return %c0_i32, %c0_i32_0 : i32, i32
  }
  func.func @transform_20(%arg0: i32) -> (i32, i32) {
    %c0_i32 = arith.constant 0 : i32
    %c0_i32_0 = arith.constant 0 : i32
    %c0_i32_1 = arith.constant 0 : i32
    return %c0_i32, %c0_i32_0 : i32, i32
  }
  func.func @transform_21(%arg0: i32) -> (i32, i32) {
    %c0_i32 = arith.constant 0 : i32
    %c0_i32_0 = arith.constant 0 : i32
    %c0_i32_1 = arith.constant 0 : i32
    return %c0_i32, %c0_i32_0 : i32, i32
  }
  func.func @transform_22(%arg0: i32) -> (i32, i32) {
    %c0_i32 = arith.constant 0 : i32
    %c0_i32_0 = arith.constant 0 : i32
    %c0_i32_1 = arith.constant 0 : i32
    return %c0_i32, %c0_i32_0 : i32, i32
  }
  func.func @transform_23(%arg0: i32) -> (i32, i32) {
    %c0_i32 = arith.constant 0 : i32
    %c0_i32_0 = arith.constant 0 : i32
    %c0_i32_1 = arith.constant 0 : i32
    return %c0_i32, %c0_i32_0 : i32, i32
  }
  func.func @transform_24(%arg0: i32) -> (i32, i32) {
    %c0_i32 = arith.constant 0 : i32
    %c0_i32_0 = arith.constant 0 : i32
    %c0_i32_1 = arith.constant 0 : i32
    return %c0_i32, %c0_i32_0 : i32, i32
  }
  func.func @transform_25(%arg0: i32) -> (i32, i32) {
    %c0_i32 = arith.constant 0 : i32
    %c0_i32_0 = arith.constant 0 : i32
    %c0_i32_1 = arith.constant 0 : i32
    return %c0_i32, %c0_i32_0 : i32, i32
  }
  func.func @transform_26(%arg0: i32) -> (i32, i32) {
    %c0_i32 = arith.constant 0 : i32
    %c0_i32_0 = arith.constant 0 : i32
    %c0_i32_1 = arith.constant 0 : i32
    return %c0_i32, %c0_i32_0 : i32, i32
  }
  func.func @transform_27(%arg0: i32) -> (i32, i32) {
    %c0_i32 = arith.constant 0 : i32
    %c0_i32_0 = arith.constant 0 : i32
    %c0_i32_1 = arith.constant 0 : i32
    return %c0_i32, %c0_i32_0 : i32, i32
  }
  func.func @transform_28(%arg0: i32) -> (i32, i32) {
    %c0_i32 = arith.constant 0 : i32
    %c0_i32_0 = arith.constant 0 : i32
    %c0_i32_1 = arith.constant 0 : i32
    return %c0_i32, %c0_i32_0 : i32, i32
  }
  func.func @transform_29(%arg0: i32) -> (i32, i32) {
    %c0_i32 = arith.constant 0 : i32
    %c0_i32_0 = arith.constant 0 : i32
    %c0_i32_1 = arith.constant 0 : i32
    return %c0_i32, %c0_i32_0 : i32, i32
  }
  func.func @transform_30(%arg0: i32) -> (i32, i32, i32) {
    %c0_i32 = arith.constant 0 : i32
    %c0_i32_0 = arith.constant 0 : i32
    %c0_i32_1 = arith.constant 0 : i32
    return %arg0, %c0_i32, %c0_i32_0 : i32, i32, i32
  }
  func.func @transform_31(%arg0: i32) -> (i32, i32, i32, i32) {
    %c0_i32 = arith.constant 0 : i32
    %c0_i32_0 = arith.constant 0 : i32
    %c0_i32_1 = arith.constant 0 : i32
    %c0_i32_2 = arith.constant 0 : i32
    return %arg0, %c0_i32, %c0_i32_0, %c0_i32_1 : i32, i32, i32, i32
  }
}

</mosaic_0001>

<bundles_post_ra>
// kernel: transformer_forward.4
= control target key start
LH: loop header
LB: loop body
LE: loop exit
PB: predicated region body
PF: predicated region fallthrough
CT: control target
= control target key end

     0   :  { %s2832_s24 = smov 0   ;;  %s3103_s0 = inlined_call_operand.vmem [shape: f32[2,16,32], index: 0, kind: input, shape index: {}]   ;;  %s3104_s1 = inlined_call_operand.vmem [shape: f32[2,16,32], index: 1, kind: input, shape index: {}]   ;;  %s3105_s2 = inlined_call_operand.vmem [shape: f32[2,1,16], index: 2, kind: input, shape index: {}]   ;;  %s3106_s3 = inlined_call_operand.vmem [shape: f32[32,64], index: 3, kind: input, shape index: {}]   ;;  %s3107_s4 = inlined_call_operand.vmem [shape: f32[1,64], index: 4, kind: input, shape index: {}]   ;;  %s3108_s5 = inlined_call_operand.vmem [shape: f32[32,32], index: 5, kind: input, shape index: {}]   ;;  %s3109_s6 = inlined_call_operand.vmem [shape: f32[1,32], index: 6, kind: input, shape index: {}]   ;;  %s3110_s7 = inlined_call_operand.vmem [shape: f32[32,32], index: 7, kind: input, shape index: {}]   ;;  %s3111_s8 = inlined_call_operand.vmem [shape: f32[1,32], index: 8, kind: input, shape index: {}]   ;;  %s3112_s9 = inlined_call_operand.vmem [shape: f32[1,32], index: 9, kind: input, shape index: {}]   ;;  %s3113_s10 = inlined_call_operand.vmem [shape: f32[1,32], index: 10, kind: input, shape index: {}]   ;;  %s3114_s11 = inlined_call_operand.vmem [shape: f32[32,64], index: 11, kind: input, shape index: {}]   ;;  %s3115_s12 = inlined_call_operand.vmem [shape: f32[1,64], index: 12, kind: input, shape index: {}]   ;;  %s3116_s13 = inlined_call_operand.vmem [shape: f32[64,32], index: 13, kind: input, shape index: {}]   ;;  %s3117_s14 = inlined_call_operand.vmem [shape: f32[1,32], index: 14, kind: input, shape index: {}]   ;;  %s3118_s15 = inlined_call_operand.vmem [shape: f32[1,32], index: 15, kind: input, shape index: {}]   ;;  %s3119_s16 = inlined_call_operand.vmem [shape: f32[1,32], index: 16, kind: input, shape index: {}]   ;;  %s3120_s17 = inlined_call_operand.vmem [shape: f32[2,16,32], index: 17, kind: output, shape index: {}]  }
   0x1   :  { %3121 = sst [smem:[#allocation2_spill]] %s3103_s0 }
   0x2   :  { %3122 = sst [smem:[#allocation3_spill]] %s3104_s1 }
   0x3 LB: > { %s2283_s25 = sadd.s32 4294967295, %s2733_s24   ;;  %p2287_p0 = scmp.ge.s32.totalorder %s2733_s24, 1  ;;  %s2733_s24 = sphi %s2832_s24, %s27_s24  }
   0x4   : > { %p505_p1 = scmp.lt.s32.totalorder %s2733_s24, 3 }
   0x6   : > { %p506_p2 = pnand %p2287_p0, %p505_p1 }
   0x7   : > { %v589_v0 = vld [vmem:[%s3106_s3] sm:$0xff] (!%p506_p2)  ;;  %v590_v1 = vld [vmem:[%s3106_s3 + $0x8] sm:$0xff] (!%p506_p2)  ;;  %v591_v2 = vld [vmem:[%s3106_s3 + $0x10] sm:$0xff] (!%p506_p2)  ;;  %p565_p3 = scmp.lt.s32.totalorder (!%p506_p2), %s2283_s25, 1  ;;  %s3123_s22 = sld [smem:[#allocation2_spill]] (!%p506_p2)  ;;  %vm600_vm0 = vcmask (!%p506_p2), 261120  }
   0x8   : > { %509 = sbr.rel (%p506_p2) target bundleno = 3483 (0xd9b), region = 88  ;;  %v2549_v3 = vpack.c.bf16 (!%p506_p2), %v590_v1, %v589_v0  ;;  %v592_v4 = vld [vmem:[%s3106_s3 + $0x18] sm:$0xff] (!%p506_p2)  ;;  %s3124_s28 = sld [smem:[#allocation3_spill]] (!%p506_p2)  ;;  %v2294_v12 = vld [vmem:[%s3107_s4] ss:$0 sm:$0xff] (!%p506_p2)  ;;  %vm799_vm1 = vcmask (!%p506_p2), 64512  }
   0x9   : > { %v2553_v5 = vpack.c.bf16 (!%p506_p2), %v592_v4, %v591_v2  ;;  %v682_v18 = vld [vmem:[%s3108_s5] sm:$0xff] (!%p506_p2)  ;;  %v683_v19 = vld [vmem:[%s3108_s5 + $0x8] sm:$0xff] (!%p506_p2)  ;;  %v684_v20 = vld [vmem:[%s3108_s5 + $0x10] sm:$0xff] (!%p506_p2)  ;;  %s2735_s26 = smov (!%p506_p2), 96   ;;  %vm883_vm3 = vcmask (!%p506_p2), 130048   ;;  %s2737_s20 = smov (!%p506_p2), 120  }
   0xa   : > { %2550 = vmatprep.subr.bf16.mxu0 (!%p506_p2), %v2549_v3  ;;  %v2557_v21 = vpack.c.bf16 (!%p506_p2), %v683_v19, %v682_v18  ;;  %v685_v22 = vld [vmem:[%s3108_s5 + $0x18] sm:$0xff] (!%p506_p2)  ;;  %vm2905_vm2 = vmpackc.low (!%p506_p2), %vm799_vm1, %vm799_vm1  ;;  %v2297_v37 = vld [vmem:[%s3109_s6] ss:$0 sm:$0xff] (!%p506_p2)  ;;  %s2738_s21 = smov (!%p506_p2), 80   ;;  %s2740_s27 = smov (!%p506_p2), 104   ;;  %vm2077_vm4 = vcmask (!%p506_p2), 523264  }
   0xb   : > { %2552 = vmatpush3.bf16.msra.mxu0 (!%p506_p2), %v2549_v3  ;;  %v2561_v23 = vpack.c.bf16 (!%p506_p2), %v685_v22, %v684_v20 }
   0xc   : > { %2554 = vmatprep.subr.bf16.mxu0 (!%p506_p2), %v2553_v5  ;;  %2558 = vmatprep.subr.bf16.mxu1 (!%p506_p2), %v2557_v21 }
   0xd   : > { %2560 = vmatpush3.bf16.msra.mxu1 (!%p506_p2), %v2557_v21 }
   0xe   : > { %2562 = vmatprep.subr.bf16.mxu1 (!%p506_p2), %v2561_v23 }
   0xf   : > { %s3128_s25 = smov (!%p565_p3, %s2283_s25), 1  ;;  %2556 = vmatpush3.bf16.msra.mxu0 %v2553_v5 }
  0x10   : > { %s2855_s1 = sshll.u32 %s3128_s25, 4  ;;  %s577_s30 = scalar_lea.vmem %s3105_s2, %s3128_s25 }
  0x11   : > { %s569_s23 = scalar_lea.vmem %s3123_s22, %s2855_s1  ;;  %s574_s29 = scalar_lea.vmem %s3124_s28, %s2855_s1  ;;  %2564 = vmatpush3.bf16.msra.mxu1 %v2561_v23  ;;  %v2919_v29 = vld [vmem:[%s577_s30] ss:$0 sm:$0xff] }
  0x12   : > { %v2865_v6 = vld [vmem:[%s569_s23] sm:$0xff]  ;;  %v2867_v7 = vld [vmem:[%s569_s23 + $0x8] sm:$0xff]  ;;  %s2736_s25 = smov 88   ;;  %s2739_s22 = smov 112  }
  0x13   : > { %v585_v8 = vld [vmem:[%s574_s29] sm:$0xff]  ;;  %v586_v9 = vld [vmem:[%s574_s29 + $0x8] sm:$0xff]  ;;  %2440 = vmatprep.mubr.msk.f32.mxu1 %vm600_vm0, %v2865_v6  ;;  %s2741_s28 = smov 72  }
  0x14   : > { %v587_v10 = vadd.f32 %v585_v8, %v2865_v6  ;;  %v588_v11 = vadd.f32 %v586_v9, %v2867_v7  ;;  %2441 = vmatmul.mubr.msk.f32.vlgmr.msra.gmra.mrb[0].mxu1 %vm600_vm0, %v2867_v7  ;;  %v774_v8 = vld [vmem:[%s3110_s7] sm:$0xff] }
  0x15   : > { %2457 = vmatprep.subr.mxu1 %v774_v8 }
  0x16   : > { %2429 = vmatprep.mubr.msk.f32.mxu0 %vm600_vm0, %v587_v10  ;;  %2458 = vmatpush3.msra.mxu1 %v774_v8 }
  0x17   : > { %2430 = vmatmul.mubr.msk.f32.vlgmr.msra.gmra.mrb[0].mxu0 %vm600_vm0, %v588_v11 }
  0xe7   : > { %v2442_v36 = vpop.f32.mrb[0].mxu1 }
  0xe8   : > { %v765_v38 = vpop.f32.mrb[1].mxu1  ;;  %v2928_v39 = vadd.f32 %v2442_v36, %v2297_v37 }
  0xe9   : > { %v2930_v40 = vadd.f32 %v2297_v37, %v765_v38 }
  0xea   : > { %v2431_v13 = vpop.f32.mrb[0].mxu0 }
  0xeb   : > { %v2878_v14 = vadd.f32 %v2431_v13, %v2294_v12  ;;  %v673_v15 = vpop.f32.mrb[1].mxu0  ;;  %v2571_v41 = vpack.c.bf16 %v2928_v39, %v2930_v40  ;;  %v2971_v22 = vpack.i.bf16 %v2928_v39, %v2930_v40 }
  0xec   : > { %v2880_v16 = vadd.f32 %v2294_v12, %v673_v15 }
  0xee   : > { %2447 = vmatprep.mubr.msk.f32.mxu0 %vm799_vm1, %v2880_v16  ;;  %v2886_v17 = vpack.i.bf16 %v2878_v14, %v2880_v16 }
  0xf0   : > { %2653 = vrot.lane.b32.xlu0 %v2886_v17, %s2735_s26 }
 0x162   : > { %v2654_v24 = vpop.permute.xlu0 %2653 }
 0x163   : > { %v2656_v25 = vunpack.i.h.bf16 %v2654_v24  ;;  %v2655_v26 = vunpack.i.l.bf16 %v2654_v24 }
 0x165   : > { %v2565_v28 = vpack.c.bf16 %v2656_v25, %v2655_v26 }
 0x167   : > { %2567 = vmatprep.subr.msk.bf16.mxu0 %vm2905_vm2, %v2565_v28 }
 0x168   : > { %2570 = vmatpush3.bf16.xpose.msk.msra.mxu0 %vm2905_vm2, %v2565_v28 }
 0x169   : > { %2572 = vmatprep.subr.bf16.mxu0 %v2571_v41 }
 0x16f   : > { %2448 = vmatmul.mubr.msk.f32.vlgmr.msra.gmra.mrb[2].mxu0 %vm799_vm1, %v2878_v14 }
 0x170   : > { %2574 = vmatpush3.bf16.msra.mxu0 %v2571_v41 }
 0x242   : > { %v2449_v30 = vpop.f32.mrb[2].mxu0 }
 0x243   : > { %v880_v31 = vadd.f32 %v2449_v30, %v2919_v29  ;;  %v874_v32 = vpop.f32.mrb[3].mxu0 }
 0x244   : > { %v875_v33 = vadd.f32 %v2919_v29, %v874_v32 }
 0x245   : > { %v887_v34 = vsel %vm883_vm3, %v880_v31, -inf }
 0x246   : > { %888 = vmax.xlane.f32.xlu1 %v887_v34  ;;  %v884_v35 = vsel %vm883_vm3, %v875_v33, -inf }
 0x247   : > { %885 = vmax.xlane.f32.xlu0 %v884_v35 }
 0x257   : > { %2658 = vrot.lane.b32.xlu1 %v2886_v17, %s2736_s25 }
 0x25b   : > { %1070 = vrot.lane.b32.xlu1 %v2880_v16, %s2737_s20 }
 0x25d   : > { %2663 = vrot.lane.b32.xlu0 %v2886_v17, %s2738_s21  ;;  %s582_s21 = scalar_lea.vmem %s3120_s17, %s2855_s1 }
 0x2d3   : > { %v889_v42 = vpop.xlane.xlu1 %888 }
 0x2d4   : > { %v891_v43 = vsub.f32 %v880_v31, %v889_v42  ;;  %v886_v44 = vpop.xlane.xlu0 %885 }
 0x2d5   : > { %v890_v45 = vsub.f32 %v875_v33, %v886_v44 }
 0x2d6   : > { %v894_v46 = vmul.f32 1.442695, %v891_v43 }
 0x2d7   : > { %v892_v47 = vmul.f32 1.442695, %v890_v45  ;;  %v2659_v48 = vpop.permute.xlu1 %2658 }
 0x2d8   : > { %2687 = vpow2.f32 %v894_v46  ;;  %v2661_v49 = vunpack.i.h.bf16 %v2659_v48  ;;  %v2660_v50 = vunpack.i.l.bf16 %v2659_v48  ;;  %v2664_v59 = vpop.permute.xlu0 %2663 }
 0x2d9   : > { %2689 = vpow2.f32 %v892_v47  ;;  %v2666_v62 = vunpack.i.h.bf16 %v2664_v59  ;;  %v2665_v63 = vunpack.i.l.bf16 %v2664_v59 }
 0x2da   : > { %v2575_v51 = vpack.c.bf16 %v2661_v49, %v2660_v50 }
 0x2db   : > { %v1071_v56 = vpop.permute.xlu1 %1070  ;;  %v2585_v2 = vpack.c.bf16 %v2666_v62, %v2665_v63  ;;  %v775_v62 = vld [vmem:[%s3110_s7 + $0x8] sm:$0xff] }
 0x2dc   : > { %2577 = vmatprep.subr.msk.bf16.mxu0 %vm2905_vm2, %v2575_v51 }
 0x2e2   : > { %v2688_v52 = vpop.eup %2687 }
 0x2e3   : > { %v899_v53 = vsel %vm883_vm3, %v2688_v52, 0.0  ;;  %v2690_v54 = vpop.eup %2689 }
 0x2e4   : > { %900 = vadd.xlane.f32.xlu1 %v899_v53  ;;  %v896_v55 = vsel %vm883_vm3, %v2690_v54, 0.0 }
 0x2e8   : > { %897 = vadd.xlane.f32.xlu1 %v896_v55 }
 0x2f9   : > { %1072 = vrot.lane.b32.xlu1 %v2878_v14, %s2737_s20 }
 0x2fd   : > { %1355 = vrot.lane.b32.xlu1 %v2880_v16, %s2739_s22 }
 0x301   : > { %1357 = vrot.lane.b32.xlu1 %v2878_v14, %s2739_s22 }
 0x371   : > { %v901_v57 = vpop.xlane.xlu1 %900 }
 0x372   : > { %2691 = vrcp.f32 %v901_v57 }
 0x375   : > { %v898_v58 = vpop.xlane.xlu1 %897 }
 0x376   : > { %2693 = vrcp.f32 %v898_v58 }
 0x379   : > { %v1073_v3 = vpop.permute.xlu1 %1072 }
 0x37c   : > { %v2692_v60 = vpop.eup %2691 }
 0x37d   : > { %v905_v1 = vmul.f32 %v2692_v60, %v2688_v52  ;;  %v1356_v4 = vpop.permute.xlu1 %1355 }
 0x380   : > { %v2694_v61 = vpop.eup %2693 }
 0x381   : > { %v904_v0 = vmul.f32 %v2694_v61, %v2690_v54  ;;  %v1358_v5 = vpop.permute.xlu1 %1357 }
 0x383   : > { %2454 = vmatprep.mubr.msk.f32.mxu0 %vm883_vm3, %v904_v0 }
 0x384   : > { %2455 = vmatmul.mubr.msk.f32.vlgmr.msra.gmra.mrb[4].mxu0 %vm883_vm3, %v905_v1 }
 0x385   : > { %2580 = vmatpush3.bf16.xpose.msk.msra.mxu0 %vm2905_vm2, %v2575_v51  ;;  %2466 = vmatprep.mubr.msk.f32.mxu0 %vm799_vm1, %v1071_v56 }
 0x386   : > { %2587 = vmatprep.subr.msk.bf16.mxu0 %vm2905_vm2, %v2585_v2 }
 0x38c   : > { %2467 = vmatmul.mubr.msk.f32.vlgmr.msra.gmra.mrb[6].mxu0 %vm799_vm1, %v1073_v3 }
 0x38d   : > { %2590 = vmatpush3.bf16.xpose.msk.msra.mxu0 %vm2905_vm2, %v2585_v2  ;;  %2485 = vmatprep.mubr.msk.f32.mxu0 %vm799_vm1, %v1356_v4 }
 0x394   : > { %2486 = vmatmul.mubr.msk.f32.vlgmr.msra.gmra.mrb[8].mxu0 %vm799_vm1, %v1358_v5 }
 0x457   : > { %v2456_v9 = vpop.f32.mrb[4].mxu0 }
 0x458   : > { %v978_v10 = vpop.f32.mrb[5].mxu0 }
 0x459   : > { %2459 = vmatprep.mubr.msk.f32.mxu1 %vm799_vm1, %v978_v10 }
 0x45a   : > { %2460 = vmatmul.mubr.msk.f32.vlgmr.msra.gmra.mrb[2].mxu1 %vm799_vm1, %v2456_v9 }
 0x45f   : > { %v2468_v11 = vpop.f32.mrb[6].mxu0 }
 0x460   : > { %v1158_v12 = vadd.f32 %v2468_v11, %v2919_v29  ;;  %v1152_v13 = vpop.f32.mrb[7].mxu0 }
 0x461   : > { %v1153_v15 = vadd.f32 %v2919_v29, %v1152_v13 }
 0x462   : > { %v1164_v18 = vsel %vm883_vm3, %v1158_v12, -inf }
 0x463   : > { %1165 = vmax.xlane.f32.xlu0 %v1164_v18  ;;  %v1161_v19 = vsel %vm883_vm3, %v1153_v15, -inf }
 0x464   : > { %1162 = vmax.xlane.f32.xlu1 %v1161_v19 }
 0x467   : > { %v2487_v20 = vpop.f32.mrb[8].mxu0 }
 0x468   : > { %v1437_v21 = vpop.f32.mrb[9].mxu0  ;;  %v1443_v23 = vadd.f32 %v2487_v20, %v2919_v29 }
 0x469   : > { %v1438_v44 = vadd.f32 %v2919_v29, %v1437_v21  ;;  %v776_v21 = vld [vmem:[%s3110_s7 + $0x10] sm:$0xff] }
 0x46a   : > { %v1449_v24 = vsel %vm883_vm3, %v1443_v23, -inf }
 0x46b   : > { %v1446_v45 = vsel %vm883_vm3, %v1438_v44, -inf }
 0x479   : > { %2668 = vrot.lane.b32.xlu0 %v2971_v22, %s2737_s20 }
 0x47d   : > { %1640 = vrot.lane.b32.xlu0 %v2878_v14, %s2740_s27 }
 0x49c   : > { %1450 = vmax.xlane.f32.xlu0 %v1449_v24 }
 0x4f0   : > { %v1166_v25 = vpop.xlane.xlu0 %1165 }
 0x4f1   : > { %v1168_v26 = vsub.f32 %v1158_v12, %v1166_v25  ;;  %v1163_v28 = vpop.xlane.xlu1 %1162 }
 0x4f2   : > { %v1167_v30 = vsub.f32 %v1153_v15, %v1163_v28 }
 0x4f3   : > { %v1171_v31 = vmul.f32 1.442695, %v1168_v26 }
 0x4f4   : > { %v1169_v32 = vmul.f32 1.442695, %v1167_v30  ;;  %v2669_v33 = vpop.permute.xlu0 %2668 }
 0x4f5   : > { %v2671_v34 = vunpack.i.h.bf16 %v2669_v33  ;;  %v2670_v35 = vunpack.i.l.bf16 %v2669_v33 }
 0x4f6   : > { %2695 = vpow2.f32 %v1169_v32 }
 0x4f7   : > { %v2581_v36 = vpack.c.bf16 %v2671_v34, %v2670_v35  ;;  %2697 = vpow2.f32 %v1171_v31 }
 0x4f8   : > { %v1641_v40 = vpop.permute.xlu0 %1640 }
 0x4f9   : > { %2582 = vmatprep.subr.bf16.mxu1 %v2581_v36 }
 0x4fa   : > { %2584 = vmatpush3.bf16.msra.mxu1 %v2581_v36 }
 0x4fb   : > { %2476 = vmatprep.subr.mxu1 %v775_v62 }
 0x500   : > { %v2696_v14 = vpop.eup %2695 }
 0x501   : > { %v1173_v37 = vsel %vm883_vm3, %v2696_v14, 0.0  ;;  %v2698_v38 = vpop.eup %2697 }
 0x502   : > { %1174 = vadd.xlane.f32.xlu1 %v1173_v37  ;;  %v1176_v39 = vsel %vm883_vm3, %v2698_v38, 0.0 }
 0x506   : > { %1177 = vadd.xlane.f32.xlu1 %v1176_v39 }
 0x517   : > { %2673 = vrot.lane.b32.xlu1 %v2886_v17, %s2741_s28 }
 0x51b   : > { %1638 = vrot.lane.b32.xlu1 %v2880_v16, %s2740_s27 }
 0x529   : > { %v1451_v41 = vpop.xlane.xlu0 %1450 }
 0x52a   : > { %v1453_v42 = vsub.f32 %v1443_v23, %v1451_v41  ;;  %v777_v41 = vld [vmem:[%s3110_s7 + $0x18] sm:$0xff] }
 0x52c   : > { %v1456_v43 = vmul.f32 1.442695, %v1453_v42 }
 0x52e   : > { %2699 = vpow2.f32 %v1456_v43 }
 0x538   : > { %v2700_v46 = vpop.eup %2699 }
 0x539   : > { %v1461_v47 = vsel %vm883_vm3, %v2700_v46, 0.0 }
 0x53f   : > { %1447 = vmax.xlane.f32.xlu1 %v1446_v45 }
 0x543   : > { %1462 = vadd.xlane.f32.xlu1 %v1461_v47  ;;  %v2300_v47 = vld [vmem:[%s3111_s8] ss:$0 sm:$0xff] }
 0x58f   : > { %v1175_v48 = vpop.xlane.xlu1 %1174 }
 0x590   : > { %2701 = vrcp.f32 %v1175_v48 }
 0x593   : > { %v1178_v17 = vpop.xlane.xlu1 %1177 }
 0x594   : > { %2703 = vrcp.f32 %v1178_v17 }
 0x597   : > { %v2674_v49 = vpop.permute.xlu1 %2673 }
 0x598   : > { %v2676_v16 = vunpack.i.h.bf16 %v2674_v49  ;;  %v2675_v50 = vunpack.i.l.bf16 %v2674_v49 }
 0x59a   : > { %v2702_v51 = vpop.eup %2701  ;;  %v2595_v52 = vpack.c.bf16 %v2676_v16, %v2675_v50 }
 0x59b   : > { %v1639_v53 = vpop.permute.xlu1 %1638  ;;  %v1181_v54 = vmul.f32 %v2702_v51, %v2696_v14 }
 0x59c   : > { %2597 = vmatprep.subr.msk.bf16.mxu0 %vm2905_vm2, %v2595_v52  ;;  %2504 = vmatprep.mubr.msk.f32.mxu0 %vm799_vm1, %v1639_v53 }
 0x59d   : > { %2473 = vmatprep.mubr.msk.f32.mxu1 %vm883_vm3, %v1181_v54  ;;  %2600 = vmatpush3.bf16.xpose.msk.msra.mxu0 %vm2905_vm2, %v2595_v52 }
 0x59e   : > { %v2704_v55 = vpop.eup %2703 }
 0x59f   : > { %v1182_v56 = vmul.f32 %v2704_v55, %v2698_v38 }
 0x5a1   : > { %2474 = vmatmul.mubr.msk.f32.vlgmr.msra.gmra.mrb[4].mxu1 %vm883_vm3, %v1182_v56 }
 0x5a2   : > { %2477 = vmatpush3.msra.mxu1 %v775_v62 }
 0x5a4   : > { %2505 = vmatmul.mubr.msk.f32.vlgmr.msra.gmra.mrb[10].mxu0 %vm799_vm1, %v1641_v40 }
 0x5cc   : > { %v1448_v57 = vpop.xlane.xlu1 %1447 }
 0x5cd   : > { %v1452_v58 = vsub.f32 %v1438_v44, %v1448_v57 }
 0x5cf   : > { %v1454_v59 = vmul.f32 1.442695, %v1452_v58 }
 0x5d0   : > { %v1463_v27 = vpop.xlane.xlu1 %1462 }
 0x5d1   : > { %2705 = vpow2.f32 %v1454_v59 }
 0x5db   : > { %v2706_v60 = vpop.eup %2705 }
 0x5dc   : > { %v1458_v61 = vsel %vm883_vm3, %v2706_v60, 0.0 }
 0x5dd   : > { %1459 = vadd.xlane.f32.xlu0 %v1458_v61 }
 0x5f3   : > { %2678 = vrot.lane.b32.xlu0 %v2971_v22, %s2739_s22 }
 0x66a   : > { %v1460_v63 = vpop.xlane.xlu0 %1459 }
 0x66b   : > { %2707 = vrcp.f32 %v1460_v63 }
 0x66c   : > { %2709 = vrcp.f32 %v1463_v27  ;;  %v1969_v27 = vld [vmem:[%s3114_s11 + $0x8] sm:$0xff] }
 0x66e   : > { %v2679_v0 = vpop.permute.xlu0 %2678 }
 0x66f   : > { %v2681_v1 = vunpack.i.h.bf16 %v2679_v0  ;;  %v2680_v2 = vunpack.i.l.bf16 %v2679_v0  ;;  %v1970_v0 = vld [vmem:[%s3114_s11 + $0x10] sm:$0xff] }
 0x671   : > { %v2591_v3 = vpack.c.bf16 %v2681_v1, %v2680_v2  ;;  %v1971_v1 = vld [vmem:[%s3114_s11 + $0x18] sm:$0xff] }
 0x672   : > { %v2609_v2 = vpack.c.bf16 %v1971_v1, %v1970_v0  ;;  %v2342_v0 = vld [vmem:[%s3118_s15] ss:$0 sm:$0xff] }
 0x673   : > { %2592 = vmatprep.subr.bf16.mxu1 %v2591_v3 }
 0x674   : > { %v2475_v4 = vpop.f32.mrb[4].mxu1 }
 0x675   : > { %v2708_v5 = vpop.eup %2707  ;;  %v1263_v8 = vpop.f32.mrb[5].mxu1 }
 0x676   : > { %v2710_v9 = vpop.eup %2709  ;;  %2478 = vmatprep.mubr.msk.f32.mxu1 %vm799_vm1, %v1263_v8  ;;  %v1466_v10 = vmul.f32 %v2708_v5, %v2706_v60  ;;  %v2064_v5 = vld [vmem:[%s3116_s13 + $0x10] sm:$0xff] }
 0x677   : > { %2479 = vmatmul.mubr.msk.f32.vlgmr.msra.gmra.mrb[2].mxu1 %vm799_vm1, %v2475_v4  ;;  %v2506_v11 = vpop.f32.mrb[10].mxu0  ;;  %v1467_v13 = vmul.f32 %v2710_v9, %v2700_v46  ;;  %v2063_v4 = vld [vmem:[%s3116_s13 + $0x8] sm:$0xff]  ;;  %v2065_v9 = vld [vmem:[%s3116_s13 + $0x18] sm:$0xff] }
 0x678   : > { %2594 = vmatpush3.bf16.msra.mxu1 %v2591_v3  ;;  %2492 = vmatprep.mubr.msk.f32.mxu1 %vm883_vm3, %v1466_v10  ;;  %v1720_v12 = vpop.f32.mrb[11].mxu0  ;;  %v1726_v18 = vadd.f32 %v2506_v11, %v2919_v29  ;;  %v2062_v3 = vld [vmem:[%s3116_s13] sm:$0xff]  ;;  %v2617_v10 = vpack.c.bf16 %v2065_v9, %v2064_v5 }
 0x679   : > { %v1721_v15 = vadd.f32 %v2919_v29, %v1720_v12  ;;  %2495 = vmatprep.subr.mxu1 %v776_v21  ;;  %v2613_v8 = vpack.c.bf16 %v2063_v4, %v2062_v3  ;;  %v2066_v11 = vld [vmem:[%s3116_s13 + $0x20] sm:$0xff]  ;;  %v2067_v12 = vld [vmem:[%s3116_s13 + $0x28] sm:$0xff] }
 0x67a   : > { %v1732_v20 = vsel %vm883_vm3, %v1726_v18, -inf }
 0x67b   : > { %2493 = vmatmul.mubr.msk.f32.vlgmr.msra.gmra.mrb[6].mxu1 %vm883_vm3, %v1467_v13  ;;  %v1729_v19 = vsel %vm883_vm3, %v1721_v15, -inf  ;;  %v2621_v13 = vpack.c.bf16 %v2067_v12, %v2066_v11 }
 0x67c   : > { %1730 = vmax.xlane.f32.xlu1 %v1729_v19  ;;  %2496 = vmatpush3.msra.mxu1 %v776_v21 }
 0x680   : > { %1733 = vmax.xlane.f32.xlu1 %v1732_v20 }
 0x709   : > { %v1731_v23 = vpop.xlane.xlu1 %1730 }
 0x70a   : > { %v1735_v24 = vsub.f32 %v1721_v15, %v1731_v23 }
 0x70c   : > { %v1737_v28 = vmul.f32 1.442695, %v1735_v24 }
 0x70d   : > { %v1734_v25 = vpop.xlane.xlu1 %1733 }
 0x70e   : > { %v1736_v26 = vsub.f32 %v1726_v18, %v1734_v25  ;;  %v2334_v25 = vld [vmem:[%s3112_s9] ss:$0 sm:$0xff] }
 0x710   : > { %v1739_v29 = vmul.f32 1.442695, %v1736_v26 }
 0x712   : > { %2711 = vpow2.f32 %v1739_v29 }
 0x713   : > { %2713 = vpow2.f32 %v1737_v28  ;;  %v2335_v28 = vld [vmem:[%s3113_s10] ss:$0 sm:$0xff] }
 0x71c   : > { %v2712_v30 = vpop.eup %2711 }
 0x71d   : > { %v1744_v31 = vsel %vm883_vm3, %v2712_v30, 0.0  ;;  %v2714_v32 = vpop.eup %2713 }
 0x71e   : > { %1745 = vadd.xlane.f32.xlu1 %v1744_v31  ;;  %v1741_v33 = vsel %vm883_vm3, %v2714_v32, 0.0 }
 0x722   : > { %1742 = vadd.xlane.f32.xlu1 %v1741_v33 }
 0x733   : > { %2683 = vrot.lane.b32.xlu1 %v2971_v22, %s2740_s27 }
 0x74e   : > { %v2494_v34 = vpop.f32.mrb[6].mxu1 }
 0x74f   : > { %v1546_v35 = vpop.f32.mrb[7].mxu1 }
 0x750   : > { %2497 = vmatprep.mubr.msk.f32.mxu1 %vm799_vm1, %v1546_v35  ;;  %v2068_v35 = vld [vmem:[%s3116_s13 + $0x30] sm:$0xff] }
 0x751   : > { %2498 = vmatmul.mubr.msk.f32.vlgmr.msra.gmra.mrb[2].mxu1 %vm799_vm1, %v2494_v34 }
 0x7ab   : > { %v1746_v36 = vpop.xlane.xlu1 %1745 }
 0x7ac   : > { %2715 = vrcp.f32 %v1746_v36  ;;  %v2069_v36 = vld [vmem:[%s3116_s13 + $0x38] sm:$0xff] }
 0x7af   : > { %v1743_v14 = vpop.xlane.xlu1 %1742 }
 0x7b0   : > { %2717 = vrcp.f32 %v1743_v14  ;;  %v2625_v14 = vpack.c.bf16 %v2069_v36, %v2068_v35 }
 0x7b3   : > { %v2684_v37 = vpop.permute.xlu1 %2683 }
 0x7b4   : > { %v2686_v38 = vunpack.i.h.bf16 %v2684_v37  ;;  %v2685_v39 = vunpack.i.l.bf16 %v2684_v37  ;;  %v2336_v37 = vld [vmem:[%s3115_s12] ss:$0 sm:$0xff] }
 0x7b6   : > { %v2601_v40 = vpack.c.bf16 %v2686_v38, %v2685_v39  ;;  %v2716_v22 = vpop.eup %2715 }
 0x7b7   : > { %v1750_v44 = vmul.f32 %v2716_v22, %v2712_v30 }
 0x7b8   : > { %2602 = vmatprep.subr.bf16.mxu1 %v2601_v40 }
 0x7b9   : > { %2604 = vmatpush3.bf16.msra.mxu1 %v2601_v40 }
 0x7ba   : > { %v2718_v42 = vpop.eup %2717  ;;  %2514 = vmatprep.subr.mxu1 %v777_v41 }
 0x7bb   : > { %v1749_v43 = vmul.f32 %v2718_v42, %v2714_v32 }
 0x7bd   : > { %2511 = vmatprep.mubr.msk.f32.mxu1 %vm883_vm3, %v1749_v43  ;;  %v2339_v43 = vld [vmem:[%s3117_s14] ss:$0 sm:$0xff] }
 0x7be   : > { %2512 = vmatmul.mubr.msk.f32.vlgmr.msra.gmra.mrb[8].mxu1 %vm883_vm3, %v1750_v44 }
 0x7bf   : > { %2515 = vmatpush3.msra.mxu1 %v777_v41 }
 0x7c0   : > { %2614 = vmatprep.subr.bf16.mxu1 %v2613_v8 }
 0x891   : > { %v2513_v45 = vpop.f32.mrb[8].mxu1 }
 0x892   : > { %v1829_v46 = vpop.f32.mrb[9].mxu1 }
 0x893   : > { %2516 = vmatprep.mubr.msk.f32.mxu1 %vm799_vm1, %v1829_v46 }
 0x894   : > { %2517 = vmatmul.mubr.msk.f32.vlgmr.msra.gmra.mrb[2].mxu1 %vm799_vm1, %v2513_v45 }
 0x895   : > { %2616 = vmatpush3.bf16.msra.mxu1 %v2613_v8 }
 0x896   : > { %2618 = vmatprep.subr.bf16.mxu1 %v2617_v10 }
 0x899   : > { %2620 = vmatpush3.bf16.msra.mxu1 %v2617_v10 }
 0x89a   : > { %2622 = vmatprep.subr.bf16.mxu1 %v2621_v13 }
 0x89d   : > { %2624 = vmatpush3.bf16.msra.mxu1 %v2621_v13 }
 0x89e   : > { %2626 = vmatprep.subr.bf16.mxu1 %v2625_v14 }
 0x8a1   : > { %2628 = vmatpush3.bf16.msra.mxu1 %v2625_v14 }
 0x967   : > { %v2518_v48 = vpop.f32.mrb[2].mxu1 }
 0x968   : > { %v2629_v17 = vadd.f32 %v2518_v48, %v2300_v47  ;;  %v1910_v49 = vpop.f32.mrb[3].mxu1 }
 0x969   : > { %v2630_v16 = vadd.f32 %v2300_v47, %v1910_v49 }
 0x96a   : > { %v1922_v50 = vadd.f32 %v2629_v17, %v2867_v7 }
 0x96b   : > { %v1921_v51 = vadd.f32 %v2630_v16, %v2865_v6  ;;  %v1968_v6 = vld [vmem:[%s3114_s11] sm:$0xff] }
 0x96c   : > { %v1928_v52 = vsel %vm600_vm0, %v1922_v50, 0.0  ;;  %v2605_v63 = vpack.c.bf16 %v1969_v27, %v1968_v6 }
 0x96d   : > { %1929 = vadd.xlane.f32.xlu1 %v1928_v52  ;;  %v1925_v53 = vsel %vm600_vm0, %v1921_v51, 0.0 }
 0x96e   : > { %1926 = vadd.xlane.f32.xlu0 %v1925_v53  ;;  %2606 = vmatprep.subr.bf16.mxu0 %v2605_v63 }
 0x96f   : > { %2608 = vmatpush3.bf16.msra.mxu0 %v2605_v63 }
 0x970   : > { %2610 = vmatprep.subr.bf16.mxu0 %v2609_v2 }
 0x973   : > { %2612 = vmatpush3.bf16.msra.mxu0 %v2609_v2  ;;  %v2343_v2 = vld [vmem:[%s3119_s16] ss:$0 sm:$0xff] }
 0x9fa   : > { %v1930_v54 = vpop.xlane.xlu1 %1929 }
 0x9fb   : > { %v1933_v55 = vmul.f32 0.03125, %v1930_v54  ;;  %v1927_v56 = vpop.xlane.xlu0 %1926 }
 0x9fc   : > { %v1932_v57 = vmul.f32 0.03125, %v1927_v56 }
 0x9fd   : > { %v1935_v58 = vsub.f32 %v1922_v50, %v1933_v55 }
 0x9fe   : > { %v1934_v59 = vsub.f32 %v1921_v51, %v1932_v57 }
 0x9ff   : > { %v1937_v62 = vmul.f32 %v1935_v58, %v1935_v58 }
 0xa00   : > { %v1936_v60 = vmul.f32 %v1934_v59, %v1934_v59 }
 0xa01   : > { %v1941_v7 = vsel %vm600_vm0, %v1937_v62, 0.0 }
 0xa02   : > { %v1938_v61 = vsel %vm600_vm0, %v1936_v60, 0.0 }
 0xa03   : > { %1939 = vadd.xlane.f32.xlu0 %v1938_v61 }
 0xa07   : > { %1942 = vadd.xlane.f32.xlu0 %v1941_v7 }
 0xa90   : > { %v1940_v15 = vpop.xlane.xlu0 %1939 }
 0xa91   : > { %v1944_v18 = vmul.f32 0.03125, %v1940_v15 }
 0xa93   : > { %v1946_v19 = vadd.f32 1e-05, %v1944_v18 }
 0xa94   : > { %v1943_v20 = vpop.xlane.xlu0 %1942 }
 0xa95   : > { %2719 = vrsqrt.f32 %v1946_v19  ;;  %v1945_v21 = vmul.f32 0.03125, %v1943_v20 }
 0xa97   : > { %v1947_v23 = vadd.f32 1e-05, %v1945_v21 }
 0xa99   : > { %2721 = vrsqrt.f32 %v1947_v23 }
 0xa9f   : > { %v2720_v24 = vpop.eup %2719 }
 0xaa0   : > { %v1950_v26 = vmul.f32 %v2720_v24, %v1934_v59 }
 0xaa2   : > { %v1958_v29 = vmul.f32 %v2334_v25, %v1950_v26 }
 0xaa3   : > { %v2722_v30 = vpop.eup %2721 }
 0xaa4   : > { %v1951_v31 = vmul.f32 %v2722_v30, %v1935_v58  ;;  %v1966_v32 = vadd.f32 %v2335_v28, %v1958_v29 }
 0xaa6   : > { %v1959_v33 = vmul.f32 %v2334_v25, %v1951_v31  ;;  %2527 = vmatprep.mubr.msk.f32.mxu0 %vm600_vm0, %v1966_v32 }
 0xaa8   : > { %v1967_v34 = vadd.f32 %v2335_v28, %v1959_v33 }
 0xaaa   : > { %2528 = vmatmul.mubr.msk.f32.vlgmr.msra.gmra.mrb[12].mxu0 %vm600_vm0, %v1967_v34 }
 0xb7d   : > { %v2529_v38 = vpop.f32.mrb[12].mxu0 }
 0xb7e   : > { %v2057_v39 = vadd.f32 %v2529_v38, %v2336_v37  ;;  %v2051_v40 = vpop.f32.mrb[13].mxu0 }
 0xb7f   : > { %v2052_v41 = vadd.f32 %v2336_v37, %v2051_v40 }
 0xb80   : > { %v2061_v42 = vmax.f32 %v2057_v39, 0.0 }
 0xb81   : > { %v2060_v22 = vmax.f32 %v2052_v41, 0.0 }
 0xb83   : > { %2546 = vmatprep.mubr.msk.f32.mxu1 %vm2077_vm4, %v2060_v22 }
 0xb84   : > { %2547 = vmatmul.mubr.msk.f32.vlgmr.msra.gmra.mrb[10].mxu1 %vm2077_vm4, %v2061_v42 }
 0xc57   : > { %v2548_v44 = vpop.f32.mrb[10].mxu1 }
 0xc58   : > { %v2150_v45 = vpop.f32.mrb[11].mxu1  ;;  %v2156_v46 = vadd.f32 %v2548_v44, %v2339_v43 }
 0xc59   : > { %v2151_v47 = vadd.f32 %v2339_v43, %v2150_v45 }
 0xc5a   : > { %v2160_v49 = vadd.f32 %v2156_v46, %v1967_v34 }
 0xc5b   : > { %v2159_v48 = vadd.f32 %v2151_v47, %v1966_v32 }
 0xc5c   : > { %v2166_v16 = vsel %vm600_vm0, %v2160_v49, 0.0 }
 0xc5d   : > { %v2163_v17 = vsel %vm600_vm0, %v2159_v48, 0.0 }
 0xc5e   : > { %2164 = vadd.xlane.f32.xlu0 %v2163_v17 }
 0xc62   : > { %2167 = vadd.xlane.f32.xlu0 %v2166_v16 }
 0xceb   : > { %v2165_v50 = vpop.xlane.xlu0 %2164 }
 0xcec   : > { %v2169_v51 = vmul.f32 0.03125, %v2165_v50 }
 0xcee   : > { %v2171_v52 = vsub.f32 %v2159_v48, %v2169_v51 }
 0xcef   : > { %v2168_v53 = vpop.xlane.xlu0 %2167 }
 0xcf0   : > { %v2170_v54 = vmul.f32 0.03125, %v2168_v53  ;;  %v2173_v55 = vmul.f32 %v2171_v52, %v2171_v52 }
 0xcf2   : > { %v2172_v56 = vsub.f32 %v2160_v49, %v2170_v54  ;;  %v2175_v57 = vsel %vm600_vm0, %v2173_v55, 0.0 }
 0xcf3   : > { %2176 = vadd.xlane.f32.xlu0 %v2175_v57 }
 0xcf4   : > { %v2174_v58 = vmul.f32 %v2172_v56, %v2172_v56 }
 0xcf6   : > { %v2178_v59 = vsel %vm600_vm0, %v2174_v58, 0.0 }
 0xcf7   : > { %2179 = vadd.xlane.f32.xlu1 %v2178_v59 }
 0xd80   : > { %v2177_v60 = vpop.xlane.xlu0 %2176 }
 0xd81   : > { %v2181_v61 = vmul.f32 0.03125, %v2177_v60 }
 0xd83   : > { %v2183_v62 = vadd.f32 1e-05, %v2181_v61 }
 0xd84   : > { %v2180_v7 = vpop.xlane.xlu1 %2179 }
 0xd85   : > { %2723 = vrsqrt.f32 %v2183_v62  ;;  %v2182_v6 = vmul.f32 0.03125, %v2180_v7 }
 0xd87   : > { %v2184_v27 = vadd.f32 1e-05, %v2182_v6 }
 0xd89   : > { %2725 = vrsqrt.f32 %v2184_v27 }
 0xd8f   : > { %v2724_v63 = vpop.eup %2723 }
 0xd90   : > { %v2187_v1 = vmul.f32 %v2724_v63, %v2171_v52 }
 0xd92   : > { %v2195_v3 = vmul.f32 %v2342_v0, %v2187_v1 }
 0xd93   : > { %v2726_v4 = vpop.eup %2725 }
 0xd94   : > { %v2203_v5 = vadd.f32 %v2343_v2, %v2195_v3  ;;  %v2188_v8 = vmul.f32 %v2726_v4, %v2172_v56 }
 0xd96   : > { %2205 = vst.msk [vmem:[%s582_s21] sm:$0xff] %vm600_vm0, %v2203_v5  ;;  %v2196_v9 = vmul.f32 %v2342_v0, %v2188_v8 }
 0xd98   : > { %v2204_v10 = vadd.f32 %v2343_v2, %v2196_v9 }
 0xd9a   : > { %2206 = vst.msk [vmem:[%s582_s21 + $0x8] sm:$0xff] %vm600_vm0, %v2204_v10 }
 0xd9b PF: > { %s27_s24 = sadd.s32 1, %s2733_s24  }
 0xd9c   : > { %p24_p4 = scmp.ge.s32.totalorder %s27_s24, 4  }
 0xd9e   :  { %26 = sbr.rel (!%p24_p4) target bundleno = 3 (0x3), region = 124 }

// kernel: transformer_forward.6
= control target key start
LH: loop header
LB: loop body
LE: loop exit
PB: predicated region body
PF: predicated region fallthrough
CT: control target
= control target key end

     0   :  { %s4761_s6 = smov 1   ;;  %s4762_s10 = smov 2   ;;  %s5405_s0 = inlined_call_operand.smem [shape: u32[31], index: -1, kind: input, shape index: {}] }
   0x1   :  { %s4814_s5 = sld [smem:[%s5405_s0]]   ;;  %s4763_s14 = smov 3  }
   0x2   :  { %s4819_s9 = sld [smem:[%s5405_s0 + %s4761_s6]]   ;;  %s4764_s18 = smov 4  }
   0x3   :  { %s4824_s13 = sld [smem:[%s5405_s0 + %s4762_s10]]   ;;  %s4765_s22 = smov 5  }
   0x4   :  { %s4829_s17 = sld [smem:[%s5405_s0 + %s4763_s14]]   ;;  %s4766_s26 = smov 6  }
   0x5   :  { %s4834_s21 = sld [smem:[%s5405_s0 + %s4764_s18]]   ;;  %s4767_s30 = smov 7  }
   0x6   :  { %s4839_s25 = sld [smem:[%s5405_s0 + %s4765_s22]]   ;;  %s4768_s4 = smov 8  }
   0x7   :  { %s4844_s29 = sld [smem:[%s5405_s0 + %s4766_s26]]   ;;  %s4769_s10 = smov 9  }
   0x8   :  { %s4849_s3 = sld [smem:[%s5405_s0 + %s4767_s30]]   ;;  %s4770_s15 = smov 10  }
   0x9   :  { %s4854_s8 = sld [smem:[%s5405_s0 + %s4768_s4]]   ;;  %s4771_s20 = smov 11  }
   0xa   :  { %s4859_s14 = sld [smem:[%s5405_s0 + %s4769_s10]]   ;;  %s4772_s26 = smov 12  }
   0xb   :  { %5413 = sst [smem:[#allocation16_spill]] %s4834_s21  ;;  %s4773_s1 = smov 13  }
   0xc   :  { %s4864_s19 = sld [smem:[%s5405_s0 + %s4770_s15]]   ;;  %s4774_s7 = smov 14  }
   0xd   :  { %s4869_s24 = sld [smem:[%s5405_s0 + %s4771_s20]]   ;;  %s4775_s15 = smov 15  }
   0xe   :  { %s4874_s30 = sld [smem:[%s5405_s0 + %s4772_s26]]   ;;  %s4776_s22 = smov 16  }
   0xf   :  { %s4879_s6 = sld [smem:[%s5405_s0 + %s4773_s1]]   ;;  %s4777_s28 = smov 17  }
  0x10   :  { %s4884_s12 = sld [smem:[%s5405_s0 + %s4774_s7]]   ;;  %s4778_s7 = smov 18  }
  0x11   :  { %s4889_s20 = sld [smem:[%s5405_s0 + %s4775_s15]]   ;;  %s4779_s15 = smov 19  }
  0x12   :  { %s4894_s27 = sld [smem:[%s5405_s0 + %s4776_s22]]   ;;  %s4780_s22 = smov 20  }
  0x13   :  { %5414 = sst [smem:[#allocation17_spill]] %s4869_s24 }
  0x14   :  { %5415 = sst [smem:[#allocation18_spill]] %s4874_s30 }
  0x15   :  { %5416 = sst [smem:[#allocation19_spill]] %s4879_s6 }
  0x16   :  { %5417 = sst [smem:[#allocation20_spill]] %s4884_s12 }
  0x17   :  { %s4899_s4 = sld [smem:[%s5405_s0 + %s4777_s28]]   ;;  %s4781_s28 = smov 22  }
  0x18   :  { %5418 = sst [smem:[#allocation21_spill]] %s4894_s27 }
  0x19   :  { %s4904_s21 = sld [smem:[%s5405_s0 + %s4778_s7]]   ;;  %s4782_s7 = smov 23  }
  0x1a   :  { %s4909_s12 = sld [smem:[%s5405_s0 + %s4779_s15]]   ;;  %s4783_s15 = smov 24  }
  0x1b   :  { %s4914_s27 = sld [smem:[%s5405_s0 + %s4780_s22]]   ;;  %s4784_s22 = smov 25  }
  0x1d   :  { %5419 = sst [smem:[#allocation22_spill]] %s4899_s4 }
  0x1e   :  { %s4919_s4 = sld [smem:[%s5405_s0 + %s4781_s28]]   ;;  %s4785_s28 = smov 26  }
  0x1f   :  { %5420 = sst [smem:[#allocation23_spill]] %s4904_s21 }
  0x20   :  { %5421 = sst [smem:[#allocation24_spill]] %s4909_s12 }
  0x21   :  { %5422 = sst [smem:[#allocation25_spill]] %s4914_s27 }
  0x22   :  { %s4924_s21 = sld [smem:[%s5405_s0 + %s4782_s7]]   ;;  %s4786_s7 = smov 27  }
  0x23   :  { %s4929_s12 = sld [smem:[%s5405_s0 + %s4783_s15]]   ;;  %s4787_s15 = smov 28  }
  0x24   :  { %s4934_s27 = sld [smem:[%s5405_s0 + %s4784_s22]]   ;;  %s4788_s22 = smov 29  }
  0x25   :  { %s4939_s30 = sld [smem:[%s5405_s0 + %s4785_s28]]   ;;  %s4789_s28 = smov 30  }
  0x26   :  { %s4944_s24 = sld [smem:[%s5405_s0 + %s4786_s7]]  }
  0x27   :  { %s4954_s6 = sld [smem:[%s5405_s0 + %s4788_s22]]  }
  0x29   :  { %5423 = sst [smem:[#allocation26_spill]] %s4929_s12 }
  0x2a   :  { %s4949_s12 = sld [smem:[%s5405_s0 + %s4787_s15]]  }
  0x2b   :  { %5424 = sst [smem:[#allocation27_spill]] %s4939_s30 }
  0x2c   :  { %s4959_s30 = sld [smem:[%s5405_s0 + %s4789_s28]]  }
  0x2d   :  { %66 = vsyncpa [#allocation3], 0 }
  0x2e   :  { %67 = vsyncpa [#allocation5], 0 }
  0x2f   :  { %68 = vsyncpa [#allocation8], 0 }
  0x30   :  { %69 = vsyncpa [#allocation11], 0  ;;  %s4961_s7 = smov 0  }
  0x31 LB: > { %s4790_s10 = smov [#allocation4]   ;;  %s4967_s15 = sadd.s32 4294967295, %s4759_s7   ;;  %s4759_s7 = sphi %s4961_s7, %s75_s7  }
  0x32   : > { %s834_s11 = sshll.u32 %s4790_s10, 4  ;;  %p3909_p0 = scmp.ge.s32.totalorder %s4759_s7, 1  ;;  %s4972_s11 = int_to_ptr.vmem [resolvable:$true] %s834_s11 }
  0x33   : > { %p756_p1 = scmp.lt.s32.totalorder %s4759_s7, 3  ;;  %p5411_p2 = scmp.eq.s32.totalorder %s4967_s15, 0 }
  0x34   : > { %s4791_s16 = smov [#allocation7]   ;;  %s4792_s22 = smov [#allocation2]  }
  0x35   : > { %p4974_p3 = pnand %p3909_p0, %p756_p1  ;;  %s862_s18 = sshll.u32 %s4791_s16, 4  ;;  %s4980_s18 = int_to_ptr.vmem [resolvable:$true] %s862_s18 }
  0x36   : > { %s823_s23 = sshll.u32 %s4792_s22, 4  ;;  %s4793_s28 = smov [#allocation6]   ;;  %s4988_s23 = int_to_ptr.vmem [resolvable:$true] %s823_s23 }
  0x37   : > { %s5425_s0 = scalar_select %p4974_p3, 1, 0 }
  0x38   : > { %p4417_p4 = pneg %p4974_p3  ;;  %s848_s1 = sshll.u32 %s4793_s28, 4  ;;  %s4990_s1 = int_to_ptr.vmem [resolvable:$true] %s848_s1 }
  0x39   : > { %s4569_s2 = scalar_lea.hbm %s4924_s21, 16 }
  0x3a   : > { %p4984_p5 = pnand %p5411_p2, %p4417_p4  ;;  %p4570_p6 = scmp.ne.s32.totalorder %s4924_s21, %s4569_s2 }
  0x3b   : > { %p4576_p10 = scmp.lt.u32.totalorder %s4569_s2, %s4924_s21 }
  0x3c   : > { %p4996_p7 = pneg %p4984_p5 }
  0x3e   : > { %p4572_p8 = pnand %p4996_p7, %p4570_p6 }
  0x40   : > { %p4573_p9 = pneg %p4572_p8 }
  0x42   : > { %p4578_p11 = pnand %p4576_p10, %p4573_p9 }
  0x44   : > { %4581 = shalt.err (!%p4578_p11)
}
  0x45   : > { %s4582_s16 = scalar_lea.vmem %s4972_s11, 16  ;;  %s4589_s22 = scalar_lea.vmem %s4972_s11, 32 }
  0x46   : > { %p4583_p12 = scmp.ne.s32.totalorder %s4972_s11, %s4582_s16  ;;  %p4590_p1 = scmp.lt.s32.totalorder %s4972_s11, %s4972_s11 }
  0x47   : > { %p4591_p4 = scmp.lt.s32.totalorder %s4589_s22, %s4582_s16 }
  0x48   : > { %p4585_p13 = pnand %p4583_p12, %p4996_p7 }
  0x49   : > { %p4592_p2 = por %p4591_p4, %p4590_p1 }
  0x4a   : > { %p4586_p0 = pneg %p4585_p13 }
  0x4c   : > { %p4593_p6 = pnand %p4592_p2, %p4586_p0 }
  0x4e   : > { %4596 = shalt.err (!%p4593_p6)
}
  0x4f   : > { %4423 = dma.hbm_to_vmem [thread:$0]  (!%p4984_p5), %s4924_s21, 16, %s4972_s11, [#allocation5]  }
  0x50   : > { %s4597_s28 = scalar_lea.hbm %s4944_s24, 16 }
  0x51   : > { %p4598_p8 = scmp.ne.s32.totalorder %s4944_s24, %s4597_s28  ;;  %p4604_p11 = scmp.lt.u32.totalorder %s4597_s28, %s4944_s24 }
  0x53   : > { %p4600_p9 = pnand %p4598_p8, %p4996_p7 }
  0x55   : > { %p4601_p10 = pneg %p4600_p9 }
  0x57   : > { %p4606_p12 = pnand %p4604_p11, %p4601_p10 }
  0x59   : > { %4609 = shalt.err (!%p4606_p12)
}
  0x5a   : > { %s4610_s2 = scalar_lea.vmem %s4980_s18, 16  ;;  %s4617_s16 = scalar_lea.vmem %s4980_s18, 32 }
  0x5b   : > { %p4611_p2 = scmp.ne.s32.totalorder %s4980_s18, %s4610_s2  ;;  %p4618_p1 = scmp.lt.s32.totalorder %s4980_s18, %s4980_s18 }
  0x5c   : > { %p4619_p4 = scmp.lt.s32.totalorder %s4617_s16, %s4610_s2 }
  0x5d   : > { %p4613_p13 = pnand %p4611_p2, %p4996_p7 }
  0x5e   : > { %p4620_p6 = por %p4619_p4, %p4618_p1 }
  0x5f   : > { %p4614_p0 = pneg %p4613_p13 }
  0x61   : > { %p4621_p8 = pnand %p4620_p6, %p4614_p0 }
  0x63   : > { %4624 = shalt.err (!%p4621_p8)
}
  0x64   : > { %4429 = dma.hbm_to_vmem [thread:$0]  (!%p4984_p5), %s4944_s24, 16, %s4980_s18, [#allocation8]  }
  0x65   : > { %s4625_s11 = scalar_lea.hbm %s4919_s4, 16 }
  0x66   : > { %p4626_p9 = scmp.ne.s32.totalorder %s4919_s4, %s4625_s11  ;;  %p4632_p12 = scmp.lt.u32.totalorder %s4625_s11, %s4919_s4 }
  0x68   : > { %p4628_p10 = pnand %p4626_p9, %p4996_p7 }
  0x6a   : > { %p4629_p11 = pneg %p4628_p10 }
  0x6c   : > { %p4634_p2 = pnand %p4632_p12, %p4629_p11 }
  0x6e   : > { %4637 = shalt.err (!%p4634_p2)
}
  0x6f   : > { %s4638_s22 = scalar_lea.vmem %s4988_s23, 16  ;;  %s4645_s28 = scalar_lea.vmem %s4988_s23, 32 }
  0x70   : > { %p4639_p13 = scmp.ne.s32.totalorder %s4988_s23, %s4638_s22  ;;  %p4646_p4 = scmp.lt.s32.totalorder %s4988_s23, %s4988_s23 }
  0x71   : > { %p4647_p6 = scmp.lt.s32.totalorder %s4645_s28, %s4638_s22 }
  0x72   : > { %p4641_p0 = pnand %p4639_p13, %p4996_p7 }
  0x73   : > { %p4648_p8 = por %p4647_p6, %p4646_p4 }
  0x74   : > { %p4642_p1 = pneg %p4641_p0 }
  0x76   : > { %p4649_p9 = pnand %p4648_p8, %p4642_p1 }
  0x78   : > { %4652 = shalt.err (!%p4649_p9)
}
  0x79   : > { %4420 = dma.hbm_to_vmem [thread:$0]  (!%p4984_p5), %s4919_s4, 16, %s4988_s23, [#allocation3]  }
  0x7a   : > { %s4653_s18 = scalar_lea.hbm %s4934_s27, 16 }
  0x7b   : > { %p4654_p10 = scmp.ne.s32.totalorder %s4934_s27, %s4653_s18  ;;  %p4660_p2 = scmp.lt.u32.totalorder %s4653_s18, %s4934_s27 }
  0x7d   : > { %p4656_p11 = pnand %p4654_p10, %p4996_p7 }
  0x7f   : > { %p4657_p12 = pneg %p4656_p11 }
  0x81   : > { %p4662_p13 = pnand %p4660_p2, %p4657_p12 }
  0x83   : > { %4665 = shalt.err (!%p4662_p13)
}
  0x84   : > { %s4666_s2 = scalar_lea.vmem %s4990_s1, 16  ;;  %s4673_s16 = scalar_lea.vmem %s4990_s1, 32 }
  0x85   : > { %p4667_p0 = scmp.ne.s32.totalorder %s4990_s1, %s4666_s2  ;;  %p4674_p6 = scmp.lt.s32.totalorder %s4990_s1, %s4990_s1 }
  0x86   : > { %p4675_p8 = scmp.lt.s32.totalorder %s4673_s16, %s4666_s2 }
  0x87   : > { %p4669_p1 = pnand %p4667_p0, %p4996_p7 }
  0x88   : > { %p4676_p9 = por %p4675_p8, %p4674_p6 }
  0x89   : > { %p4670_p4 = pneg %p4669_p1 }
  0x8b   : > { %p4677_p10 = pnand %p4676_p9, %p4670_p4 }
  0x8d   : > { %4680 = shalt.err (!%p4677_p10)
}
  0x8e   : > { %4426 = dma.hbm_to_vmem [thread:$0]  (!%p4984_p5), %s4934_s27, 16, %s4990_s1, [#allocation5]  }
  0x8f   : > { %s4794_s23 = smov [#allocation9]   ;;  %s4795_s22 = smov [#allocation10]  }
  0x90   : > { %s873_s11 = sshll.u32 %s4794_s23, 4  ;;  %s884_s28 = sshll.u32 %s4795_s22, 4  ;;  %s874_s11 = int_to_ptr.vmem [resolvable:$true] %s873_s11  ;;  %s885_s28 = int_to_ptr.vmem [resolvable:$true] %s884_s28 }
  0x91   : > { %s4681_s18 = scalar_lea.hbm %s4949_s12, 16 }
  0x92   : > { %p4682_p11 = scmp.ne.s32.totalorder %s4949_s12, %s4681_s18  ;;  %p4688_p13 = scmp.lt.u32.totalorder %s4681_s18, %s4949_s12 }
  0x94   : > { %p4684_p12 = pnand %p4682_p11, %p4996_p7 }
  0x96   : > { %p4685_p2 = pneg %p4684_p12 }
  0x98   : > { %p4690_p0 = pnand %p4688_p13, %p4685_p2 }
  0x9a   : > { %4693 = shalt.err (!%p4690_p0)
}
  0x9b   : > { %s4694_s2 = scalar_lea.vmem %s874_s11, 16  ;;  %s4701_s1 = scalar_lea.vmem %s874_s11, 32 }
  0x9c   : > { %p4695_p1 = scmp.ne.s32.totalorder %s874_s11, %s4694_s2  ;;  %p4702_p8 = scmp.lt.s32.totalorder %s874_s11, %s874_s11 }
  0x9d   : > { %p4703_p9 = scmp.lt.s32.totalorder %s4701_s1, %s4694_s2 }
  0x9e   : > { %p4697_p4 = pnand %p4695_p1, %p4996_p7 }
  0x9f   : > { %p4704_p10 = por %p4703_p9, %p4702_p8 }
  0xa0   : > { %p4698_p6 = pneg %p4697_p4 }
  0xa2   : > { %p4705_p3 = pnand %p4704_p10, %p4698_p6 }
  0xa4   : > { %4708 = shalt.err (!%p4705_p3)
}
  0xa5   : > { %4432 = dma.hbm_to_vmem [thread:$0]  (!%p4984_p5), %s4949_s12, 16, %s874_s11, [#allocation8]  }
  0xa6   : > { %s4709_s16 = scalar_lea.hbm %s4954_s6, 16 }
  0xa7   : > { %p4710_p11 = scmp.ne.s32.totalorder %s4954_s6, %s4709_s16  ;;  %p4716_p13 = scmp.lt.u32.totalorder %s4709_s16, %s4954_s6 }
  0xa9   : > { %p4712_p12 = pnand %p4710_p11, %p4996_p7 }
  0xab   : > { %p4713_p2 = pneg %p4712_p12 }
  0xad   : > { %p4718_p0 = pnand %p4716_p13, %p4713_p2 }
  0xaf   : > { %4721 = shalt.err (!%p4718_p0)
}
  0xb0   : > { %s4722_s23 = scalar_lea.vmem %s885_s28, 16  ;;  %s4729_s22 = scalar_lea.vmem %s885_s28, 32 }
  0xb1   : > { %p4723_p3 = scmp.ne.s32.totalorder %s885_s28, %s4722_s23  ;;  %p4730_p6 = scmp.lt.s32.totalorder %s885_s28, %s885_s28 }
  0xb2   : > { %p4731_p8 = scmp.lt.s32.totalorder %s4729_s22, %s4722_s23 }
  0xb3   : > { %p4725_p1 = pnand %p4723_p3, %p4996_p7 }
  0xb4   : > { %p4732_p9 = por %p4731_p8, %p4730_p6 }
  0xb5   : > { %p4726_p4 = pneg %p4725_p1 }
  0xb7   : > { %p4733_p10 = pnand %p4732_p9, %p4726_p4 }
  0xb9   : > { %4736 = shalt.err (!%p4733_p10)
}
  0xba   : > { %4435 = dma.hbm_to_vmem [thread:$0]  (!%p4984_p5), %s4954_s6, 16, %s885_s28, [#allocation11]  }
  0xbb   : > { %p5428_p11 = scmp.ne.s32.totalorder %s5425_s0, 0 }
  0xbc   : > { %p5429_p12 = scmp.eq.s32.totalorder (!%p5428_p11), %s4967_s15, 0 }
  0xbd   : > { %926 = sbr.rel (%p5428_p11) target bundleno = 6392 (0x18f8), region = 140 }
  0xc4   : > { %4742 = dma.done.wait (%p5429_p12), [#allocation3], 16   ;;  %p5430_p2 = pmov %p5429_p12 }
  0xc6   : > { %4744 = vsyncadd (%p5430_p2), [#allocation3], 4294967280  ;;  %p5431_p7 = pmov %p5430_p2 }
  0xc7   : > { %p5432_p13 = pmov %p5430_p2 }
  0xc8   : > { %4746 = dma.done.wait (%p5431_p7), [#allocation5], 32  }
  0xc9   : > { %4748 = vsyncadd (%p5432_p13), [#allocation5], 4294967264  ;;  %p5433_p0 = pmov %p5430_p2 }
  0xcb   : > { %4750 = dma.done.wait (%p5433_p0), [#allocation8], 32   ;;  %p5434_p5 = pmov %p5433_p0 }
  0xcc   : > { %p5435_p3 = pmov %p5433_p0 }
  0xcd   : > { %4752 = vsyncadd (%p5434_p5), [#allocation8], 4294967264 }
  0xce   : > { %4754 = dma.done.wait (%p5435_p3), [#allocation11], 16   ;;  %p5436_p1 = pmov %p5433_p0 }
  0xcf   : > { %p1035_p4 = scmp.lt.s32.totalorder %s4967_s15, 1  ;;  %v4796_v0 = vmov 0.0|0.0   ;;  %vm4797_vm0 = vmmov 0   ;;  %v4798_v1 = vmov 0.0   ;;  %v1063_v2 = vld [vmem:[%s4839_s25] sm:$0xff]  ;;  %v1064_v3 = vld [vmem:[%s4839_s25 + $0x8] sm:$0xff] }
  0xd0   : > { %4756 = vsyncadd (%p5436_p1), [#allocation11], 4294967280  ;;  %4313 = vmatprep.subr.bf16.mxu0 %v4796_v0  ;;  %4100 = vmatprep.mubr.msk.f32.mxu0 %vm4797_vm0, %v4798_v1  ;;  %v1065_v4 = vld [vmem:[%s4839_s25 + $0x10] sm:$0xff]  ;;  %v4314_v5 = vpack.c.bf16 %v1064_v3, %v1063_v2  ;;  %v1066_v6 = vld [vmem:[%s4839_s25 + $0x18] sm:$0xff]  ;;  %vm1074_vm1 = vcmask 261120   ;;  %s4799_s10 = smov 120  }
  0xd1   : > { %s5452_s15 = smov (!%p1035_p4, %s4967_s15), 1  ;;  %4319 = vmatprep.subr.bf16.mxu1 %v4796_v0  ;;  %4111 = vmatprep.mubr.msk.f32.mxu1 %vm4797_vm0, %v4798_v1  ;;  %v4317_v7 = vpack.c.bf16 %v1066_v6, %v1065_v4  ;;  %v5121_v9 = vld [vmem:[%s4819_s9] sm:$0xff]  ;;  %v1149_v12 = vld [vmem:[%s4849_s3 + $0x8] sm:$0xff]  ;;  %v1150_v13 = vld [vmem:[%s4849_s3 + $0x10] sm:$0xff]  ;;  %s4800_s11 = smov 96   ;;  %vm1247_vm2 = vcmask 64512  }
  0xd2   : > { %s3924_s0 = sshll.u32 %s5452_s15, 3  ;;  %4315 = vmatpush3.bf16.msra.mxu0 %v4314_v5  ;;  %v1148_v11 = vld [vmem:[%s4849_s3] sm:$0xff]  ;;  %v1151_v15 = vld [vmem:[%s4849_s3 + $0x18] sm:$0xff]  ;;  %s4801_s28 = smov 88   ;;  %v1233_v56 = vld [vmem:[%s4859_s14 + $0x8] sm:$0xff]  ;;  %vm2598_vm4 = vcmask 130048  }
  0xd3   : > { %s1038_s26 = scalar_lea.vmem %s4814_s5, %s3924_s0  ;;  %4316 = vmatprep.subr.bf16.mxu0 %v4796_v0  ;;  %v4320_v14 = vpack.c.bf16 %v1149_v12, %v1148_v11  ;;  %v4323_v16 = vpack.c.bf16 %v1151_v15, %v1150_v13  ;;  %v3930_v17 = vld [vmem:[%s4844_s29] ss:$0 sm:$0xff]  ;;  %s4802_s18 = smov 80   ;;  %vm5257_vm3 = vmpackc.low %vm1247_vm2, %vm1247_vm2  ;;  %vm3627_vm5 = vcmask 523264  }
  0xd4   : > { %v5118_v8 = vld [vmem:[%s1038_s26] sm:$0xff]  ;;  %s4803_s2 = smov 112   ;;  %s4804_s1 = smov 104  }
  0xd5   : > { %v1062_v10 = vadd.f32 %v5121_v9, %v5118_v8  ;;  %4321 = vmatpush3.bf16.msra.mxu1 %v4320_v14  ;;  %v3932_v24 = vld [vmem:[%s4854_s8] ss:$0 sm:$0xff]  ;;  %s4805_s16 = smov 72   ;;  %s5437_s23 = sld [smem:[#allocation19_spill]] }
  0xd6   : > { %4318 = vmatpush3.bf16.msra.mxu0 %v4317_v7  ;;  %4322 = vmatprep.subr.bf16.mxu1 %v4796_v0  ;;  %v1232_v47 = vld [vmem:[%s4859_s14] sm:$0xff]  ;;  %s3993_s22 = sshll.u32 %s5452_s15, 4 }
  0xd7   : > { %4114 = vmatprep.subr.mxu0 %v4798_v1  ;;  %s1043_s26 = scalar_lea.vmem %s4824_s13, %s3993_s22 }
  0xd9   : > { %4101 = vmatmul.mubr.msk.f32.vlgmr.msra.gmra.mrb[0].mxu0 %vm1074_vm1, %v1062_v10  ;;  %4324 = vmatpush3.bf16.msra.mxu1 %v4323_v16  ;;  %v3934_v10 = vld [vmem:[%s4864_s19] ss:$0 sm:$0xff] }
  0xda   : > { %4116 = vmatprep.mubr.msk.f32.mxu0 %vm4797_vm0, %v4798_v1  ;;  %4129 = vmatprep.subr.mxu1 %v4798_v1 }
  0xdc   : > { %4112 = vmatmul.mubr.msk.f32.vlgmr.msra.gmra.mrb[0].mxu1 %vm1074_vm1, %v5118_v8 }
  0xdd   : > { %4131 = vmatprep.mubr.msk.f32.mxu1 %vm4797_vm0, %v4798_v1 }
 0x1ac   : > { %v1144_v18 = vpop.f32.mrb[0].mxu0 }
 0x1ad   : > { %v5141_v19 = vadd.f32 %v3930_v17, %v1144_v18  ;;  %v4102_v20 = vpop.f32.mrb[1].mxu0 }
 0x1ae   : > { %v1234_v20 = vld [vmem:[%s4859_s14 + $0x10] sm:$0xff] }
 0x1af   : > { %1480 = vrot.lane.b32.xlu1 %v5141_v19, %s4799_s10  ;;  %1245 = vrot.lane.b32.xlu0 %v5141_v19, %s4800_s11  ;;  %v1228_v25 = vpop.f32.mrb[0].mxu1  ;;  %s1048_s11 = scalar_lea.vmem %s4829_s17, %s3993_s22  ;;  %s5441_s22 = sld [smem:[#allocation20_spill]] }
 0x1b0   : > { %v5159_v26 = vadd.f32 %v3932_v24, %v1228_v25  ;;  %v4113_v27 = vpop.f32.mrb[1].mxu1 }
 0x1b3   : > { %1482 = vrot.lane.b32.xlu0 %v5141_v19, %s4801_s28  ;;  %s5438_s28 = sld [smem:[#allocation17_spill]] }
 0x221   : > { %v1246_v21 = vpop.permute.xlu0 %1245  ;;  %v1481_v23 = vpop.permute.xlu1 %1480 }
 0x222   : > { %4115 = vmatpush3.xpose.msk.msra.mxu0 %vm1247_vm2, %v1246_v21 }
 0x223   : > { %4119 = vmatprep.subr.mxu0 %v4798_v1 }
 0x225   : > { %4117 = vmatmul.mubr.msk.f32.vlgmr.msra.gmra.mrb[2].mxu0 %vm1247_vm2, %v5141_v19  ;;  %v1483_v22 = vpop.permute.xlu0 %1482 }
 0x226   : > { %4130 = vmatpush3.xpose.msk.msra.mxu1 %vm1247_vm2, %v1483_v22  ;;  %4121 = vmatprep.mubr.msk.f32.mxu0 %vm4797_vm0, %v4798_v1 }
 0x227   : > { %4139 = vmatprep.subr.mxu1 %v4798_v1  ;;  %4120 = vmatpush3.msra.mxu0 %v5159_v26 }
 0x228   : > { %4124 = vmatprep.subr.mxu0 %v4798_v1 }
 0x229   : > { %4132 = vmatmul.mubr.msk.f32.vlgmr.msra.gmra.mrb[2].mxu1 %vm1247_vm2, %v1481_v23 }
 0x22a   : > { %4141 = vmatprep.mubr.msk.f32.mxu1 %vm4797_vm0, %v4798_v1  ;;  %4140 = vmatpush3.msra.mxu1 %v1233_v56  ;;  %v1058_v56 = vld [vmem:[%s1043_s26] sm:$0xff] }
 0x22b   : > { %4149 = vmatprep.subr.mxu1 %v4798_v1 }
 0x2f8   : > { %v1318_v28 = vpop.f32.mrb[2].mxu0 }
 0x2f9   : > { %v4118_v29 = vpop.f32.mrb[3].mxu0  ;;  %v1322_v30 = vsel %vm1247_vm2, %v1318_v28, -inf }
 0x2fa   : > { %1323 = vmax.xlane.f32.xlu1 %v1322_v30 }
 0x2fc   : > { %v1554_v31 = vpop.f32.mrb[2].mxu1 }
 0x2fd   : > { %v4133_v32 = vpop.f32.mrb[3].mxu1  ;;  %v1558_v38 = vsel %vm1247_vm2, %v1554_v31, -inf }
 0x2fe   : > { %v1235_v32 = vld [vmem:[%s4859_s14 + $0x18] sm:$0xff] }
 0x30b   : > { %1722 = vrot.lane.b32.xlu1 %v5141_v19, %s4802_s18  ;;  %s5439_s18 = sld [smem:[#allocation18_spill]] }
 0x387   : > { %v1324_v33 = vpop.xlane.xlu1 %1323 }
 0x388   : > { %v1325_v34 = vsub.f32 %v1318_v28, %v1324_v33 }
 0x38a   : > { %v1326_v35 = vmul.f32 1.442695, %v1325_v34 }
 0x38b   : > { %v1723_v48 = vpop.permute.xlu1 %1722 }
 0x38c   : > { %4531 = vpow2.f32 %v1326_v35 }
 0x396   : > { %v4532_v36 = vpop.eup %4531 }
 0x397   : > { %v1328_v37 = vsel %vm1247_vm2, %v4532_v36, 0.0 }
 0x398   : > { %1329 = vadd.xlane.f32.xlu0 %v1328_v37 }
 0x39c   : > { %1559 = vmax.xlane.f32.xlu0 %v1558_v38 }
 0x3b2   : > { %1570 = vrot.lane.b32.xlu0 %v5159_v26, %s4799_s10 }
 0x425   : > { %v1330_v39 = vpop.xlane.xlu0 %1329 }
 0x426   : > { %4533 = vrcp.f32 %v1330_v39 }
 0x429   : > { %v1560_v40 = vpop.xlane.xlu0 %1559 }
 0x42a   : > { %v1561_v41 = vsub.f32 %v1554_v31, %v1560_v40 }
 0x42c   : > { %v1562_v42 = vmul.f32 1.442695, %v1561_v41 }
 0x42d   : > { %v1571_v52 = vpop.permute.xlu0 %1570 }
 0x42e   : > { %4535 = vpow2.f32 %v1562_v42 }
 0x430   : > { %v4534_v43 = vpop.eup %4533 }
 0x431   : > { %v1332_v44 = vmul.f32 %v4534_v43, %v4532_v36 }
 0x433   : > { %4122 = vmatmul.mubr.msk.f32.vlgmr.msra.gmra.mrb[4].mxu0 %vm1247_vm2, %v1332_v44 }
 0x434   : > { %4126 = vmatprep.mubr.msk.f32.mxu0 %vm4797_vm0, %v4798_v1  ;;  %4125 = vmatpush3.msra.mxu0 %v1232_v47 }
 0x435   : > { %4134 = vmatprep.subr.mxu0 %v4798_v1 }
 0x438   : > { %v4536_v45 = vpop.eup %4535 }
 0x439   : > { %v1564_v46 = vsel %vm1247_vm2, %v4536_v45, 0.0 }
 0x43a   : > { %1565 = vadd.xlane.f32.xlu1 %v1564_v46 }
 0x44b   : > { %1720 = vrot.lane.b32.xlu1 %v5141_v19, %s4803_s2 }
 0x4c7   : > { %v1566_v49 = vpop.xlane.xlu1 %1565 }
 0x4c8   : > { %4537 = vrcp.f32 %v1566_v49 }
 0x4cb   : > { %v1721_v55 = vpop.permute.xlu1 %1720 }
 0x4d2   : > { %v4538_v50 = vpop.eup %4537 }
 0x4d3   : > { %v1568_v54 = vmul.f32 %v4538_v50, %v4536_v45 }
 0x506   : > { %v1402_v51 = vpop.f32.mrb[4].mxu0 }
 0x507   : > { %v4123_v53 = vpop.f32.mrb[5].mxu0  ;;  %4127 = vmatmul.mubr.msk.f32.vlgmr.msra.gmra.mrb[6].mxu0 %vm1247_vm2, %v1402_v51  ;;  %v2316_v51 = vld [vmem:[%s4889_s20] sm:$0xff] }
 0x508   : > { %4135 = vmatpush3.msra.mxu0 %v1571_v52  ;;  %4136 = vmatprep.mubr.msk.f32.mxu0 %vm4797_vm0, %v4798_v1  ;;  %v2317_v52 = vld [vmem:[%s4889_s20 + $0x8] sm:$0xff] }
 0x509   : > { %4144 = vmatprep.subr.mxu0 %v4798_v1  ;;  %v4331_v53 = vpack.c.bf16 %v2317_v52, %v2316_v51 }
 0x50b   : > { %4137 = vmatmul.mubr.msk.f32.vlgmr.msra.gmra.mrb[8].mxu0 %vm1247_vm2, %v1568_v54  ;;  %v2318_v54 = vld [vmem:[%s4889_s20 + $0x10] sm:$0xff] }
 0x50c   : > { %4146 = vmatprep.mubr.msk.f32.mxu0 %vm4797_vm0, %v4798_v1 }
 0x50f   : > { %4145 = vmatpush3.xpose.msk.msra.mxu0 %vm1247_vm2, %v1723_v48 }
 0x510   : > { %4154 = vmatprep.subr.mxu0 %v4798_v1 }
 0x512   : > { %4147 = vmatmul.mubr.msk.f32.vlgmr.msra.gmra.mrb[10].mxu0 %vm1247_vm2, %v1721_v55 }
 0x513   : > { %4156 = vmatprep.mubr.msk.f32.mxu0 %vm4797_vm0, %v4798_v1  ;;  %4155 = vmatpush3.msra.mxu0 %v1234_v20 }
 0x514   : > { %4164 = vmatprep.subr.mxu0 %v4798_v1 }
 0x5da   : > { %v1475_v57 = vpop.f32.mrb[6].mxu0 }
 0x5db   : > { %v4128_v58 = vpop.f32.mrb[7].mxu0  ;;  %v1479_v11 = vadd.f32 %v3934_v10, %v1475_v57  ;;  %v1060_v57 = vld [vmem:[%s1048_s11] sm:$0xff] }
 0x5dc   : > { %v1059_v58 = vld [vmem:[%s1043_s26 + $0x8] sm:$0xff]  ;;  %s5442_s26 = sld [smem:[#allocation22_spill]] }
 0x5de   : > { %v1642_v59 = vpop.f32.mrb[8].mxu0 }
 0x5df   : > { %v4138_v60 = vpop.f32.mrb[9].mxu0  ;;  %4142 = vmatmul.mubr.msk.f32.vlgmr.msra.gmra.mrb[4].mxu1 %vm1247_vm2, %v1642_v59  ;;  %v1061_v59 = vld [vmem:[%s1048_s11 + $0x8] sm:$0xff]  ;;  %s5445_s11 = sld [smem:[#allocation16_spill]] }
 0x5e0   : > { %4151 = vmatprep.mubr.msk.f32.mxu1 %vm4797_vm0, %v4798_v1  ;;  %v2314_v60 = vadd.f32 %v1060_v57, %v1058_v56 }
 0x5e5   : > { %v1794_v61 = vpop.f32.mrb[10].mxu0 }
 0x5e6   : > { %v4148_v62 = vpop.f32.mrb[11].mxu0  ;;  %v1798_v63 = vsel %vm1247_vm2, %v1794_v61, -inf }
 0x5e7   : > { %1799 = vmax.xlane.f32.xlu0 %v1798_v63  ;;  %v2230_v62 = vld [vmem:[%s5437_s23] sm:$0xff]  ;;  %v2231_v63 = vld [vmem:[%s5437_s23 + $0x8] sm:$0xff] }
 0x5fd   : > { %1809 = vrot.lane.b32.xlu0 %v5159_v26, %s4803_s2 }
 0x601   : > { %1959 = vrot.lane.b32.xlu0 %v5141_v19, %s4804_s1 }
 0x674   : > { %v1800_v2 = vpop.xlane.xlu0 %1799 }
 0x675   : > { %v1801_v3 = vsub.f32 %v1794_v61, %v1800_v2  ;;  %v2315_v61 = vadd.f32 %v1061_v59, %v1059_v58  ;;  %v4326_v2 = vpack.c.bf16 %v2231_v63, %v2230_v62 }
 0x677   : > { %v1802_v4 = vmul.f32 1.442695, %v1801_v3  ;;  %v2232_v3 = vld [vmem:[%s5437_s23 + $0x10] sm:$0xff] }
 0x678   : > { %v1810_v5 = vpop.permute.xlu0 %1809 }
 0x679   : > { %4539 = vpow2.f32 %v1802_v4  ;;  %4150 = vmatpush3.msra.mxu1 %v1810_v5  ;;  %v2233_v4 = vld [vmem:[%s5437_s23 + $0x18] sm:$0xff] }
 0x67a   : > { %4159 = vmatprep.subr.mxu1 %v4798_v1  ;;  %v4329_v5 = vpack.c.bf16 %v2233_v4, %v2232_v3 }
 0x683   : > { %v4540_v6 = vpop.eup %4539 }
 0x684   : > { %v1804_v7 = vsel %vm1247_vm2, %v4540_v6, 0.0 }
 0x685   : > { %1805 = vadd.xlane.f32.xlu1 %v1804_v7 }
 0x696   : > { %1961 = vrot.lane.b32.xlu1 %v5141_v19, %s4805_s16  ;;  %v1960_v19 = vpop.permute.xlu0 %1959  ;;  %s5440_s16 = sld [smem:[#allocation21_spill]] }
 0x6b2   : > { %v1715_v12 = vpop.f32.mrb[4].mxu1 }
 0x6b3   : > { %v1719_v13 = vadd.f32 %v1715_v12, %v1479_v11  ;;  %v4143_v14 = vpop.f32.mrb[5].mxu1  ;;  %v3951_v12 = vld [vmem:[%s5438_s28] ss:$0 sm:$0xff]  ;;  %s1051_s28 = scalar_lea.vmem %s5445_s11, %s5452_s15 }
 0x6b4   : > { %v3952_v14 = vld [vmem:[%s5439_s18] ss:$0 sm:$0xff]  ;;  %s5446_s18 = sld [smem:[#allocation23_spill]] }
 0x712   : > { %v1806_v15 = vpop.xlane.xlu1 %1805 }
 0x713   : > { %4541 = vrcp.f32 %v1806_v15 }
 0x716   : > { %v1962_v18 = vpop.permute.xlu1 %1961 }
 0x71d   : > { %v4542_v16 = vpop.eup %4541 }
 0x71e   : > { %v1808_v17 = vmul.f32 %v4542_v16, %v4540_v6 }
 0x720   : > { %4152 = vmatmul.mubr.msk.f32.vlgmr.msra.gmra.mrb[6].mxu1 %vm1247_vm2, %v1808_v17 }
 0x721   : > { %4160 = vmatpush3.xpose.msk.msra.mxu1 %vm1247_vm2, %v1962_v18  ;;  %4161 = vmatprep.mubr.msk.f32.mxu1 %vm4797_vm0, %v4798_v1  ;;  %v3955_v18 = vld [vmem:[%s5440_s16] ss:$0 sm:$0xff]  ;;  %s5447_s16 = sld [smem:[#allocation24_spill]] }
 0x722   : > { %4169 = vmatprep.subr.mxu1 %v4798_v1 }
 0x724   : > { %4162 = vmatmul.mubr.msk.f32.vlgmr.msra.gmra.mrb[8].mxu1 %vm1247_vm2, %v1960_v19 }
 0x725   : > { %4171 = vmatprep.mubr.msk.f32.mxu1 %vm4797_vm0, %v4798_v1  ;;  %4170 = vmatpush3.msra.mxu1 %v1235_v32  ;;  %v2410_v32 = vld [vmem:[%s5442_s26 + $0x10] sm:$0xff] }
 0x726   : > { %4332 = vmatprep.subr.bf16.mxu1 %v4331_v53 }
 0x7f3   : > { %v1881_v21 = vpop.f32.mrb[6].mxu1 }
 0x7f4   : > { %v4153_v22 = vpop.f32.mrb[7].mxu1  ;;  %4157 = vmatmul.mubr.msk.f32.vlgmr.msra.gmra.mrb[12].mxu0 %vm1247_vm2, %v1881_v21 }
 0x7f5   : > { %4166 = vmatprep.mubr.msk.f32.mxu0 %vm4797_vm0, %v4798_v1 }
 0x7f7   : > { %v2033_v23 = vpop.f32.mrb[8].mxu1 }
 0x7f8   : > { %v4163_v24 = vpop.f32.mrb[9].mxu1  ;;  %v2037_v25 = vsel %vm1247_vm2, %v2033_v23, -inf }
 0x7f9   : > { %2038 = vmax.xlane.f32.xlu1 %v2037_v25  ;;  %v3953_v25 = vld [vmem:[%s5441_s22] ss:$0 sm:$0xff]  ;;  %s1055_s22 = scalar_lea.vmem %s4959_s30, %s3924_s0 }
 0x886   : > { %v2039_v27 = vpop.xlane.xlu1 %2038 }
 0x887   : > { %v2040_v28 = vsub.f32 %v2033_v23, %v2039_v27 }
 0x889   : > { %v2041_v29 = vmul.f32 1.442695, %v2040_v28 }
 0x88b   : > { %4543 = vpow2.f32 %v2041_v29 }
 0x895   : > { %v4544_v30 = vpop.eup %4543 }
 0x896   : > { %v2043_v31 = vsel %vm1247_vm2, %v4544_v30, 0.0 }
 0x897   : > { %2044 = vadd.xlane.f32.xlu0 %v2043_v31  ;;  %v2409_v31 = vld [vmem:[%s5442_s26 + $0x8] sm:$0xff] }
 0x8ad   : > { %2048 = vrot.lane.b32.xlu0 %v5159_v26, %s4804_s1 }
 0x8c7   : > { %v1954_v33 = vpop.f32.mrb[12].mxu0 }
 0x8c8   : > { %v1958_v34 = vadd.f32 %v1954_v33, %v1719_v13  ;;  %v4158_v35 = vpop.f32.mrb[13].mxu0 }
 0x924   : > { %v2045_v36 = vpop.xlane.xlu0 %2044 }
 0x925   : > { %4545 = vrcp.f32 %v2045_v36  ;;  %v5289_v36 = vld [vmem:[%s1051_s28] ss:$0 sm:$0xff] }
 0x928   : > { %v2049_v37 = vpop.permute.xlu0 %2048 }
 0x929   : > { %4165 = vmatpush3.msra.mxu0 %v2049_v37 }
 0x92a   : > { %4325 = vmatprep.subr.bf16.mxu0 %v4796_v0 }
 0x92f   : > { %v4546_v38 = vpop.eup %4545 }
 0x930   : > { %v2047_v39 = vmul.f32 %v4546_v38, %v4544_v30  ;;  %v2408_v30 = vld [vmem:[%s5442_s26] sm:$0xff] }
 0x931   : > { %v4339_v33 = vpack.c.bf16 %v2409_v31, %v2408_v30 }
 0x932   : > { %4167 = vmatmul.mubr.msk.f32.vlgmr.msra.gmra.mrb[14].mxu0 %vm1247_vm2, %v2047_v39 }
 0x933   : > { %4182 = vmatprep.mubr.msk.f32.mxu0 %vm4797_vm0, %v4798_v1  ;;  %4327 = vmatpush3.bf16.msra.mxu0 %v4326_v2  ;;  %v2500_v2 = vld [vmem:[%s5447_s16] sm:$0xff] }
 0x934   : > { %4328 = vmatprep.subr.bf16.mxu0 %v4796_v0 }
 0x937   : > { %4330 = vmatpush3.bf16.msra.mxu0 %v4329_v5 }
 0x938   : > { %4340 = vmatprep.subr.bf16.mxu0 %v4339_v33 }
 0xa05   : > { %v2120_v26 = vpop.f32.mrb[14].mxu0 }
 0xa06   : > { %v4168_v40 = vpop.f32.mrb[15].mxu0  ;;  %4172 = vmatmul.mubr.msk.f32.vlgmr.msra.gmra.mrb[10].mxu1 %vm1247_vm2, %v2120_v26 }
 0xa07   : > { %4334 = vmatpush3.bf16.msra.mxu1 %v4331_v53  ;;  %4193 = vmatprep.mubr.msk.f32.mxu1 %vm1074_vm1, %v2314_v60 }
 0xad9   : > { %v2193_v41 = vpop.f32.mrb[10].mxu1 }
 0xada   : > { %v2197_v42 = vadd.f32 %v2193_v41, %v1958_v34  ;;  %v4173_v43 = vpop.f32.mrb[11].mxu1  ;;  %v2411_v34 = vld [vmem:[%s5442_s26 + $0x18] sm:$0xff] }
 0xadb   : > { %v4343_v35 = vpack.c.bf16 %v2411_v34, %v2410_v32 }
 0xadc   : > { %v2198_v44 = vadd.f32 %v2197_v42, %v5118_v8  ;;  %v2319_v8 = vld [vmem:[%s4889_s20 + $0x18] sm:$0xff] }
 0xadd   : > { %v4335_v55 = vpack.c.bf16 %v2319_v8, %v2318_v54 }
 0xade   : > { %v2201_v45 = vsel %vm1074_vm1, %v2198_v44, 0.0 }
 0xadf   : > { %2202 = vadd.xlane.f32.xlu1 %v2201_v45  ;;  %4336 = vmatprep.subr.bf16.mxu1 %v4335_v55 }
 0xae0   : > { %4338 = vmatpush3.bf16.msra.mxu1 %v4335_v55 }
 0xae1   : > { %4347 = vmatprep.subr.bf16.mxu1 %v4796_v0 }
 0xae3   : > { %4194 = vmatmul.mubr.msk.f32.vlgmr.msra.gmra.mrb[12].mxu1 %vm1074_vm1, %v2315_v61 }
 0xae4   : > { %4211 = vmatprep.mubr.msk.f32.mxu1 %vm4797_vm0, %v4798_v1 }
 0xb6c   : > { %v2203_v46 = vpop.xlane.xlu1 %2202 }
 0xb6d   : > { %v2205_v47 = vmul.f32 0.03125, %v2203_v46  ;;  %v3958_v46 = vld [vmem:[%s5446_s18] ss:$0 sm:$0xff] }
 0xb6f   : > { %v2206_v48 = vsub.f32 %v2198_v44, %v2205_v47 }
 0xb71   : > { %v2207_v49 = vmul.f32 %v2206_v48, %v2206_v48 }
 0xb73   : > { %v2208_v50 = vsel %vm1074_vm1, %v2207_v49, 0.0 }
 0xb74   : > { %2209 = vadd.xlane.f32.xlu1 %v2208_v50 }
 0xbb6   : > { %v4195_v19 = vpop.f32.mrb[12].mxu1 }
 0xbb7   : > { %v2405_v20 = vadd.f32 %v4195_v19, %v3955_v18  ;;  %v2399_v21 = vpop.f32.mrb[13].mxu1 }
 0xbb8   : > { %v2400_v22 = vadd.f32 %v3955_v18, %v2399_v21 }
 0xbba   : > { %v4348_v24 = vpack.c.bf16 %v2405_v20, %v2400_v22 }
 0xbbc   : > { %4350 = vmatpush3.bf16.xpose.msk.msra.mxu1 %vm5257_vm3, %v4348_v24 }
 0xbbd   : > { %4221 = vmatprep.subr.mxu1 %v4798_v1 }
 0xc01   : > { %v2210_v6 = vpop.xlane.xlu1 %2209 }
 0xc02   : > { %v2211_v7 = vmul.f32 0.03125, %v2210_v6 }
 0xc04   : > { %v2212_v10 = vadd.f32 1e-05, %v2211_v7 }
 0xc06   : > { %4547 = vrsqrt.f32 %v2212_v10 }
 0xc10   : > { %v4548_v11 = vpop.eup %4547 }
 0xc11   : > { %v2214_v13 = vmul.f32 %v4548_v11, %v2206_v48 }
 0xc13   : > { %v2221_v15 = vmul.f32 %v3951_v12, %v2214_v13 }
 0xc15   : > { %v5248_v16 = vadd.f32 %v3952_v14, %v2221_v15 }
 0xc17   : > { %v2229_v17 = vadd.f32 %v5248_v16, %v5121_v9  ;;  %v5261_v9 = vpack.i.bf16 %v2405_v20, %v2400_v22 }
 0xc19   : > { %4183 = vmatmul.mubr.msk.f32.vlgmr.msra.gmra.mrb[16].mxu0 %vm1074_vm1, %v2229_v17 }
 0xc1a   : > { %4204 = vmatprep.mubr.msk.f32.mxu0 %vm1074_vm1, %v1058_v56  ;;  %4342 = vmatpush3.bf16.msra.mxu0 %v4339_v33 }
 0xc1b   : > { %4344 = vmatprep.subr.bf16.mxu0 %v4343_v35 }
 0xc1e   : > { %4346 = vmatpush3.bf16.msra.mxu0 %v4343_v35 }
 0xc1f   : > { %4351 = vmatprep.subr.bf16.mxu0 %v4796_v0 }
 0xc21   : > { %4205 = vmatmul.mubr.msk.f32.vlgmr.msra.gmra.mrb[18].mxu0 %vm1074_vm1, %v1059_v58 }
 0xc22   : > { %4218 = vmatprep.mubr.msk.f32.mxu0 %vm4797_vm0, %v4798_v1 }
 0xcec   : > { %v2310_v27 = vpop.f32.mrb[16].mxu0 }
 0xced   : > { %v5267_v28 = vadd.f32 %v3953_v25, %v2310_v27  ;;  %v4184_v29 = vpop.f32.mrb[17].mxu0 }
 0xcef   : > { %2757 = vrot.lane.b32.xlu0 %v5267_v28, %s4799_s10  ;;  %4212 = vmatmul.mubr.msk.f32.vlgmr.msra.gmra.mrb[14].mxu1 %vm1247_vm2, %v5267_v28 }
 0xcf0   : > { %4223 = vmatprep.mubr.msk.f32.mxu1 %vm4797_vm0, %v4798_v1  ;;  %4222 = vmatpush3.msra.mxu1 %v2500_v2 }
 0xcf1   : > { %4358 = vmatprep.subr.bf16.mxu1 %v4796_v0 }
 0xcf3   : > { %4507 = vrot.lane.b32.xlu0 %v5261_v9, %s4803_s2 }
 0xcf4   : > { %v4206_v40 = vpop.f32.mrb[18].mxu0 }
 0xcf5   : > { %v2497_v47 = vadd.f32 %v4206_v40, %v3958_v46  ;;  %v2491_v48 = vpop.f32.mrb[19].mxu0  ;;  %v2501_v40 = vld [vmem:[%s5447_s16 + $0x8] sm:$0xff] }
 0xcf6   : > { %v2492_v49 = vadd.f32 %v3958_v46, %v2491_v48 }
 0xcf7   : > { %3005 = vrot.lane.b32.xlu0 %v5267_v28, %s4803_s2 }
 0xcf8   : > { %v4352_v50 = vpack.c.bf16 %v2497_v47, %v2492_v49  ;;  %v5295_v51 = vpack.i.bf16 %v2497_v47, %v2492_v49 }
 0xcfa   : > { %4353 = vmatpush3.bf16.msra.mxu0 %v4352_v50 }
 0xcfb   : > { %4354 = vmatprep.subr.bf16.mxu0 %v4796_v0 }
 0xd61   : > { %v2758_v54 = vpop.permute.xlu0 %2757 }
 0xd65   : > { %v4508_v59 = vpop.permute.xlu0 %4507 }
 0xd66   : > { %v4510_v60 = vunpack.i.h.bf16 %v4508_v59  ;;  %v4509_v61 = vunpack.i.l.bf16 %v4508_v59 }
 0xd68   : > { %v4362_v62 = vpack.c.bf16 %v4510_v60, %v4509_v61 }
 0xd69   : > { %v3006_v63 = vpop.permute.xlu0 %3005 }
 0xdc2   : > { %v2594_v37 = vpop.f32.mrb[14].mxu1 }
 0xdc3   : > { %v2595_v38 = vadd.f32 %v5289_v36, %v2594_v37  ;;  %v4213_v39 = vpop.f32.mrb[15].mxu1 }
 0xdc5   : > { %v2599_v26 = vsel %vm2598_vm4, %v2595_v38, -inf }
 0xdc6   : > { %2600 = vmax.xlane.f32.xlu1 %v2599_v26 }
 0xe53   : > { %v2601_v41 = vpop.xlane.xlu1 %2600 }
 0xe54   : > { %v2602_v42 = vsub.f32 %v2595_v38, %v2601_v41 }
 0xe56   : > { %v2603_v43 = vmul.f32 1.442695, %v2602_v42 }
 0xe58   : > { %4549 = vpow2.f32 %v2603_v43 }
 0xe62   : > { %v4550_v44 = vpop.eup %4549 }
 0xe63   : > { %v2605_v45 = vsel %vm2598_vm4, %v4550_v44, 0.0 }
 0xe64   : > { %2606 = vadd.xlane.f32.xlu1 %v2605_v45 }
 0xe75   : > { %4502 = vrot.lane.b32.xlu1 %v5261_v9, %s4799_s10 }
 0xef1   : > { %v2607_v52 = vpop.xlane.xlu1 %2606 }
 0xef2   : > { %4551 = vrcp.f32 %v2607_v52 }
 0xef5   : > { %v4503_v53 = vpop.permute.xlu1 %4502 }
 0xef6   : > { %v4505_v8 = vunpack.i.h.bf16 %v4503_v53  ;;  %v4504_v55 = vunpack.i.l.bf16 %v4503_v53 }
 0xef8   : > { %v4355_v58 = vpack.c.bf16 %v4505_v8, %v4504_v55  ;;  %v2502_v8 = vld [vmem:[%s5447_s16 + $0x10] sm:$0xff] }
 0xefc   : > { %v4552_v56 = vpop.eup %4551 }
 0xefd   : > { %v2609_v57 = vmul.f32 %v4552_v56, %v4550_v44 }
 0xeff   : > { %4219 = vmatmul.mubr.msk.f32.vlgmr.msra.gmra.mrb[20].mxu0 %vm2598_vm4, %v2609_v57 }
 0xf00   : > { %4357 = vmatpush3.bf16.xpose.msk.msra.mxu0 %vm5257_vm3, %v4355_v58  ;;  %4230 = vmatprep.mubr.msk.f32.mxu0 %vm4797_vm0, %v4798_v1 }
 0xf01   : > { %4361 = vmatprep.subr.bf16.mxu0 %v4796_v0 }
 0xf07   : > { %4231 = vmatmul.mubr.msk.f32.vlgmr.msra.gmra.mrb[22].mxu0 %vm1247_vm2, %v2758_v54 }
 0xf08   : > { %4364 = vmatpush3.bf16.xpose.msk.msra.mxu0 %vm5257_vm3, %v4362_v62  ;;  %4249 = vmatprep.mubr.msk.f32.mxu0 %vm4797_vm0, %v4798_v1 }
 0xf09   : > { %4368 = vmatprep.subr.bf16.mxu0 %v4796_v0 }
 0xf0f   : > { %4250 = vmatmul.mubr.msk.f32.vlgmr.msra.gmra.mrb[24].mxu0 %vm1247_vm2, %v3006_v63 }
 0xf10   : > { %4268 = vmatprep.mubr.msk.f32.mxu0 %vm4797_vm0, %v4798_v1 }
 0xfd2   : > { %v2679_v3 = vpop.f32.mrb[20].mxu0 }
 0xfd3   : > { %v4220_v4 = vpop.f32.mrb[21].mxu0  ;;  %4224 = vmatmul.mubr.msk.f32.vlgmr.msra.gmra.mrb[16].mxu1 %vm1247_vm2, %v2679_v3 }
 0xfd4   : > { %4237 = vmatprep.mubr.msk.f32.mxu1 %vm4797_vm0, %v4798_v1 }
 0xfda   : > { %v2835_v5 = vpop.f32.mrb[22].mxu0 }
 0xfdb   : > { %v2836_v6 = vadd.f32 %v5289_v36, %v2835_v5  ;;  %v4232_v7 = vpop.f32.mrb[23].mxu0 }
 0xfdd   : > { %v2839_v10 = vsel %vm2598_vm4, %v2836_v6, -inf }
 0xfde   : > { %2840 = vmax.xlane.f32.xlu0 %v2839_v10 }
 0xfe2   : > { %v3083_v11 = vpop.f32.mrb[24].mxu0 }
 0xfe3   : > { %v4251_v12 = vpop.f32.mrb[25].mxu0  ;;  %v3084_v27 = vadd.f32 %v5289_v36, %v3083_v11 }
 0xfe4   : > { %v2503_v12 = vld [vmem:[%s5447_s16 + $0x18] sm:$0xff] }
 0xff4   : > { %4512 = vrot.lane.b32.xlu0 %v5295_v51, %s4799_s10  ;;  %s5448_s10 = sld [smem:[#allocation25_spill]] }
 0xff8   : > { %3251 = vrot.lane.b32.xlu0 %v5267_v28, %s4804_s1  ;;  %v3087_v28 = vsel %vm2598_vm4, %v3084_v27, -inf }
 0xffa   : > { %v3961_v59 = vld [vmem:[%s5448_s10] ss:$0 sm:$0xff] }
0x106b   : > { %v2841_v13 = vpop.xlane.xlu0 %2840 }
0x106c   : > { %v2842_v14 = vsub.f32 %v2836_v6, %v2841_v13 }
0x106e   : > { %v2843_v15 = vmul.f32 1.442695, %v2842_v14 }
0x106f   : > { %v4513_v17 = vpop.permute.xlu0 %4512 }
0x1070   : > { %4553 = vpow2.f32 %v2843_v15  ;;  %v4515_v18 = vunpack.i.h.bf16 %v4513_v17  ;;  %v4514_v19 = vunpack.i.l.bf16 %v4513_v17 }
0x1072   : > { %v4359_v20 = vpack.c.bf16 %v4515_v18, %v4514_v19 }
0x1073   : > { %v3252_v35 = vpop.permute.xlu0 %3251 }
0x1074   : > { %4360 = vmatpush3.bf16.msra.mxu1 %v4359_v20 }
0x1075   : > { %4240 = vmatprep.subr.mxu1 %v4798_v1 }
0x107a   : > { %v4554_v21 = vpop.eup %4553 }
0x107b   : > { %v2845_v22 = vsel %vm2598_vm4, %v4554_v21, 0.0 }
0x107c   : > { %2846 = vadd.xlane.f32.xlu1 %v2845_v22 }
0x108d   : > { %4517 = vrot.lane.b32.xlu1 %v5261_v9, %s4804_s1 }
0x10a6   : > { %v5330_v24 = vpop.f32.mrb[16].mxu1 }
0x10a7   : > { %v4225_v25 = vpop.f32.mrb[17].mxu1  ;;  %v2756_v60 = vadd.f32 %v3961_v59, %v5330_v24 }
0x10b1   : > { %3088 = vmax.xlane.f32.xlu1 %v3087_v28 }
0x1109   : > { %v2847_v29 = vpop.xlane.xlu1 %2846 }
0x110a   : > { %4555 = vrcp.f32 %v2847_v29 }
0x110d   : > { %v4518_v30 = vpop.permute.xlu1 %4517 }
0x110e   : > { %v4520_v31 = vunpack.i.h.bf16 %v4518_v30  ;;  %v4519_v32 = vunpack.i.l.bf16 %v4518_v30 }
0x1110   : > { %v4369_v33 = vpack.c.bf16 %v4520_v31, %v4519_v32 }
0x1112   : > { %4371 = vmatpush3.bf16.xpose.msk.msra.mxu0 %vm5257_vm3, %v4369_v33 }
0x1113   : > { %4375 = vmatprep.subr.bf16.mxu0 %v4796_v0 }
0x1114   : > { %v4556_v9 = vpop.eup %4555 }
0x1115   : > { %v2849_v34 = vmul.f32 %v4556_v9, %v4554_v21 }
0x1117   : > { %4238 = vmatmul.mubr.msk.f32.vlgmr.msra.gmra.mrb[18].mxu1 %vm2598_vm4, %v2849_v34 }
0x1118   : > { %4242 = vmatprep.mubr.msk.f32.mxu1 %vm4797_vm0, %v4798_v1  ;;  %4241 = vmatpush3.msra.mxu1 %v2501_v40 }
0x1119   : > { %4269 = vmatmul.mubr.msk.f32.vlgmr.msra.gmra.mrb[26].mxu0 %vm1247_vm2, %v3252_v35  ;;  %4365 = vmatprep.subr.bf16.mxu1 %v4796_v0 }
0x111a   : > { %4291 = vmatprep.mubr.msk.f32.mxu0 %vm4797_vm0, %v4798_v1 }
0x113e   : > { %v3089_v37 = vpop.xlane.xlu1 %3088 }
0x113f   : > { %v3090_v38 = vsub.f32 %v3084_v27, %v3089_v37 }
0x1141   : > { %v3091_v23 = vmul.f32 1.442695, %v3090_v38 }
0x1143   : > { %4557 = vpow2.f32 %v3091_v23 }
0x114d   : > { %v4558_v39 = vpop.eup %4557 }
0x114e   : > { %v3093_v26 = vsel %vm2598_vm4, %v4558_v39, 0.0 }
0x114f   : > { %3094 = vadd.xlane.f32.xlu0 %v3093_v26 }
0x1165   : > { %4522 = vrot.lane.b32.xlu0 %v5295_v51, %s4803_s2  ;;  %s5449_s2 = sld [smem:[#allocation26_spill]] }
0x116b   : > { %v3527_v30 = vld [vmem:[%s5449_s2] sm:$0xff]  ;;  %v3528_v31 = vld [vmem:[%s5449_s2 + $0x8] sm:$0xff]  ;;  %v3530_v33 = vld [vmem:[%s5449_s2 + $0x18] sm:$0xff] }
0x116c   : > { %v4376_v32 = vpack.c.bf16 %v3528_v31, %v3527_v30 }
0x116e   : > { %4377 = vmatpush3.bf16.msra.mxu0 %v4376_v32 }
0x116f   : > { %4378 = vmatprep.subr.bf16.mxu0 %v4796_v0 }
0x11dc   : > { %v3095_v41 = vpop.xlane.xlu0 %3094 }
0x11dd   : > { %4559 = vrcp.f32 %v3095_v41 }
0x11e0   : > { %v4523_v42 = vpop.permute.xlu0 %4522 }
0x11e1   : > { %v4525_v43 = vunpack.i.h.bf16 %v4523_v42  ;;  %v4524_v44 = vunpack.i.l.bf16 %v4523_v42 }
0x11e3   : > { %v4366_v46 = vpack.c.bf16 %v4525_v43, %v4524_v44 }
0x11e7   : > { %v4560_v45 = vpop.eup %4559 }
0x11e8   : > { %v3097_v50 = vmul.f32 %v4560_v45, %v4558_v39 }
0x11ea   : > { %v2927_v47 = vpop.f32.mrb[18].mxu1 }
0x11eb   : > { %v4239_v48 = vpop.f32.mrb[19].mxu1  ;;  %4243 = vmatmul.mubr.msk.f32.vlgmr.msra.gmra.mrb[20].mxu1 %vm1247_vm2, %v2927_v47 }
0x11ec   : > { %4367 = vmatpush3.bf16.msra.mxu1 %v4366_v46  ;;  %v3329_v49 = vpop.f32.mrb[26].mxu0  ;;  %4256 = vmatprep.mubr.msk.f32.mxu1 %vm4797_vm0, %v4798_v1  ;;  %v3983_v46 = vld [vmem:[#allocation2] ss:$0 sm:$0xff]  ;;  %v3984_v48 = vld [vmem:[#allocation4] ss:$0 sm:$0xff] }
0x11ed   : > { %v3330_v52 = vadd.f32 %v5289_v36, %v3329_v49  ;;  %v4270_v53 = vpop.f32.mrb[27].mxu0  ;;  %4259 = vmatprep.subr.mxu1 %v4798_v1 }
0x11ef   : > { %4257 = vmatmul.mubr.msk.f32.vlgmr.msra.gmra.mrb[22].mxu1 %vm2598_vm4, %v3097_v50  ;;  %v3333_v54 = vsel %vm2598_vm4, %v3330_v52, -inf }
0x11f0   : > { %3334 = vmax.xlane.f32.xlu1 %v3333_v54  ;;  %4261 = vmatprep.mubr.msk.f32.mxu1 %vm4797_vm0, %v4798_v1 }
0x11f1   : > { %4260 = vmatpush3.msra.mxu1 %v2502_v8  ;;  %v3985_v8 = vld [vmem:[#allocation6] ss:$0 sm:$0xff] }
0x11f2   : > { %4372 = vmatprep.subr.bf16.mxu1 %v4796_v0 }
0x127d   : > { %v3335_v55 = vpop.xlane.xlu1 %3334 }
0x127e   : > { %v3336_v56 = vsub.f32 %v3330_v52, %v3335_v55 }
0x1280   : > { %v3337_v57 = vmul.f32 1.442695, %v3336_v56 }
0x1282   : > { %4561 = vpow2.f32 %v3337_v57 }
0x128c   : > { %v4562_v36 = vpop.eup %4561 }
0x128d   : > { %v3339_v58 = vsel %vm2598_vm4, %v4562_v36, 0.0 }
0x128e   : > { %3340 = vadd.xlane.f32.xlu1 %v3339_v58 }
0x129f   : > { %4527 = vrot.lane.b32.xlu1 %v5295_v51, %s4804_s1  ;;  %s5450_s1 = sld [smem:[#allocation27_spill]] }
0x12a5   : > { %v3612_v34 = vld [vmem:[%s5450_s1] sm:$0xff]  ;;  %v3613_v35 = vld [vmem:[%s5450_s1 + $0x8] sm:$0xff]  ;;  %v3614_v37 = vld [vmem:[%s5450_s1 + $0x10] sm:$0xff] }
0x12a6   : > { %v4382_v38 = vpack.c.bf16 %v3613_v35, %v3612_v34  ;;  %v3615_v23 = vld [vmem:[%s5450_s1 + $0x18] sm:$0xff]  ;;  %v3616_v26 = vld [vmem:[%s5450_s1 + $0x20] sm:$0xff]  ;;  %v3617_v40 = vld [vmem:[%s5450_s1 + $0x28] sm:$0xff] }
0x12a7   : > { %v4385_v39 = vpack.c.bf16 %v3615_v23, %v3614_v37  ;;  %v4388_v41 = vpack.c.bf16 %v3617_v40, %v3616_v26  ;;  %v3618_v52 = vld [vmem:[%s5450_s1 + $0x30] sm:$0xff]  ;;  %v3619_v53 = vld [vmem:[%s5450_s1 + $0x38] sm:$0xff] }
0x12a8   : > { %v4391_v54 = vpack.c.bf16 %v3619_v53, %v3618_v52 }
0x12be   : > { %v3000_v61 = vpop.f32.mrb[20].mxu1 }
0x12bf   : > { %v3004_v62 = vadd.f32 %v3000_v61, %v2756_v60  ;;  %v4244_v63 = vpop.f32.mrb[21].mxu1 }
0x12c2   : > { %v3173_v2 = vpop.f32.mrb[22].mxu1 }
0x12c3   : > { %v4258_v3 = vpop.f32.mrb[23].mxu1  ;;  %4262 = vmatmul.mubr.msk.f32.vlgmr.msra.gmra.mrb[24].mxu1 %vm1247_vm2, %v3173_v2 }
0x12c4   : > { %4275 = vmatprep.mubr.msk.f32.mxu1 %vm4797_vm0, %v4798_v1 }
0x131b   : > { %v3341_v4 = vpop.xlane.xlu1 %3340 }
0x131c   : > { %4563 = vrcp.f32 %v3341_v4 }
0x131f   : > { %v4528_v5 = vpop.permute.xlu1 %4527 }
0x1320   : > { %v4530_v6 = vunpack.i.h.bf16 %v4528_v5  ;;  %v4529_v7 = vunpack.i.l.bf16 %v4528_v5 }
0x1322   : > { %v4373_v51 = vpack.c.bf16 %v4530_v6, %v4529_v7 }
0x1324   : > { %4374 = vmatpush3.bf16.msra.mxu1 %v4373_v51 }
0x1325   : > { %4278 = vmatprep.subr.mxu1 %v4798_v1 }
0x1326   : > { %v4564_v10 = vpop.eup %4563 }
0x1327   : > { %v3343_v11 = vmul.f32 %v4564_v10, %v4562_v36  ;;  %v3987_v36 = vld [vmem:[#allocation7] ss:$0 sm:$0xff] }
0x1329   : > { %4276 = vmatmul.mubr.msk.f32.vlgmr.msra.gmra.mrb[26].mxu1 %vm2598_vm4, %v3343_v11  ;;  %v3989_v11 = vld [vmem:[#allocation9] ss:$0 sm:$0xff] }
0x132a   : > { %4279 = vmatpush3.msra.mxu1 %v2503_v12  ;;  %4280 = vmatprep.mubr.msk.f32.mxu1 %vm4797_vm0, %v4798_v1 }
0x132b   : > { %4381 = vmatprep.subr.bf16.mxu1 %v4796_v0 }
0x1396   : > { %v3246_v13 = vpop.f32.mrb[24].mxu1 }
0x1397   : > { %v3250_v14 = vadd.f32 %v3246_v13, %v3004_v62  ;;  %v4263_v15 = vpop.f32.mrb[25].mxu1  ;;  %v3990_v13 = vld [vmem:[#allocation10] ss:$0 sm:$0xff] }
0x13fc   : > { %v3419_v17 = vpop.f32.mrb[26].mxu1 }
0x13fd   : > { %v4277_v18 = vpop.f32.mrb[27].mxu1  ;;  %4281 = vmatmul.mubr.msk.f32.vlgmr.msra.gmra.mrb[28].mxu1 %vm1247_vm2, %v3419_v17 }
0x13fe   : > { %4310 = vmatprep.mubr.msk.f32.mxu1 %vm4797_vm0, %v4798_v1  ;;  %4383 = vmatpush3.bf16.msra.mxu1 %v4382_v38 }
0x13ff   : > { %4384 = vmatprep.subr.bf16.mxu1 %v4796_v0 }
0x1402   : > { %4386 = vmatpush3.bf16.msra.mxu1 %v4385_v39 }
0x1403   : > { %4387 = vmatprep.subr.bf16.mxu1 %v4796_v0 }
0x1406   : > { %4389 = vmatpush3.bf16.msra.mxu1 %v4388_v41 }
0x1407   : > { %4390 = vmatprep.subr.bf16.mxu1 %v4796_v0 }
0x140a   : > { %4392 = vmatpush3.bf16.msra.mxu1 %v4391_v54 }
0x14d0   : > { %v3492_v19 = vpop.f32.mrb[28].mxu1 }
0x14d1   : > { %v3496_v20 = vadd.f32 %v3492_v19, %v3250_v14  ;;  %v4282_v21 = vpop.f32.mrb[29].mxu1 }
0x14d3   : > { %v3497_v22 = vadd.f32 %v3496_v20, %v5248_v16  ;;  %v3529_v16 = vld [vmem:[%s5449_s2 + $0x10] sm:$0xff] }
0x14d4   : > { %v4379_v9 = vpack.c.bf16 %v3530_v33, %v3529_v16 }
0x14d5   : > { %v3500_v24 = vsel %vm1074_vm1, %v3497_v22, 0.0 }
0x14d6   : > { %3501 = vadd.xlane.f32.xlu0 %v3500_v24  ;;  %4380 = vmatpush3.bf16.msra.mxu0 %v4379_v9 }
0x1563   : > { %v3502_v25 = vpop.xlane.xlu0 %3501 }
0x1564   : > { %v3503_v27 = vmul.f32 0.03125, %v3502_v25 }
0x1566   : > { %v3504_v28 = vsub.f32 %v3497_v22, %v3503_v27 }
0x1568   : > { %v3505_v29 = vmul.f32 %v3504_v28, %v3504_v28 }
0x156a   : > { %v3506_v1 = vsel %vm1074_vm1, %v3505_v29, 0.0 }
0x156b   : > { %3507 = vadd.xlane.f32.xlu1 %v3506_v1 }
0x15f8   : > { %v3508_v42 = vpop.xlane.xlu1 %3507 }
0x15f9   : > { %v3509_v43 = vmul.f32 0.03125, %v3508_v42 }
0x15fb   : > { %v3510_v44 = vadd.f32 1e-05, %v3509_v43 }
0x15fd   : > { %4565 = vrsqrt.f32 %v3510_v44 }
0x1607   : > { %v4566_v45 = vpop.eup %4565 }
0x1608   : > { %v3512_v47 = vmul.f32 %v4566_v45, %v3504_v28 }
0x160a   : > { %v3519_v49 = vmul.f32 %v3983_v46, %v3512_v47 }
0x160c   : > { %v3526_v50 = vadd.f32 %v3984_v48, %v3519_v49 }
0x160e   : > { %4292 = vmatmul.mubr.msk.f32.vlgmr.msra.gmra.mrb[28].mxu0 %vm1074_vm1, %v3526_v50 }
0x16e1   : > { %v3607_v55 = vpop.f32.mrb[28].mxu0 }
0x16e2   : > { %v3608_v56 = vadd.f32 %v3985_v8, %v3607_v55  ;;  %v4293_v0 = vpop.f32.mrb[29].mxu0 }
0x16e4   : > { %v3611_v57 = vmax.f32 %v3608_v56, 0.0 }
0x16e6   : > { %4311 = vmatmul.mubr.msk.f32.vlgmr.msra.gmra.mrb[30].mxu1 %vm3627_vm5, %v3611_v57 }
0x17b9   : > { %v3697_v58 = vpop.f32.mrb[30].mxu1 }
0x17ba   : > { %v3698_v59 = vadd.f32 %v3987_v36, %v3697_v58  ;;  %v4312_v60 = vpop.f32.mrb[31].mxu1 }
0x17bc   : > { %v3701_v61 = vadd.f32 %v3698_v59, %v3526_v50 }
0x17be   : > { %v3704_v62 = vsel %vm1074_vm1, %v3701_v61, 0.0 }
0x17bf   : > { %3705 = vadd.xlane.f32.xlu0 %v3704_v62 }
0x184c   : > { %v3706_v63 = vpop.xlane.xlu0 %3705 }
0x184d   : > { %v3707_v2 = vmul.f32 0.03125, %v3706_v63 }
0x184f   : > { %v3708_v3 = vsub.f32 %v3701_v61, %v3707_v2 }
0x1851   : > { %v3709_v4 = vmul.f32 %v3708_v3, %v3708_v3 }
0x1853   : > { %v3710_v5 = vsel %vm1074_vm1, %v3709_v4, 0.0 }
0x1854   : > { %3711 = vadd.xlane.f32.xlu0 %v3710_v5 }
0x18e1   : > { %v3712_v6 = vpop.xlane.xlu0 %3711 }
0x18e2   : > { %v3713_v7 = vmul.f32 0.03125, %v3712_v6 }
0x18e4   : > { %v3714_v51 = vadd.f32 1e-05, %v3713_v7 }
0x18e6   : > { %4567 = vrsqrt.f32 %v3714_v51 }
0x18f0   : > { %v4568_v10 = vpop.eup %4567 }
0x18f1   : > { %v3716_v12 = vmul.f32 %v4568_v10, %v3708_v3 }
0x18f3   : > { %v3723_v14 = vmul.f32 %v3989_v11, %v3716_v12 }
0x18f5   : > { %v3730_v15 = vadd.f32 %v3990_v13, %v3723_v14 }
0x18f7   : > { %3731 = vst.msk [vmem:[%s1055_s22] sm:$0xff] %vm1074_vm1, %v3730_v15 }
0x18f8 PF: > { %s75_s7 = sadd.s32 1, %s4759_s7  }
0x18f9   : > { %p72_p6 = scmp.ge.s32.totalorder %s75_s7, 4  }
0x18fb   :  { %74 = sbr.rel (!%p72_p6) target bundleno = 49 (0x31), region = 234 }
0x1902   :  { %3751 = vsyncpa [#allocation3], 1 }
0x1903   :  { %3753 = vsyncpa [#allocation3 + $0x1], 1 }
0x1904   :  { %3754 = vsyncpa [#allocation5], 1 }
0x1905   :  { %3755 = vsyncpa [#allocation8], 1 }
0x1906   :  { %3756 = vsyncpa [#allocation11], 1 }

// kernel: transformer_forward.7
= control target key start
LH: loop header
LB: loop body
LE: loop exit
PB: predicated region body
PF: predicated region fallthrough
CT: control target
= control target key end

     0   :  { %s5932_s6 = smov 1   ;;  %s5933_s10 = smov 2   ;;  %s7274_s0 = inlined_call_operand.smem [shape: u32[32], index: -1, kind: input, shape index: {}] }
   0x1   :  { %s5986_s5 = sld [smem:[%s7274_s0]]   ;;  %s5934_s14 = smov 3  }
   0x2   :  { %s5991_s9 = sld [smem:[%s7274_s0 + %s5932_s6]]   ;;  %s5935_s18 = smov 4  }
   0x3   :  { %s5996_s13 = sld [smem:[%s7274_s0 + %s5933_s10]]   ;;  %s5936_s22 = smov 5  }
   0x4   :  { %s6001_s17 = sld [smem:[%s7274_s0 + %s5934_s14]]   ;;  %s5937_s26 = smov 6  }
   0x5   :  { %s6006_s21 = sld [smem:[%s7274_s0 + %s5935_s18]]   ;;  %s5938_s30 = smov 7  }
   0x6   :  { %s6011_s25 = sld [smem:[%s7274_s0 + %s5936_s22]]   ;;  %s5939_s4 = smov 8  }
   0x7   :  { %7302 = sst [smem:[#allocation12_spill]] %s5986_s5  ;;  %s5940_s10 = smov 9  }
   0x8   :  { %s6016_s29 = sld [smem:[%s7274_s0 + %s5937_s26]]   ;;  %s5941_s15 = smov 10  }
   0x9   :  { %s6021_s3 = sld [smem:[%s7274_s0 + %s5938_s30]]   ;;  %s5942_s20 = smov 11  }
   0xa   :  { %s6026_s8 = sld [smem:[%s7274_s0 + %s5939_s4]]   ;;  %s5943_s26 = smov 12  }
   0xb   :  { %7303 = sst [smem:[#allocation13_spill]] %s6006_s21  ;;  %s5944_s1 = smov 13  }
   0xc   :  { %s6031_s14 = sld [smem:[%s7274_s0 + %s5940_s10]]   ;;  %s5945_s7 = smov 14  }
   0xd   :  { %s6036_s19 = sld [smem:[%s7274_s0 + %s5941_s15]]   ;;  %s5946_s15 = smov 15  }
   0xe   :  { %s6041_s24 = sld [smem:[%s7274_s0 + %s5942_s20]]   ;;  %s5947_s22 = smov 16  }
   0xf   :  { %7304 = sst [smem:[#allocation14_spill]] %s6021_s3  ;;  %s5948_s28 = smov 17  }
  0x10   :  { %s6046_s30 = sld [smem:[%s7274_s0 + %s5943_s26]]  }
  0x11   :  { %s6051_s6 = sld [smem:[%s7274_s0 + %s5944_s1]]  }
  0x12   :  { %s6056_s12 = sld [smem:[%s7274_s0 + %s5945_s7]]   ;;  %s5949_s7 = smov 18  }
  0x13   :  { %s6061_s20 = sld [smem:[%s7274_s0 + %s5946_s15]]   ;;  %s5950_s15 = smov 19  }
  0x14   :  { %s6066_s27 = sld [smem:[%s7274_s0 + %s5947_s22]]   ;;  %s5951_s22 = smov 20  }
  0x15   :  { %s6071_s4 = sld [smem:[%s7274_s0 + %s5948_s28]]   ;;  %s5952_s28 = smov 21  }
  0x16   :  { %7305 = sst [smem:[#allocation15_spill]] %s6046_s30 }
  0x17   :  { %7306 = sst [smem:[#allocation16_spill]] %s6051_s6 }
  0x18   :  { %7307 = sst [smem:[#allocation17_spill]] %s6056_s12 }
  0x19   :  { %s6076_s21 = sld [smem:[%s7274_s0 + %s5949_s7]]   ;;  %s5953_s7 = smov 22  }
  0x1a   :  { %7308 = sst [smem:[#allocation18_spill]] %s6066_s27 }
  0x1b   :  { %7309 = sst [smem:[#allocation19_spill]] %s6071_s4 }
  0x1c   :  { %s6081_s12 = sld [smem:[%s7274_s0 + %s5950_s15]]   ;;  %s5954_s15 = smov 23  }
  0x1d   :  { %s6086_s27 = sld [smem:[%s7274_s0 + %s5951_s22]]   ;;  %s5955_s22 = smov 24  }
  0x1e   :  { %s6091_s4 = sld [smem:[%s7274_s0 + %s5952_s28]]   ;;  %s5956_s28 = smov 25  }
  0x1f   :  { %7310 = sst [smem:[#allocation20_spill]] %s6076_s21 }
  0x20   :  { %s6096_s21 = sld [smem:[%s7274_s0 + %s5953_s7]]   ;;  %s5957_s7 = smov 26  }
  0x22   :  { %7311 = sst [smem:[#allocation21_spill]] %s6081_s12 }
  0x23   :  { %7312 = sst [smem:[#allocation22_spill]] %s6086_s27 }
  0x24   :  { %7313 = sst [smem:[#allocation23_spill]] %s6091_s4 }
  0x25   :  { %s6101_s12 = sld [smem:[%s7274_s0 + %s5954_s15]]   ;;  %s5958_s15 = smov 27  }
  0x26   :  { %7314 = sst [smem:[#allocation24_spill]] %s6096_s21 }
  0x27   :  { %s6106_s27 = sld [smem:[%s7274_s0 + %s5955_s22]]   ;;  %s5959_s22 = smov 28  }
  0x28   :  { %s6111_s4 = sld [smem:[%s7274_s0 + %s5956_s28]]   ;;  %s5960_s28 = smov 29  }
  0x29   :  { %s6116_s21 = sld [smem:[%s7274_s0 + %s5957_s7]]   ;;  %s5961_s7 = smov 30  }
  0x2b   :  { %7315 = sst [smem:[#allocation25_spill]] %s6101_s12 }
  0x2c   :  { %s6121_s12 = sld [smem:[%s7274_s0 + %s5958_s15]]   ;;  %s5962_s15 = smov 31  }
  0x2d   :  { %7316 = sst [smem:[#allocation26_spill]] %s6106_s27 }
  0x2e   :  { %7317 = sst [smem:[#allocation27_spill]] %s6111_s4 }
  0x2f   :  { %7318 = sst [smem:[#allocation28_spill]] %s6116_s21 }
  0x30   :  { %s6126_s27 = sld [smem:[%s7274_s0 + %s5959_s22]]  }
  0x31   :  { %s6131_s4 = sld [smem:[%s7274_s0 + %s5960_s28]]  }
  0x32   :  { %s6136_s21 = sld [smem:[%s7274_s0 + %s5961_s7]]  }
  0x33   :  { %s6141_s30 = sld [smem:[%s7274_s0 + %s5962_s15]]  }
  0x37   :  { %7319 = sst [smem:[#allocation29_spill]] %s6131_s4 }
  0x38   :  { %69 = vsyncpa [#allocation3], 0 }
  0x39   :  { %70 = vsyncpa [#allocation6], 0 }
  0x3a   :  { %71 = vsyncpa [#allocation4], 0 }
  0x3b   :  { %73 = vsyncpa [#allocation4 + $0x1], 0  ;;  %s6143_s22 = smov 0   ;;  %s6145_s23 = smov 0  }
  0x3c   :  { %s6147_s26 = smov 0   ;;  %s6149_s28 = smov 0  }
  0x3d LB: > { %s7320_s6 = sld [smem:[#allocation16_spill]]  ;;  %s7321_s4 = sld [smem:[#allocation29_spill]]  ;;  %s5926_s26 = sphi %s6147_s26, %s7431_s26   ;;  %s5922_s23 = sphi %s6145_s23, %s7433_s23   ;;  %s5918_s22 = sphi %s6143_s22, %s7432_s22   ;;  %s5930_s28 = sphi %s6149_s28, %s7429_s28  }
  0x3e   : > { %s7322_s3 = sld [smem:[#allocation14_spill]]  ;;  %7323 = sst [smem:[#allocation30_spill]] %s5918_s22 }
  0x3f   : > { %7324 = sst [smem:[#allocation31_spill]] %s5926_s26  ;;  %s6164_s0 = sadd.s32 4294967295, %s5930_s28  }
  0x40   : > { %s5000_s1 = sadd.s32 4294967294, %s5930_s28   ;;  %s6168_s2 = sadd.s32 1, %s5930_s28  }
  0x41   : > { %7325 = sst [smem:[#allocation32_spill]] %s6168_s2  ;;  %s736_s7 = sadd.s32 1, %s5926_s26 }
  0x42   : > { %s733_s10 = ssub.s32 %s5930_s28, %s6168_s2  ;;  %p746_p0 = scmp.ne.s32.totalorder %s5926_s26, %s5922_s23 }
  0x43   : > { %p734_p1 = scmp.eq.s32.totalorder %s733_s10, 0  ;;  %p747_p2 = scmp.eq.s32.totalorder %s6164_s0, 1 }
  0x44   : > { %p752_p3 = scmp.ne.s32.totalorder %s5922_s23, %s5918_s22  ;;  %p753_p4 = scmp.eq.s32.totalorder %s5000_s1, 1 }
  0x45   : > { %s6179_s11 = scalar_select %p734_p1, %s5926_s26, %s736_s7  }
  0x46   : > { %p6181_p5 = por %p747_p2, %p746_p0  ;;  %p6185_p6 = por %p753_p4, %p752_p3 }
  0x47   : > { %7326 = sst [smem:[#allocation33_spill]] %s6179_s11  ;;  %p5001_p7 = scmp.ge.s32.totalorder %s5930_s28, 1 }
  0x48   : > { %s7327_s15 = scalar_select %p6181_p5, 1, 0 }
  0x49   : > { %s7328_s16 = scalar_select %p6185_p6, 1, 0 }
  0x4a   : > { %p786_p8 = scmp.lt.s32.totalorder %s5930_s28, 3  ;;  %p7285_p9 = scmp.eq.s32.totalorder %s6164_s0, 0 }
  0x4b   : > { %7329 = sst [smem:[#allocation34_spill]] %s7328_s16  ;;  %s5963_s1 = smov [#allocation5]  }
  0x4c   : > { %p6192_p10 = pnand %p5001_p7, %p786_p8  ;;  %s879_s7 = sshll.u32 %s5963_s1, 4  ;;  %s880_s7 = int_to_ptr.vmem [resolvable:$true] %s879_s7 }
  0x4d   : > { %s5964_s10 = smov [#allocation2]   ;;  %s5965_s2 = smov [#allocation7]  }
  0x4e   : > { %s7330_s18 = scalar_select %p6192_p10, 1, 0 }
  0x4f   : > { %p5610_p11 = pneg %p6192_p10  ;;  %s868_s11 = sshll.u32 %s5964_s10, 4  ;;  %s6204_s11 = int_to_ptr.vmem [resolvable:$true] %s868_s11 }
  0x50   : > { %s890_s16 = sshll.u32 %s5965_s2, 4  ;;  %s5776_s22 = scalar_lea.hbm %s6126_s27, 16  ;;  %s6206_s16 = int_to_ptr.vmem [resolvable:$true] %s890_s16 }
  0x51   : > { %p6200_p12 = pnand %p7285_p9, %p5610_p11  ;;  %p5777_p13 = scmp.ne.s32.totalorder %s6126_s27, %s5776_s22 }
  0x52   : > { %p5783_p3 = scmp.lt.u32.totalorder %s5776_s22, %s6126_s27 }
  0x53   : > { %p6212_p0 = pneg %p6200_p12 }
  0x55   : > { %p5779_p1 = pnand %p6212_p0, %p5777_p13 }
  0x57   : > { %p5780_p2 = pneg %p5779_p1 }
  0x59   : > { %p5785_p4 = pnand %p5783_p3, %p5780_p2 }
  0x5b   : > { %5788 = shalt.err (!%p5785_p4)
}
  0x5c   : > { %s5789_s10 = scalar_lea.vmem %s880_s7, 16  ;;  %s5796_s2 = scalar_lea.vmem %s880_s7, 32 }
  0x5d   : > { %p5790_p7 = scmp.ne.s32.totalorder %s880_s7, %s5789_s10  ;;  %p5797_p9 = scmp.lt.s32.totalorder %s880_s7, %s880_s7 }
  0x5e   : > { %p5798_p6 = scmp.lt.s32.totalorder %s5796_s2, %s5789_s10 }
  0x5f   : > { %p5792_p8 = pnand %p5790_p7, %p6212_p0 }
  0x60   : > { %p5799_p5 = por %p5798_p6, %p5797_p9 }
  0x61   : > { %p5793_p11 = pneg %p5792_p8 }
  0x63   : > { %p5800_p10 = pnand %p5799_p5, %p5793_p11 }
  0x65   : > { %5803 = shalt.err (!%p5800_p10)
}
  0x66   : > { %5616 = dma.hbm_to_vmem [thread:$0]  (!%p6200_p12), %s6126_s27, 16, %s880_s7, [#allocation6]  }
  0x67   : > { %s5804_s22 = scalar_lea.hbm %s6121_s12, 16 }
  0x68   : > { %p5805_p13 = scmp.ne.s32.totalorder %s6121_s12, %s5804_s22  ;;  %p5811_p3 = scmp.lt.u32.totalorder %s5804_s22, %s6121_s12 }
  0x6a   : > { %p5807_p1 = pnand %p5805_p13, %p6212_p0 }
  0x6c   : > { %p5808_p2 = pneg %p5807_p1 }
  0x6e   : > { %p5813_p4 = pnand %p5811_p3, %p5808_p2 }
  0x70   : > { %5816 = shalt.err (!%p5813_p4)
}
  0x71   : > { %s5817_s10 = scalar_lea.vmem %s6204_s11, 16  ;;  %s5824_s2 = scalar_lea.vmem %s6204_s11, 32 }
  0x72   : > { %p5818_p5 = scmp.ne.s32.totalorder %s6204_s11, %s5817_s10  ;;  %p5825_p10 = scmp.lt.s32.totalorder %s6204_s11, %s6204_s11 }
  0x73   : > { %p5826_p7 = scmp.lt.s32.totalorder %s5824_s2, %s5817_s10 }
  0x74   : > { %p5820_p6 = pnand %p5818_p5, %p6212_p0 }
  0x75   : > { %p5827_p8 = por %p5826_p7, %p5825_p10 }
  0x76   : > { %p5821_p9 = pneg %p5820_p6 }
  0x78   : > { %p5828_p11 = pnand %p5827_p8, %p5821_p9 }
  0x7a   : > { %5831 = shalt.err (!%p5828_p11)
}
  0x7b   : > { %5613 = dma.hbm_to_vmem [thread:$0]  (!%p6200_p12), %s6121_s12, 16, %s6204_s11, [#allocation3]  }
  0x7c   : > { %s5832_s7 = scalar_lea.hbm %s7321_s4, 16 }
  0x7d   : > { %p5833_p13 = scmp.ne.s32.totalorder %s7321_s4, %s5832_s7  ;;  %p5839_p3 = scmp.lt.u32.totalorder %s5832_s7, %s7321_s4 }
  0x7f   : > { %p5835_p1 = pnand %p5833_p13, %p6212_p0 }
  0x81   : > { %p5836_p2 = pneg %p5835_p1 }
  0x83   : > { %p5841_p4 = pnand %p5839_p3, %p5836_p2 }
  0x85   : > { %5844 = shalt.err (!%p5841_p4)
}
  0x86   : > { %s5845_s22 = scalar_lea.vmem %s6206_s16, 16  ;;  %s5852_s10 = scalar_lea.vmem %s6206_s16, 32 }
  0x87   : > { %p5846_p5 = scmp.ne.s32.totalorder %s6206_s16, %s5845_s22  ;;  %p5853_p10 = scmp.lt.s32.totalorder %s6206_s16, %s6206_s16 }
  0x88   : > { %p5854_p7 = scmp.lt.s32.totalorder %s5852_s10, %s5845_s22 }
  0x89   : > { %p5848_p6 = pnand %p5846_p5, %p6212_p0 }
  0x8a   : > { %p5855_p8 = por %p5854_p7, %p5853_p10 }
  0x8b   : > { %p5849_p9 = pneg %p5848_p6 }
  0x8d   : > { %p5856_p11 = pnand %p5855_p8, %p5849_p9 }
  0x8f   : > { %5859 = shalt.err (!%p5856_p11)
}
  0x90   : > { %5619 = dma.hbm_to_vmem [thread:$0]  (!%p6200_p12), %s7321_s4, 16, %s6206_s16, [#allocation6]  }
  0x91   : > { %p7333_p13 = scmp.ne.s32.totalorder %s7330_s18, 0 }
  0x93   : > { %932 = sbr.rel (%p7333_p13) target bundleno = 6573 (0x19ad), region = 140 }
  0x9a   : > { %p7334_p1 = scmp.eq.s32.totalorder %s6164_s0, 0 }
  0x9c   : > { %5905 = dma.done.wait (%p7334_p1), [#allocation3], 16   ;;  %p7335_p0 = pmov %p7334_p1 }
  0x9e   : > { %5907 = vsyncadd (%p7335_p0), [#allocation3], 4294967280  ;;  %p7336_p2 = pmov %p7335_p0 }
  0x9f   : > { %p7337_p3 = pmov %p7335_p0 }
  0xa0   : > { %5909 = dma.done.wait (%p7336_p2), [#allocation6], 32  }
  0xa1   : > { %5911 = vsyncadd (%p7337_p3), [#allocation6], 4294967264  ;;  %s7338_s5 = sld [smem:[#allocation12_spill]]  ;;  %p1037_p12 = scmp.lt.s32.totalorder %s6164_s0, 1  ;;  %v5966_v0 = vmov 0.0|0.0   ;;  %vm5967_vm0 = vmmov 0  }
  0xa2   : > { %5492 = vmatprep.subr.bf16.mxu0 %v5966_v0  ;;  %v5968_v1 = vmov 0.0   ;;  %5498 = vmatprep.subr.bf16.mxu1 %v5966_v0  ;;  %v1066_v2 = vld [vmem:[%s6011_s25] sm:$0xff]  ;;  %v1067_v3 = vld [vmem:[%s6011_s25 + $0x8] sm:$0xff]  ;;  %v1068_v4 = vld [vmem:[%s6011_s25 + $0x10] sm:$0xff]  ;;  %vm1077_vm1 = vcmask 261120   ;;  %s5969_s18 = smov 88  }
  0xa3   : > { %5239 = vmatprep.mubr.msk.f32.mxu0 %vm5967_vm0, %v5968_v1  ;;  %s6271_s26 = scalar_select %p1037_p12, %s6164_s0, 1  ;;  %5250 = vmatprep.mubr.msk.f32.mxu1 %vm5967_vm0, %v5968_v1  ;;  %v5493_v5 = vpack.c.bf16 %v1067_v3, %v1066_v2  ;;  %v1069_v6 = vld [vmem:[%s6011_s25 + $0x18] sm:$0xff]  ;;  %v6285_v9 = vld [vmem:[%s5991_s9] sm:$0xff]  ;;  %v1152_v12 = vld [vmem:[%s7322_s3 + $0x8] sm:$0xff]  ;;  %vm1250_vm2 = vcmask 64512   ;;  %vm2601_vm4 = vcmask 130048  }
  0xa4   : > { %v5496_v7 = vpack.c.bf16 %v1069_v6, %v1068_v4  ;;  %v1151_v11 = vld [vmem:[%s7322_s3] sm:$0xff]  ;;  %v1153_v13 = vld [vmem:[%s7322_s3 + $0x10] sm:$0xff]  ;;  %v1154_v15 = vld [vmem:[%s7322_s3 + $0x18] sm:$0xff]  ;;  %s5970_s1 = smov 96   ;;  %s5971_s2 = smov 120   ;;  %vm3630_vm5 = vcmask 523264  }
  0xa5   : > { %s5011_s11 = sshll.u32 %s6271_s26, 3  ;;  %5494 = vmatpush3.bf16.msra.mxu0 %v5493_v5  ;;  %v5499_v14 = vpack.c.bf16 %v1152_v12, %v1151_v11  ;;  %v5502_v16 = vpack.c.bf16 %v1154_v15, %v1153_v13  ;;  %v5018_v17 = vld [vmem:[%s6016_s29] ss:$0 sm:$0xff]  ;;  %s5972_s7 = smov 112   ;;  %v1236_v58 = vld [vmem:[%s6031_s14 + $0x8] sm:$0xff]  ;;  %vm6421_vm3 = vmpackc.low %vm1250_vm2, %vm1250_vm2 }
  0xa6   : > { %5495 = vmatprep.subr.bf16.mxu0 %v5966_v0  ;;  %v5020_v23 = vld [vmem:[%s6026_s8] ss:$0 sm:$0xff]  ;;  %s5973_s22 = smov 80   ;;  %s7288_s10 = smov 104  }
  0xa7   : > { %s1040_s16 = scalar_lea.vmem %s7338_s5, %s5011_s11  ;;  %5500 = vmatpush3.bf16.msra.mxu1 %v5499_v14  ;;  %v1235_v34 = vld [vmem:[%s6031_s14] sm:$0xff]  ;;  %s5975_s11 = smov 72  }
  0xa8   : > { %v6282_v8 = vld [vmem:[%s1040_s16] sm:$0xff]  ;;  %5501 = vmatprep.subr.bf16.mxu1 %v5966_v0  ;;  %s5107_s16 = sshll.u32 %s6271_s26, 4  ;;  %s7356_s3 = sld [smem:[#allocation25_spill]] }
  0xa9   : > { %v1065_v10 = vadd.f32 %v6285_v9, %v6282_v8  ;;  %5497 = vmatpush3.bf16.msra.mxu0 %v5496_v7  ;;  %p7425_p5 = scmp.ne.s32.totalorder %s7327_s15, 0 }
  0xaa   : > { %5263 = vmatprep.subr.mxu0 %v5968_v1 }
  0xab   : > { %5503 = vmatpush3.bf16.msra.mxu1 %v5502_v16 }
  0xac   : > { %5240 = vmatmul.mubr.msk.f32.vlgmr.msra.gmra.mrb[0].mxu0 %vm1077_vm1, %v1065_v10  ;;  %5253 = vmatprep.subr.mxu1 %v5968_v1  ;;  %v5022_v10 = vld [vmem:[%s6036_s19] ss:$0 sm:$0xff] }
  0xad   : > { %5265 = vmatprep.mubr.msk.f32.mxu0 %vm5967_vm0, %v5968_v1  ;;  %5264 = vmatpush3.msra.mxu0 %v1235_v34 }
  0xae   : > { %5251 = vmatmul.mubr.msk.f32.vlgmr.msra.gmra.mrb[0].mxu1 %vm1077_vm1, %v6282_v8  ;;  %5273 = vmatprep.subr.mxu0 %v5968_v1 }
  0xaf   : > { %5255 = vmatprep.mubr.msk.f32.mxu1 %vm5967_vm0, %v5968_v1 }
 0x17f   : > { %v1147_v18 = vpop.f32.mrb[0].mxu0 }
 0x180   : > { %v6305_v19 = vadd.f32 %v5018_v17, %v1147_v18  ;;  %v5241_v20 = vpop.f32.mrb[1].mxu0 }
 0x181   : > { %v1231_v21 = vpop.f32.mrb[0].mxu1  ;;  %v1237_v20 = vld [vmem:[%s6031_s14 + $0x10] sm:$0xff] }
 0x182   : > { %1485 = vrot.lane.b32.xlu1 %v6305_v19, %s5969_s18  ;;  %1248 = vrot.lane.b32.xlu0 %v6305_v19, %s5970_s1  ;;  %v5252_v22 = vpop.f32.mrb[1].mxu1  ;;  %v6311_v25 = vadd.f32 %v5020_v23, %v1231_v21  ;;  %s1045_s18 = scalar_lea.vmem %s5996_s13, %s5107_s16  ;;  %s1050_s1 = scalar_lea.vmem %s6001_s17, %s5107_s16 }
 0x183   : > { %s7341_s16 = sld [smem:[#allocation17_spill]] }
 0x1f4   : > { %v1249_v24 = vpop.permute.xlu0 %1248  ;;  %v1486_v35 = vpop.permute.xlu1 %1485 }
 0x1f5   : > { %5254 = vmatpush3.xpose.msk.msra.mxu1 %vm1250_vm2, %v1249_v24 }
 0x1f6   : > { %5258 = vmatprep.subr.mxu1 %v5968_v1 }
 0x1f8   : > { %5256 = vmatmul.mubr.msk.f32.vlgmr.msra.gmra.mrb[2].mxu1 %vm1250_vm2, %v6305_v19 }
 0x1f9   : > { %5259 = vmatpush3.msra.mxu1 %v6311_v25  ;;  %5260 = vmatprep.mubr.msk.f32.mxu1 %vm5967_vm0, %v5968_v1 }
 0x1fa   : > { %5268 = vmatprep.subr.mxu1 %v5968_v1 }
 0x2cb   : > { %v1321_v26 = vpop.f32.mrb[2].mxu1 }
 0x2cc   : > { %v5257_v27 = vpop.f32.mrb[3].mxu1  ;;  %v1325_v28 = vsel %vm1250_vm2, %v1321_v26, -inf }
 0x2cd   : > { %1326 = vmax.xlane.f32.xlu0 %v1325_v28 }
 0x2e3   : > { %1573 = vrot.lane.b32.xlu0 %v6311_v25, %s5971_s2 }
 0x35a   : > { %v1327_v29 = vpop.xlane.xlu0 %1326 }
 0x35b   : > { %v1328_v30 = vsub.f32 %v1321_v26, %v1327_v29 }
 0x35d   : > { %v1329_v31 = vmul.f32 1.442695, %v1328_v30 }
 0x35e   : > { %v1574_v41 = vpop.permute.xlu0 %1573 }
 0x35f   : > { %5738 = vpow2.f32 %v1329_v31 }
 0x369   : > { %v5739_v32 = vpop.eup %5738 }
 0x36a   : > { %v1331_v33 = vsel %vm1250_vm2, %v5739_v32, 0.0 }
 0x36b   : > { %1332 = vadd.xlane.f32.xlu1 %v1331_v33  ;;  %v1238_v33 = vld [vmem:[%s6031_s14 + $0x18] sm:$0xff] }
 0x37c   : > { %1483 = vrot.lane.b32.xlu1 %v6305_v19, %s5971_s2 }
 0x3f8   : > { %v1333_v36 = vpop.xlane.xlu1 %1332 }
 0x3f9   : > { %5740 = vrcp.f32 %v1333_v36 }
 0x3fc   : > { %v1484_v39 = vpop.permute.xlu1 %1483 }
 0x403   : > { %v5741_v37 = vpop.eup %5740 }
 0x404   : > { %v1335_v38 = vmul.f32 %v5741_v37, %v5739_v32 }
 0x406   : > { %5261 = vmatmul.mubr.msk.f32.vlgmr.msra.gmra.mrb[4].mxu1 %vm1250_vm2, %v1335_v38 }
 0x407   : > { %5269 = vmatpush3.xpose.msk.msra.mxu1 %vm1250_vm2, %v1486_v35  ;;  %5270 = vmatprep.mubr.msk.f32.mxu1 %vm5967_vm0, %v5968_v1 }
 0x408   : > { %5278 = vmatprep.subr.mxu1 %v5968_v1 }
 0x40a   : > { %5271 = vmatmul.mubr.msk.f32.vlgmr.msra.gmra.mrb[6].mxu1 %vm1250_vm2, %v1484_v39 }
 0x40b   : > { %5280 = vmatprep.mubr.msk.f32.mxu1 %vm5967_vm0, %v5968_v1  ;;  %5279 = vmatpush3.msra.mxu1 %v1236_v58  ;;  %v1062_v58 = vld [vmem:[%s1045_s18 + $0x8] sm:$0xff] }
 0x40c   : > { %5288 = vmatprep.subr.mxu1 %v5968_v1 }
 0x4d9   : > { %v1405_v40 = vpop.f32.mrb[4].mxu1 }
 0x4da   : > { %v5262_v42 = vpop.f32.mrb[5].mxu1  ;;  %5266 = vmatmul.mubr.msk.f32.vlgmr.msra.gmra.mrb[2].mxu0 %vm1250_vm2, %v1405_v40 }
 0x4db   : > { %5274 = vmatpush3.msra.mxu0 %v1574_v41  ;;  %5275 = vmatprep.mubr.msk.f32.mxu0 %vm5967_vm0, %v5968_v1 }
 0x4dc   : > { %5283 = vmatprep.subr.mxu0 %v5968_v1 }
 0x4dd   : > { %v1557_v43 = vpop.f32.mrb[6].mxu1 }
 0x4de   : > { %v5272_v44 = vpop.f32.mrb[7].mxu1  ;;  %v1561_v45 = vsel %vm1250_vm2, %v1557_v43, -inf }
 0x4df   : > { %1562 = vmax.xlane.f32.xlu1 %v1561_v45 }
 0x4f0   : > { %1723 = vrot.lane.b32.xlu1 %v6305_v19, %s5972_s7 }
 0x56c   : > { %v1563_v46 = vpop.xlane.xlu1 %1562 }
 0x56d   : > { %v1564_v47 = vsub.f32 %v1557_v43, %v1563_v46 }
 0x56f   : > { %v1565_v48 = vmul.f32 1.442695, %v1564_v47 }
 0x570   : > { %v1724_v57 = vpop.permute.xlu1 %1723 }
 0x571   : > { %5742 = vpow2.f32 %v1565_v48 }
 0x57b   : > { %v5743_v49 = vpop.eup %5742 }
 0x57c   : > { %v1567_v50 = vsel %vm1250_vm2, %v5743_v49, 0.0 }
 0x57d   : > { %1568 = vadd.xlane.f32.xlu0 %v1567_v50 }
 0x593   : > { %1725 = vrot.lane.b32.xlu0 %v6305_v19, %s5973_s22  ;;  %s7339_s22 = sld [smem:[#allocation15_spill]] }
 0x5ad   : > { %v1478_v51 = vpop.f32.mrb[2].mxu0 }
 0x5ae   : > { %v5267_v52 = vpop.f32.mrb[3].mxu0  ;;  %v1482_v11 = vadd.f32 %v5022_v10, %v1478_v51  ;;  %v2319_v51 = vld [vmem:[%s6061_s20] sm:$0xff] }
 0x5af   : > { %v2320_v52 = vld [vmem:[%s6061_s20 + $0x8] sm:$0xff] }
 0x60a   : > { %v1569_v53 = vpop.xlane.xlu0 %1568 }
 0x60b   : > { %5744 = vrcp.f32 %v1569_v53  ;;  %v5510_v53 = vpack.c.bf16 %v2320_v52, %v2319_v51 }
 0x60e   : > { %v1726_v56 = vpop.permute.xlu0 %1725 }
 0x615   : > { %v5745_v54 = vpop.eup %5744 }
 0x616   : > { %v1571_v55 = vmul.f32 %v5745_v54, %v5743_v49  ;;  %v2321_v54 = vld [vmem:[%s6061_s20 + $0x10] sm:$0xff] }
 0x618   : > { %5276 = vmatmul.mubr.msk.f32.vlgmr.msra.gmra.mrb[4].mxu0 %vm1250_vm2, %v1571_v55 }
 0x619   : > { %5284 = vmatpush3.xpose.msk.msra.mxu0 %vm1250_vm2, %v1726_v56  ;;  %5285 = vmatprep.mubr.msk.f32.mxu0 %vm5967_vm0, %v5968_v1  ;;  %v1061_v56 = vld [vmem:[%s1045_s18] sm:$0xff]  ;;  %s7342_s18 = sld [smem:[#allocation19_spill]] }
 0x61a   : > { %5293 = vmatprep.subr.mxu0 %v5968_v1 }
 0x61c   : > { %5286 = vmatmul.mubr.msk.f32.vlgmr.msra.gmra.mrb[6].mxu0 %vm1250_vm2, %v1724_v57  ;;  %v1063_v57 = vld [vmem:[%s1050_s1] sm:$0xff] }
 0x61d   : > { %5295 = vmatprep.mubr.msk.f32.mxu0 %vm5967_vm0, %v5968_v1  ;;  %5294 = vmatpush3.msra.mxu0 %v1237_v20 }
 0x61e   : > { %5303 = vmatprep.subr.mxu0 %v5968_v1 }
 0x6eb   : > { %v1645_v59 = vpop.f32.mrb[4].mxu0 }
 0x6ec   : > { %v5277_v60 = vpop.f32.mrb[5].mxu0  ;;  %5281 = vmatmul.mubr.msk.f32.vlgmr.msra.gmra.mrb[8].mxu1 %vm1250_vm2, %v1645_v59  ;;  %v1064_v59 = vld [vmem:[%s1050_s1 + $0x8] sm:$0xff]  ;;  %s7345_s1 = sld [smem:[#allocation13_spill]] }
 0x6ed   : > { %5290 = vmatprep.mubr.msk.f32.mxu1 %vm5967_vm0, %v5968_v1  ;;  %v2317_v60 = vadd.f32 %v1063_v57, %v1061_v56 }
 0x6ef   : > { %v1797_v61 = vpop.f32.mrb[6].mxu0 }
 0x6f0   : > { %v5287_v62 = vpop.f32.mrb[7].mxu0  ;;  %v1801_v63 = vsel %vm1250_vm2, %v1797_v61, -inf }
 0x6f1   : > { %1802 = vmax.xlane.f32.xlu0 %v1801_v63  ;;  %v2233_v62 = vld [vmem:[%s7320_s6] sm:$0xff]  ;;  %v2234_v63 = vld [vmem:[%s7320_s6 + $0x8] sm:$0xff] }
 0x707   : > { %1812 = vrot.lane.b32.xlu0 %v6311_v25, %s5972_s7 }
 0x70b   : > { %1962 = vrot.lane.b32.xlu0 %v6305_v19, %s7288_s10 }
 0x77e   : > { %v1803_v2 = vpop.xlane.xlu0 %1802 }
 0x77f   : > { %v1804_v3 = vsub.f32 %v1797_v61, %v1803_v2  ;;  %v2318_v61 = vadd.f32 %v1064_v59, %v1062_v58  ;;  %v5505_v2 = vpack.c.bf16 %v2234_v63, %v2233_v62 }
 0x781   : > { %v1805_v4 = vmul.f32 1.442695, %v1804_v3  ;;  %v2235_v3 = vld [vmem:[%s7320_s6 + $0x10] sm:$0xff] }
 0x782   : > { %v1813_v5 = vpop.permute.xlu0 %1812 }
 0x783   : > { %5746 = vpow2.f32 %v1805_v4  ;;  %5289 = vmatpush3.msra.mxu1 %v1813_v5  ;;  %v2236_v4 = vld [vmem:[%s7320_s6 + $0x18] sm:$0xff] }
 0x784   : > { %5298 = vmatprep.subr.mxu1 %v5968_v1  ;;  %v5508_v5 = vpack.c.bf16 %v2236_v4, %v2235_v3 }
 0x78d   : > { %v5747_v6 = vpop.eup %5746 }
 0x78e   : > { %v1807_v7 = vsel %vm1250_vm2, %v5747_v6, 0.0 }
 0x78f   : > { %1808 = vadd.xlane.f32.xlu1 %v1807_v7 }
 0x7a0   : > { %1964 = vrot.lane.b32.xlu1 %v6305_v19, %s5975_s11  ;;  %v1963_v19 = vpop.permute.xlu0 %1962  ;;  %s7340_s11 = sld [smem:[#allocation18_spill]] }
 0x7bf   : > { %v1718_v12 = vpop.f32.mrb[8].mxu1 }
 0x7c0   : > { %v1722_v13 = vadd.f32 %v1718_v12, %v1482_v11  ;;  %v5282_v14 = vpop.f32.mrb[9].mxu1  ;;  %v5039_v12 = vld [vmem:[%s6041_s24] ss:$0 sm:$0xff] }
 0x7c1   : > { %v5040_v14 = vld [vmem:[%s7339_s22] ss:$0 sm:$0xff]  ;;  %s1053_s22 = scalar_lea.vmem %s7345_s1, %s6271_s26  ;;  %s7348_s1 = sld [smem:[#allocation26_spill]] }
 0x81c   : > { %v1809_v15 = vpop.xlane.xlu1 %1808 }
 0x81d   : > { %5748 = vrcp.f32 %v1809_v15 }
 0x820   : > { %v1965_v18 = vpop.permute.xlu1 %1964 }
 0x827   : > { %v5749_v16 = vpop.eup %5748 }
 0x828   : > { %v1811_v17 = vmul.f32 %v5749_v16, %v5747_v6 }
 0x82a   : > { %5291 = vmatmul.mubr.msk.f32.vlgmr.msra.gmra.mrb[10].mxu1 %vm1250_vm2, %v1811_v17 }
 0x82b   : > { %5299 = vmatpush3.xpose.msk.msra.mxu1 %vm1250_vm2, %v1965_v18  ;;  %5300 = vmatprep.mubr.msk.f32.mxu1 %vm5967_vm0, %v5968_v1  ;;  %v5043_v18 = vld [vmem:[%s7340_s11] ss:$0 sm:$0xff]  ;;  %s7346_s11 = sld [smem:[#allocation20_spill]] }
 0x82c   : > { %5308 = vmatprep.subr.mxu1 %v5968_v1 }
 0x82e   : > { %5301 = vmatmul.mubr.msk.f32.vlgmr.msra.gmra.mrb[12].mxu1 %vm1250_vm2, %v1963_v19 }
 0x82f   : > { %5310 = vmatprep.mubr.msk.f32.mxu1 %vm5967_vm0, %v5968_v1  ;;  %5309 = vmatpush3.msra.mxu1 %v1238_v33 }
 0x830   : > { %5511 = vmatprep.subr.bf16.mxu1 %v5510_v53 }
 0x8fd   : > { %v1884_v21 = vpop.f32.mrb[10].mxu1 }
 0x8fe   : > { %v5292_v22 = vpop.f32.mrb[11].mxu1  ;;  %5296 = vmatmul.mubr.msk.f32.vlgmr.msra.gmra.mrb[8].mxu0 %vm1250_vm2, %v1884_v21 }
 0x8ff   : > { %5305 = vmatprep.mubr.msk.f32.mxu0 %vm5967_vm0, %v5968_v1 }
 0x901   : > { %v2036_v23 = vpop.f32.mrb[12].mxu1 }
 0x902   : > { %v5302_v24 = vpop.f32.mrb[13].mxu1  ;;  %v2040_v26 = vsel %vm1250_vm2, %v2036_v23, -inf }
 0x903   : > { %2041 = vmax.xlane.f32.xlu0 %v2040_v26  ;;  %v5041_v26 = vld [vmem:[%s7341_s16] ss:$0 sm:$0xff]  ;;  %s7347_s16 = sld [smem:[#allocation21_spill]] }
 0x919   : > { %2051 = vrot.lane.b32.xlu0 %v6311_v25, %s7288_s10 }
 0x990   : > { %v2042_v27 = vpop.xlane.xlu0 %2041 }
 0x991   : > { %v2043_v28 = vsub.f32 %v2036_v23, %v2042_v27 }
 0x993   : > { %v2044_v29 = vmul.f32 1.442695, %v2043_v28 }
 0x994   : > { %v2052_v30 = vpop.permute.xlu0 %2051 }
 0x995   : > { %5750 = vpow2.f32 %v2044_v29  ;;  %5304 = vmatpush3.msra.mxu0 %v2052_v30  ;;  %v2411_v30 = vld [vmem:[%s7342_s18] sm:$0xff] }
 0x996   : > { %5504 = vmatprep.subr.bf16.mxu0 %v5966_v0 }
 0x99f   : > { %v5751_v31 = vpop.eup %5750 }
 0x9a0   : > { %v2046_v32 = vsel %vm1250_vm2, %v5751_v31, 0.0 }
 0x9a1   : > { %2047 = vadd.xlane.f32.xlu1 %v2046_v32  ;;  %v2413_v32 = vld [vmem:[%s7342_s18 + $0x10] sm:$0xff] }
 0x9d1   : > { %v1957_v34 = vpop.f32.mrb[8].mxu0 }
 0x9d2   : > { %v1961_v35 = vadd.f32 %v1957_v34, %v1722_v13  ;;  %v5297_v36 = vpop.f32.mrb[9].mxu0  ;;  %v2414_v34 = vld [vmem:[%s7342_s18 + $0x18] sm:$0xff] }
 0x9d3   : > { %v6449_v36 = vld [vmem:[%s1053_s22] ss:$0 sm:$0xff]  ;;  %s7349_s22 = sld [smem:[#allocation22_spill]] }
 0xa2e   : > { %v2048_v37 = vpop.xlane.xlu1 %2047 }
 0xa2f   : > { %5752 = vrcp.f32 %v2048_v37 }
 0xa39   : > { %v5753_v25 = vpop.eup %5752 }
 0xa3a   : > { %v2050_v38 = vmul.f32 %v5753_v25, %v5751_v31  ;;  %v2412_v31 = vld [vmem:[%s7342_s18 + $0x8] sm:$0xff] }
 0xa3b   : > { %v5518_v33 = vpack.c.bf16 %v2412_v31, %v2411_v30 }
 0xa3c   : > { %5306 = vmatmul.mubr.msk.f32.vlgmr.msra.gmra.mrb[10].mxu0 %vm1250_vm2, %v2050_v38 }
 0xa3d   : > { %5321 = vmatprep.mubr.msk.f32.mxu0 %vm5967_vm0, %v5968_v1  ;;  %5506 = vmatpush3.bf16.msra.mxu0 %v5505_v2  ;;  %v2503_v2 = vld [vmem:[%s7347_s16] sm:$0xff] }
 0xa3e   : > { %5507 = vmatprep.subr.bf16.mxu0 %v5966_v0 }
 0xa41   : > { %5509 = vmatpush3.bf16.msra.mxu0 %v5508_v5 }
 0xa42   : > { %5519 = vmatprep.subr.bf16.mxu0 %v5518_v33 }
 0xb0f   : > { %v2123_v39 = vpop.f32.mrb[10].mxu0 }
 0xb10   : > { %v5307_v40 = vpop.f32.mrb[11].mxu0  ;;  %5311 = vmatmul.mubr.msk.f32.vlgmr.msra.gmra.mrb[14].mxu1 %vm1250_vm2, %v2123_v39 }
 0xb11   : > { %5513 = vmatpush3.bf16.msra.mxu1 %v5510_v53  ;;  %5332 = vmatprep.mubr.msk.f32.mxu1 %vm1077_vm1, %v2317_v60 }
 0xbe3   : > { %v2196_v41 = vpop.f32.mrb[14].mxu1 }
 0xbe4   : > { %v2200_v42 = vadd.f32 %v2196_v41, %v1961_v35  ;;  %v5312_v43 = vpop.f32.mrb[15].mxu1  ;;  %v5522_v35 = vpack.c.bf16 %v2414_v34, %v2413_v32  ;;  %v3533_v34 = vld [vmem:[%s7348_s1 + $0x18] sm:$0xff] }
 0xbe6   : > { %v2201_v44 = vadd.f32 %v2200_v42, %v6282_v8  ;;  %v2322_v8 = vld [vmem:[%s6061_s20 + $0x18] sm:$0xff] }
 0xbe7   : > { %v5514_v55 = vpack.c.bf16 %v2322_v8, %v2321_v54 }
 0xbe8   : > { %v2204_v45 = vsel %vm1077_vm1, %v2201_v44, 0.0 }
 0xbe9   : > { %2205 = vadd.xlane.f32.xlu1 %v2204_v45  ;;  %5515 = vmatprep.subr.bf16.mxu1 %v5514_v55 }
 0xbea   : > { %5517 = vmatpush3.bf16.msra.mxu1 %v5514_v55 }
 0xbeb   : > { %5526 = vmatprep.subr.bf16.mxu1 %v5966_v0 }
 0xbed   : > { %5333 = vmatmul.mubr.msk.f32.vlgmr.msra.gmra.mrb[16].mxu1 %vm1077_vm1, %v2318_v61 }
 0xbee   : > { %5350 = vmatprep.mubr.msk.f32.mxu1 %vm5967_vm0, %v5968_v1 }
 0xc76   : > { %v2206_v46 = vpop.xlane.xlu1 %2205 }
 0xc77   : > { %v2208_v47 = vmul.f32 0.03125, %v2206_v46  ;;  %v5046_v46 = vld [vmem:[%s7346_s11] ss:$0 sm:$0xff]  ;;  %s7351_s11 = sld [smem:[#allocation28_spill]] }
 0xc79   : > { %v2209_v48 = vsub.f32 %v2201_v44, %v2208_v47 }
 0xc7b   : > { %v2210_v49 = vmul.f32 %v2209_v48, %v2209_v48 }
 0xc7d   : > { %v2211_v50 = vsel %vm1077_vm1, %v2210_v49, 0.0 }
 0xc7e   : > { %2212 = vadd.xlane.f32.xlu1 %v2211_v50 }
 0xcc0   : > { %v5334_v19 = vpop.f32.mrb[16].mxu1 }
 0xcc1   : > { %v2408_v20 = vadd.f32 %v5334_v19, %v5043_v18  ;;  %v2402_v21 = vpop.f32.mrb[17].mxu1 }
 0xcc2   : > { %v2403_v22 = vadd.f32 %v5043_v18, %v2402_v21 }
 0xcc4   : > { %v6425_v24 = vpack.i.bf16 %v2408_v20, %v2403_v22 }
 0xcc6   : > { %5709 = vrot.lane.b32.xlu1 %v6425_v24, %s5971_s2 }
 0xd0b   : > { %v2213_v6 = vpop.xlane.xlu1 %2212 }
 0xd0c   : > { %v2214_v7 = vmul.f32 0.03125, %v2213_v6 }
 0xd0e   : > { %v2215_v10 = vadd.f32 1e-05, %v2214_v7 }
 0xd10   : > { %5754 = vrsqrt.f32 %v2215_v10 }
 0xd1a   : > { %v5755_v11 = vpop.eup %5754 }
 0xd1b   : > { %v2217_v13 = vmul.f32 %v5755_v11, %v2209_v48 }
 0xd1d   : > { %v2224_v15 = vmul.f32 %v5039_v12, %v2217_v13 }
 0xd1f   : > { %v6412_v16 = vadd.f32 %v5040_v14, %v2224_v15 }
 0xd21   : > { %v2232_v17 = vadd.f32 %v6412_v16, %v6285_v9  ;;  %v5527_v9 = vpack.c.bf16 %v2408_v20, %v2403_v22 }
 0xd23   : > { %5322 = vmatmul.mubr.msk.f32.vlgmr.msra.gmra.mrb[12].mxu0 %vm1077_vm1, %v2232_v17  ;;  %5529 = vmatpush3.bf16.xpose.msk.msra.mxu1 %vm6421_vm3, %v5527_v9 }
 0xd24   : > { %5343 = vmatprep.mubr.msk.f32.mxu0 %vm1077_vm1, %v1061_v56  ;;  %5360 = vmatprep.subr.mxu1 %v5968_v1 }
 0xd25   : > { %5521 = vmatpush3.bf16.msra.mxu0 %v5518_v33  ;;  %v3532_v33 = vld [vmem:[%s7348_s1 + $0x10] sm:$0xff] }
 0xd26   : > { %5523 = vmatprep.subr.bf16.mxu0 %v5522_v35 }
 0xd29   : > { %5525 = vmatpush3.bf16.msra.mxu0 %v5522_v35 }
 0xd2a   : > { %5530 = vmatprep.subr.bf16.mxu0 %v5966_v0 }
 0xd2c   : > { %5344 = vmatmul.mubr.msk.f32.vlgmr.msra.gmra.mrb[14].mxu0 %vm1077_vm1, %v1062_v58 }
 0xd2d   : > { %5357 = vmatprep.mubr.msk.f32.mxu0 %vm5967_vm0, %v5968_v1 }
 0xd38   : > { %v5710_v52 = vpop.permute.xlu1 %5709 }
 0xd39   : > { %v5712_v8 = vunpack.i.h.bf16 %v5710_v52  ;;  %v5711_v55 = vunpack.i.l.bf16 %v5710_v52 }
 0xd3b   : > { %v5534_v58 = vpack.c.bf16 %v5712_v8, %v5711_v55 }
 0xdf6   : > { %v2313_v27 = vpop.f32.mrb[12].mxu0 }
 0xdf7   : > { %v6433_v28 = vadd.f32 %v5041_v26, %v2313_v27  ;;  %v5323_v29 = vpop.f32.mrb[13].mxu0 }
 0xdf8   : > { %v3531_v29 = vld [vmem:[%s7348_s1 + $0x8] sm:$0xff] }
 0xdf9   : > { %5351 = vmatmul.mubr.msk.f32.vlgmr.msra.gmra.mrb[18].mxu1 %vm1250_vm2, %v6433_v28 }
 0xdfa   : > { %5362 = vmatprep.mubr.msk.f32.mxu1 %vm5967_vm0, %v5968_v1  ;;  %5361 = vmatpush3.msra.mxu1 %v2503_v2 }
 0xdfb   : > { %5537 = vmatprep.subr.bf16.mxu1 %v5966_v0 }
 0xdff   : > { %v5345_v40 = vpop.f32.mrb[14].mxu0 }
 0xe00   : > { %v2500_v47 = vadd.f32 %v5345_v40, %v5046_v46  ;;  %v2494_v48 = vpop.f32.mrb[15].mxu0 }
 0xe01   : > { %v2495_v49 = vadd.f32 %v5046_v46, %v2494_v48 }
 0xe03   : > { %v6455_v50 = vpack.c.bf16 %v2500_v47, %v2495_v49  ;;  %v6457_v51 = vpack.i.bf16 %v2500_v47, %v2495_v49 }
 0xe05   : > { %5532 = vmatpush3.bf16.msra.mxu0 %v6455_v50 }
 0xe06   : > { %5533 = vmatprep.subr.bf16.mxu0 %v5966_v0 }
 0xecc   : > { %v2597_v37 = vpop.f32.mrb[18].mxu1 }
 0xecd   : > { %v2598_v25 = vadd.f32 %v6449_v36, %v2597_v37  ;;  %v5352_v38 = vpop.f32.mrb[19].mxu1  ;;  %v5558_v37 = vpack.c.bf16 %v3533_v34, %v3532_v33 }
 0xecf   : > { %v2602_v39 = vsel %vm2601_vm4, %v2598_v25, -inf }
 0xed0   : > { %2603 = vmax.xlane.f32.xlu0 %v2602_v39 }
 0xf5d   : > { %v2604_v41 = vpop.xlane.xlu0 %2603 }
 0xf5e   : > { %v2605_v42 = vsub.f32 %v2598_v25, %v2604_v41 }
 0xf60   : > { %v2606_v43 = vmul.f32 1.442695, %v2605_v42 }
 0xf62   : > { %5756 = vpow2.f32 %v2606_v43 }
 0xf6c   : > { %v5757_v44 = vpop.eup %5756 }
 0xf6d   : > { %v2608_v45 = vsel %vm2601_vm4, %v5757_v44, 0.0 }
 0xf6e   : > { %2609 = vadd.xlane.f32.xlu1 %v2608_v45 }
 0xf7f   : > { %2760 = vrot.lane.b32.xlu1 %v6433_v28, %s5971_s2 }
 0xf83   : > { %5714 = vrot.lane.b32.xlu1 %v6425_v24, %s5972_s7 }
 0xf87   : > { %3008 = vrot.lane.b32.xlu1 %v6433_v28, %s5972_s7 }
 0xffb   : > { %v2610_v53 = vpop.xlane.xlu1 %2609 }
 0xffc   : > { %5758 = vrcp.f32 %v2610_v53  ;;  %v2504_v53 = vld [vmem:[%s7347_s16 + $0x8] sm:$0xff] }
 0xfff   : > { %v2761_v54 = vpop.permute.xlu1 %2760 }
0x1003   : > { %v5715_v59 = vpop.permute.xlu1 %5714 }
0x1004   : > { %v5717_v60 = vunpack.i.h.bf16 %v5715_v59  ;;  %v5716_v61 = vunpack.i.l.bf16 %v5715_v59 }
0x1006   : > { %v5759_v56 = vpop.eup %5758  ;;  %v5541_v62 = vpack.c.bf16 %v5717_v60, %v5716_v61 }
0x1007   : > { %v6467_v57 = vmul.f32 %v5759_v56, %v5757_v44  ;;  %v3009_v63 = vpop.permute.xlu1 %3008 }
0x1009   : > { %5358 = vmatmul.mubr.msk.f32.vlgmr.msra.gmra.mrb[16].mxu0 %vm2601_vm4, %v6467_v57 }
0x100a   : > { %5536 = vmatpush3.bf16.xpose.msk.msra.mxu0 %vm6421_vm3, %v5534_v58  ;;  %5369 = vmatprep.mubr.msk.f32.mxu0 %vm5967_vm0, %v5968_v1 }
0x100b   : > { %5540 = vmatprep.subr.bf16.mxu0 %v5966_v0 }
0x1011   : > { %5370 = vmatmul.mubr.msk.f32.vlgmr.msra.gmra.mrb[18].mxu0 %vm1250_vm2, %v2761_v54 }
0x1012   : > { %5543 = vmatpush3.bf16.xpose.msk.msra.mxu0 %vm6421_vm3, %v5541_v62  ;;  %5388 = vmatprep.mubr.msk.f32.mxu0 %vm5967_vm0, %v5968_v1 }
0x1013   : > { %5547 = vmatprep.subr.bf16.mxu0 %v5966_v0 }
0x1019   : > { %5389 = vmatmul.mubr.msk.f32.vlgmr.msra.gmra.mrb[20].mxu0 %vm1250_vm2, %v3009_v63 }
0x101a   : > { %5407 = vmatprep.mubr.msk.f32.mxu0 %vm5967_vm0, %v5968_v1 }
0x10dc   : > { %v2682_v3 = vpop.f32.mrb[16].mxu0 }
0x10dd   : > { %v5359_v4 = vpop.f32.mrb[17].mxu0  ;;  %5363 = vmatmul.mubr.msk.f32.vlgmr.msra.gmra.mrb[20].mxu1 %vm1250_vm2, %v2682_v3 }
0x10de   : > { %5376 = vmatprep.mubr.msk.f32.mxu1 %vm5967_vm0, %v5968_v1 }
0x10e4   : > { %v2838_v5 = vpop.f32.mrb[18].mxu0 }
0x10e5   : > { %v2839_v6 = vadd.f32 %v6449_v36, %v2838_v5  ;;  %v5371_v7 = vpop.f32.mrb[19].mxu0  ;;  %v2505_v5 = vld [vmem:[%s7347_s16 + $0x10] sm:$0xff] }
0x10e6   : > { %v5049_v7 = vld [vmem:[%s7349_s22] ss:$0 sm:$0xff]  ;;  %s7352_s22 = sld [smem:[#allocation23_spill]] }
0x10e7   : > { %v2842_v10 = vsel %vm2601_vm4, %v2839_v6, -inf }
0x10e8   : > { %2843 = vmax.xlane.f32.xlu0 %v2842_v10 }
0x10ec   : > { %v3086_v11 = vpop.f32.mrb[20].mxu0 }
0x10ed   : > { %v5390_v12 = vpop.f32.mrb[21].mxu0  ;;  %v3087_v13 = vadd.f32 %v6449_v36, %v3086_v11 }
0x10ef   : > { %v3090_v14 = vsel %vm2601_vm4, %v3087_v13, -inf }
0x10fe   : > { %5719 = vrot.lane.b32.xlu0 %v6457_v51, %s5971_s2 }
0x1102   : > { %5724 = vrot.lane.b32.xlu0 %v6425_v24, %s7288_s10 }
0x1106   : > { %3254 = vrot.lane.b32.xlu0 %v6433_v28, %s7288_s10  ;;  %v3530_v28 = vld [vmem:[%s7348_s1] sm:$0xff]  ;;  %s7354_s1 = smov 104  }
0x1107   : > { %v5555_v32 = vpack.c.bf16 %v3531_v29, %v3530_v28 }
0x1125   : > { %3091 = vmax.xlane.f32.xlu0 %v3090_v14 }
0x1175   : > { %v2844_v15 = vpop.xlane.xlu0 %2843 }
0x1176   : > { %v2845_v17 = vsub.f32 %v2839_v6, %v2844_v15 }
0x1178   : > { %v2846_v18 = vmul.f32 1.442695, %v2845_v17 }
0x1179   : > { %v5720_v19 = vpop.permute.xlu0 %5719 }
0x117a   : > { %5760 = vpow2.f32 %v2846_v18  ;;  %v5722_v20 = vunpack.i.h.bf16 %v5720_v19  ;;  %v5721_v21 = vunpack.i.l.bf16 %v5720_v19 }
0x117c   : > { %v6500_v22 = vpack.c.bf16 %v5722_v20, %v5721_v21 }
0x117d   : > { %v5725_v9 = vpop.permute.xlu0 %5724 }
0x117e   : > { %v5727_v24 = vunpack.i.h.bf16 %v5725_v9  ;;  %v5726_v26 = vunpack.i.l.bf16 %v5725_v9  ;;  %5539 = vmatpush3.bf16.msra.mxu1 %v6500_v22  ;;  %v2506_v9 = vld [vmem:[%s7347_s16 + $0x18] sm:$0xff] }
0x117f   : > { %5379 = vmatprep.subr.mxu1 %v5968_v1 }
0x1180   : > { %v5548_v27 = vpack.c.bf16 %v5727_v24, %v5726_v26  ;;  %v3615_v24 = vld [vmem:[%s7351_s11] sm:$0xff]  ;;  %v3616_v26 = vld [vmem:[%s7351_s11 + $0x8] sm:$0xff] }
0x1181   : > { %v3255_v35 = vpop.permute.xlu0 %3254 }
0x1182   : > { %5550 = vmatpush3.bf16.xpose.msk.msra.mxu0 %vm6421_vm3, %v5548_v27 }
0x1183   : > { %5554 = vmatprep.subr.bf16.mxu0 %v5966_v0 }
0x1184   : > { %v5761_v30 = vpop.eup %5760 }
0x1185   : > { %v2848_v31 = vsel %vm2601_vm4, %v5761_v30, 0.0 }
0x1186   : > { %2849 = vadd.xlane.f32.xlu1 %v2848_v31  ;;  %v3617_v31 = vld [vmem:[%s7351_s11 + $0x10] sm:$0xff] }
0x1189   : > { %5408 = vmatmul.mubr.msk.f32.vlgmr.msra.gmra.mrb[22].mxu0 %vm1250_vm2, %v3255_v35 }
0x118a   : > { %5556 = vmatpush3.bf16.msra.mxu0 %v5555_v32  ;;  %5430 = vmatprep.mubr.msk.f32.mxu0 %vm5967_vm0, %v5968_v1  ;;  %v3618_v32 = vld [vmem:[%s7351_s11 + $0x18] sm:$0xff] }
0x118b   : > { %5557 = vmatprep.subr.bf16.mxu0 %v5966_v0  ;;  %v5564_v35 = vpack.c.bf16 %v3618_v32, %v3617_v31 }
0x118e   : > { %5559 = vmatpush3.bf16.msra.mxu0 %v5558_v37  ;;  %v3619_v37 = vld [vmem:[%s7351_s11 + $0x20] sm:$0xff] }
0x118f   : > { %5574 = vmatprep.subr.msk.bf16.mxu0 %vm6421_vm3, %v6455_v50 }
0x11b0   : > { %v2755_v25 = vpop.f32.mrb[20].mxu1 }
0x11b1   : > { %v5364_v38 = vpop.f32.mrb[21].mxu1  ;;  %v2759_v11 = vadd.f32 %v5049_v7, %v2755_v25  ;;  %v3620_v25 = vld [vmem:[%s7351_s11 + $0x28] sm:$0xff] }
0x11b2   : > { %v3092_v39 = vpop.xlane.xlu0 %3091  ;;  %v5567_v38 = vpack.c.bf16 %v3620_v25, %v3619_v37 }
0x11b3   : > { %v3093_v40 = vsub.f32 %v3087_v13, %v3092_v39  ;;  %v3621_v39 = vld [vmem:[%s7351_s11 + $0x30] sm:$0xff] }
0x11b5   : > { %v3094_v41 = vmul.f32 1.442695, %v3093_v40  ;;  %v3622_v40 = vld [vmem:[%s7351_s11 + $0x38] sm:$0xff] }
0x11b7   : > { %5762 = vpow2.f32 %v3094_v41  ;;  %v5570_v41 = vpack.c.bf16 %v3622_v40, %v3621_v39 }
0x11c1   : > { %v5763_v42 = vpop.eup %5762 }
0x11c2   : > { %v3096_v43 = vsel %vm2601_vm4, %v5763_v42, 0.0 }
0x11c3   : > { %3097 = vadd.xlane.f32.xlu1 %v3096_v43 }
0x11d4   : > { %5729 = vrot.lane.b32.xlu1 %v6457_v51, %s5972_s7 }
0x1213   : > { %v2850_v44 = vpop.xlane.xlu1 %2849 }
0x1214   : > { %5764 = vrcp.f32 %v2850_v44 }
0x121e   : > { %v5765_v45 = vpop.eup %5764 }
0x121f   : > { %v6522_v46 = vmul.f32 %v5765_v45, %v5761_v30  ;;  %v5561_v30 = vpack.c.bf16 %v3616_v26, %v3615_v24  ;;  %v3840_v24 = vcombine.high %v6467_v57, %v6467_v57 }
0x1221   : > { %5377 = vmatmul.mubr.msk.f32.vlgmr.msra.gmra.mrb[22].mxu1 %vm2601_vm4, %v6522_v46 }
0x1222   : > { %5381 = vmatprep.mubr.msk.f32.mxu1 %vm5967_vm0, %v5968_v1  ;;  %5380 = vmatpush3.msra.mxu1 %v2504_v53 }
0x1223   : > { %5544 = vmatprep.subr.bf16.mxu1 %v5966_v0 }
0x1250   : > { %v3098_v54 = vpop.xlane.xlu1 %3097 }
0x1251   : > { %5766 = vrcp.f32 %v3098_v54 }
0x1254   : > { %v5730_v8 = vpop.permute.xlu1 %5729 }
0x1255   : > { %v5732_v58 = vunpack.i.h.bf16 %v5730_v8  ;;  %v5731_v59 = vunpack.i.l.bf16 %v5730_v8 }
0x125b   : > { %v5767_v61 = vpop.eup %5766 }
0x125c   : > { %v3332_v47 = vpop.f32.mrb[22].mxu0  ;;  %v6538_v2 = vmul.f32 %v5767_v61, %v5763_v42 }
0x125d   : > { %v3333_v48 = vadd.f32 %v6449_v36, %v3332_v47  ;;  %v5409_v49 = vpop.f32.mrb[23].mxu0  ;;  %v6532_v36 = vpack.c.bf16 %v5732_v58, %v5731_v59  ;;  %v3738_v47 = vld [vmem:[%s7352_s22 + $0x18] sm:$0xff] }
0x125e   : > { %7350 = vst [vmem:[#allocation35_spill] sm:$0xff] %v6538_v2 }
0x125f   : > { %v3336_v52 = vsel %vm2601_vm4, %v3333_v48, -inf }
0x1260   : > { %3337 = vmax.xlane.f32.xlu1 %v3336_v52 }
0x12ed   : > { %v3338_v55 = vpop.xlane.xlu1 %3337 }
0x12ee   : > { %v3339_v56 = vsub.f32 %v3333_v48, %v3338_v55 }
0x12f0   : > { %v3340_v60 = vmul.f32 1.442695, %v3339_v56 }
0x12f2   : > { %5768 = vpow2.f32 %v3340_v60 }
0x12f4   : > { %v2930_v62 = vpop.f32.mrb[22].mxu1 }
0x12f5   : > { %v5378_v63 = vpop.f32.mrb[23].mxu1  ;;  %5382 = vmatmul.mubr.msk.f32.vlgmr.msra.gmra.mrb[24].mxu1 %vm1250_vm2, %v2930_v62 }
0x12f6   : > { %5546 = vmatpush3.bf16.msra.mxu1 %v6532_v36  ;;  %5395 = vmatprep.mubr.msk.f32.mxu1 %vm5967_vm0, %v5968_v1 }
0x12f7   : > { %5398 = vmatprep.subr.mxu1 %v5968_v1 }
0x12f9   : > { %5396 = vmatmul.mubr.msk.f32.vlgmr.msra.gmra.mrb[26].mxu1 %vm2601_vm4, %v6538_v2 }
0x12fa   : > { %5400 = vmatprep.mubr.msk.f32.mxu1 %vm5967_vm0, %v5968_v1  ;;  %5399 = vmatpush3.msra.mxu1 %v2505_v5  ;;  %v5072_v5 = vld [vmem:[%s7356_s3] ss:$0 sm:$0xff]  ;;  %s7359_s3 = sld [smem:[#allocation27_spill]] }
0x12fb   : > { %5551 = vmatprep.subr.bf16.mxu1 %v5966_v0 }
0x12fc   : > { %v5769_v3 = vpop.eup %5768 }
0x12fd   : > { %v3342_v4 = vsel %vm2601_vm4, %v5769_v3, 0.0 }
0x12fe   : > { %3343 = vadd.xlane.f32.xlu0 %v3342_v4 }
0x1314   : > { %5734 = vrot.lane.b32.xlu0 %v6457_v51, %s7288_s10  ;;  %s7353_s10 = smov %s7352_s22  ;;  %s7355_s22 = sld [smem:[#allocation24_spill]] }
0x1315   : > { %v3735_v54 = vld [vmem:[%s7353_s10] sm:$0xff]  ;;  %v3737_v8 = vld [vmem:[%s7353_s10 + $0x10] sm:$0xff] }
0x131a   : > { %v5071_v63 = vld [vmem:[%s7355_s22] ss:$0 sm:$0xff]  ;;  %s5104_s22 = sshll.u32 %s6164_s0, 7  ;;  %s5977_s0 = smov [#allocation8]  }
0x138b   : > { %v3344_v6 = vpop.xlane.xlu0 %3343 }
0x138c   : > { %5770 = vrcp.f32 %v3344_v6 }
0x138f   : > { %v5735_v10 = vpop.permute.xlu0 %5734 }
0x1390   : > { %v5737_v12 = vunpack.i.h.bf16 %v5735_v10  ;;  %v5736_v13 = vunpack.i.l.bf16 %v5735_v10 }
0x1392   : > { %v6551_v19 = vpack.c.bf16 %v5737_v12, %v5736_v13 }
0x1396   : > { %v5771_v18 = vpop.eup %5770 }
0x1397   : > { %v6557_v21 = vmul.f32 %v5771_v18, %v5769_v3 }
0x13c8   : > { %v3003_v14 = vpop.f32.mrb[24].mxu1 }
0x13c9   : > { %v3007_v15 = vadd.f32 %v3003_v14, %v2759_v11  ;;  %v5383_v17 = vpop.f32.mrb[25].mxu1 }
0x13ca   : > { %v5976_v17 = vmov 1966171168  }
0x13cb   : > { %v3842_v18 = vunpack.c.l.s4 %v5976_v17 }
0x13cc   : > { %v3176_v51 = vpop.f32.mrb[26].mxu1 }
0x13cd   : > { %v5397_v20 = vpop.f32.mrb[27].mxu1  ;;  %5401 = vmatmul.mubr.msk.f32.vlgmr.msra.gmra.mrb[28].mxu1 %vm1250_vm2, %v3176_v51  ;;  %v3844_v51 = vlaneseq }
0x13ce   : > { %5553 = vmatpush3.bf16.msra.mxu1 %v6551_v19  ;;  %5414 = vmatprep.mubr.msk.f32.mxu1 %vm5967_vm0, %v5968_v1 }
0x13cf   : > { %5417 = vmatprep.subr.mxu1 %v5968_v1  ;;  %v3845_v20 = vshrl.u32 %v3844_v51, 7 }
0x13d1   : > { %5415 = vmatmul.mubr.msk.f32.vlgmr.msra.gmra.mrb[30].mxu1 %vm2601_vm4, %v6557_v21 }
0x13d2   : > { %5419 = vmatprep.mubr.msk.f32.mxu1 %vm5967_vm0, %v5968_v1  ;;  %5418 = vmatpush3.msra.mxu1 %v2506_v9 }
0x13d3   : > { %5560 = vmatprep.subr.bf16.mxu1 %v5966_v0 }
0x14a0   : > { %v3249_v27 = vpop.f32.mrb[28].mxu1 }
0x14a1   : > { %v3253_v28 = vadd.f32 %v3249_v27, %v3007_v15  ;;  %v5402_v29 = vpop.f32.mrb[29].mxu1  ;;  %v4098_v27 = vcombine.high %v6522_v46, %v6522_v46 }
0x14a2   : > { %v4614_v29 = vcombine.high %v6557_v21, %v6557_v21 }
0x14a4   : > { %v3422_v33 = vpop.f32.mrb[30].mxu1 }
0x14a5   : > { %v5416_v34 = vpop.f32.mrb[31].mxu1  ;;  %5420 = vmatmul.mubr.msk.f32.vlgmr.msra.gmra.mrb[32].mxu1 %vm1250_vm2, %v3422_v33 }
0x14a6   : > { %5562 = vmatpush3.bf16.msra.mxu1 %v5561_v30  ;;  %5449 = vmatprep.mubr.msk.f32.mxu1 %vm5967_vm0, %v5968_v1 }
0x14a7   : > { %5563 = vmatprep.subr.bf16.mxu1 %v5966_v0 }
0x14aa   : > { %5565 = vmatpush3.bf16.msra.mxu1 %v5564_v35 }
0x14ab   : > { %5566 = vmatprep.subr.bf16.mxu1 %v5966_v0 }
0x14ae   : > { %5568 = vmatpush3.bf16.msra.mxu1 %v5567_v38  ;;  %v6662_v38 = vsub.s32 0, %v3845_v20 }
0x14af   : > { %5569 = vmatprep.subr.bf16.mxu1 %v5966_v0 }
0x14b0   : > { %7360 = vst [vmem:[#allocation38_spill] sm:$0xff] %v6662_v38 }
0x14b2   : > { %5571 = vmatpush3.bf16.msra.mxu1 %v5570_v41 }
0x14b3   : > { %5586 = vmatprep.subr.msk.bf16.mxu1 %vm6421_vm3, %v6532_v36 }
0x1578   : > { %v3495_v1 = vpop.f32.mrb[32].mxu1 }
0x1579   : > { %v3499_v42 = vadd.f32 %v3495_v1, %v3253_v28  ;;  %v5421_v43 = vpop.f32.mrb[33].mxu1 }
0x157b   : > { %v3500_v44 = vadd.f32 %v3499_v42, %v6412_v16  ;;  %v3736_v16 = vld [vmem:[%s7353_s10 + $0x8] sm:$0xff] }
0x157d   : > { %v3503_v45 = vsel %vm1077_vm1, %v3500_v44, 0.0 }
0x157e   : > { %3504 = vadd.xlane.f32.xlu0 %v3503_v45 }
0x1594   : > { %3999 = vrot.lane.b32.xlu0 %v3738_v47, %s5971_s2 }
0x1598   : > { %4257 = vrot.lane.b32.xlu0 %v3738_v47, %s5972_s7 }
0x159c   : > { %4515 = vrot.lane.b32.xlu0 %v3738_v47, %s7354_s1 }
0x160b   : > { %v3505_v0 = vpop.xlane.xlu0 %3504 }
0x160c   : > { %v3506_v48 = vmul.f32 0.03125, %v3505_v0 }
0x160e   : > { %v3507_v49 = vsub.f32 %v3500_v44, %v3506_v48 }
0x160f   : > { %v4000_v12 = vpop.permute.xlu0 %3999 }
0x1610   : > { %v3508_v52 = vmul.f32 %v3507_v49, %v3507_v49 }
0x1612   : > { %v3509_v53 = vsel %vm1077_vm1, %v3508_v52, 0.0 }
0x1613   : > { %3510 = vadd.xlane.f32.xlu1 %v3509_v53 }
0x1624   : > { %3993 = vrot.lane.b32.xlu1 %v3735_v54, %s5971_s2 }
0x1628   : > { %3995 = vrot.lane.b32.xlu1 %v3736_v16, %s5971_s2 }
0x162c   : > { %3997 = vrot.lane.b32.xlu1 %v3737_v8, %s5971_s2  ;;  %s5109_s2 = sshll.u32 %s6271_s26, 8 }
0x162d   : > { %s7070_s26 = scalar_lea.vmem %s6141_s30, %s5109_s2 }
0x1630   : > { %4251 = vrot.lane.b32.xlu1 %v3735_v54, %s5972_s7 }
0x1634   : > { %4253 = vrot.lane.b32.xlu1 %v3736_v16, %s5972_s7 }
0x1638   : > { %4509 = vrot.lane.b32.xlu1 %v3735_v54, %s7354_s1 }
0x163c   : > { %4511 = vrot.lane.b32.xlu1 %v3736_v16, %s7354_s1 }
0x1640   : > { %4255 = vrot.lane.b32.xlu1 %v3737_v8, %s5972_s7  ;;  %s1027_s7 = sand.u32 1, %s5922_s23  }
0x1641   : > { %s4800_s4 = scalar_lea.sflag [#allocation4], %s1027_s7 }
0x1644   : > { %4513 = vrot.lane.b32.xlu1 %v3737_v8, %s7354_s1  ;;  %s5010_s1 = sshll.u32 %s1027_s7, 3 }
0x16a0   : > { %v3511_v55 = vpop.xlane.xlu1 %3510 }
0x16a1   : > { %v3512_v56 = vmul.f32 0.03125, %v3511_v55 }
0x16a3   : > { %v3513_v58 = vadd.f32 1e-05, %v3512_v56 }
0x16a4   : > { %v3994_v59 = vpop.permute.xlu1 %3993 }
0x16a5   : > { %5772 = vrsqrt.f32 %v3513_v58 }
0x16a8   : > { %v3996_v60 = vpop.permute.xlu1 %3995 }
0x16ac   : > { %v3998_v61 = vpop.permute.xlu1 %3997 }
0x16af   : > { %v5773_v62 = vpop.eup %5772 }
0x16b0   : > { %v3515_v3 = vmul.f32 %v5773_v62, %v3507_v49  ;;  %v6603_v4 = vpop.permute.xlu1 %4251  ;;  %v5073_v49 = vld [vmem:[%s7359_s3] ss:$0 sm:$0xff]  ;;  %s1029_s3 = scalar_lea.vmem [#allocation8], %s5010_s1  ;;  %s5864_s1 = sshll.u32 %s5977_s0, 4  ;;  %s5865_s1 = int_to_ptr.vmem [resolvable:$false] %s5864_s1 }
0x16b1   : > { %s4818_s2 = sshll.u32 %s1029_s3, 4  ;;  %s5866_s6 = scalar_lea.vmem %s5865_s1, 256  ;;  %s7237_s2 = int_to_ptr.vmem [resolvable:$true] %s4818_s2 }
0x16b2   : > { %v3522_v6 = vmul.f32 %v5071_v63, %v3515_v3  ;;  %s5860_s5 = scalar_lea.vmem %s7237_s2, 128  ;;  %p5867_p10 = scmp.lt.s32.totalorder %s7237_s2, %s5865_s1 }
0x16b3   : > { %p5861_p4 = scmp.ne.s32.totalorder %s7237_s2, %s5860_s5  ;;  %p5868_p7 = scmp.lt.s32.totalorder %s5866_s6, %s5860_s5 }
0x16b4   : > { %v6606_v7 = vadd.f32 %v5072_v5, %v3522_v6  ;;  %v6608_v10 = vpop.permute.xlu1 %4253 }
0x16b5   : > { %p5862_p6 = pnand %p5861_p4, %p7425_p5  ;;  %p5869_p8 = por %p5868_p7, %p5867_p10 }
0x16b6   : > { %7357 = vst [vmem:[#allocation36_spill] sm:$0xff] %v6606_v7  ;;  %5431 = vmatmul.mubr.msk.f32.vlgmr.msra.gmra.mrb[24].mxu0 %vm1077_vm1, %v6606_v7 }
0x16b7   : > { %5577 = vmatpush3.bf16.xpose.msk.msra.mxu0 %vm6421_vm3, %v6455_v50  ;;  %5456 = vmatprep.mubr.msk.f32.mxu0 %vm1250_vm2, %v3735_v54  ;;  %p5863_p9 = pneg %p5862_p6 }
0x16b8   : > { %5580 = vmatprep.subr.msk.bf16.mxu0 %vm6421_vm3, %v6500_v22  ;;  %v4510_v11 = vpop.permute.xlu1 %4509 }
0x16b9   : > { %p5870_p11 = pnand %p5869_p8, %p5863_p9 }
0x16bc   : > { %v4512_v50 = vpop.permute.xlu1 %4511 }
0x16be   : > { %5457 = vmatmul.mubr.msk.f32.vlgmr.msra.gmra.mrb[26].mxu0 %vm1250_vm2, %v3736_v16 }
0x16bf   : > { %5583 = vmatpush3.bf16.xpose.msk.msra.mxu0 %vm6421_vm3, %v6500_v22  ;;  %5459 = vmatprep.mubr.msk.f32.mxu0 %vm1250_vm2, %v3737_v8  ;;  %v6636_v22 = vpop.permute.xlu0 %4257 }
0x16c0   : > { %5592 = vmatprep.subr.msk.bf16.mxu0 %vm6421_vm3, %v6551_v19  ;;  %v6630_v13 = vpop.permute.xlu1 %4255 }
0x16c2   : > { %5460 = vmatmul.mubr.msk.f32.gmra.mrb[28].mxu0 %vm1250_vm2, %v3738_v47 }
0x16c3   : > { %5466 = vmatprep.mubr.msk.f32.mxu0 %vm1250_vm2, %v3994_v59  ;;  %v4516_v15 = vpop.permute.xlu0 %4515 }
0x16c4   : > { %v4514_v14 = vpop.permute.xlu1 %4513 }
0x16c6   : > { %5467 = vmatmul.mubr.msk.f32.vlgmr.msra.gmra.mrb[30].mxu0 %vm1250_vm2, %v3996_v60 }
0x16c7   : > { %5595 = vmatpush3.bf16.xpose.msk.msra.mxu0 %vm6421_vm3, %v6551_v19  ;;  %5469 = vmatprep.mubr.msk.f32.mxu0 %vm1250_vm2, %v3998_v61  ;;  %v3843_v19 = vunpack.c.0.s8 %v3842_v18 }
0x16c9   : > { %v6643_v9 = vsub.s32 %v3843_v19, %v3845_v20 }
0x16ca   : > { %5470 = vmatmul.mubr.msk.f32.gmra.mrb[32].mxu0 %vm1250_vm2, %v4000_v12 }
0x16cb   : > { %5486 = vmatprep.mubr.msk.f32.mxu0 %vm1250_vm2, %v4510_v11  ;;  %7358 = vst [vmem:[#allocation37_spill] sm:$0xff] %v6643_v9  ;;  %v3847_v26 = vrot.slane %v6467_v57, %v6643_v9  ;;  %v3854_v28 = vrot.slane %v3840_v24, %v6643_v9  ;;  %v4105_v31 = vrot.slane %v6522_v46, %v6643_v9 }
0x16cc   : > { %v4112_v32 = vrot.slane %v4098_v27, %v6643_v9  ;;  %v4621_v57 = vrot.slane %v6557_v21, %v6643_v9  ;;  %v4628_v35 = vrot.slane %v4614_v29, %v6643_v9 }
0x16cd   : > { %v3855_v30 = vcombine.high %v3847_v26, %v3847_v26  ;;  %v3856_v33 = vcombine.high %v3854_v28, %v3854_v28  ;;  %v3863_v34 = vrot.slane %v3847_v26, %v6643_v9  ;;  %v4113_v25 = vcombine.high %v4105_v31, %v4105_v31 }
0x16ce   : > { %5487 = vmatmul.mubr.msk.f32.vlgmr.msra.gmra.mrb[34].mxu0 %vm1250_vm2, %v4512_v50  ;;  %v3870_v39 = vrot.slane %v3854_v28, %v6643_v9  ;;  %v4114_v40 = vcombine.high %v4112_v32, %v4112_v32  ;;  %v4629_v1 = vcombine.high %v4621_v57, %v4621_v57  ;;  %v4630_v42 = vcombine.high %v4628_v35, %v4628_v35 }
0x16cf   : > { %5489 = vmatprep.mubr.msk.f32.mxu0 %vm1250_vm2, %v4514_v14  ;;  %v3877_v37 = vrot.slane %v3855_v30, %v6643_v9  ;;  %v3884_v46 = vrot.slane %v3856_v33, %v6643_v9  ;;  %v3885_v41 = vcombine.high %v3863_v34, %v3863_v34  ;;  %v4121_v44 = vrot.slane %v4105_v31, %v6643_v9 }
0x16d0   : > { %v4135_v21 = vrot.slane %v4113_v25, %v6643_v9  ;;  %v3886_v45 = vcombine.high %v3870_v39, %v3870_v39  ;;  %v6669_v47 = vrot.slane %v3863_v34, %v6662_v38  ;;  %v4128_v0 = vrot.slane %v4112_v32, %v6643_v9 }
0x16d1   : > { %v3887_v43 = vcombine.high %v3877_v37, %v3877_v37  ;;  %v4142_v48 = vrot.slane %v4114_v40, %v6643_v9  ;;  %v3888_v52 = vcombine.high %v3884_v46, %v3884_v46  ;;  %v6675_v53 = vrot.slane %v3877_v37, %v6662_v38 }
0x16d2   : > { %5490 = vmatmul.mubr.msk.f32.gmra.mrb[36].mxu0 %vm1250_vm2, %v4516_v15  ;;  %v6678_v54 = vrot.slane %v3885_v41, %v6662_v38  ;;  %v4637_v16 = vrot.slane %v4621_v57, %v6643_v9  ;;  %v6682_v8 = vrot.slane %v3870_v39, %v6662_v38  ;;  %v4644_v55 = vrot.slane %v4628_v35, %v6643_v9 }
0x16d3   : > { %v4651_v56 = vrot.slane %v4629_v1, %v6643_v9  ;;  %v4658_v58 = vrot.slane %v4630_v42, %v6643_v9  ;;  %v6688_v60 = vrot.slane %v3887_v43, %v6662_v38  ;;  %v4143_v61 = vcombine.high %v4121_v44, %v4121_v44 }
0x16d4   : > { %v4145_v62 = vcombine.high %v4135_v21, %v4135_v21  ;;  %v6691_v5 = vrot.slane %v3884_v46, %v6662_v38  ;;  %v4144_v6 = vcombine.high %v4128_v0, %v4128_v0  ;;  %v4146_v11 = vcombine.high %v4142_v48, %v4142_v48 }
0x16d5   : > { %v3916_v50 = vrot.slane %v3886_v45, %v6662_v38  ;;  %v3920_v12 = vrot.slane %v3888_v52, %v6662_v38  ;;  %v4659_v14 = vcombine.high %v4637_v16, %v4637_v16  ;;  %v6696_v17 = vrot.slane %v4121_v44, %v6662_v38 }
0x16d6   : > { %v4660_v18 = vcombine.high %v4644_v55, %v4644_v55  ;;  %v4661_v51 = vcombine.high %v4651_v56, %v4651_v56  ;;  %v4662_v19 = vcombine.high %v4658_v58, %v4658_v58  ;;  %v6699_v20 = vrot.slane %v4135_v21, %v6662_v38 }
0x16d7   : > { %v6702_v24 = vrot.slane %v4143_v61, %v6662_v38  ;;  %v6705_v26 = vrot.slane %v4145_v62, %v6662_v38  ;;  %v6708_v27 = vrot.slane %v4128_v0, %v6662_v38  ;;  %v6711_v28 = vrot.slane %v4142_v48, %v6662_v38 }
0x16d8   : > { %v6714_v29 = vrot.slane %v4144_v6, %v6662_v38  ;;  %v6717_v30 = vrot.slane %v4146_v11, %v6662_v38  ;;  %v6725_v31 = vrot.slane %v4637_v16, %v6662_v38  ;;  %v6728_v32 = vrot.slane %v4651_v56, %v6662_v38 }
0x16d9   : > { %v6731_v33 = vrot.slane %v4659_v14, %v6662_v38  ;;  %v6734_v34 = vrot.slane %v4644_v55, %v6662_v38  ;;  %v6737_v57 = vrot.slane %v4661_v51, %v6662_v38  ;;  %v6740_v23 = vrot.slane %v4658_v58, %v6662_v38 }
0x1789   : > { %v3610_v59 = vpop.f32.mrb[24].mxu0 }
0x178a   : > { %v3611_v63 = vadd.f32 %v5073_v49, %v3610_v59  ;;  %v5432_v3 = vpop.f32.mrb[25].mxu0 }
0x178c   : > { %v3614_v15 = vmax.f32 %v3611_v63, 0.0 }
0x178e   : > { %5450 = vmatmul.mubr.msk.f32.vlgmr.msra.gmra.mrb[34].mxu1 %vm3630_vm5, %v3614_v15 }
0x178f   : > { %5589 = vmatpush3.bf16.xpose.msk.msra.mxu1 %vm6421_vm3, %v6532_v36  ;;  %5476 = vmatprep.mubr.msk.f32.mxu1 %vm1250_vm2, %v6603_v4  ;;  %v6743_v36 = vrot.slane %v4660_v18, %v6662_v38  ;;  %v6746_v4 = vrot.slane %v4662_v19, %v6662_v38 }
0x1791   : > { %v5458_v35 = vpop.f32.mrb[26].mxu0 }
0x1792   : > { %v3930_v37 = vmul.f32 %v5458_v35, %v6669_v47  ;;  %v3934_v25 = vmul.f32 %v5458_v35, %v6675_v53  ;;  %v3938_v39 = vmul.f32 %v5458_v35, %v6678_v54  ;;  %v3942_v40 = vmul.f32 %v5458_v35, %v6688_v60  ;;  %v3821_v46 = vpop.f32.mrb[27].mxu0 }
0x1793   : > { %v3946_v41 = vmul.f32 %v5458_v35, %v6682_v8  ;;  %v3950_v1 = vmul.f32 %v5458_v35, %v6691_v5  ;;  %v3954_v42 = vmul.f32 %v5458_v35, %v3916_v50  ;;  %v3958_v43 = vmul.f32 %v5458_v35, %v3920_v12 }
0x1794   : > { %v3929_v44 = vmul.f32 %v6669_v47, %v3821_v46  ;;  %v3933_v21 = vmul.f32 %v6675_v53, %v3821_v46  ;;  %v3937_v45 = vmul.f32 %v6678_v54, %v3821_v46  ;;  %v3941_v0 = vmul.f32 %v6688_v60, %v3821_v46 }
0x1795   : > { %v3945_v48 = vmul.f32 %v6682_v8, %v3821_v46  ;;  %v3949_v49 = vmul.f32 %v6691_v5, %v3821_v46  ;;  %v3953_v52 = vmul.f32 %v3916_v50, %v3821_v46  ;;  %v3957_v16 = vmul.f32 %v3920_v12, %v3821_v46  ;;  %v5461_v55 = vpop.f32.mrb[28].mxu0 }
0x1796   : > { %v6761_v56 = vmul.f32 %v5461_v55, %v6669_v47  ;;  %v6764_v58 = vmul.f32 %v5461_v55, %v6675_v53  ;;  %v6767_v59 = vmul.f32 %v5461_v55, %v6678_v54  ;;  %v6770_v61 = vmul.f32 %v5461_v55, %v6688_v60  ;;  %v3831_v62 = vpop.f32.mrb[29].mxu0  ;;  %5477 = vmatmul.mubr.msk.f32.vlgmr.msra.gmra.mrb[36].mxu1 %vm1250_vm2, %v6608_v10 }
0x1797   : > { %v6775_v63 = vmul.f32 %v5461_v55, %v6682_v8  ;;  %v6778_v3 = vmul.f32 %v5461_v55, %v6691_v5  ;;  %v6780_v6 = vmul.f32 %v5461_v55, %v3916_v50  ;;  %v6782_v11 = vmul.f32 %v5461_v55, %v3920_v12  ;;  %5479 = vmatprep.mubr.msk.f32.mxu1 %vm1250_vm2, %v6630_v13 }
0x1798   : > { %v6787_v14 = vmul.f32 %v6669_v47, %v3831_v62  ;;  %v6790_v15 = vmul.f32 %v6675_v53, %v3831_v62  ;;  %v6793_v10 = vmul.f32 %v6678_v54, %v3831_v62  ;;  %v6796_v18 = vmul.f32 %v6688_v60, %v3831_v62 }
0x1799   : > { %v6799_v51 = vmul.f32 %v6682_v8, %v3831_v62  ;;  %v6802_v19 = vmul.f32 %v6691_v5, %v3831_v62  ;;  %v6804_v35 = vmul.f32 %v3916_v50, %v3831_v62  ;;  %v6806_v13 = vmul.f32 %v3920_v12, %v3831_v62  ;;  %v5468_v47 = vpop.f32.mrb[30].mxu0 }
0x179a   : > { %v4188_v53 = vmul.f32 %v5468_v47, %v6696_v17  ;;  %v4192_v46 = vmul.f32 %v5468_v47, %v6699_v20  ;;  %v4196_v54 = vmul.f32 %v5468_v47, %v6702_v24  ;;  %v4200_v60 = vmul.f32 %v5468_v47, %v6705_v26  ;;  %v4079_v55 = vpop.f32.mrb[31].mxu0  ;;  %5480 = vmatmul.mubr.msk.f32.gmra.mrb[38].mxu1 %vm1250_vm2, %v6636_v22 }
0x179b   : > { %7361 = vst [vmem:[#allocation39_spill] sm:$0xff] %v6799_v51  ;;  %7362 = vst [vmem:[#allocation40_spill] sm:$0xff] %v6802_v19  ;;  %v4204_v8 = vmul.f32 %v5468_v47, %v6708_v27  ;;  %v4208_v5 = vmul.f32 %v5468_v47, %v6711_v28  ;;  %v4212_v50 = vmul.f32 %v5468_v47, %v6714_v29 }
0x179c   : > { %7363 = vst [vmem:[#allocation41_spill] sm:$0xff] %v6804_v35  ;;  %7364 = vst [vmem:[#allocation42_spill] sm:$0xff] %v6806_v13  ;;  %v4216_v12 = vmul.f32 %v5468_v47, %v6717_v30  ;;  %v6818_v62 = vadd.f32 %v4188_v53, %v3930_v37  ;;  %v6820_v38 = vadd.f32 %v4192_v46, %v3934_v25 }
0x179d   : > { %v6822_v7 = vadd.f32 %v4196_v54, %v3938_v39  ;;  %v6824_v9 = vadd.f32 %v4200_v60, %v3942_v40  ;;  %v6826_v2 = vadd.f32 %v4204_v8, %v3946_v41  ;;  %v6828_v13 = vadd.f32 %v4208_v5, %v3950_v1  ;;  %v5471_v19 = vpop.f32.mrb[32].mxu0 }
0x179e   : > { %v6830_v22 = vadd.f32 %v4212_v50, %v3954_v42  ;;  %v6832_v35 = vadd.f32 %v4216_v12, %v3958_v43  ;;  %v4187_v51 = vmul.f32 %v6696_v17, %v4079_v55  ;;  %v4191_v37 = vmul.f32 %v6699_v20, %v4079_v55  ;;  %v4089_v47 = vpop.f32.mrb[33].mxu0 }
0x179f   : > { %v4195_v25 = vmul.f32 %v6702_v24, %v4079_v55  ;;  %v4199_v39 = vmul.f32 %v6705_v26, %v4079_v55  ;;  %v4203_v40 = vmul.f32 %v6708_v27, %v4079_v55  ;;  %v4207_v41 = vmul.f32 %v6711_v28, %v4079_v55 }
0x17a0   : > { %7365 = vst [vmem:[#allocation43_spill] sm:$0xff] %v6832_v35  ;;  %v4211_v1 = vmul.f32 %v6714_v29, %v4079_v55  ;;  %v4215_v42 = vmul.f32 %v6717_v30, %v4079_v55  ;;  %v6842_v43 = vadd.f32 %v4187_v51, %v3929_v44  ;;  %v6844_v53 = vadd.f32 %v4191_v37, %v3933_v21 }
0x17a1   : > { %v6846_v46 = vadd.f32 %v4195_v25, %v3937_v45  ;;  %v6848_v54 = vadd.f32 %v4199_v39, %v3941_v0  ;;  %v6850_v60 = vadd.f32 %v4203_v40, %v3945_v48  ;;  %v6852_v8 = vadd.f32 %v4207_v41, %v3949_v49  ;;  %v5488_v12 = vpop.f32.mrb[34].mxu0 }
0x17a2   : > { %v6854_v5 = vadd.f32 %v4211_v1, %v3953_v52  ;;  %v6856_v50 = vadd.f32 %v4215_v42, %v3957_v16  ;;  %v4190_v35 = vmul.f32 %v5471_v19, %v6696_v17  ;;  %v4194_v44 = vmul.f32 %v5471_v19, %v6699_v20  ;;  %v4595_v51 = vpop.f32.mrb[35].mxu0 }
0x17a3   : > { %v4198_v21 = vmul.f32 %v5471_v19, %v6702_v24  ;;  %v4202_v45 = vmul.f32 %v5471_v19, %v6705_v26  ;;  %v4206_v0 = vmul.f32 %v5471_v19, %v6708_v27  ;;  %v4210_v48 = vmul.f32 %v5471_v19, %v6711_v28 }
0x17a4   : > { %v4214_v49 = vmul.f32 %v5471_v19, %v6714_v29  ;;  %v4218_v52 = vmul.f32 %v5471_v19, %v6717_v30  ;;  %v6867_v16 = vadd.f32 %v4190_v35, %v6761_v56  ;;  %v6870_v55 = vadd.f32 %v4194_v44, %v6764_v58 }
0x17a5   : > { %v6873_v37 = vadd.f32 %v4198_v21, %v6767_v59  ;;  %v6876_v25 = vadd.f32 %v4202_v45, %v6770_v61  ;;  %v6879_v39 = vadd.f32 %v4206_v0, %v6775_v63  ;;  %v6882_v40 = vadd.f32 %v4210_v48, %v6778_v3  ;;  %v5491_v58 = vpop.f32.mrb[36].mxu0 }
0x17a6   : > { %v6885_v19 = vadd.f32 %v4214_v49, %v6780_v6  ;;  %v6888_v56 = vadd.f32 %v4218_v52, %v6782_v11  ;;  %v4189_v35 = vmul.f32 %v6696_v17, %v4089_v47  ;;  %v4193_v59 = vmul.f32 %v6699_v20, %v4089_v47  ;;  %v4605_v63 = vpop.f32.mrb[37].mxu0 }
0x17a7   : > { %7366 = vst [vmem:[#allocation44_spill] sm:$0xff] %v6879_v39  ;;  %7367 = vst [vmem:[#allocation45_spill] sm:$0xff] %v6882_v40  ;;  %v4197_v61 = vmul.f32 %v6702_v24, %v4089_v47  ;;  %v4201_v41 = vmul.f32 %v6705_v26, %v4089_v47  ;;  %v4205_v1 = vmul.f32 %v6708_v27, %v4089_v47 }
0x17a8   : > { %7368 = vst [vmem:[#allocation46_spill] sm:$0xff] %v6885_v19  ;;  %7369 = vst [vmem:[#allocation47_spill] sm:$0xff] %v6888_v56  ;;  %v4209_v3 = vmul.f32 %v6711_v28, %v4089_v47  ;;  %v4213_v6 = vmul.f32 %v6714_v29, %v4089_v47  ;;  %v4217_v42 = vmul.f32 %v6717_v30, %v4089_v47 }
0x17a9   : > { %v6899_v11 = vmul.f32 %v5488_v12, %v6725_v31  ;;  %v6902_v17 = vmul.f32 %v5488_v12, %v6728_v32  ;;  %v6905_v20 = vmul.f32 %v5488_v12, %v6731_v33  ;;  %v6908_v24 = vmul.f32 %v5488_v12, %v6737_v57 }
0x17aa   : > { %v6911_v26 = vmul.f32 %v5488_v12, %v6734_v34  ;;  %v6914_v27 = vmul.f32 %v5488_v12, %v6740_v23  ;;  %v6917_v28 = vmul.f32 %v5488_v12, %v6743_v36  ;;  %v6920_v29 = vmul.f32 %v5488_v12, %v6746_v4 }
0x17ab   : > { %v6923_v30 = vmul.f32 %v6725_v31, %v4595_v51  ;;  %v6926_v47 = vmul.f32 %v6728_v32, %v4595_v51  ;;  %v6929_v44 = vmul.f32 %v6731_v33, %v4595_v51  ;;  %v6932_v21 = vmul.f32 %v6737_v57, %v4595_v51 }
0x17ac   : > { %v6935_v45 = vmul.f32 %v6734_v34, %v4595_v51  ;;  %v6938_v0 = vmul.f32 %v6740_v23, %v4595_v51  ;;  %v6941_v12 = vmul.f32 %v6743_v36, %v4595_v51  ;;  %v6944_v48 = vmul.f32 %v6746_v4, %v4595_v51 }
0x17ad   : > { %v6947_v49 = vmul.f32 %v5491_v58, %v6725_v31  ;;  %v6950_v52 = vmul.f32 %v5491_v58, %v6728_v32  ;;  %v6953_v56 = vmul.f32 %v5491_v58, %v6731_v33  ;;  %v6956_v19 = vmul.f32 %v5491_v58, %v6737_v57 }
0x17ae   : > { %v6959_v40 = vmul.f32 %v5491_v58, %v6734_v34  ;;  %v6962_v39 = vmul.f32 %v5491_v58, %v6740_v23  ;;  %v6965_v51 = vmul.f32 %v5491_v58, %v6743_v36 }
0x17af   : > { %7370 = vst [vmem:[#allocation48_spill] sm:$0xff] %v6947_v49  ;;  %7371 = vst [vmem:[#allocation49_spill] sm:$0xff] %v6950_v52  ;;  %v6968_v49 = vmul.f32 %v5491_v58, %v6746_v4  ;;  %v6971_v52 = vmul.f32 %v6725_v31, %v4605_v63  ;;  %v6989_v58 = vmul.f32 %v6743_v36, %v4605_v63  ;;  %v7388_v36 = vld [vmem:[#allocation40_spill] sm:$0xff] }
0x17b0   : > { %7372 = vst [vmem:[#allocation50_spill] sm:$0xff] %v6953_v56  ;;  %7373 = vst [vmem:[#allocation51_spill] sm:$0xff] %v6956_v19  ;;  %v6974_v56 = vmul.f32 %v6728_v32, %v4605_v63  ;;  %v6977_v19 = vmul.f32 %v6731_v33, %v4605_v63  ;;  %v6992_v31 = vmul.f32 %v6746_v4, %v4605_v63  ;;  %v7390_v4 = vld [vmem:[#allocation41_spill] sm:$0xff] }
0x17b1   : > { %7374 = vst [vmem:[#allocation52_spill] sm:$0xff] %v6959_v40  ;;  %7375 = vst [vmem:[#allocation53_spill] sm:$0xff] %v6962_v39  ;;  %v6980_v40 = vmul.f32 %v6737_v57, %v4605_v63  ;;  %v6983_v39 = vmul.f32 %v6734_v34, %v4605_v63  ;;  %v6995_v32 = vadd.f32 %v4189_v35, %v6787_v14  ;;  %v7392_v14 = vld [vmem:[#allocation42_spill] sm:$0xff] }
0x17b2   : > { %7376 = vst [vmem:[#allocation54_spill] sm:$0xff] %v6965_v51  ;;  %7377 = vst [vmem:[#allocation55_spill] sm:$0xff] %v6971_v52  ;;  %v6986_v51 = vmul.f32 %v6740_v23, %v4605_v63  ;;  %v6998_v33 = vadd.f32 %v4193_v59, %v6790_v15  ;;  %v7001_v57 = vadd.f32 %v4197_v61, %v6793_v10  ;;  %v7386_v23 = vld [vmem:[#allocation39_spill] sm:$0xff]  ;;  %v7395_v10 = vld [vmem:[#allocation37_spill] sm:$0xff] }
0x17b3   : > { %7378 = vst [vmem:[#allocation56_spill] sm:$0xff] %v6974_v56  ;;  %7379 = vst [vmem:[#allocation57_spill] sm:$0xff] %v6977_v19  ;;  %v7004_v34 = vadd.f32 %v4201_v41, %v6796_v18  ;;  %v7013_v63 = vadd.f32 %v4213_v6, %v7390_v4  ;;  %v7016_v35 = vadd.f32 %v4217_v42, %v7392_v14  ;;  %v7394_v15 = vld [vmem:[#allocation35_spill] sm:$0xff] }
0x17b4   : > { %7380 = vst [vmem:[#allocation58_spill] sm:$0xff] %v6980_v40  ;;  %7381 = vst [vmem:[#allocation59_spill] sm:$0xff] %v6983_v39  ;;  %v4356_v59 = vcombine.high %v7394_v15, %v7394_v15  ;;  %v4363_v61 = vrot.slane %v7394_v15, %v7395_v10  ;;  %v7396_v15 = vld [vmem:[#allocation36_spill] sm:$0xff] }
0x17b5   : > { %7382 = vst [vmem:[#allocation60_spill] sm:$0xff] %v6986_v51  ;;  %7383 = vst [vmem:[#allocation61_spill] sm:$0xff] %v6989_v58  ;;  %v7007_v51 = vadd.f32 %v4205_v1, %v7386_v23  ;;  %v7010_v58 = vadd.f32 %v4209_v3, %v7388_v36  ;;  %v5075_v23 = vld [vmem:[#allocation2] ss:$0 sm:$0xff] }
0x17b6   : > { %7384 = vst [vmem:[#allocation62_spill] sm:$0xff] %v6992_v31  ;;  %7385 = vst [vmem:[#allocation63_spill] sm:$0xff] %v7004_v34  ;;  %v4370_v18 = vrot.slane %v4356_v59, %v7395_v10  ;;  %v4371_v41 = vcombine.high %v4363_v61, %v4363_v61  ;;  %v4379_v3 = vrot.slane %v4363_v61, %v7395_v10  ;;  %v7399_v34 = vld [vmem:[#allocation43_spill] sm:$0xff] }
0x17b7   : > { %7387 = vst [vmem:[#allocation39_spill] sm:$0xff] %v7007_v51  ;;  %7389 = vst [vmem:[#allocation40_spill] sm:$0xff] %v7010_v58 }
0x17b8   : > { %7391 = vst [vmem:[#allocation41_spill] sm:$0xff] %v7013_v63  ;;  %7393 = vst [vmem:[#allocation42_spill] sm:$0xff] %v7016_v35  ;;  %v4372_v1 = vcombine.high %v4370_v18, %v4370_v18  ;;  %v4393_v36 = vrot.slane %v4371_v41, %v7395_v10  ;;  %v4386_v6 = vrot.slane %v4370_v18, %v7395_v10  ;;  %v7398_v41 = vld [vmem:[#allocation38_spill] sm:$0xff] }
0x17b9   : > { %v4401_v39 = vcombine.high %v4379_v3, %v4379_v3  ;;  %v7033_v52 = vrot.slane %v4379_v3, %v7398_v41 }
0x17ba   : > { %v4400_v42 = vrot.slane %v4372_v1, %v7395_v10  ;;  %v4403_v40 = vcombine.high %v4393_v36, %v4393_v36  ;;  %v4402_v59 = vcombine.high %v4386_v6, %v4386_v6  ;;  %v7036_v10 = vrot.slane %v4393_v36, %v7398_v41 }
0x17bb   : > { %v7045_v1 = vrot.slane %v4386_v6, %v7398_v41 }
0x17bc   : > { %v4404_v56 = vcombine.high %v4400_v42, %v4400_v42  ;;  %v7042_v18 = vrot.slane %v4403_v40, %v7398_v41 }
0x17be   : > { %v7054_v3 = vrot.slane %v4404_v56, %v7398_v41 }
0x1861   : > { %v3700_v4 = vpop.f32.mrb[34].mxu1 }
0x1862   : > { %v3701_v14 = vadd.f32 %v5075_v23, %v3700_v4  ;;  %v5451_v31 = vpop.f32.mrb[35].mxu1  ;;  %v7048_v23 = vrot.slane %v4400_v42, %v7398_v41  ;;  %v7051_v4 = vrot.slane %v4402_v59, %v7398_v41 }
0x1863   : > { %v7039_v31 = vrot.slane %v4401_v39, %v7398_v41 }
0x1864   : > { %v7028_v19 = vadd.f32 %v3701_v14, %v7396_v15 }
0x1866   : > { %7397 = vst [vmem:[#allocation35_spill] sm:$0xff] %v7028_v19  ;;  %v3707_v61 = vsel %vm1077_vm1, %v7028_v19, 0.0 }
0x1867   : > { %3708 = vadd.xlane.f32.xlu1 %v3707_v61 }
0x1869   : > { %v5478_v36 = vpop.f32.mrb[36].mxu1 }
0x186a   : > { %v4446_v39 = vmul.f32 %v5478_v36, %v7033_v52  ;;  %v4450_v40 = vmul.f32 %v5478_v36, %v7036_v10  ;;  %v4454_v14 = vmul.f32 %v5478_v36, %v7039_v31  ;;  %v4458_v6 = vmul.f32 %v5478_v36, %v7042_v18  ;;  %v4337_v15 = vpop.f32.mrb[37].mxu1 }
0x186b   : > { %v4462_v42 = vmul.f32 %v5478_v36, %v7045_v1  ;;  %v4466_v59 = vmul.f32 %v5478_v36, %v7048_v23  ;;  %v4470_v61 = vmul.f32 %v5478_v36, %v7051_v4  ;;  %v4474_v56 = vmul.f32 %v5478_v36, %v7054_v3 }
0x186c   : > { %v4478_v41 = vadd.f32 %v4446_v39, %v6818_v62  ;;  %v4482_v19 = vadd.f32 %v4450_v40, %v6820_v38  ;;  %v4486_v35 = vadd.f32 %v4454_v14, %v6822_v7  ;;  %v4490_v63 = vadd.f32 %v4458_v6, %v6824_v9 }
0x186d   : > { %v4494_v58 = vadd.f32 %v4462_v42, %v6826_v2  ;;  %v4498_v51 = vadd.f32 %v4466_v59, %v6828_v13  ;;  %v4502_v36 = vadd.f32 %v4470_v61, %v6830_v22  ;;  %v4506_v62 = vadd.f32 %v4474_v56, %v7399_v34  ;;  %v5481_v39 = vpop.f32.mrb[38].mxu1 }
0x186e   : > { %v4736_v38 = vadd.f32 %v6899_v11, %v4478_v41  ;;  %v4740_v7 = vadd.f32 %v6902_v17, %v4482_v19  ;;  %v4744_v9 = vadd.f32 %v6905_v20, %v4486_v35  ;;  %v4748_v40 = vadd.f32 %v6908_v24, %v4490_v63  ;;  %v7080_v2 = vpop.f32.mrb[39].mxu1 }
0x186f   : > { %v4752_v13 = vadd.f32 %v6911_v26, %v4494_v58  ;;  %v4756_v22 = vadd.f32 %v6914_v27, %v4498_v51  ;;  %v4760_v34 = vadd.f32 %v6917_v28, %v4502_v36  ;;  %v4764_v11 = vadd.f32 %v6920_v29, %v4506_v62  ;;  %v7400_v36 = vld [vmem:[#allocation44_spill] sm:$0xff] }
0x1870   : > { %4768 = vst.msk [vmem:[%s7070_s26 + $0x8] sm:$0xff] %vm2601_vm4, %v4736_v38  ;;  %4772 = vst.msk [vmem:[%s7070_s26 + $0x28] sm:$0xff] %vm2601_vm4, %v4740_v7  ;;  %v4445_v19 = vmul.f32 %v7033_v52, %v4337_v15  ;;  %v4449_v17 = vmul.f32 %v7036_v10, %v4337_v15  ;;  %v4453_v20 = vmul.f32 %v7039_v31, %v4337_v15  ;;  %v7401_v38 = vld [vmem:[#allocation45_spill] sm:$0xff] }
0x1871   : > { %4776 = vst.msk [vmem:[%s7070_s26 + $0x48] sm:$0xff] %vm2601_vm4, %v4744_v9  ;;  %4780 = vst.msk [vmem:[%s7070_s26 + $0x68] sm:$0xff] %vm2601_vm4, %v4748_v40  ;;  %v4457_v24 = vmul.f32 %v7042_v18, %v4337_v15  ;;  %v4461_v26 = vmul.f32 %v7045_v1, %v4337_v15  ;;  %v4465_v27 = vmul.f32 %v7048_v23, %v4337_v15  ;;  %v7402_v9 = vld [vmem:[#allocation46_spill] sm:$0xff] }
0x1872   : > { %4784 = vst.msk [vmem:[%s7070_s26 + $0x88] sm:$0xff] %vm2601_vm4, %v4752_v13  ;;  %4788 = vst.msk [vmem:[%s7070_s26 + $0xa8] sm:$0xff] %vm2601_vm4, %v4756_v22  ;;  %v4469_v28 = vmul.f32 %v7051_v4, %v4337_v15  ;;  %v4473_v29 = vmul.f32 %v7054_v3, %v4337_v15  ;;  %v4477_v51 = vadd.f32 %v4445_v19, %v6842_v43  ;;  %v7403_v13 = vld [vmem:[#allocation47_spill] sm:$0xff]  ;;  %v7404_v22 = vld [vmem:[#allocation48_spill] sm:$0xff] }
0x1873   : > { %4792 = vst.msk [vmem:[%s7070_s26 + $0xc8] sm:$0xff] %vm2601_vm4, %v4760_v34  ;;  %4796 = vst.msk [vmem:[%s7070_s26 + $0xe8] sm:$0xff] %vm2601_vm4, %v4764_v11  ;;  %v4481_v58 = vadd.f32 %v4449_v17, %v6844_v53  ;;  %v4485_v63 = vadd.f32 %v4453_v20, %v6846_v46  ;;  %v4489_v35 = vadd.f32 %v4457_v24, %v6848_v54  ;;  %v7405_v34 = vld [vmem:[#allocation49_spill] sm:$0xff]  ;;  %v7406_v11 = vld [vmem:[#allocation50_spill] sm:$0xff] }
0x1874   : > { %v4493_v14 = vadd.f32 %v4461_v26, %v6850_v60  ;;  %v4497_v6 = vadd.f32 %v4465_v27, %v6852_v8  ;;  %v4501_v42 = vadd.f32 %v4469_v28, %v6854_v5  ;;  %v4505_v15 = vadd.f32 %v4473_v29, %v6856_v50  ;;  %v7407_v19 = vld [vmem:[#allocation51_spill] sm:$0xff]  ;;  %v7408_v17 = vld [vmem:[#allocation52_spill] sm:$0xff]  ;;  %v7409_v24 = vld [vmem:[#allocation53_spill] sm:$0xff] }
0x1875   : > { %v4735_v43 = vadd.f32 %v6923_v30, %v4477_v51  ;;  %v4739_v53 = vadd.f32 %v6926_v47, %v4481_v58  ;;  %v4743_v46 = vadd.f32 %v6929_v44, %v4485_v63  ;;  %v4747_v54 = vadd.f32 %v6932_v21, %v4489_v35  ;;  %v7410_v27 = vld [vmem:[#allocation54_spill] sm:$0xff] }
0x1876   : > { %v4751_v60 = vadd.f32 %v6935_v45, %v4493_v14  ;;  %v4755_v8 = vadd.f32 %v6938_v0, %v4497_v6  ;;  %v4759_v5 = vadd.f32 %v6941_v12, %v4501_v42  ;;  %v4763_v50 = vadd.f32 %v6944_v48, %v4505_v15  ;;  %v7411_v42 = vld [vmem:[#allocation63_spill] sm:$0xff] }
0x1877   : > { %4767 = vst.msk [vmem:[%s7070_s26] sm:$0xff] %vm2601_vm4, %v4735_v43  ;;  %4771 = vst.msk [vmem:[%s7070_s26 + $0x20] sm:$0xff] %vm2601_vm4, %v4739_v53  ;;  %v4448_v30 = vmul.f32 %v5481_v39, %v7033_v52  ;;  %v4452_v47 = vmul.f32 %v5481_v39, %v7036_v10  ;;  %v4456_v44 = vmul.f32 %v5481_v39, %v7039_v31  ;;  %v7412_v15 = vld [vmem:[#allocation39_spill] sm:$0xff]  ;;  %v7413_v43 = vld [vmem:[#allocation40_spill] sm:$0xff] }
0x1878   : > { %4775 = vst.msk [vmem:[%s7070_s26 + $0x40] sm:$0xff] %vm2601_vm4, %v4743_v46  ;;  %4779 = vst.msk [vmem:[%s7070_s26 + $0x60] sm:$0xff] %vm2601_vm4, %v4747_v54  ;;  %v4460_v21 = vmul.f32 %v5481_v39, %v7042_v18  ;;  %v4464_v45 = vmul.f32 %v5481_v39, %v7045_v1  ;;  %v4468_v0 = vmul.f32 %v5481_v39, %v7048_v23  ;;  %v7414_v53 = vld [vmem:[#allocation41_spill] sm:$0xff]  ;;  %v7416_v46 = vld [vmem:[#allocation55_spill] sm:$0xff] }
0x1879   : > { %4783 = vst.msk [vmem:[%s7070_s26 + $0x80] sm:$0xff] %vm2601_vm4, %v4751_v60  ;;  %4787 = vst.msk [vmem:[%s7070_s26 + $0xa0] sm:$0xff] %vm2601_vm4, %v4755_v8  ;;  %v4472_v12 = vmul.f32 %v5481_v39, %v7051_v4  ;;  %v4476_v48 = vmul.f32 %v5481_v39, %v7054_v3  ;;  %v4480_v59 = vadd.f32 %v4448_v30, %v6867_v16  ;;  %v7417_v54 = vld [vmem:[#allocation56_spill] sm:$0xff]  ;;  %v7418_v60 = vld [vmem:[#allocation57_spill] sm:$0xff] }
0x187a   : > { %4791 = vst.msk [vmem:[%s7070_s26 + $0xc0] sm:$0xff] %vm2601_vm4, %v4759_v5  ;;  %4795 = vst.msk [vmem:[%s7070_s26 + $0xe0] sm:$0xff] %vm2601_vm4, %v4763_v50  ;;  %v4484_v61 = vadd.f32 %v4452_v47, %v6870_v55  ;;  %v4488_v56 = vadd.f32 %v4456_v44, %v6873_v37  ;;  %v4492_v41 = vadd.f32 %v4460_v21, %v6876_v25  ;;  %v7419_v5 = vld [vmem:[#allocation58_spill] sm:$0xff]  ;;  %v7420_v30 = vld [vmem:[#allocation59_spill] sm:$0xff] }
0x187b   : > { %v4496_v62 = vadd.f32 %v4464_v45, %v7400_v36  ;;  %v4500_v7 = vadd.f32 %v4468_v0, %v7401_v38  ;;  %v4504_v40 = vadd.f32 %v4472_v12, %v7402_v9  ;;  %v4508_v39 = vadd.f32 %v4476_v48, %v7403_v13  ;;  %v7421_v44 = vld [vmem:[#allocation60_spill] sm:$0xff]  ;;  %v7422_v45 = vld [vmem:[#allocation61_spill] sm:$0xff]  ;;  %v7423_v12 = vld [vmem:[#allocation62_spill] sm:$0xff] }
0x187c   : > { %v4738_v16 = vadd.f32 %v7404_v22, %v4480_v59  ;;  %v4742_v55 = vadd.f32 %v7405_v34, %v4484_v61  ;;  %v4746_v37 = vadd.f32 %v7406_v11, %v4488_v56  ;;  %v4750_v25 = vadd.f32 %v7407_v19, %v4492_v41  ;;  %v7424_v56 = vld [vmem:[#allocation35_spill] sm:$0xff]  ;;  %v5077_v13 = vld [vmem:[#allocation5] ss:$0 sm:$0xff]  ;;  %v5078_v22 = vld [vmem:[#allocation7] ss:$0 sm:$0xff] }
0x187d   : > { %v4754_v20 = vadd.f32 %v7408_v17, %v4496_v62  ;;  %v4758_v26 = vadd.f32 %v7409_v24, %v4500_v7  ;;  %v4762_v28 = vadd.f32 %v7410_v27, %v4504_v40  ;;  %v4766_v29 = vadd.f32 %v6968_v49, %v4508_v39 }
0x187e   : > { %4770 = vst.msk [vmem:[%s7070_s26 + $0x18] sm:$0xff] %vm2601_vm4, %v4738_v16  ;;  %4774 = vst.msk [vmem:[%s7070_s26 + $0x38] sm:$0xff] %vm2601_vm4, %v4742_v55  ;;  %v4447_v51 = vmul.f32 %v7033_v52, %v7080_v2  ;;  %v4451_v58 = vmul.f32 %v7036_v10, %v7080_v2  ;;  %v4455_v63 = vmul.f32 %v7039_v31, %v7080_v2 }
0x187f   : > { %4778 = vst.msk [vmem:[%s7070_s26 + $0x58] sm:$0xff] %vm2601_vm4, %v4746_v37  ;;  %4782 = vst.msk [vmem:[%s7070_s26 + $0x78] sm:$0xff] %vm2601_vm4, %v4750_v25  ;;  %v4459_v49 = vmul.f32 %v7042_v18, %v7080_v2  ;;  %v4463_v52 = vmul.f32 %v7045_v1, %v7080_v2  ;;  %v4467_v10 = vmul.f32 %v7048_v23, %v7080_v2 }
0x1880   : > { %4786 = vst.msk [vmem:[%s7070_s26 + $0x98] sm:$0xff] %vm2601_vm4, %v4754_v20  ;;  %4790 = vst.msk [vmem:[%s7070_s26 + $0xb8] sm:$0xff] %vm2601_vm4, %v4758_v26  ;;  %v4471_v31 = vmul.f32 %v7051_v4, %v7080_v2  ;;  %v4475_v18 = vmul.f32 %v7054_v3, %v7080_v2  ;;  %v4479_v35 = vadd.f32 %v4447_v51, %v6995_v32  ;;  %v7415_v2 = vld [vmem:[#allocation42_spill] sm:$0xff] }
0x1881   : > { %4794 = vst.msk [vmem:[%s7070_s26 + $0xd8] sm:$0xff] %vm2601_vm4, %v4762_v28  ;;  %4798 = vst.msk [vmem:[%s7070_s26 + $0xf8] sm:$0xff] %vm2601_vm4, %v4766_v29  ;;  %v4483_v14 = vadd.f32 %v4451_v58, %v6998_v33  ;;  %v4487_v6 = vadd.f32 %v4455_v63, %v7001_v57  ;;  %v4491_v1 = vadd.f32 %v4459_v49, %v7411_v42 }
0x1882   : > { %v4495_v23 = vadd.f32 %v4463_v52, %v7412_v15  ;;  %v4499_v4 = vadd.f32 %v4467_v10, %v7413_v43  ;;  %v4503_v3 = vadd.f32 %v4471_v31, %v7414_v53  ;;  %v4507_v32 = vadd.f32 %v4475_v18, %v7415_v2 }
0x1883   : > { %v4737_v33 = vadd.f32 %v7416_v46, %v4479_v35  ;;  %v4741_v57 = vadd.f32 %v7417_v54, %v4483_v14  ;;  %v4745_v8 = vadd.f32 %v7418_v60, %v4487_v6  ;;  %v4749_v50 = vadd.f32 %v7419_v5, %v4491_v1 }
0x1884   : > { %v4753_v47 = vadd.f32 %v7420_v30, %v4495_v23  ;;  %v4757_v21 = vadd.f32 %v7421_v44, %v4499_v4  ;;  %v4761_v0 = vadd.f32 %v7422_v45, %v4503_v3  ;;  %v4765_v48 = vadd.f32 %v7423_v12, %v4507_v32 }
0x1885   : > { %4769 = vst.msk [vmem:[%s7070_s26 + $0x10] sm:$0xff] %vm2601_vm4, %v4737_v33  ;;  %4773 = vst.msk [vmem:[%s7070_s26 + $0x30] sm:$0xff] %vm2601_vm4, %v4741_v57 }
0x1886   : > { %4777 = vst.msk [vmem:[%s7070_s26 + $0x50] sm:$0xff] %vm2601_vm4, %v4745_v8  ;;  %4781 = vst.msk [vmem:[%s7070_s26 + $0x70] sm:$0xff] %vm2601_vm4, %v4749_v50 }
0x1887   : > { %4785 = vst.msk [vmem:[%s7070_s26 + $0x90] sm:$0xff] %vm2601_vm4, %v4753_v47  ;;  %4789 = vst.msk [vmem:[%s7070_s26 + $0xb0] sm:$0xff] %vm2601_vm4, %v4757_v21 }
0x1888   : > { %4793 = vst.msk [vmem:[%s7070_s26 + $0xd0] sm:$0xff] %vm2601_vm4, %v4761_v0  ;;  %4797 = vst.msk [vmem:[%s7070_s26 + $0xf0] sm:$0xff] %vm2601_vm4, %v4765_v48  ;;  %s7235_s26 = scalar_lea.hbm %s6136_s21, %s5104_s22 }
0x18f4   : > { %v3709_v59 = vpop.xlane.xlu1 %3708 }
0x18f5   : > { %v3710_v61 = vmul.f32 0.03125, %v3709_v59 }
0x18f7   : > { %v3711_v41 = vsub.f32 %v7424_v56, %v3710_v61 }
0x18f9   : > { %v3712_v36 = vmul.f32 %v3711_v41, %v3711_v41 }
0x18fb   : > { %v3713_v62 = vsel %vm1077_vm1, %v3712_v36, 0.0 }
0x18fc   : > { %3714 = vadd.xlane.f32.xlu0 %v3713_v62 }
0x1989   : > { %v3715_v38 = vpop.xlane.xlu0 %3714 }
0x198a   : > { %v3716_v7 = vmul.f32 0.03125, %v3715_v38 }
0x198c   : > { %v3717_v9 = vadd.f32 1e-05, %v3716_v7 }
0x198e   : > { %5774 = vrsqrt.f32 %v3717_v9 }
0x1998   : > { %v5775_v40 = vpop.eup %5774 }
0x1999   : > { %v3719_v39 = vmul.f32 %v5775_v40, %v3711_v41 }
0x199b   : > { %v3726_v16 = vmul.f32 %v5077_v13, %v3719_v39 }
0x199d   : > { %v3733_v34 = vadd.f32 %v5078_v22, %v3726_v16 }
0x199f   : > { %3734 = vst.msk [vmem:[%s1029_s3] sm:$0xff] %vm1077_vm1, %v3733_v34 }
0x19a0   : > { %5873 = shalt.err (!%p5870_p11)
}
0x19a1   : > { %s5874_s7 = scalar_lea.hbm %s7235_s26, 128  ;;  %s5878_s22 = scalar_lea.hbm %s6136_s21, 256 }
0x19a2   : > { %p5875_p13 = scmp.ne.s32.totalorder %s7235_s26, %s5874_s7  ;;  %p5879_p2 = scmp.lt.u32.totalorder %s7235_s26, %s6136_s21 }
0x19a3   : > { %p5880_p3 = scmp.lt.u32.totalorder %s5878_s22, %s5874_s7  ;;  %p5882_p4 = scmp.lt.u32.totalorder %s5874_s7, %s7235_s26 }
0x19a4   : > { %p5876_p1 = pnand %p5875_p13, %p7425_p5 }
0x19a5   : > { %p5881_p12 = por %p5880_p3, %p5879_p2 }
0x19a6   : > { %p5877_p0 = pneg %p5876_p1 }
0x19a7   : > { %p5883_p6 = por %p5882_p4, %p5881_p12 }
0x19a9   : > { %p5884_p9 = pnand %p5883_p6, %p5877_p0 }
0x19ab   : > { %5887 = shalt.err (!%p5884_p9)
}
0x19ac   : > { %5608 = dma.vmem_to_hbm [thread:$0]  (%p7425_p5), %s7237_s2, 128, %s7235_s26, %s4800_s4  }
0x19ad PF: > { %s7426_s5 = sld [smem:[#allocation30_spill]]  ;;  %s7427_s6 = sld [smem:[#allocation34_spill]] }
0x19ae   : > { %p5630_p10 = scmp.ge.s32.totalorder %s5930_s28, 2 }
0x19b3   : > { %s4833_s3 = sand.u32 1, %s7426_s5   ;;  %p7428_p7 = scmp.ne.s32.totalorder %s7427_s6, 0 }
0x19b4   : > { %s4834_s0 = scalar_lea.sflag [#allocation4], %s4833_s3 }
0x19b5   : > { %p5621_p8 = pnand %p5630_p10, %p7428_p7 }
0x19b7   : > { %5913 = dma.done.wait (!%p5621_p8), %s4834_s0, 128  }
0x19b8   : > { %5915 = vsyncadd (!%p5621_p8), %s4834_s0, 4294967168  ;;  %s7429_s28 = sld [smem:[#allocation32_spill]]  ;;  %s7430_s1 = sld [smem:[#allocation31_spill]] }
0x19b9   : > { %s7431_s26 = sld [smem:[#allocation33_spill]]  ;;  %s7432_s22 = smov %s5922_s23 }
0x19be   : > { %p76_p11 = scmp.ge.s32.totalorder %s7429_s28, 4   ;;  %s7433_s23 = smov %s7430_s1 }
0x19c0   :  { %78 = sbr.rel (!%p76_p11) target bundleno = 61 (0x3d), region = 240 }
0x19c7   :  { %4847 = vsyncpa [#allocation3], 1 }
0x19c8   :  { %4849 = vsyncpa [#allocation3 + $0x1], 1 }
0x19c9   :  { %4850 = vsyncpa [#allocation6], 1 }
0x19ca   :  { %4851 = vsyncpa [#allocation4], 1 }
0x19cb   :  { %4853 = vsyncpa [#allocation4 + $0x1], 1 }

</bundles_post_ra>
